<compile_context>
chip_gen: v7x
topology: tpu7x:2x2x1
jax: 0.10.0
libtpu: 0.0.40
codegen_flags: <defaults>
</compile_context>

<pallas_src>
import functools
import math

import jax
import jax.numpy as jnp
from jax.experimental import pallas as pl
from jax.experimental.pallas import tpu as pltpu

# ---------------------------------------------------------------------------
# Model dimensions (small, synthetic)
# ---------------------------------------------------------------------------
N_IMG = 2          # batch
C_Z = 64           # bottleneck (input to layer1 decoder)
C_L1 = 128         # layer1 feature channels
C_L2 = 256         # layer2 feature channels
C_FPN = 128        # FPN output channels
A_PER_LOC = 3      # anchors per location (1 size x 3 aspect ratios per level)
FEAT_HW = 16       # level-0 feature spatial size
IMG_HW = 64        # image size (stride 4 at level 0, stride 8 at level 1)
HEAD_PAD = 128     # fused cls(3)+bbox(12) head padded to 128 output lanes


# ---------------------------------------------------------------------------
# pallas_call helper: single grid step, whole arrays resident in VMEM
# ---------------------------------------------------------------------------
def _full_spec(shape):
    nd = len(shape)
    return pl.BlockSpec(tuple(shape), lambda i, _nd=nd: (0,) * _nd)


def pallas_run(kernel, inputs, out_shapes):
    single = isinstance(out_shapes, jax.ShapeDtypeStruct)
    outs = (out_shapes,) if single else tuple(out_shapes)
    out_specs = [_full_spec(s.shape) for s in outs]
    return pl.pallas_call(
        kernel,
        out_shape=out_shapes if single else outs,
        grid_spec=pltpu.PrefetchScalarGridSpec(
            num_scalar_prefetch=0,
            grid=(1,),
            in_specs=[_full_spec(x.shape) for x in inputs],
            out_specs=out_specs[0] if single else out_specs,
        ),
        compiler_params=pltpu.CompilerParams(
            dimension_semantics=("arbitrary",)),
    )(*inputs)


# ---------------------------------------------------------------------------
# Pallas kernels
# ---------------------------------------------------------------------------
def _dec_fpn0_kernel(x_ref, dw_ref, db_ref, fw_ref, fb_ref, feat1_ref, p0_ref):
    """feat1 = relu(x @ dec_w + b); p0 = feat1 @ fpn0_w + b (both emitted)."""
    feat1 = jnp.dot(x_ref[...], dw_ref[...], preferred_element_type=jnp.float32)
    feat1 = jnp.maximum(feat1 + db_ref[...], 0.0)
    feat1_ref[...] = feat1.astype(feat1_ref.dtype)
    p0 = jnp.dot(feat1.astype(fw_ref.dtype), fw_ref[...],
                 preferred_element_type=jnp.float32) + fb_ref[...]
    p0_ref[...] = p0.astype(p0_ref.dtype)


def _mm_relu_mm_kernel(x_ref, w1_ref, b1_ref, w2_ref, b2_ref, o_ref):
    """o = relu(x @ w1 + b1) @ w2 + b2 (intermediate never leaves VMEM)."""
    h1 = jnp.dot(x_ref[...], w1_ref[...], preferred_element_type=jnp.float32)
    h1 = jnp.maximum(h1 + b1_ref[...], 0.0)
    o = jnp.dot(h1.astype(w2_ref.dtype), w2_ref[...],
                preferred_element_type=jnp.float32) + b2_ref[...]
    o_ref[...] = o.astype(o_ref.dtype)


def _rpn_level_kernel(xp_ref, wc_ref, bc_ref, wh_ref, bh_ref, o_ref,
                      *, n, h, w, c):
    """RPN per-level: 3x3 conv (9-tap in-kernel im2col) + ReLU + fused head."""
    m = n * h * w
    cdim = wc_ref.shape[1]
    acc = jnp.zeros((m, cdim), jnp.float32)
    for tap in range(9):
        dy, dx = divmod(tap, 3)
        tapx = xp_ref[:, dy:dy + h, dx:dx + w, :].reshape(m, c)
        acc = acc + jnp.dot(tapx.astype(wc_ref.dtype),
                            wc_ref[tap * c:(tap + 1) * c, :],
                            preferred_element_type=jnp.float32)
    t = jnp.maximum(acc + bc_ref[...], 0.0)
    o = jnp.dot(t.astype(wh_ref.dtype), wh_ref[...],
                preferred_element_type=jnp.float32) + bh_ref[...]
    o_ref[...] = o.astype(o_ref.dtype)


def _decode_kernel(a_ref, d_ref, l_ref, boxes_ref, scores_ref, *, img_h, img_w):
    """BoxCoder.decode + sigmoid(objectness) + clip, component-major layout."""
    a = a_ref[...]                                    # (4, K) shared anchors
    ax1, ay1, ax2, ay2 = a[0:1, :], a[1:2, :], a[2:3, :], a[3:4, :]
    aw = ax2 - ax1
    ah = ay2 - ay1
    acx = ax1 + 0.5 * aw
    acy = ay1 + 0.5 * ah

    d = d_ref[...]                                    # (N, 4, K)
    dx = d[:, 0:1, :]
    dy = d[:, 1:2, :]
    clip = math.log(1000.0 / 16.0)
    dw = jnp.minimum(d[:, 2:3, :], clip)
    dh = jnp.minimum(d[:, 3:4, :], clip)

    pcx = dx * aw + acx                               # anchors broadcast over N
    pcy = dy * ah + acy
    pw = jnp.exp(dw) * aw
    ph = jnp.exp(dh) * ah

    boxes_ref[:, 0:1, :] = jnp.clip(pcx - 0.5 * pw, 0.0, img_w)
    boxes_ref[:, 1:2, :] = jnp.clip(pcy - 0.5 * ph, 0.0, img_h)
    boxes_ref[:, 2:3, :] = jnp.clip(pcx + 0.5 * pw, 0.0, img_w)
    boxes_ref[:, 3:4, :] = jnp.clip(pcy + 0.5 * ph, 0.0, img_h)
    scores_ref[...] = jax.nn.sigmoid(l_ref[...])


# ---------------------------------------------------------------------------
# JAX glue
# ---------------------------------------------------------------------------
def _im2col_3x3_s2(x_nhwc):
    # TODO(synk): stride-2 tap gather stays in XLA (strided sublane gather has
    #             no robust in-kernel form); stride-1 RPN conv is in-kernel.
    n, h, wd, c = x_nhwc.shape
    xp = jnp.pad(x_nhwc, ((0, 0), (1, 1), (1, 1), (0, 0)))
    ho = (h + 2 - 3) // 2 + 1
    wo = (wd + 2 - 3) // 2 + 1
    cols = []
    for dy in range(3):
        for dx in range(3):
            cols.append(xp[:, dy:dy + 2 * (ho - 1) + 1:2,
                            dx:dx + 2 * (wo - 1) + 1:2, :])
    patches = jnp.concatenate(cols, axis=-1).reshape(n * ho * wo, 9 * c)
    return patches, ho, wo


def cell_anchors(scales, aspect_ratios):
    scales = jnp.asarray(scales, jnp.float32)
    ars = jnp.asarray(aspect_ratios, jnp.float32)
    h_ratios = jnp.sqrt(ars)
    w_ratios = 1.0 / h_ratios
    ws = (w_ratios[:, None] * scales[None, :]).reshape(-1)
    hs = (h_ratios[:, None] * scales[None, :]).reshape(-1)
    base = jnp.stack([-ws, -hs, ws, hs], axis=1) / 2.0   # (A, 4)
    return jnp.round(base)


def grid_anchors_cm(base, grid_hw, stride_hw):
    """Component-major anchors (4, H*W*A), position-major / anchor-minor."""
    gh, gw = grid_hw
    sh, sw = stride_hw
    shifts_x = jnp.arange(gw, dtype=jnp.float32) * sw
    shifts_y = jnp.arange(gh, dtype=jnp.float32) * sh
    sy, sx = jnp.meshgrid(shifts_y, shifts_x, indexing="ij")
    sx = sx.reshape(-1)
    sy = sy.reshape(-1)
    shifts = jnp.stack([sx, sy, sx, sy], axis=0)          # (4, H*W)
    out = shifts[:, :, None] + base.T[:, None, :]         # (4, H*W, A)
    return out.reshape(4, -1)


# ---------------------------------------------------------------------------
# RcnnTail forward
# ---------------------------------------------------------------------------
def rcnn_tail_forward(params, z, image_size):
    n, c_z, h, w = z.shape
    img_h, img_w = image_size
    x = jnp.transpose(z, (0, 2, 3, 1)).astype(jnp.bfloat16)   # NCHW -> NHWC
    x_flat = x.reshape(n * h * w, c_z)

    # layer1_decoder (1x1 conv + ReLU) fused with FPN lateral 0 (1x1 conv)
    feat1_flat, p0_flat = pallas_run(
        _dec_fpn0_kernel,
        [x_flat, params["dec_w"], params["dec_b"],
         params["fpn0_w"], params["fpn0_b"]],
        (jax.ShapeDtypeStruct((n * h * w, C_L1), jnp.bfloat16),
         jax.ShapeDtypeStruct((n * h * w, C_FPN), jnp.float32)))
    feat1 = feat1_flat.reshape(n, h, w, C_L1)
    p0 = p0_flat.reshape(n, h, w, C_FPN)

    # sub_backbone layer2 (3x3 s2 conv + ReLU) fused with FPN lateral 1
    patches, h2, w2 = _im2col_3x3_s2(feat1)
    p1_flat = pallas_run(
        _mm_relu_mm_kernel,
        [patches, params["l2_w"], params["l2_b"],
         params["fpn1_w"], params["fpn1_b"]],
        jax.ShapeDtypeStruct((n * h2 * w2, C_FPN), jnp.float32))
    p1 = p1_flat.reshape(n, h2, w2, C_FPN)

    # RPN head per level: 3x3 conv + ReLU + fused cls/bbox 1x1 head
    features = [p0, p1]
    level_sizes = [(32.0,), (64.0,)]
    obj_levels, delta_levels, anchor_levels = [], [], []
    for lvl, f in enumerate(features):
        fn, fh, fw, fc = f.shape
        fp = jnp.pad(f, ((0, 0), (1, 1), (1, 1), (0, 0)))
        head = pallas_run(
            functools.partial(_rpn_level_kernel, n=fn, h=fh, w=fw, c=fc),
            [fp, params["rpn_conv_w"], params["rpn_conv_b"],
             params["rpn_head_w"], params["rpn_head_b"]],
            jax.ShapeDtypeStruct((fn * fh * fw, HEAD_PAD), jnp.float32))
        obj_levels.append(
            head[:, :A_PER_LOC].reshape(fn, fh * fw * A_PER_LOC))
        delta_levels.append(
            head[:, A_PER_LOC:A_PER_LOC + 4 * A_PER_LOC].reshape(
                fn, fh * fw * A_PER_LOC, 4))
        base = cell_anchors(level_sizes[lvl], (0.5, 1.0, 2.0))
        anchor_levels.append(
            grid_anchors_cm(base, (fh, fw), (img_h / fh, img_w / fw)))

    # concat_box_prediction_layers semantics (component-major for decode)
    obj = jnp.concatenate(obj_levels, axis=1)                 # (N, K)
    deltas = jnp.concatenate(delta_levels, axis=1)            # (N, K, 4)
    anchors_cm = jnp.concatenate(anchor_levels, axis=1)       # (4, K)
    sum_a = anchors_cm.shape[1]
    deltas_cm = jnp.transpose(deltas, (0, 2, 1))              # (N, 4, K)
    logits = obj.reshape(n, 1, sum_a)                         # (N, 1, K)

    # BoxCoder.decode + sigmoid(objectness) + clip
    boxes_cm, scores3 = pallas_run(
        functools.partial(_decode_kernel,
                          img_h=float(img_h), img_w=float(img_w)),
        [anchors_cm, deltas_cm, logits],
        (jax.ShapeDtypeStruct((n, 4, sum_a), jnp.float32),
         jax.ShapeDtypeStruct((n, 1, sum_a), jnp.float32)))
    proposals = jnp.transpose(boxes_cm, (0, 2, 1))            # (N, K, 4)
    scores = scores3.reshape(n, sum_a)

    # filter_proposals: top-k selection (pre-NMS)
    k = min(128, sum_a)
    top_scores, top_idx = jax.lax.top_k(scores, k)
    top_boxes = jnp.take_along_axis(proposals, top_idx[..., None], axis=1)

    # TODO(synk): batched NMS, roi_heads (RoIAlign + box/mask heads) and
    #             transform.postprocess are data-dependent; returning proposals.
    return {"boxes": top_boxes, "scores": top_scores}


# ---------------------------------------------------------------------------
# Deterministic parameter init (bf16 matmul weights, f32 biases)
# ---------------------------------------------------------------------------
def init_params(key):
    ks = jax.random.split(key, 8)

    def nrm(k, shape, scale=0.05):
        return scale * jax.random.normal(k, shape, jnp.float32)

    bf = jnp.bfloat16
    dec_w = nrm(ks[0], (C_Z, C_L1))
    l2_w = nrm(ks[1], (3, 3, C_L1, C_L2)).reshape(9 * C_L1, C_L2)
    fpn0_w = nrm(ks[2], (C_L1, C_FPN))
    fpn1_w = nrm(ks[3], (C_L2, C_FPN))
    rpn_conv_w = nrm(ks[4], (3, 3, C_FPN, C_FPN)).reshape(9 * C_FPN, C_FPN)
    rpn_cls_w = nrm(ks[5], (C_FPN, A_PER_LOC))
    rpn_bbox_w = nrm(ks[6], (C_FPN, 4 * A_PER_LOC))
    head_w = jnp.concatenate([rpn_cls_w, rpn_bbox_w], axis=1)   # (C_FPN, 15)
    head_w = jnp.pad(head_w, ((0, 0), (0, HEAD_PAD - head_w.shape[1])))

    return {
        "dec_w": dec_w.astype(bf),
        "dec_b": jnp.zeros((1, C_L1), jnp.float32),
        "l2_w": l2_w.astype(bf),
        "l2_b": jnp.zeros((1, C_L2), jnp.float32),
        "fpn0_w": fpn0_w.astype(bf),
        "fpn0_b": jnp.zeros((1, C_FPN), jnp.float32),
        "fpn1_w": fpn1_w.astype(bf),
        "fpn1_b": jnp.zeros((1, C_FPN), jnp.float32),
        "rpn_conv_w": rpn_conv_w.astype(bf),
        "rpn_conv_b": jnp.zeros((1, C_FPN), jnp.float32),
        "rpn_head_w": head_w.astype(bf),
        "rpn_head_b": jnp.zeros((1, HEAD_PAD), jnp.float32),
    }


if __name__ == "__main__":
    key = jax.random.PRNGKey(0)
    pkey, zkey = jax.random.split(key)
    params = init_params(pkey)
    z = jax.random.normal(zkey, (N_IMG, C_Z, FEAT_HW, FEAT_HW), jnp.float32)

    fwd = jax.jit(functools.partial(rcnn_tail_forward,
                                    image_size=(IMG_HW, IMG_HW)))
    out = fwd(params, z)
    jax.block_until_ready(out)

    assert out["boxes"].shape == (N_IMG, 128, 4)
    assert out["scores"].shape == (N_IMG, 128)
    assert bool(jnp.all(jnp.isfinite(out["boxes"]))) and bool(
        jnp.all(jnp.isfinite(out["scores"])))
    print("KERNEL_OK")
</pallas_src>

<mosaic_0001>
module attributes {stable_mosaic.version = 11 : i64} {
  func.func @_dec_fpn0_kernel(%arg0: i32, %arg1: memref<512x64xbf16, #tpu.memory_space<vmem>>, %arg2: memref<64x128xbf16, #tpu.memory_space<vmem>>, %arg3: memref<1x128xf32, #tpu.memory_space<vmem>>, %arg4: memref<128x128xbf16, #tpu.memory_space<vmem>>, %arg5: memref<1x128xf32, #tpu.memory_space<vmem>>, %arg6: memref<512x128xbf16, #tpu.memory_space<vmem>>, %arg7: memref<512x128xf32, #tpu.memory_space<vmem>>) attributes {dimension_semantics = [#tpu.dimension_semantics<arbitrary>], iteration_bounds = array<i64: 1>, scalar_prefetch = 0 : i64, scratch_operands = 0 : i64, tpu.core_type = #tpu.core_type<tc>, window_params = [{pipeline_mode = #tpu.pipeline_mode<synchronous>, transform_indices = @transform_0, window_bounds = array<i64: 512, 64>}, {pipeline_mode = #tpu.pipeline_mode<synchronous>, transform_indices = @transform_1, window_bounds = array<i64: 64, 128>}, {pipeline_mode = #tpu.pipeline_mode<synchronous>, transform_indices = @transform_2, window_bounds = array<i64: 1, 128>}, {pipeline_mode = #tpu.pipeline_mode<synchronous>, transform_indices = @transform_3, window_bounds = array<i64: 128, 128>}, {pipeline_mode = #tpu.pipeline_mode<synchronous>, transform_indices = @transform_4, window_bounds = array<i64: 1, 128>}, {pipeline_mode = #tpu.pipeline_mode<synchronous>, transform_indices = @transform_5, window_bounds = array<i64: 512, 128>}, {pipeline_mode = #tpu.pipeline_mode<synchronous>, transform_indices = @transform_6, window_bounds = array<i64: 512, 128>}]} {
    %c0 = arith.constant 0 : index
    %c0_0 = arith.constant 0 : index
    %0 = vector.load %arg1[%c0, %c0_0] : memref<512x64xbf16, #tpu.memory_space<vmem>>, vector<512x64xbf16>
    %c0_1 = arith.constant 0 : index
    %c0_2 = arith.constant 0 : index
    %1 = vector.load %arg2[%c0_1, %c0_2] : memref<64x128xbf16, #tpu.memory_space<vmem>>, vector<64x128xbf16>
    %cst = arith.constant dense<0.000000e+00> : vector<512x128xf32>
    %2 = tpu.matmul %0, %1, %cst {dimension_numbers = #tpu.dot_dimension_numbers<[1], [0], [0], [1], [0, 0, 1, 1], [], []>} : vector<512x64xbf16>, vector<64x128xbf16>, vector<512x128xf32> -> vector<512x128xf32>
    %c0_3 = arith.constant 0 : index
    %c0_4 = arith.constant 0 : index
    %3 = vector.load %arg3[%c0_3, %c0_4] : memref<1x128xf32, #tpu.memory_space<vmem>>, vector<1x128xf32>
    %4 = vector.broadcast %3 : vector<1x128xf32> to vector<512x128xf32>
    %5 = arith.addf %2, %4 : vector<512x128xf32>
    %cst_5 = arith.constant 0.000000e+00 : f32
    %6 = vector.broadcast %cst_5 : f32 to vector<512x128xf32>
    %7 = arith.maximumf %5, %6 : vector<512x128xf32>
    %8 = arith.truncf %7 : vector<512x128xf32> to vector<512x128xbf16>
    %c0_6 = arith.constant 0 : index
    %c0_7 = arith.constant 0 : index
    %9 = vector.load %arg6[%c0_6, %c0_7] : memref<512x128xbf16, #tpu.memory_space<vmem>>, vector<512x128xbf16>
    tpu.vector_store %arg6[%c0_6, %c0_7], %8 {strides = array<i32>} : memref<512x128xbf16, #tpu.memory_space<vmem>>, vector<512x128xbf16>,
    %10 = arith.truncf %7 : vector<512x128xf32> to vector<512x128xbf16>
    %c0_8 = arith.constant 0 : index
    %c0_9 = arith.constant 0 : index
    %11 = vector.load %arg4[%c0_8, %c0_9] : memref<128x128xbf16, #tpu.memory_space<vmem>>, vector<128x128xbf16>
    %cst_10 = arith.constant dense<0.000000e+00> : vector<512x128xf32>
    %12 = tpu.matmul %10, %11, %cst_10 {dimension_numbers = #tpu.dot_dimension_numbers<[1], [0], [0], [1], [0, 0, 1, 1], [], []>} : vector<512x128xbf16>, vector<128x128xbf16>, vector<512x128xf32> -> vector<512x128xf32>
    %c0_11 = arith.constant 0 : index
    %c0_12 = arith.constant 0 : index
    %13 = vector.load %arg5[%c0_11, %c0_12] : memref<1x128xf32, #tpu.memory_space<vmem>>, vector<1x128xf32>
    %14 = vector.broadcast %13 : vector<1x128xf32> to vector<512x128xf32>
    %15 = arith.addf %12, %14 : vector<512x128xf32>
    %c0_13 = arith.constant 0 : index
    %c0_14 = arith.constant 0 : index
    %16 = vector.load %arg7[%c0_13, %c0_14] : memref<512x128xf32, #tpu.memory_space<vmem>>, vector<512x128xf32>
    tpu.vector_store %arg7[%c0_13, %c0_14], %15 {strides = array<i32>} : memref<512x128xf32, #tpu.memory_space<vmem>>, vector<512x128xf32>,
    return
  }
  func.func @transform_0(%arg0: i32) -> (i32, i32) {
    %c0_i32 = arith.constant 0 : i32
    %c0_i32_0 = arith.constant 0 : i32
    %c0_i32_1 = arith.constant 0 : i32
    return %c0_i32, %c0_i32_0 : i32, i32
  }
  func.func @transform_1(%arg0: i32) -> (i32, i32) {
    %c0_i32 = arith.constant 0 : i32
    %c0_i32_0 = arith.constant 0 : i32
    %c0_i32_1 = arith.constant 0 : i32
    return %c0_i32, %c0_i32_0 : i32, i32
  }
  func.func @transform_2(%arg0: i32) -> (i32, i32) {
    %c0_i32 = arith.constant 0 : i32
    %c0_i32_0 = arith.constant 0 : i32
    %c0_i32_1 = arith.constant 0 : i32
    return %c0_i32, %c0_i32_0 : i32, i32
  }
  func.func @transform_3(%arg0: i32) -> (i32, i32) {
    %c0_i32 = arith.constant 0 : i32
    %c0_i32_0 = arith.constant 0 : i32
    %c0_i32_1 = arith.constant 0 : i32
    return %c0_i32, %c0_i32_0 : i32, i32
  }
  func.func @transform_4(%arg0: i32) -> (i32, i32) {
    %c0_i32 = arith.constant 0 : i32
    %c0_i32_0 = arith.constant 0 : i32
    %c0_i32_1 = arith.constant 0 : i32
    return %c0_i32, %c0_i32_0 : i32, i32
  }
  func.func @transform_5(%arg0: i32) -> (i32, i32) {
    %c0_i32 = arith.constant 0 : i32
    %c0_i32_0 = arith.constant 0 : i32
    %c0_i32_1 = arith.constant 0 : i32
    return %c0_i32, %c0_i32_0 : i32, i32
  }
  func.func @transform_6(%arg0: i32) -> (i32, i32) {
    %c0_i32 = arith.constant 0 : i32
    %c0_i32_0 = arith.constant 0 : i32
    %c0_i32_1 = arith.constant 0 : i32
    return %c0_i32, %c0_i32_0 : i32, i32
  }
}

module attributes {stable_mosaic.version = 11 : i64} {
  func.func @_rpn_level_kernel(%arg0: i32, %arg1: memref<2x18x18x128xf32, #tpu.memory_space<vmem>>, %arg2: memref<1152x128xbf16, #tpu.memory_space<vmem>>, %arg3: memref<1x128xf32, #tpu.memory_space<vmem>>, %arg4: memref<128x128xbf16, #tpu.memory_space<vmem>>, %arg5: memref<1x128xf32, #tpu.memory_space<vmem>>, %arg6: memref<512x128xf32, #tpu.memory_space<vmem>>) attributes {dimension_semantics = [#tpu.dimension_semantics<arbitrary>], iteration_bounds = array<i64: 1>, scalar_prefetch = 0 : i64, scratch_operands = 0 : i64, tpu.core_type = #tpu.core_type<tc>, window_params = [{pipeline_mode = #tpu.pipeline_mode<synchronous>, transform_indices = @transform_0, window_bounds = array<i64: 2, 18, 18, 128>}, {pipeline_mode = #tpu.pipeline_mode<synchronous>, transform_indices = @transform_1, window_bounds = array<i64: 1152, 128>}, {pipeline_mode = #tpu.pipeline_mode<synchronous>, transform_indices = @transform_2, window_bounds = array<i64: 1, 128>}, {pipeline_mode = #tpu.pipeline_mode<synchronous>, transform_indices = @transform_3, window_bounds = array<i64: 128, 128>}, {pipeline_mode = #tpu.pipeline_mode<synchronous>, transform_indices = @transform_4, window_bounds = array<i64: 1, 128>}, {pipeline_mode = #tpu.pipeline_mode<synchronous>, transform_indices = @transform_5, window_bounds = array<i64: 512, 128>}]} {
    %cst = arith.constant 0.000000e+00 : f32
    %0 = vector.broadcast %cst : f32 to vector<512x128xf32>
    %c0 = arith.constant 0 : index
    %c0_0 = arith.constant 0 : index
    %c0_1 = arith.constant 0 : index
    %c0_2 = arith.constant 0 : index
    %1 = vector.load %arg1[%c0, %c0_0, %c0_1, %c0_2] : memref<2x18x18x128xf32, #tpu.memory_space<vmem>>, vector<2x16x16x128xf32>
    %2 = vector.shape_cast %1 : vector<2x16x16x128xf32> to vector<512x128xf32>
    %3 = arith.truncf %2 : vector<512x128xf32> to vector<512x128xbf16>
    %c0_3 = arith.constant 0 : index
    %c0_4 = arith.constant 0 : index
    %4 = vector.load %arg2[%c0_3, %c0_4] : memref<1152x128xbf16, #tpu.memory_space<vmem>>, vector<128x128xbf16>
    %cst_5 = arith.constant dense<0.000000e+00> : vector<512x128xf32>
    %5 = tpu.matmul %3, %4, %cst_5 {dimension_numbers = #tpu.dot_dimension_numbers<[1], [0], [0], [1], [0, 0, 1, 1], [], []>} : vector<512x128xbf16>, vector<128x128xbf16>, vector<512x128xf32> -> vector<512x128xf32>
    %6 = arith.addf %0, %5 : vector<512x128xf32>
    %c0_6 = arith.constant 0 : index
    %c0_7 = arith.constant 0 : index
    %c1 = arith.constant 1 : index
    %c0_8 = arith.constant 0 : index
    %7 = vector.load %arg1[%c0_6, %c0_7, %c1, %c0_8] : memref<2x18x18x128xf32, #tpu.memory_space<vmem>>, vector<2x16x16x128xf32>
    %8 = vector.shape_cast %7 : vector<2x16x16x128xf32> to vector<512x128xf32>
    %9 = arith.truncf %8 : vector<512x128xf32> to vector<512x128xbf16>
    %c128 = arith.constant 128 : index
    %c0_9 = arith.constant 0 : index
    %10 = vector.load %arg2[%c128, %c0_9] : memref<1152x128xbf16, #tpu.memory_space<vmem>>, vector<128x128xbf16>
    %cst_10 = arith.constant dense<0.000000e+00> : vector<512x128xf32>
    %11 = tpu.matmul %9, %10, %cst_10 {dimension_numbers = #tpu.dot_dimension_numbers<[1], [0], [0], [1], [0, 0, 1, 1], [], []>} : vector<512x128xbf16>, vector<128x128xbf16>, vector<512x128xf32> -> vector<512x128xf32>
    %12 = arith.addf %6, %11 : vector<512x128xf32>
    %c0_11 = arith.constant 0 : index
    %c0_12 = arith.constant 0 : index
    %c2 = arith.constant 2 : index
    %c0_13 = arith.constant 0 : index
    %13 = vector.load %arg1[%c0_11, %c0_12, %c2, %c0_13] : memref<2x18x18x128xf32, #tpu.memory_space<vmem>>, vector<2x16x16x128xf32>
    %14 = vector.shape_cast %13 : vector<2x16x16x128xf32> to vector<512x128xf32>
    %15 = arith.truncf %14 : vector<512x128xf32> to vector<512x128xbf16>
    %c256 = arith.constant 256 : index
    %c0_14 = arith.constant 0 : index
    %16 = vector.load %arg2[%c256, %c0_14] : memref<1152x128xbf16, #tpu.memory_space<vmem>>, vector<128x128xbf16>
    %cst_15 = arith.constant dense<0.000000e+00> : vector<512x128xf32>
    %17 = tpu.matmul %15, %16, %cst_15 {dimension_numbers = #tpu.dot_dimension_numbers<[1], [0], [0], [1], [0, 0, 1, 1], [], []>} : vector<512x128xbf16>, vector<128x128xbf16>, vector<512x128xf32> -> vector<512x128xf32>
    %18 = arith.addf %12, %17 : vector<512x128xf32>
    %c0_16 = arith.constant 0 : index
    %c1_17 = arith.constant 1 : index
    %c0_18 = arith.constant 0 : index
    %c0_19 = arith.constant 0 : index
    %19 = vector.load %arg1[%c0_16, %c1_17, %c0_18, %c0_19] : memref<2x18x18x128xf32, #tpu.memory_space<vmem>>, vector<2x16x16x128xf32>
    %20 = vector.shape_cast %19 : vector<2x16x16x128xf32> to vector<512x128xf32>
    %21 = arith.truncf %20 : vector<512x128xf32> to vector<512x128xbf16>
    %c384 = arith.constant 384 : index
    %c0_20 = arith.constant 0 : index
    %22 = vector.load %arg2[%c384, %c0_20] : memref<1152x128xbf16, #tpu.memory_space<vmem>>, vector<128x128xbf16>
    %cst_21 = arith.constant dense<0.000000e+00> : vector<512x128xf32>
    %23 = tpu.matmul %21, %22, %cst_21 {dimension_numbers = #tpu.dot_dimension_numbers<[1], [0], [0], [1], [0, 0, 1, 1], [], []>} : vector<512x128xbf16>, vector<128x128xbf16>, vector<512x128xf32> -> vector<512x128xf32>
    %24 = arith.addf %18, %23 : vector<512x128xf32>
    %c0_22 = arith.constant 0 : index
    %c1_23 = arith.constant 1 : index
    %c1_24 = arith.constant 1 : index
    %c0_25 = arith.constant 0 : index
    %25 = vector.load %arg1[%c0_22, %c1_23, %c1_24, %c0_25] : memref<2x18x18x128xf32, #tpu.memory_space<vmem>>, vector<2x16x16x128xf32>
    %26 = vector.shape_cast %25 : vector<2x16x16x128xf32> to vector<512x128xf32>
    %27 = arith.truncf %26 : vector<512x128xf32> to vector<512x128xbf16>
    %c512 = arith.constant 512 : index
    %c0_26 = arith.constant 0 : index
    %28 = vector.load %arg2[%c512, %c0_26] : memref<1152x128xbf16, #tpu.memory_space<vmem>>, vector<128x128xbf16>
    %cst_27 = arith.constant dense<0.000000e+00> : vector<512x128xf32>
    %29 = tpu.matmul %27, %28, %cst_27 {dimension_numbers = #tpu.dot_dimension_numbers<[1], [0], [0], [1], [0, 0, 1, 1], [], []>} : vector<512x128xbf16>, vector<128x128xbf16>, vector<512x128xf32> -> vector<512x128xf32>
    %30 = arith.addf %24, %29 : vector<512x128xf32>
    %c0_28 = arith.constant 0 : index
    %c1_29 = arith.constant 1 : index
    %c2_30 = arith.constant 2 : index
    %c0_31 = arith.constant 0 : index
    %31 = vector.load %arg1[%c0_28, %c1_29, %c2_30, %c0_31] : memref<2x18x18x128xf32, #tpu.memory_space<vmem>>, vector<2x16x16x128xf32>
    %32 = vector.shape_cast %31 : vector<2x16x16x128xf32> to vector<512x128xf32>
    %33 = arith.truncf %32 : vector<512x128xf32> to vector<512x128xbf16>
    %c640 = arith.constant 640 : index
    %c0_32 = arith.constant 0 : index
    %34 = vector.load %arg2[%c640, %c0_32] : memref<1152x128xbf16, #tpu.memory_space<vmem>>, vector<128x128xbf16>
    %cst_33 = arith.constant dense<0.000000e+00> : vector<512x128xf32>
    %35 = tpu.matmul %33, %34, %cst_33 {dimension_numbers = #tpu.dot_dimension_numbers<[1], [0], [0], [1], [0, 0, 1, 1], [], []>} : vector<512x128xbf16>, vector<128x128xbf16>, vector<512x128xf32> -> vector<512x128xf32>
    %36 = arith.addf %30, %35 : vector<512x128xf32>
    %c0_34 = arith.constant 0 : index
    %c2_35 = arith.constant 2 : index
    %c0_36 = arith.constant 0 : index
    %c0_37 = arith.constant 0 : index
    %37 = vector.load %arg1[%c0_34, %c2_35, %c0_36, %c0_37] : memref<2x18x18x128xf32, #tpu.memory_space<vmem>>, vector<2x16x16x128xf32>
    %38 = vector.shape_cast %37 : vector<2x16x16x128xf32> to vector<512x128xf32>
    %39 = arith.truncf %38 : vector<512x128xf32> to vector<512x128xbf16>
    %c768 = arith.constant 768 : index
    %c0_38 = arith.constant 0 : index
    %40 = vector.load %arg2[%c768, %c0_38] : memref<1152x128xbf16, #tpu.memory_space<vmem>>, vector<128x128xbf16>
    %cst_39 = arith.constant dense<0.000000e+00> : vector<512x128xf32>
    %41 = tpu.matmul %39, %40, %cst_39 {dimension_numbers = #tpu.dot_dimension_numbers<[1], [0], [0], [1], [0, 0, 1, 1], [], []>} : vector<512x128xbf16>, vector<128x128xbf16>, vector<512x128xf32> -> vector<512x128xf32>
    %42 = arith.addf %36, %41 : vector<512x128xf32>
    %c0_40 = arith.constant 0 : index
    %c2_41 = arith.constant 2 : index
    %c1_42 = arith.constant 1 : index
    %c0_43 = arith.constant 0 : index
    %43 = vector.load %arg1[%c0_40, %c2_41, %c1_42, %c0_43] : memref<2x18x18x128xf32, #tpu.memory_space<vmem>>, vector<2x16x16x128xf32>
    %44 = vector.shape_cast %43 : vector<2x16x16x128xf32> to vector<512x128xf32>
    %45 = arith.truncf %44 : vector<512x128xf32> to vector<512x128xbf16>
    %c896 = arith.constant 896 : index
    %c0_44 = arith.constant 0 : index
    %46 = vector.load %arg2[%c896, %c0_44] : memref<1152x128xbf16, #tpu.memory_space<vmem>>, vector<128x128xbf16>
    %cst_45 = arith.constant dense<0.000000e+00> : vector<512x128xf32>
    %47 = tpu.matmul %45, %46, %cst_45 {dimension_numbers = #tpu.dot_dimension_numbers<[1], [0], [0], [1], [0, 0, 1, 1], [], []>} : vector<512x128xbf16>, vector<128x128xbf16>, vector<512x128xf32> -> vector<512x128xf32>
    %48 = arith.addf %42, %47 : vector<512x128xf32>
    %c0_46 = arith.constant 0 : index
    %c2_47 = arith.constant 2 : index
    %c2_48 = arith.constant 2 : index
    %c0_49 = arith.constant 0 : index
    %49 = vector.load %arg1[%c0_46, %c2_47, %c2_48, %c0_49] : memref<2x18x18x128xf32, #tpu.memory_space<vmem>>, vector<2x16x16x128xf32>
    %50 = vector.shape_cast %49 : vector<2x16x16x128xf32> to vector<512x128xf32>
    %51 = arith.truncf %50 : vector<512x128xf32> to vector<512x128xbf16>
    %c1024 = arith.constant 1024 : index
    %c0_50 = arith.constant 0 : index
    %52 = vector.load %arg2[%c1024, %c0_50] : memref<1152x128xbf16, #tpu.memory_space<vmem>>, vector<128x128xbf16>
    %cst_51 = arith.constant dense<0.000000e+00> : vector<512x128xf32>
    %53 = tpu.matmul %51, %52, %cst_51 {dimension_numbers = #tpu.dot_dimension_numbers<[1], [0], [0], [1], [0, 0, 1, 1], [], []>} : vector<512x128xbf16>, vector<128x128xbf16>, vector<512x128xf32> -> vector<512x128xf32>
    %54 = arith.addf %48, %53 : vector<512x128xf32>
    %c0_52 = arith.constant 0 : index
    %c0_53 = arith.constant 0 : index
    %55 = vector.load %arg3[%c0_52, %c0_53] : memref<1x128xf32, #tpu.memory_space<vmem>>, vector<1x128xf32>
    %56 = vector.broadcast %55 : vector<1x128xf32> to vector<512x128xf32>
    %57 = arith.addf %54, %56 : vector<512x128xf32>
    %cst_54 = arith.constant 0.000000e+00 : f32
    %58 = vector.broadcast %cst_54 : f32 to vector<512x128xf32>
    %59 = arith.maximumf %57, %58 : vector<512x128xf32>
    %60 = arith.truncf %59 : vector<512x128xf32> to vector<512x128xbf16>
    %c0_55 = arith.constant 0 : index
    %c0_56 = arith.constant 0 : index
    %61 = vector.load %arg4[%c0_55, %c0_56] : memref<128x128xbf16, #tpu.memory_space<vmem>>, vector<128x128xbf16>
    %cst_57 = arith.constant dense<0.000000e+00> : vector<512x128xf32>
    %62 = tpu.matmul %60, %61, %cst_57 {dimension_numbers = #tpu.dot_dimension_numbers<[1], [0], [0], [1], [0, 0, 1, 1], [], []>} : vector<512x128xbf16>, vector<128x128xbf16>, vector<512x128xf32> -> vector<512x128xf32>
    %c0_58 = arith.constant 0 : index
    %c0_59 = arith.constant 0 : index
    %63 = vector.load %arg5[%c0_58, %c0_59] : memref<1x128xf32, #tpu.memory_space<vmem>>, vector<1x128xf32>
    %64 = vector.broadcast %63 : vector<1x128xf32> to vector<512x128xf32>
    %65 = arith.addf %62, %64 : vector<512x128xf32>
    %c0_60 = arith.constant 0 : index
    %c0_61 = arith.constant 0 : index
    %66 = vector.load %arg6[%c0_60, %c0_61] : memref<512x128xf32, #tpu.memory_space<vmem>>, vector<512x128xf32>
    tpu.vector_store %arg6[%c0_60, %c0_61], %65 {strides = array<i32>} : memref<512x128xf32, #tpu.memory_space<vmem>>, vector<512x128xf32>,
    return
  }
  func.func @transform_0(%arg0: i32) -> (i32, i32, i32, i32) {
    %c0_i32 = arith.constant 0 : i32
    %c0_i32_0 = arith.constant 0 : i32
    %c0_i32_1 = arith.constant 0 : i32
    %c0_i32_2 = arith.constant 0 : i32
    %c0_i32_3 = arith.constant 0 : i32
    return %c0_i32, %c0_i32_0, %c0_i32_1, %c0_i32_2 : i32, i32, i32, i32
  }
  func.func @transform_1(%arg0: i32) -> (i32, i32) {
    %c0_i32 = arith.constant 0 : i32
    %c0_i32_0 = arith.constant 0 : i32
    %c0_i32_1 = arith.constant 0 : i32
    return %c0_i32, %c0_i32_0 : i32, i32
  }
  func.func @transform_2(%arg0: i32) -> (i32, i32) {
    %c0_i32 = arith.constant 0 : i32
    %c0_i32_0 = arith.constant 0 : i32
    %c0_i32_1 = arith.constant 0 : i32
    return %c0_i32, %c0_i32_0 : i32, i32
  }
  func.func @transform_3(%arg0: i32) -> (i32, i32) {
    %c0_i32 = arith.constant 0 : i32
    %c0_i32_0 = arith.constant 0 : i32
    %c0_i32_1 = arith.constant 0 : i32
    return %c0_i32, %c0_i32_0 : i32, i32
  }
  func.func @transform_4(%arg0: i32) -> (i32, i32) {
    %c0_i32 = arith.constant 0 : i32
    %c0_i32_0 = arith.constant 0 : i32
    %c0_i32_1 = arith.constant 0 : i32
    return %c0_i32, %c0_i32_0 : i32, i32
  }
  func.func @transform_5(%arg0: i32) -> (i32, i32) {
    %c0_i32 = arith.constant 0 : i32
    %c0_i32_0 = arith.constant 0 : i32
    %c0_i32_1 = arith.constant 0 : i32
    return %c0_i32, %c0_i32_0 : i32, i32
  }
}

module attributes {stable_mosaic.version = 11 : i64} {
  func.func @_rpn_level_kernel(%arg0: i32, %arg1: memref<2x10x10x128xf32, #tpu.memory_space<vmem>>, %arg2: memref<1152x128xbf16, #tpu.memory_space<vmem>>, %arg3: memref<1x128xf32, #tpu.memory_space<vmem>>, %arg4: memref<128x128xbf16, #tpu.memory_space<vmem>>, %arg5: memref<1x128xf32, #tpu.memory_space<vmem>>, %arg6: memref<128x128xf32, #tpu.memory_space<vmem>>) attributes {dimension_semantics = [#tpu.dimension_semantics<arbitrary>], iteration_bounds = array<i64: 1>, scalar_prefetch = 0 : i64, scratch_operands = 0 : i64, tpu.core_type = #tpu.core_type<tc>, window_params = [{pipeline_mode = #tpu.pipeline_mode<synchronous>, transform_indices = @transform_0, window_bounds = array<i64: 2, 10, 10, 128>}, {pipeline_mode = #tpu.pipeline_mode<synchronous>, transform_indices = @transform_1, window_bounds = array<i64: 1152, 128>}, {pipeline_mode = #tpu.pipeline_mode<synchronous>, transform_indices = @transform_2, window_bounds = array<i64: 1, 128>}, {pipeline_mode = #tpu.pipeline_mode<synchronous>, transform_indices = @transform_3, window_bounds = array<i64: 128, 128>}, {pipeline_mode = #tpu.pipeline_mode<synchronous>, transform_indices = @transform_4, window_bounds = array<i64: 1, 128>}, {pipeline_mode = #tpu.pipeline_mode<synchronous>, transform_indices = @transform_5, window_bounds = array<i64: 128, 128>}]} {
    %cst = arith.constant 0.000000e+00 : f32
    %0 = vector.broadcast %cst : f32 to vector<128x128xf32>
    %c0 = arith.constant 0 : index
    %c0_0 = arith.constant 0 : index
    %c0_1 = arith.constant 0 : index
    %c0_2 = arith.constant 0 : index
    %1 = vector.load %arg1[%c0, %c0_0, %c0_1, %c0_2] : memref<2x10x10x128xf32, #tpu.memory_space<vmem>>, vector<2x8x8x128xf32>
    %2 = vector.shape_cast %1 : vector<2x8x8x128xf32> to vector<128x128xf32>
    %3 = arith.truncf %2 : vector<128x128xf32> to vector<128x128xbf16>
    %c0_3 = arith.constant 0 : index
    %c0_4 = arith.constant 0 : index
    %4 = vector.load %arg2[%c0_3, %c0_4] : memref<1152x128xbf16, #tpu.memory_space<vmem>>, vector<128x128xbf16>
    %cst_5 = arith.constant dense<0.000000e+00> : vector<128x128xf32>
    %5 = tpu.matmul %3, %4, %cst_5 {dimension_numbers = #tpu.dot_dimension_numbers<[1], [0], [0], [1], [0, 0, 1, 1], [], []>} : vector<128x128xbf16>, vector<128x128xbf16>, vector<128x128xf32> -> vector<128x128xf32>
    %6 = arith.addf %0, %5 : vector<128x128xf32>
    %c0_6 = arith.constant 0 : index
    %c0_7 = arith.constant 0 : index
    %c1 = arith.constant 1 : index
    %c0_8 = arith.constant 0 : index
    %7 = vector.load %arg1[%c0_6, %c0_7, %c1, %c0_8] : memref<2x10x10x128xf32, #tpu.memory_space<vmem>>, vector<2x8x8x128xf32>
    %8 = vector.shape_cast %7 : vector<2x8x8x128xf32> to vector<128x128xf32>
    %9 = arith.truncf %8 : vector<128x128xf32> to vector<128x128xbf16>
    %c128 = arith.constant 128 : index
    %c0_9 = arith.constant 0 : index
    %10 = vector.load %arg2[%c128, %c0_9] : memref<1152x128xbf16, #tpu.memory_space<vmem>>, vector<128x128xbf16>
    %cst_10 = arith.constant dense<0.000000e+00> : vector<128x128xf32>
    %11 = tpu.matmul %9, %10, %cst_10 {dimension_numbers = #tpu.dot_dimension_numbers<[1], [0], [0], [1], [0, 0, 1, 1], [], []>} : vector<128x128xbf16>, vector<128x128xbf16>, vector<128x128xf32> -> vector<128x128xf32>
    %12 = arith.addf %6, %11 : vector<128x128xf32>
    %c0_11 = arith.constant 0 : index
    %c0_12 = arith.constant 0 : index
    %c2 = arith.constant 2 : index
    %c0_13 = arith.constant 0 : index
    %13 = vector.load %arg1[%c0_11, %c0_12, %c2, %c0_13] : memref<2x10x10x128xf32, #tpu.memory_space<vmem>>, vector<2x8x8x128xf32>
    %14 = vector.shape_cast %13 : vector<2x8x8x128xf32> to vector<128x128xf32>
    %15 = arith.truncf %14 : vector<128x128xf32> to vector<128x128xbf16>
    %c256 = arith.constant 256 : index
    %c0_14 = arith.constant 0 : index
    %16 = vector.load %arg2[%c256, %c0_14] : memref<1152x128xbf16, #tpu.memory_space<vmem>>, vector<128x128xbf16>
    %cst_15 = arith.constant dense<0.000000e+00> : vector<128x128xf32>
    %17 = tpu.matmul %15, %16, %cst_15 {dimension_numbers = #tpu.dot_dimension_numbers<[1], [0], [0], [1], [0, 0, 1, 1], [], []>} : vector<128x128xbf16>, vector<128x128xbf16>, vector<128x128xf32> -> vector<128x128xf32>
    %18 = arith.addf %12, %17 : vector<128x128xf32>
    %c0_16 = arith.constant 0 : index
    %c1_17 = arith.constant 1 : index
    %c0_18 = arith.constant 0 : index
    %c0_19 = arith.constant 0 : index
    %19 = vector.load %arg1[%c0_16, %c1_17, %c0_18, %c0_19] : memref<2x10x10x128xf32, #tpu.memory_space<vmem>>, vector<2x8x8x128xf32>
    %20 = vector.shape_cast %19 : vector<2x8x8x128xf32> to vector<128x128xf32>
    %21 = arith.truncf %20 : vector<128x128xf32> to vector<128x128xbf16>
    %c384 = arith.constant 384 : index
    %c0_20 = arith.constant 0 : index
    %22 = vector.load %arg2[%c384, %c0_20] : memref<1152x128xbf16, #tpu.memory_space<vmem>>, vector<128x128xbf16>
    %cst_21 = arith.constant dense<0.000000e+00> : vector<128x128xf32>
    %23 = tpu.matmul %21, %22, %cst_21 {dimension_numbers = #tpu.dot_dimension_numbers<[1], [0], [0], [1], [0, 0, 1, 1], [], []>} : vector<128x128xbf16>, vector<128x128xbf16>, vector<128x128xf32> -> vector<128x128xf32>
    %24 = arith.addf %18, %23 : vector<128x128xf32>
    %c0_22 = arith.constant 0 : index
    %c1_23 = arith.constant 1 : index
    %c1_24 = arith.constant 1 : index
    %c0_25 = arith.constant 0 : index
    %25 = vector.load %arg1[%c0_22, %c1_23, %c1_24, %c0_25] : memref<2x10x10x128xf32, #tpu.memory_space<vmem>>, vector<2x8x8x128xf32>
    %26 = vector.shape_cast %25 : vector<2x8x8x128xf32> to vector<128x128xf32>
    %27 = arith.truncf %26 : vector<128x128xf32> to vector<128x128xbf16>
    %c512 = arith.constant 512 : index
    %c0_26 = arith.constant 0 : index
    %28 = vector.load %arg2[%c512, %c0_26] : memref<1152x128xbf16, #tpu.memory_space<vmem>>, vector<128x128xbf16>
    %cst_27 = arith.constant dense<0.000000e+00> : vector<128x128xf32>
    %29 = tpu.matmul %27, %28, %cst_27 {dimension_numbers = #tpu.dot_dimension_numbers<[1], [0], [0], [1], [0, 0, 1, 1], [], []>} : vector<128x128xbf16>, vector<128x128xbf16>, vector<128x128xf32> -> vector<128x128xf32>
    %30 = arith.addf %24, %29 : vector<128x128xf32>
    %c0_28 = arith.constant 0 : index
    %c1_29 = arith.constant 1 : index
    %c2_30 = arith.constant 2 : index
    %c0_31 = arith.constant 0 : index
    %31 = vector.load %arg1[%c0_28, %c1_29, %c2_30, %c0_31] : memref<2x10x10x128xf32, #tpu.memory_space<vmem>>, vector<2x8x8x128xf32>
    %32 = vector.shape_cast %31 : vector<2x8x8x128xf32> to vector<128x128xf32>
    %33 = arith.truncf %32 : vector<128x128xf32> to vector<128x128xbf16>
    %c640 = arith.constant 640 : index
    %c0_32 = arith.constant 0 : index
    %34 = vector.load %arg2[%c640, %c0_32] : memref<1152x128xbf16, #tpu.memory_space<vmem>>, vector<128x128xbf16>
    %cst_33 = arith.constant dense<0.000000e+00> : vector<128x128xf32>
    %35 = tpu.matmul %33, %34, %cst_33 {dimension_numbers = #tpu.dot_dimension_numbers<[1], [0], [0], [1], [0, 0, 1, 1], [], []>} : vector<128x128xbf16>, vector<128x128xbf16>, vector<128x128xf32> -> vector<128x128xf32>
    %36 = arith.addf %30, %35 : vector<128x128xf32>
    %c0_34 = arith.constant 0 : index
    %c2_35 = arith.constant 2 : index
    %c0_36 = arith.constant 0 : index
    %c0_37 = arith.constant 0 : index
    %37 = vector.load %arg1[%c0_34, %c2_35, %c0_36, %c0_37] : memref<2x10x10x128xf32, #tpu.memory_space<vmem>>, vector<2x8x8x128xf32>
    %38 = vector.shape_cast %37 : vector<2x8x8x128xf32> to vector<128x128xf32>
    %39 = arith.truncf %38 : vector<128x128xf32> to vector<128x128xbf16>
    %c768 = arith.constant 768 : index
    %c0_38 = arith.constant 0 : index
    %40 = vector.load %arg2[%c768, %c0_38] : memref<1152x128xbf16, #tpu.memory_space<vmem>>, vector<128x128xbf16>
    %cst_39 = arith.constant dense<0.000000e+00> : vector<128x128xf32>
    %41 = tpu.matmul %39, %40, %cst_39 {dimension_numbers = #tpu.dot_dimension_numbers<[1], [0], [0], [1], [0, 0, 1, 1], [], []>} : vector<128x128xbf16>, vector<128x128xbf16>, vector<128x128xf32> -> vector<128x128xf32>
    %42 = arith.addf %36, %41 : vector<128x128xf32>
    %c0_40 = arith.constant 0 : index
    %c2_41 = arith.constant 2 : index
    %c1_42 = arith.constant 1 : index
    %c0_43 = arith.constant 0 : index
    %43 = vector.load %arg1[%c0_40, %c2_41, %c1_42, %c0_43] : memref<2x10x10x128xf32, #tpu.memory_space<vmem>>, vector<2x8x8x128xf32>
    %44 = vector.shape_cast %43 : vector<2x8x8x128xf32> to vector<128x128xf32>
    %45 = arith.truncf %44 : vector<128x128xf32> to vector<128x128xbf16>
    %c896 = arith.constant 896 : index
    %c0_44 = arith.constant 0 : index
    %46 = vector.load %arg2[%c896, %c0_44] : memref<1152x128xbf16, #tpu.memory_space<vmem>>, vector<128x128xbf16>
    %cst_45 = arith.constant dense<0.000000e+00> : vector<128x128xf32>
    %47 = tpu.matmul %45, %46, %cst_45 {dimension_numbers = #tpu.dot_dimension_numbers<[1], [0], [0], [1], [0, 0, 1, 1], [], []>} : vector<128x128xbf16>, vector<128x128xbf16>, vector<128x128xf32> -> vector<128x128xf32>
    %48 = arith.addf %42, %47 : vector<128x128xf32>
    %c0_46 = arith.constant 0 : index
    %c2_47 = arith.constant 2 : index
    %c2_48 = arith.constant 2 : index
    %c0_49 = arith.constant 0 : index
    %49 = vector.load %arg1[%c0_46, %c2_47, %c2_48, %c0_49] : memref<2x10x10x128xf32, #tpu.memory_space<vmem>>, vector<2x8x8x128xf32>
    %50 = vector.shape_cast %49 : vector<2x8x8x128xf32> to vector<128x128xf32>
    %51 = arith.truncf %50 : vector<128x128xf32> to vector<128x128xbf16>
    %c1024 = arith.constant 1024 : index
    %c0_50 = arith.constant 0 : index
    %52 = vector.load %arg2[%c1024, %c0_50] : memref<1152x128xbf16, #tpu.memory_space<vmem>>, vector<128x128xbf16>
    %cst_51 = arith.constant dense<0.000000e+00> : vector<128x128xf32>
    %53 = tpu.matmul %51, %52, %cst_51 {dimension_numbers = #tpu.dot_dimension_numbers<[1], [0], [0], [1], [0, 0, 1, 1], [], []>} : vector<128x128xbf16>, vector<128x128xbf16>, vector<128x128xf32> -> vector<128x128xf32>
    %54 = arith.addf %48, %53 : vector<128x128xf32>
    %c0_52 = arith.constant 0 : index
    %c0_53 = arith.constant 0 : index
    %55 = vector.load %arg3[%c0_52, %c0_53] : memref<1x128xf32, #tpu.memory_space<vmem>>, vector<1x128xf32>
    %56 = vector.broadcast %55 : vector<1x128xf32> to vector<128x128xf32>
    %57 = arith.addf %54, %56 : vector<128x128xf32>
    %cst_54 = arith.constant 0.000000e+00 : f32
    %58 = vector.broadcast %cst_54 : f32 to vector<128x128xf32>
    %59 = arith.maximumf %57, %58 : vector<128x128xf32>
    %60 = arith.truncf %59 : vector<128x128xf32> to vector<128x128xbf16>
    %c0_55 = arith.constant 0 : index
    %c0_56 = arith.constant 0 : index
    %61 = vector.load %arg4[%c0_55, %c0_56] : memref<128x128xbf16, #tpu.memory_space<vmem>>, vector<128x128xbf16>
    %cst_57 = arith.constant dense<0.000000e+00> : vector<128x128xf32>
    %62 = tpu.matmul %60, %61, %cst_57 {dimension_numbers = #tpu.dot_dimension_numbers<[1], [0], [0], [1], [0, 0, 1, 1], [], []>} : vector<128x128xbf16>, vector<128x128xbf16>, vector<128x128xf32> -> vector<128x128xf32>
    %c0_58 = arith.constant 0 : index
    %c0_59 = arith.constant 0 : index
    %63 = vector.load %arg5[%c0_58, %c0_59] : memref<1x128xf32, #tpu.memory_space<vmem>>, vector<1x128xf32>
    %64 = vector.broadcast %63 : vector<1x128xf32> to vector<128x128xf32>
    %65 = arith.addf %62, %64 : vector<128x128xf32>
    %c0_60 = arith.constant 0 : index
    %c0_61 = arith.constant 0 : index
    %66 = vector.load %arg6[%c0_60, %c0_61] : memref<128x128xf32, #tpu.memory_space<vmem>>, vector<128x128xf32>
    tpu.vector_store %arg6[%c0_60, %c0_61], %65 {strides = array<i32>} : memref<128x128xf32, #tpu.memory_space<vmem>>, vector<128x128xf32>,
    return
  }
  func.func @transform_0(%arg0: i32) -> (i32, i32, i32, i32) {
    %c0_i32 = arith.constant 0 : i32
    %c0_i32_0 = arith.constant 0 : i32
    %c0_i32_1 = arith.constant 0 : i32
    %c0_i32_2 = arith.constant 0 : i32
    %c0_i32_3 = arith.constant 0 : i32
    return %c0_i32, %c0_i32_0, %c0_i32_1, %c0_i32_2 : i32, i32, i32, i32
  }
  func.func @transform_1(%arg0: i32) -> (i32, i32) {
    %c0_i32 = arith.constant 0 : i32
    %c0_i32_0 = arith.constant 0 : i32
    %c0_i32_1 = arith.constant 0 : i32
    return %c0_i32, %c0_i32_0 : i32, i32
  }
  func.func @transform_2(%arg0: i32) -> (i32, i32) {
    %c0_i32 = arith.constant 0 : i32
    %c0_i32_0 = arith.constant 0 : i32
    %c0_i32_1 = arith.constant 0 : i32
    return %c0_i32, %c0_i32_0 : i32, i32
  }
  func.func @transform_3(%arg0: i32) -> (i32, i32) {
    %c0_i32 = arith.constant 0 : i32
    %c0_i32_0 = arith.constant 0 : i32
    %c0_i32_1 = arith.constant 0 : i32
    return %c0_i32, %c0_i32_0 : i32, i32
  }
  func.func @transform_4(%arg0: i32) -> (i32, i32) {
    %c0_i32 = arith.constant 0 : i32
    %c0_i32_0 = arith.constant 0 : i32
    %c0_i32_1 = arith.constant 0 : i32
    return %c0_i32, %c0_i32_0 : i32, i32
  }
  func.func @transform_5(%arg0: i32) -> (i32, i32) {
    %c0_i32 = arith.constant 0 : i32
    %c0_i32_0 = arith.constant 0 : i32
    %c0_i32_1 = arith.constant 0 : i32
    return %c0_i32, %c0_i32_0 : i32, i32
  }
}

module attributes {stable_mosaic.version = 11 : i64} {
  func.func @_mm_relu_mm_kernel(%arg0: i32, %arg1: memref<128x1152xbf16, #tpu.memory_space<vmem>>, %arg2: memref<1152x256xbf16, #tpu.memory_space<vmem>>, %arg3: memref<1x256xf32, #tpu.memory_space<vmem>>, %arg4: memref<256x128xbf16, #tpu.memory_space<vmem>>, %arg5: memref<1x128xf32, #tpu.memory_space<vmem>>, %arg6: memref<128x128xf32, #tpu.memory_space<vmem>>) attributes {dimension_semantics = [#tpu.dimension_semantics<arbitrary>], iteration_bounds = array<i64: 1>, scalar_prefetch = 0 : i64, scratch_operands = 0 : i64, tpu.core_type = #tpu.core_type<tc>, window_params = [{pipeline_mode = #tpu.pipeline_mode<synchronous>, transform_indices = @transform_0, window_bounds = array<i64: 128, 1152>}, {pipeline_mode = #tpu.pipeline_mode<synchronous>, transform_indices = @transform_1, window_bounds = array<i64: 1152, 256>}, {pipeline_mode = #tpu.pipeline_mode<synchronous>, transform_indices = @transform_2, window_bounds = array<i64: 1, 256>}, {pipeline_mode = #tpu.pipeline_mode<synchronous>, transform_indices = @transform_3, window_bounds = array<i64: 256, 128>}, {pipeline_mode = #tpu.pipeline_mode<synchronous>, transform_indices = @transform_4, window_bounds = array<i64: 1, 128>}, {pipeline_mode = #tpu.pipeline_mode<synchronous>, transform_indices = @transform_5, window_bounds = array<i64: 128, 128>}]} {
    %c0 = arith.constant 0 : index
    %c0_0 = arith.constant 0 : index
    %0 = vector.load %arg1[%c0, %c0_0] : memref<128x1152xbf16, #tpu.memory_space<vmem>>, vector<128x1152xbf16>
    %c0_1 = arith.constant 0 : index
    %c0_2 = arith.constant 0 : index
    %1 = vector.load %arg2[%c0_1, %c0_2] : memref<1152x256xbf16, #tpu.memory_space<vmem>>, vector<1152x256xbf16>
    %cst = arith.constant dense<0.000000e+00> : vector<128x256xf32>
    %2 = tpu.matmul %0, %1, %cst {dimension_numbers = #tpu.dot_dimension_numbers<[1], [0], [0], [1], [0, 0, 1, 1], [], []>} : vector<128x1152xbf16>, vector<1152x256xbf16>, vector<128x256xf32> -> vector<128x256xf32>
    %c0_3 = arith.constant 0 : index
    %c0_4 = arith.constant 0 : index
    %3 = vector.load %arg3[%c0_3, %c0_4] : memref<1x256xf32, #tpu.memory_space<vmem>>, vector<1x256xf32>
    %4 = vector.broadcast %3 : vector<1x256xf32> to vector<128x256xf32>
    %5 = arith.addf %2, %4 : vector<128x256xf32>
    %cst_5 = arith.constant 0.000000e+00 : f32
    %6 = vector.broadcast %cst_5 : f32 to vector<128x256xf32>
    %7 = arith.maximumf %5, %6 : vector<128x256xf32>
    %8 = arith.truncf %7 : vector<128x256xf32> to vector<128x256xbf16>
    %c0_6 = arith.constant 0 : index
    %c0_7 = arith.constant 0 : index
    %9 = vector.load %arg4[%c0_6, %c0_7] : memref<256x128xbf16, #tpu.memory_space<vmem>>, vector<256x128xbf16>
    %cst_8 = arith.constant dense<0.000000e+00> : vector<128x128xf32>
    %10 = tpu.matmul %8, %9, %cst_8 {dimension_numbers = #tpu.dot_dimension_numbers<[1], [0], [0], [1], [0, 0, 1, 1], [], []>} : vector<128x256xbf16>, vector<256x128xbf16>, vector<128x128xf32> -> vector<128x128xf32>
    %c0_9 = arith.constant 0 : index
    %c0_10 = arith.constant 0 : index
    %11 = vector.load %arg5[%c0_9, %c0_10] : memref<1x128xf32, #tpu.memory_space<vmem>>, vector<1x128xf32>
    %12 = vector.broadcast %11 : vector<1x128xf32> to vector<128x128xf32>
    %13 = arith.addf %10, %12 : vector<128x128xf32>
    %c0_11 = arith.constant 0 : index
    %c0_12 = arith.constant 0 : index
    %14 = vector.load %arg6[%c0_11, %c0_12] : memref<128x128xf32, #tpu.memory_space<vmem>>, vector<128x128xf32>
    tpu.vector_store %arg6[%c0_11, %c0_12], %13 {strides = array<i32>} : memref<128x128xf32, #tpu.memory_space<vmem>>, vector<128x128xf32>,
    return
  }
  func.func @transform_0(%arg0: i32) -> (i32, i32) {
    %c0_i32 = arith.constant 0 : i32
    %c0_i32_0 = arith.constant 0 : i32
    %c0_i32_1 = arith.constant 0 : i32
    return %c0_i32, %c0_i32_0 : i32, i32
  }
  func.func @transform_1(%arg0: i32) -> (i32, i32) {
    %c0_i32 = arith.constant 0 : i32
    %c0_i32_0 = arith.constant 0 : i32
    %c0_i32_1 = arith.constant 0 : i32
    return %c0_i32, %c0_i32_0 : i32, i32
  }
  func.func @transform_2(%arg0: i32) -> (i32, i32) {
    %c0_i32 = arith.constant 0 : i32
    %c0_i32_0 = arith.constant 0 : i32
    %c0_i32_1 = arith.constant 0 : i32
    return %c0_i32, %c0_i32_0 : i32, i32
  }
  func.func @transform_3(%arg0: i32) -> (i32, i32) {
    %c0_i32 = arith.constant 0 : i32
    %c0_i32_0 = arith.constant 0 : i32
    %c0_i32_1 = arith.constant 0 : i32
    return %c0_i32, %c0_i32_0 : i32, i32
  }
  func.func @transform_4(%arg0: i32) -> (i32, i32) {
    %c0_i32 = arith.constant 0 : i32
    %c0_i32_0 = arith.constant 0 : i32
    %c0_i32_1 = arith.constant 0 : i32
    return %c0_i32, %c0_i32_0 : i32, i32
  }
  func.func @transform_5(%arg0: i32) -> (i32, i32) {
    %c0_i32 = arith.constant 0 : i32
    %c0_i32_0 = arith.constant 0 : i32
    %c0_i32_1 = arith.constant 0 : i32
    return %c0_i32, %c0_i32_0 : i32, i32
  }
}

module attributes {stable_mosaic.version = 11 : i64} {
  func.func @_decode_kernel(%arg0: i32, %arg1: memref<4x960xf32, #tpu.memory_space<vmem>>, %arg2: memref<2x4x960xf32, #tpu.memory_space<vmem>>, %arg3: memref<2x1x960xf32, #tpu.memory_space<vmem>>, %arg4: memref<2x4x960xf32, #tpu.memory_space<vmem>>, %arg5: memref<2x1x960xf32, #tpu.memory_space<vmem>>) attributes {dimension_semantics = [#tpu.dimension_semantics<arbitrary>], iteration_bounds = array<i64: 1>, scalar_prefetch = 0 : i64, scratch_operands = 0 : i64, tpu.core_type = #tpu.core_type<tc>, window_params = [{pipeline_mode = #tpu.pipeline_mode<synchronous>, transform_indices = @transform_0, window_bounds = array<i64: 4, 960>}, {pipeline_mode = #tpu.pipeline_mode<synchronous>, transform_indices = @transform_1, window_bounds = array<i64: 2, 4, 960>}, {pipeline_mode = #tpu.pipeline_mode<synchronous>, transform_indices = @transform_2, window_bounds = array<i64: 2, 1, 960>}, {pipeline_mode = #tpu.pipeline_mode<synchronous>, transform_indices = @transform_3, window_bounds = array<i64: 2, 4, 960>}, {pipeline_mode = #tpu.pipeline_mode<synchronous>, transform_indices = @transform_4, window_bounds = array<i64: 2, 1, 960>}]} {
    %c0 = arith.constant 0 : index
    %c0_0 = arith.constant 0 : index
    %0 = vector.load %arg1[%c0, %c0_0] : memref<4x960xf32, #tpu.memory_space<vmem>>, vector<4x960xf32>
    %1 = vector.extract_strided_slice %0 {offsets = [0, 0], sizes = [1, 960], strides = [1, 1]} : vector<4x960xf32> to vector<1x960xf32>
    %2 = vector.extract_strided_slice %0 {offsets = [1, 0], sizes = [1, 960], strides = [1, 1]} : vector<4x960xf32> to vector<1x960xf32>
    %3 = vector.extract_strided_slice %0 {offsets = [2, 0], sizes = [1, 960], strides = [1, 1]} : vector<4x960xf32> to vector<1x960xf32>
    %4 = vector.extract_strided_slice %0 {offsets = [3, 0], sizes = [1, 960], strides = [1, 1]} : vector<4x960xf32> to vector<1x960xf32>
    %5 = arith.subf %3, %1 : vector<1x960xf32>
    %6 = arith.subf %4, %2 : vector<1x960xf32>
    %cst = arith.constant 5.000000e-01 : f32
    %7 = vector.broadcast %cst : f32 to vector<1x960xf32>
    %8 = arith.mulf %7, %5 : vector<1x960xf32>
    %9 = arith.addf %1, %8 : vector<1x960xf32>
    %cst_1 = arith.constant 5.000000e-01 : f32
    %10 = vector.broadcast %cst_1 : f32 to vector<1x960xf32>
    %11 = arith.mulf %10, %6 : vector<1x960xf32>
    %12 = arith.addf %2, %11 : vector<1x960xf32>
    %c0_2 = arith.constant 0 : index
    %c0_3 = arith.constant 0 : index
    %c0_4 = arith.constant 0 : index
    %13 = vector.load %arg2[%c0_2, %c0_3, %c0_4] : memref<2x4x960xf32, #tpu.memory_space<vmem>>, vector<2x4x960xf32>
    %14 = vector.extract_strided_slice %13 {offsets = [0, 0, 0], sizes = [2, 1, 960], strides = [1, 1, 1]} : vector<2x4x960xf32> to vector<2x1x960xf32>
    %15 = vector.extract_strided_slice %13 {offsets = [0, 1, 0], sizes = [2, 1, 960], strides = [1, 1, 1]} : vector<2x4x960xf32> to vector<2x1x960xf32>
    %16 = vector.extract_strided_slice %13 {offsets = [0, 2, 0], sizes = [2, 1, 960], strides = [1, 1, 1]} : vector<2x4x960xf32> to vector<2x1x960xf32>
    %cst_5 = arith.constant 4.13516665 : f32
    %17 = vector.broadcast %cst_5 : f32 to vector<2x1x960xf32>
    %18 = arith.minimumf %16, %17 : vector<2x1x960xf32>
    %19 = vector.extract_strided_slice %13 {offsets = [0, 3, 0], sizes = [2, 1, 960], strides = [1, 1, 1]} : vector<2x4x960xf32> to vector<2x1x960xf32>
    %cst_6 = arith.constant 4.13516665 : f32
    %20 = vector.broadcast %cst_6 : f32 to vector<2x1x960xf32>
    %21 = arith.minimumf %19, %20 : vector<2x1x960xf32>
    %22 = vector.shape_cast %5 : vector<1x960xf32> to vector<1x1x960xf32>
    %23 = vector.broadcast %22 : vector<1x1x960xf32> to vector<2x1x960xf32>
    %24 = arith.mulf %14, %23 : vector<2x1x960xf32>
    %25 = vector.shape_cast %9 : vector<1x960xf32> to vector<1x1x960xf32>
    %26 = vector.broadcast %25 : vector<1x1x960xf32> to vector<2x1x960xf32>
    %27 = arith.addf %24, %26 : vector<2x1x960xf32>
    %28 = vector.shape_cast %6 : vector<1x960xf32> to vector<1x1x960xf32>
    %29 = vector.broadcast %28 : vector<1x1x960xf32> to vector<2x1x960xf32>
    %30 = arith.mulf %15, %29 : vector<2x1x960xf32>
    %31 = vector.shape_cast %12 : vector<1x960xf32> to vector<1x1x960xf32>
    %32 = vector.broadcast %31 : vector<1x1x960xf32> to vector<2x1x960xf32>
    %33 = arith.addf %30, %32 : vector<2x1x960xf32>
    %34 = math.exp %18 : vector<2x1x960xf32>
    %35 = vector.shape_cast %5 : vector<1x960xf32> to vector<1x1x960xf32>
    %36 = vector.broadcast %35 : vector<1x1x960xf32> to vector<2x1x960xf32>
    %37 = arith.mulf %34, %36 : vector<2x1x960xf32>
    %38 = math.exp %21 : vector<2x1x960xf32>
    %39 = vector.shape_cast %6 : vector<1x960xf32> to vector<1x1x960xf32>
    %40 = vector.broadcast %39 : vector<1x1x960xf32> to vector<2x1x960xf32>
    %41 = arith.mulf %38, %40 : vector<2x1x960xf32>
    %cst_7 = arith.constant 5.000000e-01 : f32
    %42 = vector.broadcast %cst_7 : f32 to vector<2x1x960xf32>
    %43 = arith.mulf %42, %37 : vector<2x1x960xf32>
    %44 = arith.subf %27, %43 : vector<2x1x960xf32>
    %cst_8 = arith.constant 0.000000e+00 : f32
    %cst_9 = arith.constant 6.400000e+01 : f32
    %45 = vector.broadcast %cst_8 : f32 to vector<2x1x960xf32>
    %46 = arith.maximumf %45, %44 : vector<2x1x960xf32>
    %47 = vector.broadcast %cst_9 : f32 to vector<2x1x960xf32>
    %48 = arith.minimumf %47, %46 : vector<2x1x960xf32>
    %c0_10 = arith.constant 0 : index
    %c0_11 = arith.constant 0 : index
    %c0_12 = arith.constant 0 : index
    %49 = vector.load %arg4[%c0_10, %c0_11, %c0_12] : memref<2x4x960xf32, #tpu.memory_space<vmem>>, vector<2x1x960xf32>
    tpu.vector_store %arg4[%c0_10, %c0_11, %c0_12], %48 {strides = array<i32>} : memref<2x4x960xf32, #tpu.memory_space<vmem>>, vector<2x1x960xf32>,
    %cst_13 = arith.constant 5.000000e-01 : f32
    %50 = vector.broadcast %cst_13 : f32 to vector<2x1x960xf32>
    %51 = arith.mulf %50, %41 : vector<2x1x960xf32>
    %52 = arith.subf %33, %51 : vector<2x1x960xf32>
    %cst_14 = arith.constant 0.000000e+00 : f32
    %cst_15 = arith.constant 6.400000e+01 : f32
    %53 = vector.broadcast %cst_14 : f32 to vector<2x1x960xf32>
    %54 = arith.maximumf %53, %52 : vector<2x1x960xf32>
    %55 = vector.broadcast %cst_15 : f32 to vector<2x1x960xf32>
    %56 = arith.minimumf %55, %54 : vector<2x1x960xf32>
    %c0_16 = arith.constant 0 : index
    %c1 = arith.constant 1 : index
    %c0_17 = arith.constant 0 : index
    %57 = vector.load %arg4[%c0_16, %c1, %c0_17] : memref<2x4x960xf32, #tpu.memory_space<vmem>>, vector<2x1x960xf32>
    tpu.vector_store %arg4[%c0_16, %c1, %c0_17], %56 {strides = array<i32>} : memref<2x4x960xf32, #tpu.memory_space<vmem>>, vector<2x1x960xf32>,
    %cst_18 = arith.constant 5.000000e-01 : f32
    %58 = vector.broadcast %cst_18 : f32 to vector<2x1x960xf32>
    %59 = arith.mulf %58, %37 : vector<2x1x960xf32>
    %60 = arith.addf %27, %59 : vector<2x1x960xf32>
    %cst_19 = arith.constant 0.000000e+00 : f32
    %cst_20 = arith.constant 6.400000e+01 : f32
    %61 = vector.broadcast %cst_19 : f32 to vector<2x1x960xf32>
    %62 = arith.maximumf %61, %60 : vector<2x1x960xf32>
    %63 = vector.broadcast %cst_20 : f32 to vector<2x1x960xf32>
    %64 = arith.minimumf %63, %62 : vector<2x1x960xf32>
    %c0_21 = arith.constant 0 : index
    %c2 = arith.constant 2 : index
    %c0_22 = arith.constant 0 : index
    %65 = vector.load %arg4[%c0_21, %c2, %c0_22] : memref<2x4x960xf32, #tpu.memory_space<vmem>>, vector<2x1x960xf32>
    tpu.vector_store %arg4[%c0_21, %c2, %c0_22], %64 {strides = array<i32>} : memref<2x4x960xf32, #tpu.memory_space<vmem>>, vector<2x1x960xf32>,
    %cst_23 = arith.constant 5.000000e-01 : f32
    %66 = vector.broadcast %cst_23 : f32 to vector<2x1x960xf32>
    %67 = arith.mulf %66, %41 : vector<2x1x960xf32>
    %68 = arith.addf %33, %67 : vector<2x1x960xf32>
    %cst_24 = arith.constant 0.000000e+00 : f32
    %cst_25 = arith.constant 6.400000e+01 : f32
    %69 = vector.broadcast %cst_24 : f32 to vector<2x1x960xf32>
    %70 = arith.maximumf %69, %68 : vector<2x1x960xf32>
    %71 = vector.broadcast %cst_25 : f32 to vector<2x1x960xf32>
    %72 = arith.minimumf %71, %70 : vector<2x1x960xf32>
    %c0_26 = arith.constant 0 : index
    %c3 = arith.constant 3 : index
    %c0_27 = arith.constant 0 : index
    %73 = vector.load %arg4[%c0_26, %c3, %c0_27] : memref<2x4x960xf32, #tpu.memory_space<vmem>>, vector<2x1x960xf32>
    tpu.vector_store %arg4[%c0_26, %c3, %c0_27], %72 {strides = array<i32>} : memref<2x4x960xf32, #tpu.memory_space<vmem>>, vector<2x1x960xf32>,
    %c0_28 = arith.constant 0 : index
    %c0_29 = arith.constant 0 : index
    %c0_30 = arith.constant 0 : index
    %74 = vector.load %arg3[%c0_28, %c0_29, %c0_30] : memref<2x1x960xf32, #tpu.memory_space<vmem>>, vector<2x1x960xf32>
    %75 = arith.negf %74 : vector<2x1x960xf32>
    %76 = math.exp %75 : vector<2x1x960xf32>
    %cst_31 = arith.constant 1.000000e+00 : f32
    %77 = vector.broadcast %cst_31 : f32 to vector<2x1x960xf32>
    %78 = arith.addf %77, %76 : vector<2x1x960xf32>
    %79 = arith.divf %77, %78 : vector<2x1x960xf32>
    %c0_32 = arith.constant 0 : index
    %c0_33 = arith.constant 0 : index
    %c0_34 = arith.constant 0 : index
    %80 = vector.load %arg5[%c0_32, %c0_33, %c0_34] : memref<2x1x960xf32, #tpu.memory_space<vmem>>, vector<2x1x960xf32>
    tpu.vector_store %arg5[%c0_32, %c0_33, %c0_34], %79 {strides = array<i32>} : memref<2x1x960xf32, #tpu.memory_space<vmem>>, vector<2x1x960xf32>,
    return
  }
  func.func @transform_0(%arg0: i32) -> (i32, i32) {
    %c0_i32 = arith.constant 0 : i32
    %c0_i32_0 = arith.constant 0 : i32
    %c0_i32_1 = arith.constant 0 : i32
    return %c0_i32, %c0_i32_0 : i32, i32
  }
  func.func @transform_1(%arg0: i32) -> (i32, i32, i32) {
    %c0_i32 = arith.constant 0 : i32
    %c0_i32_0 = arith.constant 0 : i32
    %c0_i32_1 = arith.constant 0 : i32
    %c0_i32_2 = arith.constant 0 : i32
    return %c0_i32, %c0_i32_0, %c0_i32_1 : i32, i32, i32
  }
  func.func @transform_2(%arg0: i32) -> (i32, i32, i32) {
    %c0_i32 = arith.constant 0 : i32
    %c0_i32_0 = arith.constant 0 : i32
    %c0_i32_1 = arith.constant 0 : i32
    %c0_i32_2 = arith.constant 0 : i32
    return %c0_i32, %c0_i32_0, %c0_i32_1 : i32, i32, i32
  }
  func.func @transform_3(%arg0: i32) -> (i32, i32, i32) {
    %c0_i32 = arith.constant 0 : i32
    %c0_i32_0 = arith.constant 0 : i32
    %c0_i32_1 = arith.constant 0 : i32
    %c0_i32_2 = arith.constant 0 : i32
    return %c0_i32, %c0_i32_0, %c0_i32_1 : i32, i32, i32
  }
  func.func @transform_4(%arg0: i32) -> (i32, i32, i32) {
    %c0_i32 = arith.constant 0 : i32
    %c0_i32_0 = arith.constant 0 : i32
    %c0_i32_1 = arith.constant 0 : i32
    %c0_i32_2 = arith.constant 0 : i32
    return %c0_i32, %c0_i32_0, %c0_i32_1 : i32, i32, i32
  }
}

</mosaic_0001>

<bundles_post_ra>
// kernel: rcnn_tail_forward.5
= control target key start
LH: loop header
LB: loop body
LE: loop exit
PB: predicated region body
PF: predicated region fallthrough
CT: control target
= control target key end

     0   :  { %vm286_vm0 = vcmask 523264   ;;  %s2798_s1 = inlined_call_operand.vmem [shape: bf16[64,128], index: 1, kind: input, shape index: {}]   ;;  %s2799_s0 = inlined_call_operand.vmem [shape: bf16[512,64], index: 0, kind: input, shape index: {}]   ;;  %s2800_s3 = inlined_call_operand.vmem [shape: bf16[128,128], index: 3, kind: input, shape index: {}]   ;;  %s2801_s2 = inlined_call_operand.vmem [shape: f32[1,128], index: 2, kind: input, shape index: {}]   ;;  %s2802_s5 = inlined_call_operand.vmem [shape: bf16[512,128], index: 5, kind: output, shape index: {0}]   ;;  %s2803_s4 = inlined_call_operand.vmem [shape: f32[1,128], index: 4, kind: input, shape index: {}]   ;;  %s2804_s6 = inlined_call_operand.vmem [shape: f32[512,128], index: 6, kind: output, shape index: {1}]  }
   0x1   :  { %v2129_v0 = vld [vmem:[%s2798_s1] sm:$0xff]   ;;  %v2130_v1 = vld [vmem:[%s2798_s1 + $0x8] sm:$0xff]   ;;  %v2131_v2 = vld [vmem:[%s2798_s1 + $0x10] sm:$0xff]  }
   0x2   :  { %1961 = vmatprep.subr.bf16.mxu0 %v2129_v0  ;;  %v2133_v3 = vld [vmem:[%s2799_s0] sm:$0xff]   ;;  %v2132_v4 = vld [vmem:[%s2798_s1 + $0x18] sm:$0xff]   ;;  %v2134_v5 = vld [vmem:[%s2799_s0 + $0x8] sm:$0xff]  }
   0x3   :  { %1962 = vmatpush3.bf16.msra.mxu0 %v2129_v0  ;;  %1969 = vmatprep.mubr.msk.bf16.mxu0 %vm286_vm0, %v2133_v3  ;;  %v2135_v6 = vld [vmem:[%s2799_s0 + $0x10] sm:$0xff]   ;;  %v2136_v7 = vld [vmem:[%s2799_s0 + $0x18] sm:$0xff]   ;;  %v2137_v8 = vld [vmem:[%s2799_s0 + $0x20] sm:$0xff]  }
   0x4   :  { %1963 = vmatprep.subr.bf16.mxu0 %v2130_v1  ;;  %v2138_v9 = vld [vmem:[%s2799_s0 + $0x28] sm:$0xff]   ;;  %v2139_v10 = vld [vmem:[%s2799_s0 + $0x30] sm:$0xff]   ;;  %v2165_v11 = vld [vmem:[%s2800_s3] sm:$0xff]  }
   0x5   :  { %v2166_v12 = vld [vmem:[%s2800_s3 + $0x8] sm:$0xff]   ;;  %v2140_v13 = vld [vmem:[%s2799_s0 + $0x38] sm:$0xff]   ;;  %2113 = vmatprep.subr.bf16.mxu1 %v2165_v11  ;;  %v2141_v14 = vld [vmem:[%s2799_s0 + $0x40] sm:$0xff]  }
   0x6   :  { %2121 = vmatpush3.bf16.msra.mxu1 %v2165_v11  ;;  %v2167_v15 = vld [vmem:[%s2800_s3 + $0x10] sm:$0xff]   ;;  %v2168_v16 = vld [vmem:[%s2800_s3 + $0x18] sm:$0xff]   ;;  %v2142_v17 = vld [vmem:[%s2799_s0 + $0x48] sm:$0xff]  }
   0x7   :  { %1964 = vmatpush3.bf16.msra.mxu0 %v2130_v1  ;;  %2114 = vmatprep.subr.bf16.mxu1 %v2166_v12  ;;  %v2143_v18 = vld [vmem:[%s2799_s0 + $0x50] sm:$0xff]   ;;  %v2169_v19 = vld [vmem:[%s2800_s3 + $0x20] sm:$0xff]   ;;  %v2170_v20 = vld [vmem:[%s2800_s3 + $0x28] sm:$0xff]  }
   0x8   :  { %1965 = vmatprep.subr.bf16.mxu0 %v2131_v2  ;;  %v2144_v21 = vld [vmem:[%s2799_s0 + $0x58] sm:$0xff]   ;;  %v2145_v22 = vld [vmem:[%s2799_s0 + $0x60] sm:$0xff]   ;;  %v2146_v23 = vld [vmem:[%s2799_s0 + $0x68] sm:$0xff]  }
   0x9   :  { %v2147_v24 = vld [vmem:[%s2799_s0 + $0x70] sm:$0xff]   ;;  %v2148_v25 = vld [vmem:[%s2799_s0 + $0x78] sm:$0xff]   ;;  %v2149_v26 = vld [vmem:[%s2799_s0 + $0x80] sm:$0xff]  }
   0xa   :  { %2122 = vmatpush3.bf16.msra.mxu1 %v2166_v12  ;;  %v2150_v27 = vld [vmem:[%s2799_s0 + $0x88] sm:$0xff]   ;;  %v2151_v28 = vld [vmem:[%s2799_s0 + $0x90] sm:$0xff]   ;;  %v2152_v29 = vld [vmem:[%s2799_s0 + $0x98] sm:$0xff]  }
   0xb   :  { %1966 = vmatpush3.bf16.msra.mxu0 %v2131_v2  ;;  %2115 = vmatprep.subr.bf16.mxu1 %v2167_v15  ;;  %v2153_v30 = vld [vmem:[%s2799_s0 + $0xa0] sm:$0xff]   ;;  %v2154_v31 = vld [vmem:[%s2799_s0 + $0xa8] sm:$0xff]   ;;  %v2155_v32 = vld [vmem:[%s2799_s0 + $0xb0] sm:$0xff]  }
   0xc   :  { %1967 = vmatprep.subr.bf16.mxu0 %v2132_v4  ;;  %v2156_v33 = vld [vmem:[%s2799_s0 + $0xb8] sm:$0xff]   ;;  %v2171_v34 = vld [vmem:[%s2800_s3 + $0x30] sm:$0xff]   ;;  %v2157_v35 = vld [vmem:[%s2799_s0 + $0xc0] sm:$0xff]  }
   0xd   :  { %v2172_v36 = vld [vmem:[%s2800_s3 + $0x38] sm:$0xff]   ;;  %v2158_v37 = vld [vmem:[%s2799_s0 + $0xc8] sm:$0xff]   ;;  %v2159_v38 = vld [vmem:[%s2799_s0 + $0xd0] sm:$0xff]  }
   0xe   :  { %2123 = vmatpush3.bf16.msra.mxu1 %v2167_v15  ;;  %v2160_v39 = vld [vmem:[%s2799_s0 + $0xd8] sm:$0xff]   ;;  %v2161_v40 = vld [vmem:[%s2799_s0 + $0xe0] sm:$0xff]   ;;  %v2162_v41 = vld [vmem:[%s2799_s0 + $0xe8] sm:$0xff]  }
   0xf   :  { %1968 = vmatpush3.bf16.msra.mxu0 %v2132_v4  ;;  %2116 = vmatprep.subr.bf16.mxu1 %v2168_v16  ;;  %v2163_v42 = vld [vmem:[%s2799_s0 + $0xf0] sm:$0xff]   ;;  %v2164_v43 = vld [vmem:[%s2799_s0 + $0xf8] sm:$0xff]   ;;  %v2375_v44 = vld [vmem:[%s2801_s2] ss:$0 sm:$0xff] }
  0x10   :  { %2033 = vmatprep.subr.bf16.mxu0 %v2165_v11 }
  0x12   :  { %1970 = vmatmul.mubr.msk.bf16.vlgmr.msra.gmra.mrb[0].mxu0 %vm286_vm0, %v2134_v5  ;;  %2124 = vmatpush3.bf16.msra.mxu1 %v2168_v16 }
  0x13   :  { %1973 = vmatprep.mubr.msk.bf16.mxu0 %vm286_vm0, %v2135_v6  ;;  %2034 = vmatpush3.bf16.msra.mxu0 %v2165_v11 }
  0x14   :  { %2035 = vmatprep.subr.bf16.mxu0 %v2166_v12  ;;  %2117 = vmatprep.subr.bf16.mxu1 %v2169_v19 }
  0x16   :  { %2125 = vmatpush3.bf16.msra.mxu1 %v2169_v19 }
  0x17   :  { %2036 = vmatpush3.bf16.msra.mxu0 %v2166_v12  ;;  %2118 = vmatprep.subr.bf16.mxu1 %v2170_v20 }
  0x18   :  { %2037 = vmatprep.subr.bf16.mxu0 %v2167_v15 }
  0x1a   :  { %1974 = vmatmul.mubr.msk.bf16.gmra.mrb[4].mxu0 %vm286_vm0, %v2136_v7  ;;  %2126 = vmatpush3.bf16.msra.mxu1 %v2170_v20 }
  0x1b   :  { %1977 = vmatprep.mubr.msk.bf16.mxu0 %vm286_vm0, %v2137_v8  ;;  %2038 = vmatpush3.bf16.msra.mxu0 %v2167_v15 }
  0x1c   :  { %2039 = vmatprep.subr.bf16.mxu0 %v2168_v16  ;;  %2119 = vmatprep.subr.bf16.mxu1 %v2171_v34 }
  0x1e   :  { %2127 = vmatpush3.bf16.msra.mxu1 %v2171_v34 }
  0x1f   :  { %2040 = vmatpush3.bf16.msra.mxu0 %v2168_v16  ;;  %2120 = vmatprep.subr.bf16.mxu1 %v2172_v36 }
  0x20   :  { %2041 = vmatprep.subr.bf16.mxu0 %v2169_v19 }
  0x22   :  { %1978 = vmatmul.mubr.msk.bf16.gmra.mrb[8].mxu0 %vm286_vm0, %v2138_v9  ;;  %2128 = vmatpush3.bf16.msra.mxu1 %v2172_v36 }
  0x23   :  { %1981 = vmatprep.mubr.msk.bf16.mxu0 %vm286_vm0, %v2139_v10  ;;  %2042 = vmatpush3.bf16.msra.mxu0 %v2169_v19 }
  0x24   :  { %2043 = vmatprep.subr.bf16.mxu0 %v2170_v20 }
  0x27   :  { %2044 = vmatpush3.bf16.msra.mxu0 %v2170_v20 }
  0x28   :  { %2045 = vmatprep.subr.bf16.mxu0 %v2171_v34 }
  0x2a   :  { %1982 = vmatmul.mubr.msk.bf16.gmra.mrb[12].mxu0 %vm286_vm0, %v2140_v13 }
  0x2b   :  { %1985 = vmatprep.mubr.msk.bf16.mxu0 %vm286_vm0, %v2141_v14  ;;  %2046 = vmatpush3.bf16.msra.mxu0 %v2171_v34 }
  0x2c   :  { %2047 = vmatprep.subr.bf16.mxu0 %v2172_v36 }
  0x2f   :  { %2048 = vmatpush3.bf16.msra.mxu0 %v2172_v36 }
  0x32   :  { %1986 = vmatmul.mubr.msk.bf16.gmra.mrb[16].mxu0 %vm286_vm0, %v2142_v17 }
  0x33   :  { %1989 = vmatprep.mubr.msk.bf16.mxu0 %vm286_vm0, %v2143_v18 }
  0x3a   :  { %1990 = vmatmul.mubr.msk.bf16.gmra.mrb[20].mxu0 %vm286_vm0, %v2144_v21 }
  0x3b   :  { %1993 = vmatprep.mubr.msk.bf16.mxu0 %vm286_vm0, %v2145_v22 }
  0x42   :  { %1994 = vmatmul.mubr.msk.bf16.gmra.mrb[24].mxu0 %vm286_vm0, %v2146_v23 }
  0x43   :  { %1997 = vmatprep.mubr.msk.bf16.mxu0 %vm286_vm0, %v2147_v24 }
  0x4a   :  { %1998 = vmatmul.mubr.msk.bf16.gmra.mrb[28].mxu0 %vm286_vm0, %v2148_v25 }
  0x4b   :  { %2001 = vmatprep.mubr.msk.bf16.mxu0 %vm286_vm0, %v2149_v26 }
  0x52   :  { %2002 = vmatmul.mubr.msk.bf16.gmra.mrb[32].mxu0 %vm286_vm0, %v2150_v27 }
  0x53   :  { %2005 = vmatprep.mubr.msk.bf16.mxu0 %vm286_vm0, %v2151_v28 }
  0x5a   :  { %2006 = vmatmul.mubr.msk.bf16.gmra.mrb[36].mxu0 %vm286_vm0, %v2152_v29 }
  0x5b   :  { %2009 = vmatprep.mubr.msk.bf16.mxu0 %vm286_vm0, %v2153_v30 }
  0x62   :  { %2010 = vmatmul.mubr.msk.bf16.gmra.mrb[40].mxu0 %vm286_vm0, %v2154_v31 }
  0x63   :  { %2013 = vmatprep.mubr.msk.bf16.mxu0 %vm286_vm0, %v2155_v32 }
  0x6a   :  { %2014 = vmatmul.mubr.msk.bf16.gmra.mrb[44].mxu0 %vm286_vm0, %v2156_v33 }
  0x6b   :  { %2017 = vmatprep.mubr.msk.bf16.mxu0 %vm286_vm0, %v2157_v35 }
  0x72   :  { %2018 = vmatmul.mubr.msk.bf16.gmra.mrb[48].mxu0 %vm286_vm0, %v2158_v37 }
  0x73   :  { %2021 = vmatprep.mubr.msk.bf16.mxu0 %vm286_vm0, %v2159_v38 }
  0x7a   :  { %2022 = vmatmul.mubr.msk.bf16.gmra.mrb[52].mxu0 %vm286_vm0, %v2160_v39 }
  0x7b   :  { %2025 = vmatprep.mubr.msk.bf16.mxu0 %vm286_vm0, %v2161_v40 }
  0x82   :  { %2026 = vmatmul.mubr.msk.bf16.gmra.mrb[56].mxu0 %vm286_vm0, %v2162_v41 }
  0x83   :  { %2029 = vmatprep.mubr.msk.bf16.mxu0 %vm286_vm0, %v2163_v42 }
  0x8a   :  { %2030 = vmatmul.mubr.msk.bf16.gmra.mrb[60].mxu0 %vm286_vm0, %v2164_v43 }
  0xe5   :  { %v1971_v45 = vpop.f32.mrb[0].mxu0 }
  0xe6   :  { %v426_v46 = vadd.f32 %v1971_v45, %v2375_v44  ;;  %v417_v47 = vpop.f32.mrb[1].mxu0 }
  0xe7   :  { %v418_v48 = vadd.f32 %v2375_v44, %v417_v47  ;;  %v1972_v49 = vpop.f32.mrb[2].mxu0 }
  0xe8   :  { %v429_v50 = vadd.f32 %v1972_v49, %v2375_v44  ;;  %v420_v51 = vpop.f32.mrb[3].mxu0  ;;  %v674_v53 = vmax.f32 %v426_v46, 0.0 }
  0xe9   :  { %v421_v52 = vadd.f32 %v2375_v44, %v420_v51  ;;  %v672_v55 = vmax.f32 %v418_v48, 0.0 }
  0xea   :  { %v675_v54 = vmax.f32 %v429_v50, 0.0 }
  0xeb   :  { %v673_v56 = vmax.f32 %v421_v52, 0.0 }
  0xec   :  { %v737_v57 = vpack.c.bf16 %v675_v54, %v674_v53 }
  0xed   :  { %v736_v58 = vpack.c.bf16 %v673_v56, %v672_v55  ;;  %v1975_v59 = vpop.f32.mrb[4].mxu0 }
  0xee   :  { %1854 = vst [vmem:[%s2802_s5 + $0x8] sm:$0xff] %v737_v57   ;;  %v442_v60 = vadd.f32 %v1975_v59, %v2375_v44  ;;  %v433_v61 = vpop.f32.mrb[5].mxu0 }
  0xef   :  { %1698 = vst [vmem:[%s2802_s5] sm:$0xff] %v736_v58   ;;  %v434_v62 = vadd.f32 %v2375_v44, %v433_v61  ;;  %v1976_v63 = vpop.f32.mrb[6].mxu0  ;;  %2049 = vmatprep.mubr.bf16.mxu0 %v736_v58 }
  0xf0   :  { %v445_v0 = vadd.f32 %v1976_v63, %v2375_v44  ;;  %v436_v1 = vpop.f32.mrb[7].mxu0  ;;  %2050 = vmatmul.mubr.bf16.vlgmr.msra.gmra.mrb[64].mxu0 %v737_v57  ;;  %v678_v3 = vmax.f32 %v442_v60, 0.0 }
  0xf1   :  { %v437_v2 = vadd.f32 %v2375_v44, %v436_v1  ;;  %v676_v5 = vmax.f32 %v434_v62, 0.0 }
  0xf2   :  { %v679_v4 = vmax.f32 %v445_v0, 0.0 }
  0xf3   :  { %v677_v6 = vmax.f32 %v437_v2, 0.0 }
  0xf4   :  { %v739_v7 = vpack.c.bf16 %v679_v4, %v678_v3 }
  0xf5   :  { %v1979_v8 = vpop.f32.mrb[8].mxu0  ;;  %v738_v9 = vpack.c.bf16 %v677_v6, %v676_v5 }
  0xf6   :  { %1856 = vst [vmem:[%s2802_s5 + $0x18] sm:$0xff] %v739_v7   ;;  %v458_v10 = vadd.f32 %v1979_v8, %v2375_v44  ;;  %v449_v11 = vpop.f32.mrb[9].mxu0 }
  0xf7   :  { %v450_v12 = vadd.f32 %v2375_v44, %v449_v11  ;;  %v1980_v13 = vpop.f32.mrb[10].mxu0  ;;  %1855 = vst [vmem:[%s2802_s5 + $0x10] sm:$0xff] %v738_v9   ;;  %2053 = vmatprep.mubr.bf16.mxu1 %v738_v9 }
  0xf8   :  { %v461_v14 = vadd.f32 %v1980_v13, %v2375_v44  ;;  %v452_v15 = vpop.f32.mrb[11].mxu0  ;;  %2054 = vmatmul.mubr.bf16.vlgmr.msra.gmra.mrb[0].mxu1 %v739_v7  ;;  %v682_v17 = vmax.f32 %v458_v10, 0.0 }
  0xf9   :  { %v453_v16 = vadd.f32 %v2375_v44, %v452_v15  ;;  %v680_v19 = vmax.f32 %v450_v12, 0.0 }
  0xfa   :  { %v683_v18 = vmax.f32 %v461_v14, 0.0 }
  0xfb   :  { %v681_v20 = vmax.f32 %v453_v16, 0.0 }
  0xfc   :  { %v741_v21 = vpack.c.bf16 %v683_v18, %v682_v17 }
  0xfd   :  { %v740_v22 = vpack.c.bf16 %v681_v20, %v680_v19  ;;  %v1983_v23 = vpop.f32.mrb[12].mxu0 }
  0xfe   :  { %1858 = vst [vmem:[%s2802_s5 + $0x28] sm:$0xff] %v741_v21   ;;  %v474_v24 = vadd.f32 %v1983_v23, %v2375_v44  ;;  %v465_v25 = vpop.f32.mrb[13].mxu0 }
  0xff   :  { %1857 = vst [vmem:[%s2802_s5 + $0x20] sm:$0xff] %v740_v22   ;;  %v466_v26 = vadd.f32 %v2375_v44, %v465_v25  ;;  %v1984_v27 = vpop.f32.mrb[14].mxu0  ;;  %2057 = vmatprep.mubr.bf16.mxu1 %v740_v22 }
 0x100   :  { %v477_v28 = vadd.f32 %v1984_v27, %v2375_v44  ;;  %v468_v29 = vpop.f32.mrb[15].mxu0  ;;  %2058 = vmatmul.mubr.bf16.gmra.mrb[4].mxu1 %v741_v21  ;;  %v686_v31 = vmax.f32 %v474_v24, 0.0 }
 0x101   :  { %v469_v30 = vadd.f32 %v2375_v44, %v468_v29  ;;  %v684_v33 = vmax.f32 %v466_v26, 0.0 }
 0x102   :  { %v687_v32 = vmax.f32 %v477_v28, 0.0 }
 0x103   :  { %v685_v34 = vmax.f32 %v469_v30, 0.0 }
 0x104   :  { %v743_v35 = vpack.c.bf16 %v687_v32, %v686_v31 }
 0x105   :  { %v742_v36 = vpack.c.bf16 %v685_v34, %v684_v33  ;;  %v1987_v37 = vpop.f32.mrb[16].mxu0 }
 0x106   :  { %1860 = vst [vmem:[%s2802_s5 + $0x38] sm:$0xff] %v743_v35   ;;  %v490_v38 = vadd.f32 %v1987_v37, %v2375_v44  ;;  %v481_v39 = vpop.f32.mrb[17].mxu0 }
 0x107   :  { %1859 = vst [vmem:[%s2802_s5 + $0x30] sm:$0xff] %v742_v36   ;;  %v482_v40 = vadd.f32 %v2375_v44, %v481_v39  ;;  %v1988_v41 = vpop.f32.mrb[18].mxu0  ;;  %2061 = vmatprep.mubr.bf16.mxu1 %v742_v36 }
 0x108   :  { %v493_v42 = vadd.f32 %v1988_v41, %v2375_v44  ;;  %v484_v43 = vpop.f32.mrb[19].mxu0  ;;  %2062 = vmatmul.mubr.bf16.gmra.mrb[8].mxu1 %v743_v35  ;;  %v690_v46 = vmax.f32 %v490_v38, 0.0 }
 0x109   :  { %v485_v45 = vadd.f32 %v2375_v44, %v484_v43  ;;  %v688_v48 = vmax.f32 %v482_v40, 0.0 }
 0x10a   :  { %v691_v47 = vmax.f32 %v493_v42, 0.0 }
 0x10b   :  { %v689_v49 = vmax.f32 %v485_v45, 0.0 }
 0x10c   :  { %v745_v50 = vpack.c.bf16 %v691_v47, %v690_v46 }
 0x10d   :  { %v744_v51 = vpack.c.bf16 %v689_v49, %v688_v48  ;;  %v1991_v52 = vpop.f32.mrb[20].mxu0 }
 0x10e   :  { %1862 = vst [vmem:[%s2802_s5 + $0x48] sm:$0xff] %v745_v50   ;;  %v506_v53 = vadd.f32 %v1991_v52, %v2375_v44  ;;  %v497_v54 = vpop.f32.mrb[21].mxu0 }
 0x10f   :  { %1861 = vst [vmem:[%s2802_s5 + $0x40] sm:$0xff] %v744_v51   ;;  %v498_v55 = vadd.f32 %v2375_v44, %v497_v54  ;;  %v1992_v56 = vpop.f32.mrb[22].mxu0  ;;  %2065 = vmatprep.mubr.bf16.mxu1 %v744_v51 }
 0x110   :  { %v509_v57 = vadd.f32 %v1992_v56, %v2375_v44  ;;  %v500_v58 = vpop.f32.mrb[23].mxu0  ;;  %2066 = vmatmul.mubr.bf16.gmra.mrb[12].mxu1 %v745_v50  ;;  %v694_v60 = vmax.f32 %v506_v53, 0.0 }
 0x111   :  { %v501_v59 = vadd.f32 %v2375_v44, %v500_v58  ;;  %v692_v62 = vmax.f32 %v498_v55, 0.0 }
 0x112   :  { %v695_v61 = vmax.f32 %v509_v57, 0.0 }
 0x113   :  { %v693_v63 = vmax.f32 %v501_v59, 0.0 }
 0x114   :  { %v747_v0 = vpack.c.bf16 %v695_v61, %v694_v60 }
 0x115   :  { %v746_v1 = vpack.c.bf16 %v693_v63, %v692_v62  ;;  %v1995_v2 = vpop.f32.mrb[24].mxu0 }
 0x116   :  { %1864 = vst [vmem:[%s2802_s5 + $0x58] sm:$0xff] %v747_v0   ;;  %v522_v3 = vadd.f32 %v1995_v2, %v2375_v44  ;;  %v513_v4 = vpop.f32.mrb[25].mxu0 }
 0x117   :  { %1863 = vst [vmem:[%s2802_s5 + $0x50] sm:$0xff] %v746_v1   ;;  %v514_v5 = vadd.f32 %v2375_v44, %v513_v4  ;;  %v1996_v6 = vpop.f32.mrb[26].mxu0  ;;  %2069 = vmatprep.mubr.bf16.mxu1 %v746_v1 }
 0x118   :  { %v525_v7 = vadd.f32 %v1996_v6, %v2375_v44  ;;  %v516_v8 = vpop.f32.mrb[27].mxu0  ;;  %2070 = vmatmul.mubr.bf16.gmra.mrb[16].mxu1 %v747_v0  ;;  %v698_v10 = vmax.f32 %v522_v3, 0.0 }
 0x119   :  { %v517_v9 = vadd.f32 %v2375_v44, %v516_v8  ;;  %v696_v12 = vmax.f32 %v514_v5, 0.0 }
 0x11a   :  { %v699_v11 = vmax.f32 %v525_v7, 0.0 }
 0x11b   :  { %v697_v13 = vmax.f32 %v517_v9, 0.0 }
 0x11c   :  { %v749_v14 = vpack.c.bf16 %v699_v11, %v698_v10 }
 0x11d   :  { %v748_v15 = vpack.c.bf16 %v697_v13, %v696_v12  ;;  %v1999_v16 = vpop.f32.mrb[28].mxu0 }
 0x11e   :  { %1866 = vst [vmem:[%s2802_s5 + $0x68] sm:$0xff] %v749_v14   ;;  %v538_v17 = vadd.f32 %v1999_v16, %v2375_v44  ;;  %v529_v18 = vpop.f32.mrb[29].mxu0 }
 0x11f   :  { %1865 = vst [vmem:[%s2802_s5 + $0x60] sm:$0xff] %v748_v15   ;;  %v530_v19 = vadd.f32 %v2375_v44, %v529_v18  ;;  %v2000_v20 = vpop.f32.mrb[30].mxu0  ;;  %2073 = vmatprep.mubr.bf16.mxu1 %v748_v15 }
 0x120   :  { %v541_v21 = vadd.f32 %v2000_v20, %v2375_v44  ;;  %v532_v22 = vpop.f32.mrb[31].mxu0  ;;  %2074 = vmatmul.mubr.bf16.gmra.mrb[20].mxu1 %v749_v14  ;;  %v702_v24 = vmax.f32 %v538_v17, 0.0 }
 0x121   :  { %v533_v23 = vadd.f32 %v2375_v44, %v532_v22  ;;  %v700_v26 = vmax.f32 %v530_v19, 0.0 }
 0x122   :  { %v703_v25 = vmax.f32 %v541_v21, 0.0 }
 0x123   :  { %v701_v27 = vmax.f32 %v533_v23, 0.0 }
 0x124   :  { %v751_v28 = vpack.c.bf16 %v703_v25, %v702_v24 }
 0x125   :  { %v750_v29 = vpack.c.bf16 %v701_v27, %v700_v26  ;;  %v2003_v30 = vpop.f32.mrb[32].mxu0 }
 0x126   :  { %1868 = vst [vmem:[%s2802_s5 + $0x78] sm:$0xff] %v751_v28   ;;  %v554_v31 = vadd.f32 %v2003_v30, %v2375_v44  ;;  %v545_v32 = vpop.f32.mrb[33].mxu0 }
 0x127   :  { %1867 = vst [vmem:[%s2802_s5 + $0x70] sm:$0xff] %v750_v29   ;;  %v546_v33 = vadd.f32 %v2375_v44, %v545_v32  ;;  %v2004_v34 = vpop.f32.mrb[34].mxu0  ;;  %2077 = vmatprep.mubr.bf16.mxu1 %v750_v29 }
 0x128   :  { %v557_v35 = vadd.f32 %v2004_v34, %v2375_v44  ;;  %v548_v36 = vpop.f32.mrb[35].mxu0  ;;  %2078 = vmatmul.mubr.bf16.gmra.mrb[24].mxu1 %v751_v28  ;;  %v706_v38 = vmax.f32 %v554_v31, 0.0 }
 0x129   :  { %v549_v37 = vadd.f32 %v2375_v44, %v548_v36  ;;  %v704_v40 = vmax.f32 %v546_v33, 0.0 }
 0x12a   :  { %v707_v39 = vmax.f32 %v557_v35, 0.0 }
 0x12b   :  { %v705_v41 = vmax.f32 %v549_v37, 0.0 }
 0x12c   :  { %v753_v42 = vpack.c.bf16 %v707_v39, %v706_v38 }
 0x12d   :  { %v752_v43 = vpack.c.bf16 %v705_v41, %v704_v40  ;;  %v2007_v45 = vpop.f32.mrb[36].mxu0 }
 0x12e   :  { %1870 = vst [vmem:[%s2802_s5 + $0x88] sm:$0xff] %v753_v42   ;;  %v570_v46 = vadd.f32 %v2007_v45, %v2375_v44  ;;  %v561_v47 = vpop.f32.mrb[37].mxu0 }
 0x12f   :  { %1869 = vst [vmem:[%s2802_s5 + $0x80] sm:$0xff] %v752_v43   ;;  %v562_v48 = vadd.f32 %v2375_v44, %v561_v47  ;;  %v2008_v49 = vpop.f32.mrb[38].mxu0  ;;  %2081 = vmatprep.mubr.bf16.mxu1 %v752_v43 }
 0x130   :  { %v573_v50 = vadd.f32 %v2008_v49, %v2375_v44  ;;  %v564_v51 = vpop.f32.mrb[39].mxu0  ;;  %2082 = vmatmul.mubr.bf16.gmra.mrb[28].mxu1 %v753_v42  ;;  %v710_v53 = vmax.f32 %v570_v46, 0.0 }
 0x131   :  { %v565_v52 = vadd.f32 %v2375_v44, %v564_v51  ;;  %v708_v55 = vmax.f32 %v562_v48, 0.0 }
 0x132   :  { %v711_v54 = vmax.f32 %v573_v50, 0.0 }
 0x133   :  { %v709_v56 = vmax.f32 %v565_v52, 0.0 }
 0x134   :  { %v755_v57 = vpack.c.bf16 %v711_v54, %v710_v53 }
 0x135   :  { %v754_v58 = vpack.c.bf16 %v709_v56, %v708_v55  ;;  %v2011_v59 = vpop.f32.mrb[40].mxu0 }
 0x136   :  { %1872 = vst [vmem:[%s2802_s5 + $0x98] sm:$0xff] %v755_v57   ;;  %v586_v60 = vadd.f32 %v2011_v59, %v2375_v44  ;;  %v577_v61 = vpop.f32.mrb[41].mxu0 }
 0x137   :  { %1871 = vst [vmem:[%s2802_s5 + $0x90] sm:$0xff] %v754_v58   ;;  %v578_v62 = vadd.f32 %v2375_v44, %v577_v61  ;;  %v2012_v63 = vpop.f32.mrb[42].mxu0  ;;  %2085 = vmatprep.mubr.bf16.mxu1 %v754_v58 }
 0x138   :  { %v589_v0 = vadd.f32 %v2012_v63, %v2375_v44  ;;  %v580_v1 = vpop.f32.mrb[43].mxu0  ;;  %2086 = vmatmul.mubr.bf16.gmra.mrb[32].mxu1 %v755_v57  ;;  %v714_v3 = vmax.f32 %v586_v60, 0.0 }
 0x139   :  { %v581_v2 = vadd.f32 %v2375_v44, %v580_v1  ;;  %v712_v5 = vmax.f32 %v578_v62, 0.0 }
 0x13a   :  { %v715_v4 = vmax.f32 %v589_v0, 0.0 }
 0x13b   :  { %v713_v6 = vmax.f32 %v581_v2, 0.0 }
 0x13c   :  { %v757_v7 = vpack.c.bf16 %v715_v4, %v714_v3 }
 0x13d   :  { %v756_v8 = vpack.c.bf16 %v713_v6, %v712_v5  ;;  %v2015_v9 = vpop.f32.mrb[44].mxu0 }
 0x13e   :  { %1874 = vst [vmem:[%s2802_s5 + $0xa8] sm:$0xff] %v757_v7   ;;  %v602_v10 = vadd.f32 %v2015_v9, %v2375_v44  ;;  %v593_v11 = vpop.f32.mrb[45].mxu0 }
 0x13f   :  { %1873 = vst [vmem:[%s2802_s5 + $0xa0] sm:$0xff] %v756_v8   ;;  %v594_v12 = vadd.f32 %v2375_v44, %v593_v11  ;;  %v2016_v13 = vpop.f32.mrb[46].mxu0  ;;  %2089 = vmatprep.mubr.bf16.mxu1 %v756_v8 }
 0x140   :  { %v605_v14 = vadd.f32 %v2016_v13, %v2375_v44  ;;  %v596_v15 = vpop.f32.mrb[47].mxu0  ;;  %2090 = vmatmul.mubr.bf16.gmra.mrb[36].mxu1 %v757_v7  ;;  %v718_v17 = vmax.f32 %v602_v10, 0.0 }
 0x141   :  { %v597_v16 = vadd.f32 %v2375_v44, %v596_v15  ;;  %v716_v19 = vmax.f32 %v594_v12, 0.0 }
 0x142   :  { %v719_v18 = vmax.f32 %v605_v14, 0.0 }
 0x143   :  { %v717_v20 = vmax.f32 %v597_v16, 0.0 }
 0x144   :  { %v759_v21 = vpack.c.bf16 %v719_v18, %v718_v17 }
 0x145   :  { %v758_v22 = vpack.c.bf16 %v717_v20, %v716_v19  ;;  %v2019_v23 = vpop.f32.mrb[48].mxu0 }
 0x146   :  { %1876 = vst [vmem:[%s2802_s5 + $0xb8] sm:$0xff] %v759_v21   ;;  %v618_v24 = vadd.f32 %v2019_v23, %v2375_v44  ;;  %v609_v25 = vpop.f32.mrb[49].mxu0 }
 0x147   :  { %1875 = vst [vmem:[%s2802_s5 + $0xb0] sm:$0xff] %v758_v22   ;;  %v610_v26 = vadd.f32 %v2375_v44, %v609_v25  ;;  %v2020_v27 = vpop.f32.mrb[50].mxu0  ;;  %2093 = vmatprep.mubr.bf16.mxu1 %v758_v22 }
 0x148   :  { %v621_v28 = vadd.f32 %v2020_v27, %v2375_v44  ;;  %v612_v29 = vpop.f32.mrb[51].mxu0  ;;  %2094 = vmatmul.mubr.bf16.gmra.mrb[40].mxu1 %v759_v21  ;;  %v722_v31 = vmax.f32 %v618_v24, 0.0 }
 0x149   :  { %v613_v30 = vadd.f32 %v2375_v44, %v612_v29  ;;  %v720_v33 = vmax.f32 %v610_v26, 0.0 }
 0x14a   :  { %v723_v32 = vmax.f32 %v621_v28, 0.0 }
 0x14b   :  { %v721_v34 = vmax.f32 %v613_v30, 0.0 }
 0x14c   :  { %v761_v35 = vpack.c.bf16 %v723_v32, %v722_v31 }
 0x14d   :  { %v760_v36 = vpack.c.bf16 %v721_v34, %v720_v33  ;;  %v2023_v37 = vpop.f32.mrb[52].mxu0 }
 0x14e   :  { %1878 = vst [vmem:[%s2802_s5 + $0xc8] sm:$0xff] %v761_v35   ;;  %v634_v38 = vadd.f32 %v2023_v37, %v2375_v44  ;;  %v625_v39 = vpop.f32.mrb[53].mxu0 }
 0x14f   :  { %1877 = vst [vmem:[%s2802_s5 + $0xc0] sm:$0xff] %v760_v36   ;;  %v626_v40 = vadd.f32 %v2375_v44, %v625_v39  ;;  %v2024_v41 = vpop.f32.mrb[54].mxu0  ;;  %2097 = vmatprep.mubr.bf16.mxu1 %v760_v36 }
 0x150   :  { %v637_v42 = vadd.f32 %v2024_v41, %v2375_v44  ;;  %v628_v43 = vpop.f32.mrb[55].mxu0  ;;  %2098 = vmatmul.mubr.bf16.gmra.mrb[44].mxu1 %v761_v35  ;;  %v726_v46 = vmax.f32 %v634_v38, 0.0 }
 0x151   :  { %v629_v45 = vadd.f32 %v2375_v44, %v628_v43  ;;  %v724_v48 = vmax.f32 %v626_v40, 0.0 }
 0x152   :  { %v727_v47 = vmax.f32 %v637_v42, 0.0 }
 0x153   :  { %v725_v49 = vmax.f32 %v629_v45, 0.0 }
 0x154   :  { %v763_v50 = vpack.c.bf16 %v727_v47, %v726_v46 }
 0x155   :  { %v762_v51 = vpack.c.bf16 %v725_v49, %v724_v48  ;;  %v2027_v52 = vpop.f32.mrb[56].mxu0 }
 0x156   :  { %1880 = vst [vmem:[%s2802_s5 + $0xd8] sm:$0xff] %v763_v50   ;;  %v650_v53 = vadd.f32 %v2027_v52, %v2375_v44  ;;  %v641_v54 = vpop.f32.mrb[57].mxu0 }
 0x157   :  { %1879 = vst [vmem:[%s2802_s5 + $0xd0] sm:$0xff] %v762_v51   ;;  %v642_v55 = vadd.f32 %v2375_v44, %v641_v54  ;;  %v2028_v56 = vpop.f32.mrb[58].mxu0  ;;  %2101 = vmatprep.mubr.bf16.mxu1 %v762_v51 }
 0x158   :  { %v653_v57 = vadd.f32 %v2028_v56, %v2375_v44  ;;  %v644_v58 = vpop.f32.mrb[59].mxu0  ;;  %2102 = vmatmul.mubr.bf16.gmra.mrb[48].mxu1 %v763_v50  ;;  %v730_v60 = vmax.f32 %v650_v53, 0.0 }
 0x159   :  { %v645_v59 = vadd.f32 %v2375_v44, %v644_v58  ;;  %v728_v62 = vmax.f32 %v642_v55, 0.0 }
 0x15a   :  { %v731_v61 = vmax.f32 %v653_v57, 0.0 }
 0x15b   :  { %v729_v63 = vmax.f32 %v645_v59, 0.0 }
 0x15c   :  { %v765_v0 = vpack.c.bf16 %v731_v61, %v730_v60 }
 0x15d   :  { %v764_v1 = vpack.c.bf16 %v729_v63, %v728_v62  ;;  %v2031_v2 = vpop.f32.mrb[60].mxu0 }
 0x15e   :  { %1882 = vst [vmem:[%s2802_s5 + $0xe8] sm:$0xff] %v765_v0   ;;  %v666_v3 = vadd.f32 %v2031_v2, %v2375_v44  ;;  %v657_v4 = vpop.f32.mrb[61].mxu0 }
 0x15f   :  { %1881 = vst [vmem:[%s2802_s5 + $0xe0] sm:$0xff] %v764_v1   ;;  %v658_v5 = vadd.f32 %v2375_v44, %v657_v4  ;;  %v2032_v6 = vpop.f32.mrb[62].mxu0  ;;  %2105 = vmatprep.mubr.bf16.mxu1 %v764_v1 }
 0x160   :  { %v669_v7 = vadd.f32 %v2032_v6, %v2375_v44  ;;  %v660_v8 = vpop.f32.mrb[63].mxu0  ;;  %2106 = vmatmul.mubr.bf16.gmra.mrb[52].mxu1 %v765_v0  ;;  %v734_v10 = vmax.f32 %v666_v3, 0.0 }
 0x161   :  { %v661_v9 = vadd.f32 %v2375_v44, %v660_v8  ;;  %v732_v12 = vmax.f32 %v658_v5, 0.0  ;;  %v2540_v44 = vld [vmem:[%s2803_s4] ss:$0 sm:$0xff] }
 0x162   :  { %v735_v11 = vmax.f32 %v669_v7, 0.0 }
 0x163   :  { %v733_v13 = vmax.f32 %v661_v9, 0.0 }
 0x164   :  { %v767_v14 = vpack.c.bf16 %v735_v11, %v734_v10 }
 0x165   :  { %v766_v15 = vpack.c.bf16 %v733_v13, %v732_v12 }
 0x166   :  { %1884 = vst [vmem:[%s2802_s5 + $0xf8] sm:$0xff] %v767_v14  }
 0x167   :  { %1883 = vst [vmem:[%s2802_s5 + $0xf0] sm:$0xff] %v766_v15   ;;  %2109 = vmatprep.mubr.bf16.mxu1 %v766_v15 }
 0x168   :  { %2110 = vmatmul.mubr.bf16.gmra.mrb[56].mxu1 %v767_v14 }
 0x1c3   :  { %v2051_v16 = vpop.f32.mrb[64].mxu0 }
 0x1c4   :  { %v1170_v17 = vadd.f32 %v2051_v16, %v2540_v44  ;;  %v1161_v18 = vpop.f32.mrb[65].mxu0 }
 0x1c5   :  { %v1162_v19 = vadd.f32 %v2540_v44, %v1161_v18  ;;  %v2052_v20 = vpop.f32.mrb[66].mxu0 }
 0x1c6   :  { %1418 = vst [vmem:[%s2804_s6 + $0x10] sm:$0xff] %v1170_v17  ;;  %v1173_v21 = vadd.f32 %v2052_v20, %v2540_v44  ;;  %v1164_v22 = vpop.f32.mrb[67].mxu0 }
 0x1c7   :  { %1416 = vst [vmem:[%s2804_s6] sm:$0xff] %v1162_v19  ;;  %v1165_v23 = vadd.f32 %v2540_v44, %v1164_v22 }
 0x1c8   :  { %1419 = vst [vmem:[%s2804_s6 + $0x18] sm:$0xff] %v1173_v21 }
 0x1c9   :  { %1417 = vst [vmem:[%s2804_s6 + $0x8] sm:$0xff] %v1165_v23 }
 0x1cb   :  { %v2055_v24 = vpop.f32.mrb[0].mxu1 }
 0x1cc   :  { %v1186_v25 = vadd.f32 %v2055_v24, %v2540_v44  ;;  %v1177_v26 = vpop.f32.mrb[1].mxu1 }
 0x1cd   :  { %v1178_v27 = vadd.f32 %v2540_v44, %v1177_v26  ;;  %v2056_v28 = vpop.f32.mrb[2].mxu1 }
 0x1ce   :  { %1422 = vst [vmem:[%s2804_s6 + $0x30] sm:$0xff] %v1186_v25  ;;  %v1189_v29 = vadd.f32 %v2056_v28, %v2540_v44  ;;  %v1180_v30 = vpop.f32.mrb[3].mxu1 }
 0x1cf   :  { %1420 = vst [vmem:[%s2804_s6 + $0x20] sm:$0xff] %v1178_v27  ;;  %v1181_v31 = vadd.f32 %v2540_v44, %v1180_v30 }
 0x1d0   :  { %1423 = vst [vmem:[%s2804_s6 + $0x38] sm:$0xff] %v1189_v29 }
 0x1d1   :  { %1421 = vst [vmem:[%s2804_s6 + $0x28] sm:$0xff] %v1181_v31 }
 0x1d3   :  { %v2059_v32 = vpop.f32.mrb[4].mxu1 }
 0x1d4   :  { %v1202_v33 = vadd.f32 %v2059_v32, %v2540_v44  ;;  %v1193_v34 = vpop.f32.mrb[5].mxu1 }
 0x1d5   :  { %v1194_v35 = vadd.f32 %v2540_v44, %v1193_v34  ;;  %v2060_v36 = vpop.f32.mrb[6].mxu1 }
 0x1d6   :  { %1426 = vst [vmem:[%s2804_s6 + $0x50] sm:$0xff] %v1202_v33  ;;  %v1205_v37 = vadd.f32 %v2060_v36, %v2540_v44  ;;  %v1196_v38 = vpop.f32.mrb[7].mxu1 }
 0x1d7   :  { %1424 = vst [vmem:[%s2804_s6 + $0x40] sm:$0xff] %v1194_v35  ;;  %v1197_v39 = vadd.f32 %v2540_v44, %v1196_v38 }
 0x1d8   :  { %1427 = vst [vmem:[%s2804_s6 + $0x58] sm:$0xff] %v1205_v37 }
 0x1d9   :  { %1425 = vst [vmem:[%s2804_s6 + $0x48] sm:$0xff] %v1197_v39 }
 0x1db   :  { %v2063_v40 = vpop.f32.mrb[8].mxu1 }
 0x1dc   :  { %v1218_v41 = vadd.f32 %v2063_v40, %v2540_v44  ;;  %v1209_v42 = vpop.f32.mrb[9].mxu1 }
 0x1dd   :  { %v1210_v43 = vadd.f32 %v2540_v44, %v1209_v42  ;;  %v2064_v45 = vpop.f32.mrb[10].mxu1 }
 0x1de   :  { %1430 = vst [vmem:[%s2804_s6 + $0x70] sm:$0xff] %v1218_v41  ;;  %v1221_v46 = vadd.f32 %v2064_v45, %v2540_v44  ;;  %v1212_v47 = vpop.f32.mrb[11].mxu1 }
 0x1df   :  { %1428 = vst [vmem:[%s2804_s6 + $0x60] sm:$0xff] %v1210_v43  ;;  %v1213_v48 = vadd.f32 %v2540_v44, %v1212_v47 }
 0x1e0   :  { %1431 = vst [vmem:[%s2804_s6 + $0x78] sm:$0xff] %v1221_v46 }
 0x1e1   :  { %1429 = vst [vmem:[%s2804_s6 + $0x68] sm:$0xff] %v1213_v48 }
 0x1e3   :  { %v2067_v49 = vpop.f32.mrb[12].mxu1 }
 0x1e4   :  { %v1234_v50 = vadd.f32 %v2067_v49, %v2540_v44  ;;  %v1225_v51 = vpop.f32.mrb[13].mxu1 }
 0x1e5   :  { %v1226_v52 = vadd.f32 %v2540_v44, %v1225_v51  ;;  %v2068_v53 = vpop.f32.mrb[14].mxu1 }
 0x1e6   :  { %1434 = vst [vmem:[%s2804_s6 + $0x90] sm:$0xff] %v1234_v50  ;;  %v1237_v54 = vadd.f32 %v2068_v53, %v2540_v44  ;;  %v1228_v55 = vpop.f32.mrb[15].mxu1 }
 0x1e7   :  { %1432 = vst [vmem:[%s2804_s6 + $0x80] sm:$0xff] %v1226_v52  ;;  %v1229_v56 = vadd.f32 %v2540_v44, %v1228_v55 }
 0x1e8   :  { %1435 = vst [vmem:[%s2804_s6 + $0x98] sm:$0xff] %v1237_v54 }
 0x1e9   :  { %1433 = vst [vmem:[%s2804_s6 + $0x88] sm:$0xff] %v1229_v56 }
 0x1eb   :  { %v2071_v57 = vpop.f32.mrb[16].mxu1 }
 0x1ec   :  { %v1250_v58 = vadd.f32 %v2071_v57, %v2540_v44  ;;  %v1241_v59 = vpop.f32.mrb[17].mxu1 }
 0x1ed   :  { %v1242_v60 = vadd.f32 %v2540_v44, %v1241_v59  ;;  %v2072_v61 = vpop.f32.mrb[18].mxu1 }
 0x1ee   :  { %1438 = vst [vmem:[%s2804_s6 + $0xb0] sm:$0xff] %v1250_v58  ;;  %v1253_v62 = vadd.f32 %v2072_v61, %v2540_v44  ;;  %v1244_v63 = vpop.f32.mrb[19].mxu1 }
 0x1ef   :  { %1436 = vst [vmem:[%s2804_s6 + $0xa0] sm:$0xff] %v1242_v60  ;;  %v1245_v0 = vadd.f32 %v2540_v44, %v1244_v63 }
 0x1f0   :  { %1439 = vst [vmem:[%s2804_s6 + $0xb8] sm:$0xff] %v1253_v62 }
 0x1f1   :  { %1437 = vst [vmem:[%s2804_s6 + $0xa8] sm:$0xff] %v1245_v0 }
 0x1f3   :  { %v2075_v1 = vpop.f32.mrb[20].mxu1 }
 0x1f4   :  { %v1266_v2 = vadd.f32 %v2075_v1, %v2540_v44  ;;  %v1257_v3 = vpop.f32.mrb[21].mxu1 }
 0x1f5   :  { %v1258_v4 = vadd.f32 %v2540_v44, %v1257_v3  ;;  %v2076_v5 = vpop.f32.mrb[22].mxu1 }
 0x1f6   :  { %1442 = vst [vmem:[%s2804_s6 + $0xd0] sm:$0xff] %v1266_v2  ;;  %v1269_v6 = vadd.f32 %v2076_v5, %v2540_v44  ;;  %v1260_v7 = vpop.f32.mrb[23].mxu1 }
 0x1f7   :  { %1440 = vst [vmem:[%s2804_s6 + $0xc0] sm:$0xff] %v1258_v4  ;;  %v1261_v8 = vadd.f32 %v2540_v44, %v1260_v7 }
 0x1f8   :  { %1443 = vst [vmem:[%s2804_s6 + $0xd8] sm:$0xff] %v1269_v6 }
 0x1f9   :  { %1441 = vst [vmem:[%s2804_s6 + $0xc8] sm:$0xff] %v1261_v8 }
 0x1fb   :  { %v2079_v9 = vpop.f32.mrb[24].mxu1 }
 0x1fc   :  { %v1282_v10 = vadd.f32 %v2079_v9, %v2540_v44  ;;  %v1273_v11 = vpop.f32.mrb[25].mxu1 }
 0x1fd   :  { %v1274_v12 = vadd.f32 %v2540_v44, %v1273_v11  ;;  %v2080_v13 = vpop.f32.mrb[26].mxu1 }
 0x1fe   :  { %1446 = vst [vmem:[%s2804_s6 + $0xf0] sm:$0xff] %v1282_v10  ;;  %v1285_v14 = vadd.f32 %v2080_v13, %v2540_v44  ;;  %v1276_v15 = vpop.f32.mrb[27].mxu1 }
 0x1ff   :  { %1444 = vst [vmem:[%s2804_s6 + $0xe0] sm:$0xff] %v1274_v12  ;;  %v1277_v16 = vadd.f32 %v2540_v44, %v1276_v15 }
 0x200   :  { %1447 = vst [vmem:[%s2804_s6 + $0xf8] sm:$0xff] %v1285_v14 }
 0x201   :  { %1445 = vst [vmem:[%s2804_s6 + $0xe8] sm:$0xff] %v1277_v16 }
 0x203   :  { %v2083_v17 = vpop.f32.mrb[28].mxu1 }
 0x204   :  { %v1298_v18 = vadd.f32 %v2083_v17, %v2540_v44  ;;  %v1289_v19 = vpop.f32.mrb[29].mxu1 }
 0x205   :  { %v1290_v20 = vadd.f32 %v2540_v44, %v1289_v19  ;;  %v2084_v21 = vpop.f32.mrb[30].mxu1 }
 0x206   :  { %1450 = vst [vmem:[%s2804_s6 + $0x110] sm:$0xff] %v1298_v18  ;;  %v1301_v22 = vadd.f32 %v2084_v21, %v2540_v44  ;;  %v1292_v23 = vpop.f32.mrb[31].mxu1 }
 0x207   :  { %1448 = vst [vmem:[%s2804_s6 + $0x100] sm:$0xff] %v1290_v20  ;;  %v1293_v24 = vadd.f32 %v2540_v44, %v1292_v23 }
 0x208   :  { %1451 = vst [vmem:[%s2804_s6 + $0x118] sm:$0xff] %v1301_v22 }
 0x209   :  { %1449 = vst [vmem:[%s2804_s6 + $0x108] sm:$0xff] %v1293_v24 }
 0x20b   :  { %v2087_v25 = vpop.f32.mrb[32].mxu1 }
 0x20c   :  { %v1314_v26 = vadd.f32 %v2087_v25, %v2540_v44  ;;  %v1305_v27 = vpop.f32.mrb[33].mxu1 }
 0x20d   :  { %v1306_v28 = vadd.f32 %v2540_v44, %v1305_v27  ;;  %v2088_v29 = vpop.f32.mrb[34].mxu1 }
 0x20e   :  { %1454 = vst [vmem:[%s2804_s6 + $0x130] sm:$0xff] %v1314_v26  ;;  %v1317_v30 = vadd.f32 %v2088_v29, %v2540_v44  ;;  %v1308_v31 = vpop.f32.mrb[35].mxu1 }
 0x20f   :  { %1452 = vst [vmem:[%s2804_s6 + $0x120] sm:$0xff] %v1306_v28  ;;  %v1309_v32 = vadd.f32 %v2540_v44, %v1308_v31 }
 0x210   :  { %1455 = vst [vmem:[%s2804_s6 + $0x138] sm:$0xff] %v1317_v30 }
 0x211   :  { %1453 = vst [vmem:[%s2804_s6 + $0x128] sm:$0xff] %v1309_v32 }
 0x213   :  { %v2091_v33 = vpop.f32.mrb[36].mxu1 }
 0x214   :  { %v1330_v34 = vadd.f32 %v2091_v33, %v2540_v44  ;;  %v1321_v35 = vpop.f32.mrb[37].mxu1 }
 0x215   :  { %v1322_v36 = vadd.f32 %v2540_v44, %v1321_v35  ;;  %v2092_v37 = vpop.f32.mrb[38].mxu1 }
 0x216   :  { %1458 = vst [vmem:[%s2804_s6 + $0x150] sm:$0xff] %v1330_v34  ;;  %v1333_v38 = vadd.f32 %v2092_v37, %v2540_v44  ;;  %v1324_v39 = vpop.f32.mrb[39].mxu1 }
 0x217   :  { %1456 = vst [vmem:[%s2804_s6 + $0x140] sm:$0xff] %v1322_v36  ;;  %v1325_v40 = vadd.f32 %v2540_v44, %v1324_v39 }
 0x218   :  { %1459 = vst [vmem:[%s2804_s6 + $0x158] sm:$0xff] %v1333_v38 }
 0x219   :  { %1457 = vst [vmem:[%s2804_s6 + $0x148] sm:$0xff] %v1325_v40 }
 0x21b   :  { %v2095_v41 = vpop.f32.mrb[40].mxu1 }
 0x21c   :  { %v1346_v42 = vadd.f32 %v2095_v41, %v2540_v44  ;;  %v1337_v43 = vpop.f32.mrb[41].mxu1 }
 0x21d   :  { %v1338_v45 = vadd.f32 %v2540_v44, %v1337_v43  ;;  %v2096_v46 = vpop.f32.mrb[42].mxu1 }
 0x21e   :  { %1462 = vst [vmem:[%s2804_s6 + $0x170] sm:$0xff] %v1346_v42  ;;  %v1349_v47 = vadd.f32 %v2096_v46, %v2540_v44  ;;  %v1340_v48 = vpop.f32.mrb[43].mxu1 }
 0x21f   :  { %1460 = vst [vmem:[%s2804_s6 + $0x160] sm:$0xff] %v1338_v45  ;;  %v1341_v49 = vadd.f32 %v2540_v44, %v1340_v48 }
 0x220   :  { %1463 = vst [vmem:[%s2804_s6 + $0x178] sm:$0xff] %v1349_v47 }
 0x221   :  { %1461 = vst [vmem:[%s2804_s6 + $0x168] sm:$0xff] %v1341_v49 }
 0x223   :  { %v2099_v50 = vpop.f32.mrb[44].mxu1 }
 0x224   :  { %v1362_v51 = vadd.f32 %v2099_v50, %v2540_v44  ;;  %v1353_v52 = vpop.f32.mrb[45].mxu1 }
 0x225   :  { %v1354_v53 = vadd.f32 %v2540_v44, %v1353_v52  ;;  %v2100_v54 = vpop.f32.mrb[46].mxu1 }
 0x226   :  { %1466 = vst [vmem:[%s2804_s6 + $0x190] sm:$0xff] %v1362_v51  ;;  %v1365_v55 = vadd.f32 %v2100_v54, %v2540_v44  ;;  %v1356_v56 = vpop.f32.mrb[47].mxu1 }
 0x227   :  { %1464 = vst [vmem:[%s2804_s6 + $0x180] sm:$0xff] %v1354_v53  ;;  %v1357_v57 = vadd.f32 %v2540_v44, %v1356_v56 }
 0x228   :  { %1467 = vst [vmem:[%s2804_s6 + $0x198] sm:$0xff] %v1365_v55 }
 0x229   :  { %1465 = vst [vmem:[%s2804_s6 + $0x188] sm:$0xff] %v1357_v57 }
 0x22b   :  { %v2103_v58 = vpop.f32.mrb[48].mxu1 }
 0x22c   :  { %v1378_v59 = vadd.f32 %v2103_v58, %v2540_v44  ;;  %v1369_v60 = vpop.f32.mrb[49].mxu1 }
 0x22d   :  { %v1370_v61 = vadd.f32 %v2540_v44, %v1369_v60  ;;  %v2104_v62 = vpop.f32.mrb[50].mxu1 }
 0x22e   :  { %1470 = vst [vmem:[%s2804_s6 + $0x1b0] sm:$0xff] %v1378_v59  ;;  %v1381_v63 = vadd.f32 %v2104_v62, %v2540_v44  ;;  %v1372_v0 = vpop.f32.mrb[51].mxu1 }
 0x22f   :  { %1468 = vst [vmem:[%s2804_s6 + $0x1a0] sm:$0xff] %v1370_v61  ;;  %v1373_v1 = vadd.f32 %v2540_v44, %v1372_v0 }
 0x230   :  { %1471 = vst [vmem:[%s2804_s6 + $0x1b8] sm:$0xff] %v1381_v63 }
 0x231   :  { %1469 = vst [vmem:[%s2804_s6 + $0x1a8] sm:$0xff] %v1373_v1 }
 0x233   :  { %v2107_v2 = vpop.f32.mrb[52].mxu1 }
 0x234   :  { %v1394_v3 = vadd.f32 %v2107_v2, %v2540_v44  ;;  %v1385_v4 = vpop.f32.mrb[53].mxu1 }
 0x235   :  { %v1386_v5 = vadd.f32 %v2540_v44, %v1385_v4  ;;  %v2108_v6 = vpop.f32.mrb[54].mxu1 }
 0x236   :  { %1474 = vst [vmem:[%s2804_s6 + $0x1d0] sm:$0xff] %v1394_v3  ;;  %v1397_v7 = vadd.f32 %v2108_v6, %v2540_v44  ;;  %v1388_v8 = vpop.f32.mrb[55].mxu1 }
 0x237   :  { %1472 = vst [vmem:[%s2804_s6 + $0x1c0] sm:$0xff] %v1386_v5  ;;  %v1389_v9 = vadd.f32 %v2540_v44, %v1388_v8 }
 0x238   :  { %1475 = vst [vmem:[%s2804_s6 + $0x1d8] sm:$0xff] %v1397_v7 }
 0x239   :  { %1473 = vst [vmem:[%s2804_s6 + $0x1c8] sm:$0xff] %v1389_v9 }
 0x23b   :  { %v2111_v10 = vpop.f32.mrb[56].mxu1 }
 0x23c   :  { %v1410_v11 = vadd.f32 %v2111_v10, %v2540_v44  ;;  %v1401_v12 = vpop.f32.mrb[57].mxu1 }
 0x23d   :  { %v1402_v13 = vadd.f32 %v2540_v44, %v1401_v12  ;;  %v2112_v14 = vpop.f32.mrb[58].mxu1 }
 0x23e   :  { %1478 = vst [vmem:[%s2804_s6 + $0x1f0] sm:$0xff] %v1410_v11  ;;  %v1413_v15 = vadd.f32 %v2112_v14, %v2540_v44  ;;  %v1404_v16 = vpop.f32.mrb[59].mxu1 }
 0x23f   :  { %1476 = vst [vmem:[%s2804_s6 + $0x1e0] sm:$0xff] %v1402_v13  ;;  %v1405_v17 = vadd.f32 %v2540_v44, %v1404_v16 }
 0x240   :  { %1479 = vst [vmem:[%s2804_s6 + $0x1f8] sm:$0xff] %v1413_v15 }
 0x241   :  { %1477 = vst [vmem:[%s2804_s6 + $0x1e8] sm:$0xff] %v1405_v17 }

// kernel: rcnn_tail_forward.8
= control target key start
LH: loop header
LB: loop body
LE: loop exit
PB: predicated region body
PF: predicated region fallthrough
CT: control target
= control target key end

     0   :  { %s3643_s1 = inlined_call_operand.vmem [shape: bf16[1152,128], index: 1, kind: input, shape index: {}]   ;;  %s3644_s0 = inlined_call_operand.vmem [shape: f32[2,10,10,128], index: 0, kind: input, shape index: {}]   ;;  %s3645_s3 = inlined_call_operand.vmem [shape: bf16[128,128], index: 3, kind: input, shape index: {}]   ;;  %s3646_s2 = inlined_call_operand.vmem [shape: f32[1,128], index: 2, kind: input, shape index: {}]   ;;  %s3647_s4 = inlined_call_operand.vmem [shape: f32[1,128], index: 4, kind: input, shape index: {}]   ;;  %s3648_s5 = inlined_call_operand.vmem [shape: f32[128,128], index: 5, kind: output, shape index: {}]  }
   0x1   :  { %v2821_v0 = vld [vmem:[%s3643_s1 + $0x40] sm:$0xff]   ;;  %v2823_v2 = vld [vmem:[%s3643_s1 + $0x48] sm:$0xff]   ;;  %v2825_v4 = vld [vmem:[%s3643_s1 + $0x50] sm:$0xff]  }
   0x2   :  { %v2822_v1 = vld [vmem:[%s3643_s1 + $0x100] sm:$0xff]   ;;  %2373 = vmatprep.subr.bf16.mxu1 %v2821_v0  ;;  %v2824_v3 = vld [vmem:[%s3643_s1 + $0x108] sm:$0xff]   ;;  %v2826_v5 = vld [vmem:[%s3643_s1 + $0x110] sm:$0xff]  }
   0x3   :  { %2501 = vmatprep.subr.bf16.mxu0 %v2822_v1  ;;  %2374 = vmatpush3.bf16.msra.mxu1 %v2821_v0  ;;  %v2827_v6 = vld [vmem:[%s3643_s1 + $0x58] sm:$0xff]   ;;  %v2829_v8 = vld [vmem:[%s3643_s1 + $0x60] sm:$0xff]   ;;  %v2831_v10 = vld [vmem:[%s3643_s1 + $0x68] sm:$0xff]  }
   0x4   :  { %2502 = vmatpush3.bf16.msra.mxu0 %v2822_v1  ;;  %2375 = vmatprep.subr.bf16.mxu1 %v2823_v2  ;;  %v2828_v7 = vld [vmem:[%s3643_s1 + $0x118] sm:$0xff]   ;;  %v2830_v9 = vld [vmem:[%s3643_s1 + $0x120] sm:$0xff]   ;;  %v2832_v14 = vld [vmem:[%s3643_s1 + $0x128] sm:$0xff]  }
   0x5   :  { %2503 = vmatprep.subr.bf16.mxu0 %v2824_v3  ;;  %v61_v11 = vld [vmem:[%s3644_s0 + $0x1] sm:$0xff]  ;;  %v62_v12 = vld [vmem:[%s3644_s0 + $0x11] sm:$0xff] }
   0x6   :  { %v2084_v13 = vld [vmem:[%s3644_s0 + $0x21] sm:$0xff]  ;;  %v77_v15 = vpack.c.bf16 %v62_v12, %v61_v11  ;;  %v2833_v17 = vld [vmem:[%s3643_s1 + $0x70] sm:$0xff]   ;;  %v2835_v19 = vld [vmem:[%s3643_s1 + $0x78] sm:$0xff]  }
   0x7   :  { %2376 = vmatpush3.bf16.msra.mxu1 %v2823_v2  ;;  %v810_v16 = vpack.c.bf16 %v2084_v13, %v62_v12  ;;  %v2834_v18 = vld [vmem:[%s3643_s1 + $0x130] sm:$0xff]   ;;  %v2836_v20 = vld [vmem:[%s3643_s1 + $0x138] sm:$0xff]   ;;  %v2837_v22 = vld [vmem:[%s3643_s1] sm:$0xff]  }
   0x8   :  { %2504 = vmatpush3.bf16.msra.mxu0 %v2824_v3  ;;  %2377 = vmatprep.subr.bf16.mxu1 %v2825_v4  ;;  %v64_v21 = vld [vmem:[%s3644_s0 + $0x31] sm:$0xff]  ;;  %v2086_v23 = vld [vmem:[%s3644_s0 + $0x41] sm:$0xff] }
   0x9   :  { %2505 = vmatprep.subr.bf16.mxu0 %v2826_v5  ;;  %2389 = vmatprep.mubr.bf16.mxu1 %v77_v15  ;;  %v2838_v24 = vld [vmem:[%s3643_s1 + $0x140] sm:$0xff]   ;;  %v3000_v25 = vpack.c.bf16 %v64_v21, %v2084_v13  ;;  %v66_v26 = vld [vmem:[%s3644_s0 + $0x51] sm:$0xff]  ;;  %v811_v27 = vpack.c.bf16 %v2086_v23, %v64_v21  ;;  %v2839_v29 = vld [vmem:[%s3643_s1 + $0x8] sm:$0xff]  }
   0xa   :  { %2517 = vmatprep.mubr.bf16.mxu0 %v810_v16  ;;  %v2088_v28 = vld [vmem:[%s3644_s0 + $0x61] sm:$0xff]  ;;  %v3014_v31 = vpack.c.bf16 %v66_v26, %v2086_v23  ;;  %v68_v33 = vld [vmem:[%s3644_s0 + $0x71] sm:$0xff] }
   0xb   :  { %2378 = vmatpush3.bf16.msra.mxu1 %v2825_v4  ;;  %v2840_v30 = vld [vmem:[%s3643_s1 + $0x148] sm:$0xff]   ;;  %v812_v32 = vpack.c.bf16 %v2088_v28, %v66_v26  ;;  %v2841_v34 = vld [vmem:[%s3643_s1 + $0x10] sm:$0xff]   ;;  %v3032_v37 = vpack.c.bf16 %v68_v33, %v2088_v28  ;;  %v2843_v42 = vld [vmem:[%s3643_s1 + $0x18] sm:$0xff]  }
   0xc   :  { %2506 = vmatpush3.bf16.msra.mxu0 %v2826_v5  ;;  %2379 = vmatprep.subr.bf16.mxu1 %v2827_v6  ;;  %v3026_v35 = vld [vmem:[%s3644_s0 + $0x81] sm:$0xff]  ;;  %v2842_v36 = vld [vmem:[%s3643_s1 + $0x150] sm:$0xff]   ;;  %v2844_v43 = vld [vmem:[%s3643_s1 + $0x158] sm:$0xff]  }
   0xd   :  { %2507 = vmatprep.subr.bf16.mxu0 %v2828_v7  ;;  %v69_v38 = vld [vmem:[%s3644_s0 + $0xa1] sm:$0xff]  ;;  %v70_v39 = vld [vmem:[%s3644_s0 + $0xb1] sm:$0xff]  ;;  %v813_v40 = vpack.c.bf16 %v3026_v35, %v68_v33 }
   0xe   :  { %v2092_v41 = vld [vmem:[%s3644_s0 + $0xc1] sm:$0xff]  ;;  %v81_v44 = vpack.c.bf16 %v70_v39, %v69_v38  ;;  %v72_v46 = vld [vmem:[%s3644_s0 + $0xd1] sm:$0xff] }
   0xf   :  { %2380 = vmatpush3.bf16.msra.mxu1 %v2827_v6  ;;  %v814_v45 = vpack.c.bf16 %v2092_v41, %v70_v39  ;;  %v2845_v47 = vld [vmem:[%s3643_s1 + $0x20] sm:$0xff]   ;;  %v3063_v50 = vpack.c.bf16 %v72_v46, %v2092_v41  ;;  %v74_v51 = vld [vmem:[%s3644_s0 + $0xf1] sm:$0xff]  ;;  %v2847_v54 = vld [vmem:[%s3643_s1 + $0x28] sm:$0xff]  }
  0x10   :  { %2508 = vmatpush3.bf16.msra.mxu0 %v2828_v7  ;;  %2381 = vmatprep.subr.bf16.mxu1 %v2829_v8  ;;  %v2094_v48 = vld [vmem:[%s3644_s0 + $0xe1] sm:$0xff]  ;;  %v76_v58 = vld [vmem:[%s3644_s0 + $0x111] sm:$0xff] }
  0x11   :  { %2509 = vmatprep.subr.bf16.mxu0 %v2830_v9  ;;  %v2846_v49 = vld [vmem:[%s3643_s1 + $0x160] sm:$0xff]   ;;  %v815_v52 = vpack.c.bf16 %v2094_v48, %v72_v46  ;;  %v2848_v55 = vld [vmem:[%s3643_s1 + $0x168] sm:$0xff]   ;;  %v3077_v56 = vpack.c.bf16 %v74_v51, %v2094_v48  ;;  %v2849_v59 = vld [vmem:[%s3643_s1 + $0x30] sm:$0xff]  }
  0x12   :  { %v2096_v53 = vld [vmem:[%s3644_s0 + $0x101] sm:$0xff]  ;;  %v2850_v61 = vld [vmem:[%s3643_s1 + $0x170] sm:$0xff]   ;;  %v2851_v4 = vld [vmem:[%s3643_s1 + $0x38] sm:$0xff]  }
  0x13   :  { %2382 = vmatpush3.bf16.msra.mxu1 %v2829_v8  ;;  %v816_v57 = vpack.c.bf16 %v2096_v53, %v74_v51  ;;  %v3089_v60 = vld [vmem:[%s3644_s0 + $0x121] sm:$0xff]  ;;  %v3095_v62 = vpack.c.bf16 %v76_v58, %v2096_v53  ;;  %v3103_v0 = vld [vmem:[%s3644_s0 + $0x10] sm:$0xff]  ;;  %v2852_v5 = vld [vmem:[%s3643_s1 + $0x178] sm:$0xff]  }
  0x14   :  { %2510 = vmatpush3.bf16.msra.mxu0 %v2830_v9  ;;  %2383 = vmatprep.subr.bf16.mxu1 %v2831_v10  ;;  %v21_v63 = vld [vmem:[%s3644_s0] sm:$0xff]  ;;  %v3108_v1 = vld [vmem:[%s3644_s0 + $0x12] sm:$0xff]  ;;  %v817_v2 = vpack.c.bf16 %v3089_v60, %v76_v58  ;;  %v2856_v21 = vld [vmem:[%s3643_s1 + $0x188] sm:$0xff]  }
  0x15   :  { %2511 = vmatprep.subr.bf16.mxu0 %v2832_v14  ;;  %v3114_v3 = vld [vmem:[%s3644_s0 + $0x22] sm:$0xff]  ;;  %v37_v6 = vpack.c.bf16 %v3103_v0, %v21_v63  ;;  %v3134_v9 = vld [vmem:[%s3644_s0 + $0x30] sm:$0xff]  ;;  %v2860_v41 = vld [vmem:[%s3643_s1 + $0x198] sm:$0xff]  }
  0x16   :  { %v1011_v7 = vpack.c.bf16 %v3114_v3, %v3108_v1  ;;  %v3129_v8 = vld [vmem:[%s3644_s0 + $0x20] sm:$0xff]  ;;  %v3142_v11 = vld [vmem:[%s3644_s0 + $0x32] sm:$0xff]  ;;  %v2863_v53 = vld [vmem:[%s3643_s1 + $0xa8] sm:$0xff]  }
  0x17   :  { %2384 = vmatpush3.bf16.msra.mxu1 %v2831_v10  ;;  %v2853_v10 = vld [vmem:[%s3643_s1 + $0x80] sm:$0xff]   ;;  %v3160_v15 = vld [vmem:[%s3644_s0 + $0x50] sm:$0xff]  ;;  %v3164_v16 = vpack.c.bf16 %v3134_v9, %v3129_v8 }
  0x18   :  { %2512 = vmatpush3.bf16.msra.mxu0 %v2832_v14  ;;  %2385 = vmatprep.subr.bf16.mxu1 %v2833_v17  ;;  %v3147_v12 = vld [vmem:[%s3644_s0 + $0x42] sm:$0xff]  ;;  %v3207_v28 = vld [vmem:[%s3644_s0 + $0x72] sm:$0xff] }
  0x19   :  { %2513 = vmatprep.subr.bf16.mxu0 %v2834_v18  ;;  %v2854_v13 = vld [vmem:[%s3643_s1 + $0x180] sm:$0xff]   ;;  %v3236_v38 = vld [vmem:[%s3644_s0 + $0xb2] sm:$0xff] }
  0x1a   :  { %v3155_v14 = vld [vmem:[%s3644_s0 + $0x40] sm:$0xff] }
  0x1b   :  { %2386 = vmatpush3.bf16.msra.mxu1 %v2833_v17  ;;  %v3169_v17 = vld [vmem:[%s3644_s0 + $0x52] sm:$0xff]  ;;  %v3191_v23 = vld [vmem:[%s3644_s0 + $0x60] sm:$0xff] }
  0x1c   :  { %2514 = vmatpush3.bf16.msra.mxu0 %v2834_v18  ;;  %2387 = vmatprep.subr.bf16.mxu1 %v2835_v19  ;;  %v1012_v18 = vpack.c.bf16 %v3147_v12, %v3142_v11  ;;  %v2861_v46 = vld [vmem:[%s3643_s1 + $0xa0] sm:$0xff]  }
  0x1d   :  { %2515 = vmatprep.subr.bf16.mxu0 %v2836_v20  ;;  %v3273_v48 = vld [vmem:[%s3644_s0 + $0xe2] sm:$0xff] }
  0x1e   :  { %v3281_v51 = vld [vmem:[%s3644_s0 + $0xe0] sm:$0xff] }
  0x1f   :  { %2388 = vmatpush3.bf16.msra.mxu1 %v2835_v19  ;;  %v3176_v19 = vld [vmem:[%s3644_s0 + $0x62] sm:$0xff] }
  0x20   :  { %2516 = vmatpush3.bf16.msra.mxu0 %v2836_v20  ;;  %2405 = vmatprep.subr.bf16.mxu1 %v2837_v22  ;;  %v2855_v20 = vld [vmem:[%s3643_s1 + $0x88] sm:$0xff]   ;;  %v1013_v26 = vpack.c.bf16 %v3176_v19, %v3169_v17  ;;  %v3317_v63 = vld [vmem:[%s3644_s0 + $0x100] sm:$0xff] }
  0x21   :  { %2533 = vmatprep.subr.bf16.mxu0 %v2838_v24  ;;  %v3305_v58 = vld [vmem:[%s3644_s0 + $0x102] sm:$0xff] }
  0x22   :  { %2390 = vmatmul.mubr.bf16.vlgmr.msra.gmra.mrb[0].mxu1 %v3000_v25 }
  0x23   :  { %2518 = vmatmul.mubr.bf16.vlgmr.msra.gmra.mrb[0].mxu0 %v811_v27  ;;  %2406 = vmatpush3.bf16.msra.mxu1 %v2837_v22  ;;  %v3186_v22 = vpack.c.bf16 %v3160_v15, %v3155_v14  ;;  %v2857_v27 = vld [vmem:[%s3643_s1 + $0x90] sm:$0xff]  }
  0x24   :  { %2534 = vmatpush3.bf16.msra.mxu0 %v2838_v24  ;;  %2407 = vmatprep.subr.bf16.mxu1 %v2839_v29  ;;  %v3196_v24 = vld [vmem:[%s3644_s0 + $0x70] sm:$0xff] }
  0x25   :  { %2535 = vmatprep.subr.bf16.mxu0 %v2840_v30  ;;  %2393 = vmatprep.mubr.bf16.mxu1 %v3014_v31  ;;  %v3223_v33 = vpack.c.bf16 %v3196_v24, %v3191_v23 }
  0x26   :  { %2521 = vmatprep.mubr.bf16.mxu0 %v812_v32  ;;  %v29_v32 = vld [vmem:[%s3644_s0 + $0xa0] sm:$0xff] }
  0x27   :  { %2408 = vmatpush3.bf16.msra.mxu1 %v2839_v29  ;;  %v3212_v29 = vld [vmem:[%s3644_s0 + $0x82] sm:$0xff] }
  0x28   :  { %2536 = vmatpush3.bf16.msra.mxu0 %v2840_v30  ;;  %2409 = vmatprep.subr.bf16.mxu1 %v2841_v34  ;;  %v2858_v30 = vld [vmem:[%s3643_s1 + $0x190] sm:$0xff]   ;;  %v1014_v39 = vpack.c.bf16 %v3212_v29, %v3207_v28 }
  0x29   :  { %2537 = vmatprep.subr.bf16.mxu0 %v2842_v36 }
  0x2a   :  { %2394 = vmatmul.mubr.bf16.gmra.mrb[4].mxu1 %v3032_v37 }
  0x2b   :  { %2522 = vmatmul.mubr.bf16.gmra.mrb[4].mxu0 %v813_v40  ;;  %2410 = vmatpush3.bf16.msra.mxu1 %v2841_v34  ;;  %v2859_v34 = vld [vmem:[%s3643_s1 + $0x98] sm:$0xff]   ;;  %v3243_v40 = vld [vmem:[%s3644_s0 + $0xc2] sm:$0xff] }
  0x2c   :  { %2538 = vmatpush3.bf16.msra.mxu0 %v2842_v36  ;;  %2411 = vmatprep.subr.bf16.mxu1 %v2843_v42  ;;  %v3231_v36 = vld [vmem:[%s3644_s0 + $0xb0] sm:$0xff] }
  0x2d   :  { %2539 = vmatprep.subr.bf16.mxu0 %v2844_v43  ;;  %2397 = vmatprep.mubr.bf16.mxu1 %v81_v44  ;;  %v3257_v44 = vld [vmem:[%s3644_s0 + $0xd0] sm:$0xff] }
  0x2e   :  { %2525 = vmatprep.mubr.bf16.mxu0 %v814_v45  ;;  %v1015_v45 = vpack.c.bf16 %v3243_v40, %v3236_v38 }
  0x2f   :  { %2412 = vmatpush3.bf16.msra.mxu1 %v2843_v42  ;;  %v41_v42 = vpack.c.bf16 %v3231_v36, %v29_v32  ;;  %v2870_v32 = vld [vmem:[%s3643_s1 + $0x1c0] sm:$0xff]  }
  0x30   :  { %2540 = vmatpush3.bf16.msra.mxu0 %v2844_v43  ;;  %2413 = vmatprep.subr.bf16.mxu1 %v2845_v47  ;;  %v3252_v43 = vld [vmem:[%s3644_s0 + $0xc0] sm:$0xff] }
  0x31   :  { %2541 = vmatprep.subr.bf16.mxu0 %v2846_v49 }
  0x32   :  { %2398 = vmatmul.mubr.bf16.gmra.mrb[8].mxu1 %v3063_v50 }
  0x33   :  { %2526 = vmatmul.mubr.bf16.gmra.mrb[8].mxu0 %v815_v52  ;;  %2414 = vmatpush3.bf16.msra.mxu1 %v2845_v47  ;;  %v3268_v47 = vld [vmem:[%s3644_s0 + $0xd2] sm:$0xff]  ;;  %v3285_v52 = vpack.c.bf16 %v3257_v44, %v3252_v43 }
  0x34   :  { %2542 = vmatpush3.bf16.msra.mxu0 %v2846_v49  ;;  %2415 = vmatprep.subr.bf16.mxu1 %v2847_v54  ;;  %v2862_v49 = vld [vmem:[%s3643_s1 + $0x1a0] sm:$0xff]  }
  0x35   :  { %2543 = vmatprep.subr.bf16.mxu0 %v2848_v55  ;;  %2401 = vmatprep.mubr.bf16.mxu1 %v3077_v56 }
  0x36   :  { %2529 = vmatprep.mubr.bf16.mxu0 %v816_v57  ;;  %v3300_v57 = vld [vmem:[%s3644_s0 + $0xf2] sm:$0xff] }
  0x37   :  { %2416 = vmatpush3.bf16.msra.mxu1 %v2847_v54  ;;  %v3293_v54 = vld [vmem:[%s3644_s0 + $0xf0] sm:$0xff] }
  0x38   :  { %2544 = vmatpush3.bf16.msra.mxu0 %v2848_v55  ;;  %2417 = vmatprep.subr.bf16.mxu1 %v2849_v59  ;;  %v1016_v55 = vpack.c.bf16 %v3273_v48, %v3268_v47 }
  0x39   :  { %2545 = vmatprep.subr.bf16.mxu0 %v2850_v61 }
  0x3a   :  { %2402 = vmatmul.mubr.bf16.gmra.mrb[12].mxu1 %v3095_v62 }
  0x3b   :  { %2530 = vmatmul.mubr.bf16.gmra.mrb[12].mxu0 %v817_v2  ;;  %2418 = vmatpush3.bf16.msra.mxu1 %v2849_v59  ;;  %v2864_v59 = vld [vmem:[%s3643_s1 + $0x1a8] sm:$0xff]   ;;  %v1017_v2 = vpack.c.bf16 %v3305_v58, %v3300_v57 }
  0x3c   :  { %2546 = vmatpush3.bf16.msra.mxu0 %v2850_v61  ;;  %2419 = vmatprep.subr.bf16.mxu1 %v2851_v4  ;;  %v3312_v61 = vpack.c.bf16 %v3293_v54, %v3281_v51 }
  0x3d   :  { %2547 = vmatprep.subr.bf16.mxu0 %v2852_v5  ;;  %2421 = vmatprep.mubr.bf16.mxu1 %v37_v6  ;;  %v3333_v6 = vld [vmem:[%s3644_s0 + $0x112] sm:$0xff] }
  0x3e   :  { %2549 = vmatprep.mubr.bf16.mxu0 %v1011_v7  ;;  %v3338_v7 = vld [vmem:[%s3644_s0 + $0x122] sm:$0xff] }
  0x3f   :  { %2420 = vmatpush3.bf16.msra.mxu1 %v2851_v4  ;;  %v3325_v4 = vld [vmem:[%s3644_s0 + $0x110] sm:$0xff] }
  0x40   :  { %2548 = vmatpush3.bf16.msra.mxu0 %v2852_v5  ;;  %2437 = vmatprep.subr.bf16.mxu1 %v2853_v10  ;;  %v2865_v5 = vld [vmem:[%s3643_s1 + $0xb0] sm:$0xff]  }
  0x41   :  { %2565 = vmatprep.subr.bf16.mxu0 %v2854_v13 }
  0x42   :  { %2422 = vmatmul.mubr.bf16.vlgmr.msra.gmra.mrb[0].mxu1 %v3164_v16 }
  0x43   :  { %2550 = vmatmul.mubr.bf16.vlgmr.msra.gmra.mrb[0].mxu0 %v1012_v18  ;;  %2438 = vmatpush3.bf16.msra.mxu1 %v2853_v10  ;;  %v2866_v10 = vld [vmem:[%s3643_s1 + $0x1b0] sm:$0xff]   ;;  %v391_v18 = vld [vmem:[%s3644_s0 + $0x2] sm:$0xff] }
  0x44   :  { %2566 = vmatpush3.bf16.msra.mxu0 %v2854_v13  ;;  %2439 = vmatprep.subr.bf16.mxu1 %v2855_v20  ;;  %v3346_v13 = vpack.c.bf16 %v3325_v4, %v3317_v63 }
  0x45   :  { %2567 = vmatprep.subr.bf16.mxu0 %v2856_v21  ;;  %2425 = vmatprep.mubr.bf16.mxu1 %v3186_v22 }
  0x46   :  { %2553 = vmatprep.mubr.bf16.mxu0 %v1013_v26  ;;  %v2868_v26 = vld [vmem:[%s3643_s1 + $0x1b8] sm:$0xff]  }
  0x47   :  { %2440 = vmatpush3.bf16.msra.mxu1 %v2855_v20  ;;  %v1018_v20 = vpack.c.bf16 %v3338_v7, %v3333_v6 }
  0x48   :  { %2568 = vmatpush3.bf16.msra.mxu0 %v2856_v21  ;;  %2441 = vmatprep.subr.bf16.mxu1 %v2857_v27  ;;  %v2867_v21 = vld [vmem:[%s3643_s1 + $0xb8] sm:$0xff]  }
  0x49   :  { %2569 = vmatprep.subr.bf16.mxu0 %v2858_v30 }
  0x4a   :  { %2426 = vmatmul.mubr.bf16.gmra.mrb[4].mxu1 %v3223_v33 }
  0x4b   :  { %2554 = vmatmul.mubr.bf16.gmra.mrb[4].mxu0 %v1014_v39  ;;  %2442 = vmatpush3.bf16.msra.mxu1 %v2857_v27  ;;  %v407_v27 = vpack.c.bf16 %v3108_v1, %v391_v18  ;;  %v3370_v1 = vpack.c.bf16 %v3142_v11, %v3114_v3  ;;  %v2872_v39 = vld [vmem:[%s3643_s1 + $0x1c8] sm:$0xff]   ;;  %v2873_v3 = vld [vmem:[%s3643_s1 + $0xd0] sm:$0xff]   ;;  %v3390_v11 = vld [vmem:[%s3644_s0 + $0x80] sm:$0xff] }
  0x4c   :  { %2570 = vmatpush3.bf16.msra.mxu0 %v2858_v30  ;;  %2443 = vmatprep.subr.bf16.mxu1 %v2859_v34  ;;  %v2869_v30 = vld [vmem:[%s3643_s1 + $0xc0] sm:$0xff]   ;;  %v2898_v18 = vld [vmem:[%s3645_s3 + $0x28] sm:$0xff]  }
  0x4d   :  { %2571 = vmatprep.subr.bf16.mxu0 %v2860_v41  ;;  %2429 = vmatprep.mubr.bf16.mxu1 %v41_v42 }
  0x4e   :  { %2557 = vmatprep.mubr.bf16.mxu0 %v1015_v45  ;;  %v2875_v45 = vld [vmem:[%s3643_s1 + $0xd8] sm:$0xff]  }
  0x4f   :  { %2444 = vmatpush3.bf16.msra.mxu1 %v2859_v34  ;;  %v2871_v34 = vld [vmem:[%s3643_s1 + $0xc8] sm:$0xff]  }
  0x50   :  { %2572 = vmatpush3.bf16.msra.mxu0 %v2860_v41  ;;  %2445 = vmatprep.subr.bf16.mxu1 %v2861_v46  ;;  %v3380_v41 = vpack.c.bf16 %v3169_v17, %v3147_v12  ;;  %v2138_v12 = vld [vmem:[%s3644_s0 + $0x90] sm:$0xff]  ;;  %v3402_v17 = vpack.c.bf16 %v3207_v28, %v3176_v19  ;;  %v2877_v28 = vld [vmem:[%s3643_s1 + $0xe0] sm:$0xff]  }
  0x51   :  { %2573 = vmatprep.subr.bf16.mxu0 %v2862_v49  ;;  %v1216_v42 = vpack.c.bf16 %v2138_v12, %v3390_v11 }
  0x52   :  { %2430 = vmatmul.mubr.bf16.gmra.mrb[8].mxu1 %v3285_v52 }
  0x53   :  { %2558 = vmatmul.mubr.bf16.gmra.mrb[8].mxu0 %v1016_v55  ;;  %2446 = vmatpush3.bf16.msra.mxu1 %v2861_v46  ;;  %v2878_v46 = vld [vmem:[%s3643_s1 + $0x1e0] sm:$0xff]   ;;  %v3435_v55 = vpack.c.bf16 %v3300_v57, %v3273_v48  ;;  %v2146_v48 = vld [vmem:[%s3644_s0 + $0x130] sm:$0xff]  ;;  %v3457_v57 = vpack.c.bf16 %v3333_v6, %v3305_v58  ;;  %v610_v6 = vpack.c.bf16 %v3155_v14, %v3134_v9 }
  0x54   :  { %2574 = vmatpush3.bf16.msra.mxu0 %v2862_v49  ;;  %2447 = vmatprep.subr.bf16.mxu1 %v2863_v53  ;;  %v2879_v49 = vld [vmem:[%s3643_s1 + $0xe8] sm:$0xff]   ;;  %v2885_v58 = vld [vmem:[%s3643_s1 + $0x200] sm:$0xff]   ;;  %v2887_v9 = vld [vmem:[%s3643_s1 + $0x210] sm:$0xff]   ;;  %v612_v14 = vpack.c.bf16 %v3390_v11, %v3196_v24  ;;  %v615_v24 = vpack.c.bf16 %v3317_v63, %v3293_v54 }
  0x55   :  { %2575 = vmatprep.subr.bf16.mxu0 %v2864_v59  ;;  %2433 = vmatprep.mubr.bf16.mxu1 %v3312_v61  ;;  %v2194_v54 = vld [vmem:[%s3644_s0 + $0x132] sm:$0xff] }
  0x56   :  { %2561 = vmatprep.mubr.bf16.mxu0 %v1017_v2  ;;  %v2884_v2 = vld [vmem:[%s3643_s1 + $0x1f8] sm:$0xff]   ;;  %v1622_v63 = vpack.c.bf16 %v2194_v54, %v3338_v7 }
  0x57   :  { %2448 = vmatpush3.bf16.msra.mxu1 %v2863_v53  ;;  %v2880_v53 = vld [vmem:[%s3643_s1 + $0x1e8] sm:$0xff]   ;;  %v2896_v7 = vld [vmem:[%s3645_s3 + $0x18] sm:$0xff]  }
  0x58   :  { %2576 = vmatpush3.bf16.msra.mxu0 %v2864_v59  ;;  %2449 = vmatprep.subr.bf16.mxu1 %v2865_v5 }
  0x59   :  { %2577 = vmatprep.subr.bf16.mxu0 %v2866_v10 }
  0x5a   :  { %2434 = vmatmul.mubr.bf16.gmra.mrb[12].mxu1 %v3346_v13 }
  0x5b   :  { %2562 = vmatmul.mubr.bf16.gmra.mrb[12].mxu0 %v1018_v20  ;;  %2450 = vmatpush3.bf16.msra.mxu1 %v2865_v5  ;;  %v609_v5 = vpack.c.bf16 %v3129_v8, %v3103_v0  ;;  %v611_v0 = vpack.c.bf16 %v3191_v23, %v3160_v15  ;;  %v2886_v8 = vld [vmem:[%s3643_s1 + $0x208] sm:$0xff]   ;;  %v614_v23 = vpack.c.bf16 %v3281_v51, %v3257_v44  ;;  %v2899_v20 = vld [vmem:[%s3645_s3 + $0x30] sm:$0xff]  }
  0x5c   :  { %2578 = vmatpush3.bf16.msra.mxu0 %v2866_v10  ;;  %2451 = vmatprep.subr.bf16.mxu1 %v2867_v21  ;;  %v2895_v10 = vld [vmem:[%s3645_s3 + $0x10] sm:$0xff]  }
  0x5d   :  { %2579 = vmatprep.subr.bf16.mxu0 %v2868_v26  ;;  %2453 = vmatprep.mubr.bf16.mxu1 %v407_v27 }
  0x5e   :  { %2581 = vmatprep.mubr.bf16.mxu0 %v3164_v16  ;;  %v2874_v16 = vld [vmem:[%s3643_s1 + $0x1d0] sm:$0xff]  }
  0x5f   :  { %2452 = vmatpush3.bf16.msra.mxu1 %v2867_v21  ;;  %v2900_v21 = vld [vmem:[%s3645_s3 + $0x38] sm:$0xff]  }
  0x60   :  { %2580 = vmatpush3.bf16.msra.mxu0 %v2868_v26  ;;  %2469 = vmatprep.subr.bf16.mxu1 %v2869_v30 }
  0x61   :  { %2597 = vmatprep.subr.bf16.mxu0 %v2870_v32 }
  0x62   :  { %2454 = vmatmul.mubr.bf16.vlgmr.msra.gmra.mrb[0].mxu1 %v3370_v1 }
  0x63   :  { %2582 = vmatmul.mubr.bf16.vlgmr.msra.gmra.mrb[0].mxu0 %v3186_v22  ;;  %2470 = vmatpush3.bf16.msra.mxu1 %v2869_v30  ;;  %v399_v22 = vld [vmem:[%s3644_s0 + $0xa2] sm:$0xff] }
  0x64   :  { %2598 = vmatpush3.bf16.msra.mxu0 %v2870_v32  ;;  %2471 = vmatprep.subr.bf16.mxu1 %v2871_v34  ;;  %v411_v19 = vpack.c.bf16 %v3236_v38, %v399_v22  ;;  %v3425_v38 = vpack.c.bf16 %v3268_v47, %v3243_v40  ;;  %v2881_v40 = vld [vmem:[%s3643_s1 + $0xf0] sm:$0xff]   ;;  %v3445_v47 = vld [vmem:[%s3644_s0 + $0x120] sm:$0xff] }
  0x65   :  { %2599 = vmatprep.subr.bf16.mxu0 %v2872_v39  ;;  %2457 = vmatprep.mubr.bf16.mxu1 %v3380_v41  ;;  %v1220_v59 = vpack.c.bf16 %v2146_v48, %v3445_v47  ;;  %v616_v44 = vpack.c.bf16 %v3445_v47, %v3325_v4  ;;  %v2893_v4 = vld [vmem:[%s3645_s3] sm:$0xff]  }
  0x66   :  { %2585 = vmatprep.mubr.bf16.mxu0 %v3223_v33  ;;  %v2876_v33 = vld [vmem:[%s3643_s1 + $0x1d8] sm:$0xff]  }
  0x67   :  { %2472 = vmatpush3.bf16.msra.mxu1 %v2871_v34 }
  0x68   :  { %2600 = vmatpush3.bf16.msra.mxu0 %v2872_v39  ;;  %2473 = vmatprep.subr.bf16.mxu1 %v2873_v3 }
  0x69   :  { %2601 = vmatprep.subr.bf16.mxu0 %v2874_v16 }
  0x6a   :  { %2458 = vmatmul.mubr.bf16.gmra.mrb[4].mxu1 %v3402_v17 }
  0x6b   :  { %2586 = vmatmul.mubr.bf16.gmra.mrb[4].mxu0 %v1216_v42  ;;  %2474 = vmatpush3.bf16.msra.mxu1 %v2873_v3 }
  0x6c   :  { %2602 = vmatpush3.bf16.msra.mxu0 %v2874_v16  ;;  %2475 = vmatprep.subr.bf16.mxu1 %v2875_v45 }
  0x6d   :  { %2603 = vmatprep.subr.bf16.mxu0 %v2876_v33  ;;  %2461 = vmatprep.mubr.bf16.mxu1 %v411_v19  ;;  %v3570_v19 = vld [vmem:[%s3646_s2] ss:$0 sm:$0xff] }
  0x6e   :  { %2589 = vmatprep.mubr.bf16.mxu0 %v3285_v52  ;;  %v2882_v52 = vld [vmem:[%s3643_s1 + $0x1f0] sm:$0xff]  }
  0x6f   :  { %2476 = vmatpush3.bf16.msra.mxu1 %v2875_v45 }
  0x70   :  { %2604 = vmatpush3.bf16.msra.mxu0 %v2876_v33  ;;  %2477 = vmatprep.subr.bf16.mxu1 %v2877_v28 }
  0x71   :  { %2605 = vmatprep.subr.bf16.mxu0 %v2878_v46 }
  0x72   :  { %2462 = vmatmul.mubr.bf16.gmra.mrb[8].mxu1 %v3425_v38 }
  0x73   :  { %2590 = vmatmul.mubr.bf16.gmra.mrb[8].mxu0 %v3312_v61  ;;  %2478 = vmatpush3.bf16.msra.mxu1 %v2877_v28  ;;  %v2883_v61 = vld [vmem:[%s3643_s1 + $0xf8] sm:$0xff]  }
  0x74   :  { %2606 = vmatpush3.bf16.msra.mxu0 %v2878_v46  ;;  %2479 = vmatprep.subr.bf16.mxu1 %v2879_v49 }
  0x75   :  { %2607 = vmatprep.subr.bf16.mxu0 %v2880_v53  ;;  %2465 = vmatprep.mubr.bf16.mxu1 %v3435_v55 }
  0x76   :  { %2593 = vmatprep.mubr.bf16.mxu0 %v3346_v13  ;;  %v2897_v13 = vld [vmem:[%s3645_s3 + $0x20] sm:$0xff]  }
  0x77   :  { %2480 = vmatpush3.bf16.msra.mxu1 %v2879_v49 }
  0x78   :  { %2608 = vmatpush3.bf16.msra.mxu0 %v2880_v53  ;;  %2481 = vmatprep.subr.bf16.mxu1 %v2881_v40 }
  0x79   :  { %2609 = vmatprep.subr.bf16.mxu0 %v2882_v52 }
  0x7a   :  { %2466 = vmatmul.mubr.bf16.gmra.mrb[12].mxu1 %v3457_v57 }
  0x7b   :  { %2594 = vmatmul.mubr.bf16.gmra.mrb[12].mxu0 %v1220_v59  ;;  %2482 = vmatpush3.bf16.msra.mxu1 %v2881_v40 }
  0x7c   :  { %2610 = vmatpush3.bf16.msra.mxu0 %v2882_v52  ;;  %2483 = vmatprep.subr.bf16.mxu1 %v2883_v61 }
  0x7d   :  { %2611 = vmatprep.subr.bf16.mxu0 %v2884_v2  ;;  %2485 = vmatprep.mubr.bf16.mxu1 %v609_v5 }
  0x7e   :  { %2613 = vmatprep.mubr.bf16.mxu0 %v3000_v25  ;;  %v2162_v25 = vld [vmem:[%s3644_s0 + $0x91] sm:$0xff] }
  0x7f   :  { %2484 = vmatpush3.bf16.msra.mxu1 %v2883_v61  ;;  %v1417_v15 = vpack.c.bf16 %v2162_v25, %v3026_v35  ;;  %v2889_v35 = vld [vmem:[%s3643_s1 + $0x220] sm:$0xff]  }
  0x80   :  { %2612 = vmatpush3.bf16.msra.mxu0 %v2884_v2  ;;  %2661 = vmatprep.subr.bf16.mxu1 %v2893_v4 }
  0x81   :  { %2629 = vmatprep.subr.bf16.mxu0 %v2885_v58 }
  0x82   :  { %2486 = vmatmul.mubr.bf16.vlgmr.msra.gmra.mrb[0].mxu1 %v610_v6 }
  0x83   :  { %2614 = vmatmul.mubr.bf16.vlgmr.msra.gmra.mrb[0].mxu0 %v3014_v31  ;;  %2489 = vmatprep.mubr.bf16.mxu1 %v611_v0  ;;  %v613_v31 = vpack.c.bf16 %v3252_v43, %v3231_v36  ;;  %v2890_v36 = vld [vmem:[%s3643_s1 + $0x228] sm:$0xff]   ;;  %v2891_v43 = vld [vmem:[%s3643_s1 + $0x230] sm:$0xff]  }
  0x84   :  { %2630 = vmatpush3.bf16.msra.mxu0 %v2885_v58  ;;  %2617 = vmatprep.mubr.bf16.mxu0 %v3032_v37  ;;  %v2888_v37 = vld [vmem:[%s3643_s1 + $0x218] sm:$0xff]  }
  0x85   :  { %2631 = vmatprep.subr.bf16.mxu0 %v2886_v8  ;;  %2662 = vmatpush3.bf16.msra.mxu1 %v2893_v4 }
  0x88   :  { %2632 = vmatpush3.bf16.msra.mxu0 %v2886_v8 }
  0x89   :  { %2633 = vmatprep.subr.bf16.mxu0 %v2887_v9 }
  0x8a   :  { %2490 = vmatmul.mubr.bf16.gmra.mrb[4].mxu1 %v612_v14 }
  0x8b   :  { %2618 = vmatmul.mubr.bf16.gmra.mrb[4].mxu0 %v1417_v15  ;;  %2493 = vmatprep.mubr.bf16.mxu1 %v613_v31 }
  0x8c   :  { %2634 = vmatpush3.bf16.msra.mxu0 %v2887_v9  ;;  %2621 = vmatprep.mubr.bf16.mxu0 %v3063_v50  ;;  %v2170_v50 = vld [vmem:[%s3644_s0 + $0x131] sm:$0xff] }
  0x8d   :  { %2635 = vmatprep.subr.bf16.mxu0 %v2888_v37  ;;  %v1421_v51 = vpack.c.bf16 %v2170_v50, %v3089_v60  ;;  %v2186_v60 = vld [vmem:[%s3644_s0 + $0x92] sm:$0xff] }
  0x90   :  { %2636 = vmatpush3.bf16.msra.mxu0 %v2888_v37 }
  0x91   :  { %2637 = vmatprep.subr.bf16.mxu0 %v2889_v35 }
  0x92   :  { %2494 = vmatmul.mubr.bf16.gmra.mrb[8].mxu1 %v614_v23 }
  0x93   :  { %2622 = vmatmul.mubr.bf16.gmra.mrb[8].mxu0 %v3077_v56  ;;  %2497 = vmatprep.mubr.bf16.mxu1 %v615_v24  ;;  %v2892_v56 = vld [vmem:[%s3643_s1 + $0x238] sm:$0xff]  }
  0x94   :  { %2638 = vmatpush3.bf16.msra.mxu0 %v2889_v35  ;;  %2625 = vmatprep.mubr.bf16.mxu0 %v3095_v62  ;;  %v1618_v62 = vpack.c.bf16 %v2186_v60, %v3212_v29  ;;  %v2894_v29 = vld [vmem:[%s3645_s3 + $0x8] sm:$0xff]  }
  0x95   :  { %2639 = vmatprep.subr.bf16.mxu0 %v2890_v36  ;;  %2663 = vmatprep.subr.bf16.mxu1 %v2894_v29 }
  0x96   :  { %2664 = vmatpush3.bf16.msra.mxu1 %v2894_v29 }
  0x97   :  { %2665 = vmatprep.subr.bf16.mxu1 %v2895_v10 }
  0x98   :  { %2640 = vmatpush3.bf16.msra.mxu0 %v2890_v36 }
  0x99   :  { %2641 = vmatprep.subr.bf16.mxu0 %v2891_v43 }
  0x9a   :  { %2498 = vmatmul.mubr.bf16.gmra.mrb[12].mxu1 %v616_v44 }
  0x9b   :  { %2626 = vmatmul.mubr.bf16.gmra.mrb[12].mxu0 %v1421_v51  ;;  %2666 = vmatpush3.bf16.msra.mxu1 %v2895_v10 }
  0x9c   :  { %2642 = vmatpush3.bf16.msra.mxu0 %v2891_v43  ;;  %2645 = vmatprep.mubr.bf16.mxu0 %v3370_v1 }
  0x9d   :  { %2643 = vmatprep.subr.bf16.mxu0 %v2892_v56  ;;  %2667 = vmatprep.subr.bf16.mxu1 %v2896_v7 }
  0x9f   :  { %2668 = vmatpush3.bf16.msra.mxu1 %v2896_v7 }
  0xa0   :  { %2644 = vmatpush3.bf16.msra.mxu0 %v2892_v56  ;;  %2669 = vmatprep.subr.bf16.mxu1 %v2897_v13 }
  0xa3   :  { %2646 = vmatmul.mubr.bf16.vlgmr.msra.gmra.mrb[0].mxu0 %v3380_v41  ;;  %2670 = vmatpush3.bf16.msra.mxu1 %v2897_v13 }
  0xa4   :  { %2649 = vmatprep.mubr.bf16.mxu0 %v3402_v17  ;;  %2671 = vmatprep.subr.bf16.mxu1 %v2898_v18 }
  0xa7   :  { %2672 = vmatpush3.bf16.msra.mxu1 %v2898_v18 }
  0xa8   :  { %2673 = vmatprep.subr.bf16.mxu1 %v2899_v20 }
  0xab   :  { %2650 = vmatmul.mubr.bf16.gmra.mrb[4].mxu0 %v1618_v62  ;;  %2674 = vmatpush3.bf16.msra.mxu1 %v2899_v20 }
  0xac   :  { %2653 = vmatprep.mubr.bf16.mxu0 %v3425_v38  ;;  %2675 = vmatprep.subr.bf16.mxu1 %v2900_v21 }
  0xaf   :  { %2676 = vmatpush3.bf16.msra.mxu1 %v2900_v21 }
  0xb3   :  { %2654 = vmatmul.mubr.bf16.gmra.mrb[8].mxu0 %v3435_v55 }
  0xb4   :  { %2657 = vmatprep.mubr.bf16.mxu0 %v3457_v57 }
  0xbb   :  { %2658 = vmatmul.mubr.bf16.gmra.mrb[12].mxu0 %v1622_v63 }
 0x155   :  { %v2487_v26 = vpop.f32.mrb[0].mxu1 }
 0x156   :  { %v715_v27 = vpop.f32.mrb[1].mxu1 }
 0x157   :  { %v2488_v30 = vpop.f32.mrb[2].mxu1 }
 0x158   :  { %v718_v32 = vpop.f32.mrb[3].mxu1 }
 0x15d   :  { %v2491_v1 = vpop.f32.mrb[4].mxu1 }
 0x15e   :  { %v731_v34 = vpop.f32.mrb[5].mxu1 }
 0x15f   :  { %v2492_v39 = vpop.f32.mrb[6].mxu1 }
 0x160   :  { %v734_v41 = vpop.f32.mrb[7].mxu1 }
 0x165   :  { %v2495_v3 = vpop.f32.mrb[8].mxu1 }
 0x166   :  { %v747_v11 = vpop.f32.mrb[9].mxu1 }
 0x167   :  { %v2496_v12 = vpop.f32.mrb[10].mxu1 }
 0x168   :  { %v750_v16 = vpop.f32.mrb[11].mxu1 }
 0x16d   :  { %v3559_v17 = vpop.f32.mrb[12].mxu1 }
 0x16e   :  { %v3561_v22 = vpop.f32.mrb[13].mxu1 }
 0x16f   :  { %v3563_v42 = vpop.f32.mrb[14].mxu1 }
 0x170   :  { %v3565_v45 = vpop.f32.mrb[15].mxu1 }
 0x176   :  { %v2647_v33 = vpop.f32.mrb[0].mxu0 }
 0x177   :  { %v2693_v28 = vadd.f32 %v2647_v33, %v2487_v26  ;;  %v1721_v46 = vpop.f32.mrb[1].mxu0 }
 0x178   :  { %v2694_v38 = vadd.f32 %v1721_v46, %v715_v27  ;;  %v2648_v49 = vpop.f32.mrb[2].mxu0 }
 0x179   :  { %v1809_v53 = vadd.f32 %v2693_v28, %v3570_v19  ;;  %v2695_v55 = vadd.f32 %v2648_v49, %v2488_v30  ;;  %v1724_v40 = vpop.f32.mrb[3].mxu0 }
 0x17a   :  { %v1807_v47 = vadd.f32 %v2694_v38, %v3570_v19  ;;  %v2696_v48 = vadd.f32 %v1724_v40, %v718_v32 }
 0x17b   :  { %v1810_v52 = vadd.f32 %v2695_v55, %v3570_v19  ;;  %v1825_v59 = vmax.f32 %v1809_v53, 0.0 }
 0x17c   :  { %v1808_v57 = vadd.f32 %v2696_v48, %v3570_v19  ;;  %v1823_v2 = vmax.f32 %v1807_v47, 0.0 }
 0x17d   :  { %v1826_v61 = vmax.f32 %v1810_v52, 0.0 }
 0x17e   :  { %v1824_v5 = vmax.f32 %v1808_v57, 0.0  ;;  %v2651_v58 = vpop.f32.mrb[4].mxu0 }
 0x17f   :  { %v1840_v6 = vpack.c.bf16 %v1826_v61, %v1825_v59  ;;  %v2697_v0 = vadd.f32 %v2651_v58, %v2491_v1  ;;  %v1737_v8 = vpop.f32.mrb[5].mxu0 }
 0x180   :  { %v2698_v25 = vadd.f32 %v1737_v8, %v731_v34  ;;  %v2652_v9 = vpop.f32.mrb[6].mxu0  ;;  %v1839_v14 = vpack.c.bf16 %v1824_v5, %v1823_v2 }
 0x181   :  { %v1813_v15 = vadd.f32 %v2697_v0, %v3570_v19  ;;  %v2699_v31 = vadd.f32 %v2652_v9, %v2492_v39  ;;  %v1740_v37 = vpop.f32.mrb[7].mxu0 }
 0x182   :  { %v1811_v35 = vadd.f32 %v2698_v25, %v3570_v19  ;;  %v2700_v23 = vadd.f32 %v1740_v37, %v734_v41  ;;  %2677 = vmatprep.mubr.bf16.mxu1 %v1839_v14 }
 0x183   :  { %v1814_v24 = vadd.f32 %v2699_v31, %v3570_v19  ;;  %2678 = vmatmul.mubr.bf16.vlgmr.msra.gmra.mrb[16].mxu1 %v1840_v6  ;;  %v1829_v50 = vmax.f32 %v1813_v15, 0.0 }
 0x184   :  { %v1812_v36 = vadd.f32 %v2700_v23, %v3570_v19  ;;  %v1827_v44 = vmax.f32 %v1811_v35, 0.0 }
 0x185   :  { %v1830_v43 = vmax.f32 %v1814_v24, 0.0 }
 0x186   :  { %v1828_v51 = vmax.f32 %v1812_v36, 0.0  ;;  %v2655_v56 = vpop.f32.mrb[8].mxu0 }
 0x187   :  { %v2701_v60 = vadd.f32 %v2655_v56, %v2495_v3  ;;  %v1753_v62 = vpop.f32.mrb[9].mxu0  ;;  %v1842_v54 = vpack.c.bf16 %v1830_v43, %v1829_v50 }
 0x188   :  { %v2702_v63 = vadd.f32 %v1753_v62, %v747_v11  ;;  %v2656_v4 = vpop.f32.mrb[10].mxu0  ;;  %v1841_v29 = vpack.c.bf16 %v1828_v51, %v1827_v44 }
 0x189   :  { %v1817_v10 = vadd.f32 %v2701_v60, %v3570_v19  ;;  %v2703_v7 = vadd.f32 %v2656_v4, %v2496_v12  ;;  %v1756_v13 = vpop.f32.mrb[11].mxu0 }
 0x18a   :  { %v1815_v18 = vadd.f32 %v2702_v63, %v3570_v19  ;;  %v2704_v20 = vadd.f32 %v1756_v13, %v750_v16  ;;  %2681 = vmatprep.mubr.bf16.mxu1 %v1841_v29 }
 0x18b   :  { %v1818_v21 = vadd.f32 %v2703_v7, %v3570_v19  ;;  %2682 = vmatmul.mubr.bf16.gmra.mrb[20].mxu1 %v1842_v54  ;;  %v1833_v27 = vmax.f32 %v1817_v10, 0.0 }
 0x18c   :  { %v1816_v26 = vadd.f32 %v2704_v20, %v3570_v19  ;;  %v1831_v32 = vmax.f32 %v1815_v18, 0.0 }
 0x18d   :  { %v1834_v30 = vmax.f32 %v1818_v21, 0.0 }
 0x18e   :  { %v1832_v1 = vmax.f32 %v1816_v26, 0.0  ;;  %v2659_v34 = vpop.f32.mrb[12].mxu0 }
 0x18f   :  { %v2705_v39 = vadd.f32 %v2659_v34, %v3559_v17  ;;  %v1769_v41 = vpop.f32.mrb[13].mxu0  ;;  %v1844_v3 = vpack.c.bf16 %v1834_v30, %v1833_v27 }
 0x190   :  { %v2706_v11 = vadd.f32 %v1769_v41, %v3561_v22  ;;  %v2660_v12 = vpop.f32.mrb[14].mxu0  ;;  %v1843_v33 = vpack.c.bf16 %v1832_v1, %v1831_v32 }
 0x191   :  { %v1821_v16 = vadd.f32 %v2705_v39, %v3570_v19  ;;  %v2707_v28 = vadd.f32 %v2660_v12, %v3563_v42  ;;  %v1772_v46 = vpop.f32.mrb[15].mxu0  ;;  %v2204_v42 = vld [vmem:[%s3647_s4] ss:$0 sm:$0xff] }
 0x192   :  { %v1819_v38 = vadd.f32 %v2706_v11, %v3570_v19  ;;  %v2708_v49 = vadd.f32 %v1772_v46, %v3565_v45  ;;  %2685 = vmatprep.mubr.bf16.mxu1 %v1843_v33 }
 0x193   :  { %v1822_v53 = vadd.f32 %v2707_v28, %v3570_v19  ;;  %2686 = vmatmul.mubr.bf16.gmra.mrb[24].mxu1 %v1844_v3  ;;  %v1837_v55 = vmax.f32 %v1821_v16, 0.0 }
 0x194   :  { %v1820_v17 = vadd.f32 %v2708_v49, %v3570_v19  ;;  %v1835_v22 = vmax.f32 %v1819_v38, 0.0 }
 0x195   :  { %v1838_v40 = vmax.f32 %v1822_v53, 0.0 }
 0x196   :  { %v1836_v47 = vmax.f32 %v1820_v17, 0.0 }
 0x197   :  { %v1846_v48 = vpack.c.bf16 %v1838_v40, %v1837_v55 }
 0x198   :  { %v1845_v52 = vpack.c.bf16 %v1836_v47, %v1835_v22 }
 0x19a   :  { %2689 = vmatprep.mubr.bf16.mxu1 %v1845_v52 }
 0x19b   :  { %2690 = vmatmul.mubr.bf16.gmra.mrb[28].mxu1 %v1846_v48 }
 0x256   :  { %v2679_v57 = vpop.f32.mrb[16].mxu1 }
 0x257   :  { %v1961_v45 = vadd.f32 %v2679_v57, %v2204_v42  ;;  %v1952_v59 = vpop.f32.mrb[17].mxu1 }
 0x258   :  { %v1953_v61 = vadd.f32 %v2204_v42, %v1952_v59  ;;  %v2680_v2 = vpop.f32.mrb[18].mxu1 }
 0x259   :  { %2017 = vst [vmem:[%s3648_s5 + $0x10] sm:$0xff] %v1961_v45  ;;  %v1964_v19 = vadd.f32 %v2680_v2, %v2204_v42  ;;  %v1955_v5 = vpop.f32.mrb[19].mxu1 }
 0x25a   :  { %2015 = vst [vmem:[%s3648_s5] sm:$0xff] %v1953_v61  ;;  %v1956_v58 = vadd.f32 %v2204_v42, %v1955_v5 }
 0x25b   :  { %2018 = vst [vmem:[%s3648_s5 + $0x18] sm:$0xff] %v1964_v19 }
 0x25c   :  { %2016 = vst [vmem:[%s3648_s5 + $0x8] sm:$0xff] %v1956_v58 }
 0x25e   :  { %v2683_v6 = vpop.f32.mrb[20].mxu1 }
 0x25f   :  { %v1977_v0 = vadd.f32 %v2683_v6, %v2204_v42  ;;  %v1968_v8 = vpop.f32.mrb[21].mxu1 }
 0x260   :  { %v1969_v25 = vadd.f32 %v2204_v42, %v1968_v8  ;;  %v2684_v9 = vpop.f32.mrb[22].mxu1 }
 0x261   :  { %2021 = vst [vmem:[%s3648_s5 + $0x30] sm:$0xff] %v1977_v0  ;;  %v1980_v14 = vadd.f32 %v2684_v9, %v2204_v42  ;;  %v1971_v15 = vpop.f32.mrb[23].mxu1 }
 0x262   :  { %2019 = vst [vmem:[%s3648_s5 + $0x20] sm:$0xff] %v1969_v25  ;;  %v1972_v31 = vadd.f32 %v2204_v42, %v1971_v15 }
 0x263   :  { %2022 = vst [vmem:[%s3648_s5 + $0x38] sm:$0xff] %v1980_v14 }
 0x264   :  { %2020 = vst [vmem:[%s3648_s5 + $0x28] sm:$0xff] %v1972_v31 }
 0x266   :  { %v2687_v37 = vpop.f32.mrb[24].mxu1 }
 0x267   :  { %v1993_v35 = vadd.f32 %v2687_v37, %v2204_v42  ;;  %v1984_v23 = vpop.f32.mrb[25].mxu1 }
 0x268   :  { %v1985_v24 = vadd.f32 %v2204_v42, %v1984_v23  ;;  %v2688_v36 = vpop.f32.mrb[26].mxu1 }
 0x269   :  { %2025 = vst [vmem:[%s3648_s5 + $0x50] sm:$0xff] %v1993_v35  ;;  %v1996_v50 = vadd.f32 %v2688_v36, %v2204_v42  ;;  %v1987_v43 = vpop.f32.mrb[27].mxu1 }
 0x26a   :  { %2023 = vst [vmem:[%s3648_s5 + $0x40] sm:$0xff] %v1985_v24  ;;  %v1988_v44 = vadd.f32 %v2204_v42, %v1987_v43 }
 0x26b   :  { %2026 = vst [vmem:[%s3648_s5 + $0x58] sm:$0xff] %v1996_v50 }
 0x26c   :  { %2024 = vst [vmem:[%s3648_s5 + $0x48] sm:$0xff] %v1988_v44 }
 0x26e   :  { %v2691_v51 = vpop.f32.mrb[28].mxu1 }
 0x26f   :  { %v2009_v56 = vadd.f32 %v2691_v51, %v2204_v42  ;;  %v2000_v60 = vpop.f32.mrb[29].mxu1 }
 0x270   :  { %v2001_v62 = vadd.f32 %v2204_v42, %v2000_v60  ;;  %v2692_v54 = vpop.f32.mrb[30].mxu1 }
 0x271   :  { %2029 = vst [vmem:[%s3648_s5 + $0x70] sm:$0xff] %v2009_v56  ;;  %v2012_v63 = vadd.f32 %v2692_v54, %v2204_v42  ;;  %v2003_v4 = vpop.f32.mrb[31].mxu1 }
 0x272   :  { %2027 = vst [vmem:[%s3648_s5 + $0x60] sm:$0xff] %v2001_v62  ;;  %v2004_v29 = vadd.f32 %v2204_v42, %v2003_v4 }
 0x273   :  { %2030 = vst [vmem:[%s3648_s5 + $0x78] sm:$0xff] %v2012_v63 }
 0x274   :  { %2028 = vst [vmem:[%s3648_s5 + $0x68] sm:$0xff] %v2004_v29 }

// kernel: rcnn_tail_forward.6
= control target key start
LH: loop header
LB: loop body
LE: loop exit
PB: predicated region body
PF: predicated region fallthrough
CT: control target
= control target key end

     0   :  { %s3911_s1 = inlined_call_operand.vmem [shape: bf16[1152,256], index: 1, kind: input, shape index: {}]   ;;  %s3912_s0 = inlined_call_operand.vmem [shape: bf16[128,1152], index: 0, kind: input, shape index: {}]   ;;  %s3913_s3 = inlined_call_operand.vmem [shape: bf16[256,128], index: 3, kind: input, shape index: {}]   ;;  %s3914_s2 = inlined_call_operand.vmem [shape: f32[1,256], index: 2, kind: input, shape index: {}]   ;;  %s3915_s4 = inlined_call_operand.vmem [shape: f32[1,128], index: 4, kind: input, shape index: {}]   ;;  %s3916_s5 = inlined_call_operand.vmem [shape: f32[128,128], index: 5, kind: output, shape index: {}]  }
   0x1   :  { %v2668_v0 = vld [vmem:[%s3911_s1 + $0x4] ss:$8 sps:$4 sm:$0xff]   ;;  %v2672_v2 = vld [vmem:[%s3911_s1] ss:$8 sps:$4 sm:$0xff]   ;;  %v2674_v4 = vld [vmem:[%s3911_s1 + $0x14] ss:$8 sps:$4 sm:$0xff]  }
   0x2   :  { %v2670_v1 = vld [vmem:[%s3911_s1 + $0x204] ss:$8 sps:$4 sm:$0xff]   ;;  %1345 = vmatprep.subr.bf16.mxu1 %v2668_v0  ;;  %v2673_v3 = vld [vmem:[%s3911_s1 + $0x200] ss:$8 sps:$4 sm:$0xff]   ;;  %v2676_v5 = vld [vmem:[%s3911_s1 + $0x214] ss:$8 sps:$4 sm:$0xff]  }
   0x3   :  { %1571 = vmatprep.subr.bf16.mxu0 %v2670_v1  ;;  %1346 = vmatpush1.bf16.msra.mxu1 %v2672_v2  ;;  %v2678_v6 = vld [vmem:[%s3911_s1 + $0x10] ss:$8 sps:$4 sm:$0xff]   ;;  %v2680_v8 = vld [vmem:[%s3911_s1 + $0x24] ss:$8 sps:$4 sm:$0xff]   ;;  %v2684_v10 = vld [vmem:[%s3911_s1 + $0x20] ss:$8 sps:$4 sm:$0xff]  }
   0x4   :  { %1572 = vmatpush1.bf16.msra.mxu0 %v2673_v3  ;;  %1347 = vmatprep.subr.bf16.mxu1 %v2674_v4  ;;  %v2679_v7 = vld [vmem:[%s3911_s1 + $0x210] ss:$8 sps:$4 sm:$0xff]   ;;  %v2682_v9 = vld [vmem:[%s3911_s1 + $0x224] ss:$8 sps:$4 sm:$0xff]   ;;  %v2685_v11 = vld [vmem:[%s3911_s1 + $0x220] ss:$8 sps:$4 sm:$0xff]  }
   0x5   :  { %1573 = vmatprep.subr.bf16.mxu0 %v2676_v5  ;;  %v2686_v12 = vld [vmem:[%s3911_s1 + $0x34] ss:$8 sps:$4 sm:$0xff]   ;;  %v2690_v14 = vld [vmem:[%s3911_s1 + $0x30] ss:$8 sps:$4 sm:$0xff]   ;;  %v2692_v16 = vld [vmem:[%s3911_s1 + $0x44] ss:$8 sps:$4 sm:$0xff]  }
   0x6   :  { %v2688_v13 = vld [vmem:[%s3911_s1 + $0x234] ss:$8 sps:$4 sm:$0xff]   ;;  %v2691_v15 = vld [vmem:[%s3911_s1 + $0x230] ss:$8 sps:$4 sm:$0xff]   ;;  %v2694_v17 = vld [vmem:[%s3911_s1 + $0x244] ss:$8 sps:$4 sm:$0xff]  }
   0x7   :  { %1348 = vmatpush1.bf16.msra.mxu1 %v2678_v6  ;;  %v2696_v18 = vld [vmem:[%s3911_s1 + $0x40] ss:$8 sps:$4 sm:$0xff]   ;;  %v2698_v20 = vld [vmem:[%s3911_s1 + $0x54] ss:$8 sps:$4 sm:$0xff]   ;;  %v2702_v22 = vld [vmem:[%s3911_s1 + $0x50] ss:$8 sps:$4 sm:$0xff]  }
   0x8   :  { %1574 = vmatpush1.bf16.msra.mxu0 %v2679_v7  ;;  %1349 = vmatprep.subr.bf16.mxu1 %v2680_v8  ;;  %v2697_v19 = vld [vmem:[%s3911_s1 + $0x240] ss:$8 sps:$4 sm:$0xff]   ;;  %v2700_v21 = vld [vmem:[%s3911_s1 + $0x254] ss:$8 sps:$4 sm:$0xff]   ;;  %v2703_v23 = vld [vmem:[%s3911_s1 + $0x250] ss:$8 sps:$4 sm:$0xff]  }
   0x9   :  { %1575 = vmatprep.subr.bf16.mxu0 %v2682_v9  ;;  %v2704_v24 = vld [vmem:[%s3911_s1 + $0x64] ss:$8 sps:$4 sm:$0xff]   ;;  %v2708_v26 = vld [vmem:[%s3911_s1 + $0x60] ss:$8 sps:$4 sm:$0xff]   ;;  %v2710_v28 = vld [vmem:[%s3911_s1 + $0x74] ss:$8 sps:$4 sm:$0xff]  }
   0xa   :  { %v2706_v25 = vld [vmem:[%s3911_s1 + $0x264] ss:$8 sps:$4 sm:$0xff]   ;;  %v2709_v27 = vld [vmem:[%s3911_s1 + $0x260] ss:$8 sps:$4 sm:$0xff]   ;;  %v2712_v29 = vld [vmem:[%s3911_s1 + $0x274] ss:$8 sps:$4 sm:$0xff]  }
   0xb   :  { %1350 = vmatpush1.bf16.msra.mxu1 %v2684_v10  ;;  %v2714_v30 = vld [vmem:[%s3911_s1 + $0x70] ss:$8 sps:$4 sm:$0xff]   ;;  %v2716_v32 = vld [vmem:[%s3911_s1 + $0x84] ss:$8 sps:$4 sm:$0xff]   ;;  %v2720_v34 = vld [vmem:[%s3911_s1 + $0x80] ss:$8 sps:$4 sm:$0xff]  }
   0xc   :  { %1576 = vmatpush1.bf16.msra.mxu0 %v2685_v11  ;;  %1351 = vmatprep.subr.bf16.mxu1 %v2686_v12  ;;  %v2715_v31 = vld [vmem:[%s3911_s1 + $0x270] ss:$8 sps:$4 sm:$0xff]   ;;  %v2718_v33 = vld [vmem:[%s3911_s1 + $0x284] ss:$8 sps:$4 sm:$0xff]   ;;  %v2721_v35 = vld [vmem:[%s3911_s1 + $0x280] ss:$8 sps:$4 sm:$0xff]  }
   0xd   :  { %1577 = vmatprep.subr.bf16.mxu0 %v2688_v13  ;;  %v2722_v36 = vld [vmem:[%s3911_s1 + $0x94] ss:$8 sps:$4 sm:$0xff]   ;;  %v2726_v38 = vld [vmem:[%s3911_s1 + $0x90] ss:$8 sps:$4 sm:$0xff]   ;;  %v2728_v40 = vld [vmem:[%s3911_s1 + $0xa4] ss:$8 sps:$4 sm:$0xff]  }
   0xe   :  { %v2724_v37 = vld [vmem:[%s3911_s1 + $0x294] ss:$8 sps:$4 sm:$0xff]   ;;  %v2727_v39 = vld [vmem:[%s3911_s1 + $0x290] ss:$8 sps:$4 sm:$0xff]   ;;  %v2730_v41 = vld [vmem:[%s3911_s1 + $0x2a4] ss:$8 sps:$4 sm:$0xff]  }
   0xf   :  { %1352 = vmatpush1.bf16.msra.mxu1 %v2690_v14  ;;  %v2732_v42 = vld [vmem:[%s3911_s1 + $0xa0] ss:$8 sps:$4 sm:$0xff]   ;;  %v2734_v44 = vld [vmem:[%s3911_s1 + $0xb4] ss:$8 sps:$4 sm:$0xff]   ;;  %v2738_v46 = vld [vmem:[%s3911_s1 + $0xb0] ss:$8 sps:$4 sm:$0xff]  }
  0x10   :  { %1578 = vmatpush1.bf16.msra.mxu0 %v2691_v15  ;;  %1353 = vmatprep.subr.bf16.mxu1 %v2692_v16  ;;  %v2733_v43 = vld [vmem:[%s3911_s1 + $0x2a0] ss:$8 sps:$4 sm:$0xff]   ;;  %v2736_v45 = vld [vmem:[%s3911_s1 + $0x2b4] ss:$8 sps:$4 sm:$0xff]   ;;  %v2739_v47 = vld [vmem:[%s3911_s1 + $0x2b0] ss:$8 sps:$4 sm:$0xff]  }
  0x11   :  { %1579 = vmatprep.subr.bf16.mxu0 %v2694_v17  ;;  %v2740_v48 = vld [vmem:[%s3911_s1 + $0xc4] ss:$8 sps:$4 sm:$0xff]   ;;  %v2769_v51 = vld [vmem:[%s3912_s0 + $0x14] ss:$36 sps:$4 sm:$0xff]   ;;  %v2744_v52 = vld [vmem:[%s3911_s1 + $0xc0] ss:$8 sps:$4 sm:$0xff]  }
  0x12   :  { %v2766_v49 = vld [vmem:[%s3912_s0 + $0x4] ss:$36 sps:$4 sm:$0xff]   ;;  %1603 = vmatprep.mubr.bf16.mxu0 %v2769_v51  ;;  %v2746_v54 = vld [vmem:[%s3911_s1 + $0xd4] ss:$8 sps:$4 sm:$0xff]   ;;  %v2750_v56 = vld [vmem:[%s3911_s1 + $0xd0] ss:$8 sps:$4 sm:$0xff]  }
  0x13   :  { %1354 = vmatpush1.bf16.msra.mxu1 %v2696_v18  ;;  %v2742_v50 = vld [vmem:[%s3911_s1 + $0x2c4] ss:$8 sps:$4 sm:$0xff]   ;;  %1377 = vmatprep.mubr.bf16.mxu1 %v2766_v49  ;;  %v2745_v53 = vld [vmem:[%s3911_s1 + $0x2c0] ss:$8 sps:$4 sm:$0xff]   ;;  %v2748_v55 = vld [vmem:[%s3911_s1 + $0x2d4] ss:$8 sps:$4 sm:$0xff]  }
  0x14   :  { %1580 = vmatpush1.bf16.msra.mxu0 %v2697_v19  ;;  %1355 = vmatprep.subr.bf16.mxu1 %v2698_v20  ;;  %v2751_v57 = vld [vmem:[%s3911_s1 + $0x2d0] ss:$8 sps:$4 sm:$0xff]   ;;  %v2752_v58 = vld [vmem:[%s3911_s1 + $0xe4] ss:$8 sps:$4 sm:$0xff]   ;;  %v2756_v60 = vld [vmem:[%s3911_s1 + $0xe0] ss:$8 sps:$4 sm:$0xff]  }
  0x15   :  { %1581 = vmatprep.subr.bf16.mxu0 %v2700_v21  ;;  %v2754_v59 = vld [vmem:[%s3911_s1 + $0x2e4] ss:$8 sps:$4 sm:$0xff]   ;;  %v2757_v61 = vld [vmem:[%s3911_s1 + $0x2e0] ss:$8 sps:$4 sm:$0xff]   ;;  %v2758_v62 = vld [vmem:[%s3911_s1 + $0xf4] ss:$8 sps:$4 sm:$0xff]  }
  0x16   :  { %v2760_v63 = vld [vmem:[%s3911_s1 + $0x2f4] ss:$8 sps:$4 sm:$0xff]   ;;  %v2762_v0 = vld [vmem:[%s3911_s1 + $0xf0] ss:$8 sps:$4 sm:$0xff]   ;;  %v2772_v2 = vld [vmem:[%s3911_s1 + $0x104] ss:$8 sps:$4 sm:$0xff]  }
  0x17   :  { %1356 = vmatpush1.bf16.msra.mxu1 %v2702_v22  ;;  %v2763_v1 = vld [vmem:[%s3911_s1 + $0x2f0] ss:$8 sps:$4 sm:$0xff]   ;;  %v2775_v3 = vld [vmem:[%s3911_s1 + $0x304] ss:$8 sps:$4 sm:$0xff]   ;;  %v2770_v6 = vld [vmem:[%s3911_s1 + $0x100] ss:$8 sps:$4 sm:$0xff]  }
  0x18   :  { %1582 = vmatpush1.bf16.msra.mxu0 %v2703_v23  ;;  %1357 = vmatprep.subr.bf16.mxu1 %v2704_v24  ;;  %v2764_v4 = vld [vmem:[%s3912_s0] ss:$36 sps:$4 sm:$0xff]   ;;  %v2767_v5 = vld [vmem:[%s3912_s0 + $0x10] ss:$36 sps:$4 sm:$0xff]   ;;  %v2786_v16 = vld [vmem:[%s3912_s0 + $0x48] ss:$36 sps:$4 sm:$0xff]  }
  0x19   :  { %1583 = vmatprep.subr.bf16.mxu0 %v2706_v25  ;;  %v2773_v7 = vld [vmem:[%s3911_s1 + $0x300] ss:$8 sps:$4 sm:$0xff]   ;;  %v2778_v8 = vld [vmem:[%s3911_s1 + $0x114] ss:$8 sps:$4 sm:$0xff]   ;;  %v2782_v10 = vld [vmem:[%s3912_s0 + $0x4c] ss:$36 sps:$4 sm:$0xff]  }
  0x1a   :  { %v2781_v9 = vld [vmem:[%s3911_s1 + $0x314] ss:$8 sps:$4 sm:$0xff]   ;;  %v2776_v12 = vld [vmem:[%s3911_s1 + $0x110] ss:$8 sps:$4 sm:$0xff]   ;;  %v2789_v14 = vld [vmem:[%s3911_s1 + $0x124] ss:$8 sps:$4 sm:$0xff]  }
  0x1b   :  { %1358 = vmatpush1.bf16.msra.mxu1 %v2708_v26  ;;  %v2784_v11 = vld [vmem:[%s3912_s0 + $0x5c] ss:$36 sps:$4 sm:$0xff]   ;;  %v2779_v13 = vld [vmem:[%s3911_s1 + $0x310] ss:$8 sps:$4 sm:$0xff]   ;;  %v2793_v15 = vld [vmem:[%s3911_s1 + $0x324] ss:$8 sps:$4 sm:$0xff]  }
  0x1c   :  { %1584 = vmatpush1.bf16.msra.mxu0 %v2709_v27  ;;  %1359 = vmatprep.subr.bf16.mxu1 %v2710_v28  ;;  %v2787_v17 = vld [vmem:[%s3911_s1 + $0x120] ss:$8 sps:$4 sm:$0xff]   ;;  %v2790_v18 = vld [vmem:[%s3912_s0 + $0x58] ss:$36 sps:$4 sm:$0xff]   ;;  %v2807_v26 = vld [vmem:[%s3911_s1 + $0x144] ss:$8 sps:$4 sm:$0xff]  }
  0x1d   :  { %1585 = vmatprep.subr.bf16.mxu0 %v2712_v29  ;;  %v2791_v19 = vld [vmem:[%s3911_s1 + $0x320] ss:$8 sps:$4 sm:$0xff]   ;;  %v2796_v20 = vld [vmem:[%s3911_s1 + $0x134] ss:$8 sps:$4 sm:$0xff]   ;;  %v2794_v24 = vld [vmem:[%s3911_s1 + $0x130] ss:$8 sps:$4 sm:$0xff]  }
  0x1e   :  { %v2799_v21 = vld [vmem:[%s3911_s1 + $0x334] ss:$8 sps:$4 sm:$0xff]   ;;  %v2802_v23 = vld [vmem:[%s3912_s0 + $0xa4] ss:$36 sps:$4 sm:$0xff]   ;;  %v2797_v25 = vld [vmem:[%s3911_s1 + $0x330] ss:$8 sps:$4 sm:$0xff]  }
  0x1f   :  { %1360 = vmatpush1.bf16.msra.mxu1 %v2714_v30  ;;  %v2800_v22 = vld [vmem:[%s3912_s0 + $0x94] ss:$36 sps:$4 sm:$0xff]   ;;  %v2811_v27 = vld [vmem:[%s3911_s1 + $0x344] ss:$8 sps:$4 sm:$0xff]   ;;  %v2805_v29 = vld [vmem:[%s3911_s1 + $0x140] ss:$8 sps:$4 sm:$0xff]  }
  0x20   :  { %1586 = vmatpush1.bf16.msra.mxu0 %v2715_v31  ;;  %1361 = vmatprep.subr.bf16.mxu1 %v2716_v32  ;;  %v2804_v28 = vld [vmem:[%s3912_s0 + $0x90] ss:$36 sps:$4 sm:$0xff]   ;;  %v2808_v30 = vld [vmem:[%s3912_s0 + $0xa0] ss:$36 sps:$4 sm:$0xff]  }
  0x21   :  { %1587 = vmatprep.subr.bf16.mxu0 %v2718_v33  ;;  %v2809_v31 = vld [vmem:[%s3911_s1 + $0x340] ss:$8 sps:$4 sm:$0xff]   ;;  %v2814_v32 = vld [vmem:[%s3911_s1 + $0x154] ss:$8 sps:$4 sm:$0xff]   ;;  %v2833_v49 = vld [vmem:[%s3911_s1 + $0x370] ss:$8 sps:$4 sm:$0xff]  }
  0x22   :  { %v2817_v33 = vld [vmem:[%s3911_s1 + $0x354] ss:$8 sps:$4 sm:$0xff]   ;;  %v2847_v51 = vld [vmem:[%s3911_s1 + $0x384] ss:$8 sps:$4 sm:$0xff]  }
  0x23   :  { %1362 = vmatpush1.bf16.msra.mxu1 %v2720_v34  ;;  %v2818_v34 = vld [vmem:[%s3912_s0 + $0xdc] ss:$36 sps:$4 sm:$0xff]  }
  0x24   :  { %1588 = vmatpush1.bf16.msra.mxu0 %v2721_v35  ;;  %1363 = vmatprep.subr.bf16.mxu1 %v2722_v36  ;;  %v2820_v35 = vld [vmem:[%s3912_s0 + $0xec] ss:$36 sps:$4 sm:$0xff]  }
  0x25   :  { %1589 = vmatprep.subr.bf16.mxu0 %v2724_v37  ;;  %v2812_v36 = vld [vmem:[%s3911_s1 + $0x150] ss:$8 sps:$4 sm:$0xff]  }
  0x26   :  { %v2815_v37 = vld [vmem:[%s3911_s1 + $0x350] ss:$8 sps:$4 sm:$0xff]  }
  0x27   :  { %1364 = vmatpush1.bf16.msra.mxu1 %v2726_v38  ;;  %v2825_v38 = vld [vmem:[%s3911_s1 + $0x164] ss:$8 sps:$4 sm:$0xff]  }
  0x28   :  { %1590 = vmatpush1.bf16.msra.mxu0 %v2727_v39  ;;  %1365 = vmatprep.subr.bf16.mxu1 %v2728_v40  ;;  %v2829_v39 = vld [vmem:[%s3911_s1 + $0x364] ss:$8 sps:$4 sm:$0xff]   ;;  %v2822_v40 = vld [vmem:[%s3912_s0 + $0xd8] ss:$36 sps:$4 sm:$0xff]  }
  0x29   :  { %1591 = vmatprep.subr.bf16.mxu0 %v2730_v41  ;;  %v2823_v41 = vld [vmem:[%s3911_s1 + $0x160] ss:$8 sps:$4 sm:$0xff]  }
  0x2b   :  { %1366 = vmatpush1.bf16.msra.mxu1 %v2732_v42  ;;  %v2826_v42 = vld [vmem:[%s3912_s0 + $0xe8] ss:$36 sps:$4 sm:$0xff]  }
  0x2c   :  { %1592 = vmatpush1.bf16.msra.mxu0 %v2733_v43  ;;  %1367 = vmatprep.subr.bf16.mxu1 %v2734_v44  ;;  %v2827_v43 = vld [vmem:[%s3911_s1 + $0x360] ss:$8 sps:$4 sm:$0xff]   ;;  %v2832_v44 = vld [vmem:[%s3911_s1 + $0x174] ss:$8 sps:$4 sm:$0xff]  }
  0x2d   :  { %1593 = vmatprep.subr.bf16.mxu0 %v2736_v45  ;;  %v2835_v45 = vld [vmem:[%s3911_s1 + $0x374] ss:$8 sps:$4 sm:$0xff]  }
  0x2f   :  { %1368 = vmatpush1.bf16.msra.mxu1 %v2738_v46  ;;  %v2836_v46 = vld [vmem:[%s3912_s0 + $0x124] ss:$36 sps:$4 sm:$0xff]  }
  0x30   :  { %1594 = vmatpush1.bf16.msra.mxu0 %v2739_v47  ;;  %1369 = vmatprep.subr.bf16.mxu1 %v2740_v48  ;;  %v2838_v47 = vld [vmem:[%s3912_s0 + $0x134] ss:$36 sps:$4 sm:$0xff]  }
  0x31   :  { %1595 = vmatprep.subr.bf16.mxu0 %v2742_v50  ;;  %v2830_v48 = vld [vmem:[%s3911_s1 + $0x170] ss:$8 sps:$4 sm:$0xff]   ;;  %v2843_v50 = vld [vmem:[%s3911_s1 + $0x184] ss:$8 sps:$4 sm:$0xff]  }
  0x33   :  { %1370 = vmatpush1.bf16.msra.mxu1 %v2744_v52  ;;  %v2840_v52 = vld [vmem:[%s3912_s0 + $0x120] ss:$36 sps:$4 sm:$0xff]  }
  0x34   :  { %1596 = vmatpush1.bf16.msra.mxu0 %v2745_v53  ;;  %1371 = vmatprep.subr.bf16.mxu1 %v2746_v54  ;;  %v2841_v53 = vld [vmem:[%s3911_s1 + $0x180] ss:$8 sps:$4 sm:$0xff]   ;;  %v2844_v54 = vld [vmem:[%s3912_s0 + $0x130] ss:$36 sps:$4 sm:$0xff]  }
  0x35   :  { %1597 = vmatprep.subr.bf16.mxu0 %v2748_v55  ;;  %v2845_v55 = vld [vmem:[%s3911_s1 + $0x380] ss:$8 sps:$4 sm:$0xff]  }
  0x37   :  { %1372 = vmatpush1.bf16.msra.mxu1 %v2750_v56  ;;  %v2850_v56 = vld [vmem:[%s3911_s1 + $0x194] ss:$8 sps:$4 sm:$0xff]  }
  0x38   :  { %1598 = vmatpush1.bf16.msra.mxu0 %v2751_v57  ;;  %1373 = vmatprep.subr.bf16.mxu1 %v2752_v58  ;;  %v2853_v57 = vld [vmem:[%s3911_s1 + $0x394] ss:$8 sps:$4 sm:$0xff]   ;;  %v2854_v58 = vld [vmem:[%s3912_s0 + $0x16c] ss:$36 sps:$4 sm:$0xff]  }
  0x39   :  { %1599 = vmatprep.subr.bf16.mxu0 %v2754_v59  ;;  %v2856_v59 = vld [vmem:[%s3912_s0 + $0x17c] ss:$36 sps:$4 sm:$0xff]  }
  0x3b   :  { %1374 = vmatpush1.bf16.msra.mxu1 %v2756_v60  ;;  %v2848_v60 = vld [vmem:[%s3911_s1 + $0x190] ss:$8 sps:$4 sm:$0xff]  }
  0x3c   :  { %1600 = vmatpush1.bf16.msra.mxu0 %v2757_v61  ;;  %1375 = vmatprep.subr.bf16.mxu1 %v2758_v62  ;;  %v2851_v61 = vld [vmem:[%s3911_s1 + $0x390] ss:$8 sps:$4 sm:$0xff]   ;;  %v2861_v62 = vld [vmem:[%s3911_s1 + $0x1a4] ss:$8 sps:$4 sm:$0xff]  }
  0x3d   :  { %1601 = vmatprep.subr.bf16.mxu0 %v2760_v63  ;;  %v2865_v63 = vld [vmem:[%s3911_s1 + $0x3a4] ss:$8 sps:$4 sm:$0xff]  }
  0x3f   :  { %1376 = vmatpush1.bf16.msra.mxu1 %v2762_v0  ;;  %v2858_v0 = vld [vmem:[%s3912_s0 + $0x168] ss:$36 sps:$4 sm:$0xff]  }
  0x40   :  { %1602 = vmatpush1.bf16.msra.mxu0 %v2763_v1  ;;  %1458 = vmatprep.subr.bf16.mxu1 %v2772_v2  ;;  %v2859_v1 = vld [vmem:[%s3911_s1 + $0x1a0] ss:$8 sps:$4 sm:$0xff]   ;;  %v2862_v2 = vld [vmem:[%s3912_s0 + $0x178] ss:$36 sps:$4 sm:$0xff]  }
  0x41   :  { %1684 = vmatprep.subr.bf16.mxu0 %v2775_v3  ;;  %v2863_v3 = vld [vmem:[%s3911_s1 + $0x3a0] ss:$8 sps:$4 sm:$0xff]  }
  0x42   :  { %1378 = vmatmul.mubr.bf16.vlgmr.msra.gmra.mrb[0].mxu1 %v2764_v4  ;;  %v2868_v4 = vld [vmem:[%s3911_s1 + $0x1b4] ss:$8 sps:$4 sm:$0xff]  }
  0x43   :  { %1604 = vmatmul.mubr.bf16.vlgmr.msra.gmra.mrb[0].mxu0 %v2767_v5  ;;  %1459 = vmatpush1.bf16.msra.mxu1 %v2770_v6  ;;  %v2871_v5 = vld [vmem:[%s3911_s1 + $0x3b4] ss:$8 sps:$4 sm:$0xff]  }
  0x44   :  { %1685 = vmatpush1.bf16.msra.mxu0 %v2773_v7  ;;  %1460 = vmatprep.subr.bf16.mxu1 %v2778_v8  ;;  %v2872_v6 = vld [vmem:[%s3912_s0 + $0x1b4] ss:$36 sps:$4 sm:$0xff]   ;;  %v2874_v7 = vld [vmem:[%s3912_s0 + $0x1c4] ss:$36 sps:$4 sm:$0xff]  }
  0x45   :  { %1686 = vmatprep.subr.bf16.mxu0 %v2781_v9  ;;  %1387 = vmatprep.mubr.bf16.mxu1 %v2782_v10  ;;  %v2866_v8 = vld [vmem:[%s3911_s1 + $0x1b0] ss:$8 sps:$4 sm:$0xff]   ;;  %v2879_v10 = vld [vmem:[%s3911_s1 + $0x1c4] ss:$8 sps:$4 sm:$0xff]  }
  0x46   :  { %1613 = vmatprep.mubr.bf16.mxu0 %v2784_v11  ;;  %v2869_v9 = vld [vmem:[%s3911_s1 + $0x3b0] ss:$8 sps:$4 sm:$0xff]   ;;  %v2883_v11 = vld [vmem:[%s3911_s1 + $0x3c4] ss:$8 sps:$4 sm:$0xff]  }
  0x47   :  { %1461 = vmatpush1.bf16.msra.mxu1 %v2776_v12  ;;  %v2876_v12 = vld [vmem:[%s3912_s0 + $0x1b0] ss:$36 sps:$4 sm:$0xff]  }
  0x48   :  { %1687 = vmatpush1.bf16.msra.mxu0 %v2779_v13  ;;  %1462 = vmatprep.subr.bf16.mxu1 %v2789_v14  ;;  %v2877_v13 = vld [vmem:[%s3911_s1 + $0x1c0] ss:$8 sps:$4 sm:$0xff]  }
  0x49   :  { %1688 = vmatprep.subr.bf16.mxu0 %v2793_v15  ;;  %v2880_v14 = vld [vmem:[%s3912_s0 + $0x1c0] ss:$36 sps:$4 sm:$0xff]  }
  0x4a   :  { %1388 = vmatmul.mubr.bf16.gmra.mrb[4].mxu1 %v2786_v16  ;;  %v2881_v15 = vld [vmem:[%s3911_s1 + $0x3c0] ss:$8 sps:$4 sm:$0xff]   ;;  %v2886_v16 = vld [vmem:[%s3911_s1 + $0x1d4] ss:$8 sps:$4 sm:$0xff]  }
  0x4b   :  { %1614 = vmatmul.mubr.bf16.gmra.mrb[4].mxu0 %v2790_v18  ;;  %1463 = vmatpush1.bf16.msra.mxu1 %v2787_v17  ;;  %v2889_v17 = vld [vmem:[%s3911_s1 + $0x3d4] ss:$8 sps:$4 sm:$0xff]  }
  0x4c   :  { %1689 = vmatpush1.bf16.msra.mxu0 %v2791_v19  ;;  %1464 = vmatprep.subr.bf16.mxu1 %v2796_v20  ;;  %v2890_v18 = vld [vmem:[%s3912_s0 + $0x1fc] ss:$36 sps:$4 sm:$0xff]   ;;  %v2892_v19 = vld [vmem:[%s3912_s0 + $0x20c] ss:$36 sps:$4 sm:$0xff]  }
  0x4d   :  { %1690 = vmatprep.subr.bf16.mxu0 %v2799_v21  ;;  %1397 = vmatprep.mubr.bf16.mxu1 %v2800_v22  ;;  %v2884_v20 = vld [vmem:[%s3911_s1 + $0x1d0] ss:$8 sps:$4 sm:$0xff]   ;;  %v2897_v22 = vld [vmem:[%s3911_s1 + $0x1e4] ss:$8 sps:$4 sm:$0xff]  }
  0x4e   :  { %1623 = vmatprep.mubr.bf16.mxu0 %v2802_v23  ;;  %v2887_v21 = vld [vmem:[%s3911_s1 + $0x3d0] ss:$8 sps:$4 sm:$0xff]   ;;  %v2901_v23 = vld [vmem:[%s3911_s1 + $0x3e4] ss:$8 sps:$4 sm:$0xff]  }
  0x4f   :  { %1465 = vmatpush1.bf16.msra.mxu1 %v2794_v24  ;;  %v2894_v24 = vld [vmem:[%s3912_s0 + $0x1f8] ss:$36 sps:$4 sm:$0xff]  }
  0x50   :  { %1691 = vmatpush1.bf16.msra.mxu0 %v2797_v25  ;;  %1466 = vmatprep.subr.bf16.mxu1 %v2807_v26  ;;  %v2895_v25 = vld [vmem:[%s3911_s1 + $0x1e0] ss:$8 sps:$4 sm:$0xff]  }
  0x51   :  { %1692 = vmatprep.subr.bf16.mxu0 %v2811_v27  ;;  %v2898_v26 = vld [vmem:[%s3912_s0 + $0x208] ss:$36 sps:$4 sm:$0xff]  }
  0x52   :  { %1398 = vmatmul.mubr.bf16.gmra.mrb[8].mxu1 %v2804_v28  ;;  %v2899_v27 = vld [vmem:[%s3911_s1 + $0x3e0] ss:$8 sps:$4 sm:$0xff]   ;;  %v2904_v28 = vld [vmem:[%s3911_s1 + $0x1f4] ss:$8 sps:$4 sm:$0xff]  }
  0x53   :  { %1624 = vmatmul.mubr.bf16.gmra.mrb[8].mxu0 %v2808_v30  ;;  %1467 = vmatpush1.bf16.msra.mxu1 %v2805_v29  ;;  %v2907_v29 = vld [vmem:[%s3911_s1 + $0x3f4] ss:$8 sps:$4 sm:$0xff]   ;;  %v2910_v30 = vld [vmem:[%s3912_s0 + $0xc] ss:$36 sps:$4 sm:$0xff]  }
  0x54   :  { %1693 = vmatpush1.bf16.msra.mxu0 %v2809_v31  ;;  %1468 = vmatprep.subr.bf16.mxu1 %v2814_v32  ;;  %v2913_v31 = vld [vmem:[%s3912_s0 + $0x1c] ss:$36 sps:$4 sm:$0xff]   ;;  %v2902_v32 = vld [vmem:[%s3911_s1 + $0x1f0] ss:$8 sps:$4 sm:$0xff]  }
  0x55   :  { %1694 = vmatprep.subr.bf16.mxu0 %v2817_v33  ;;  %1407 = vmatprep.mubr.bf16.mxu1 %v2818_v34  ;;  %v2905_v33 = vld [vmem:[%s3911_s1 + $0x3f0] ss:$8 sps:$4 sm:$0xff]   ;;  %v2916_v34 = vld [vmem:[%s3911_s1 + $0x404] ss:$8 sps:$4 sm:$0xff]  }
  0x56   :  { %1633 = vmatprep.mubr.bf16.mxu0 %v2820_v35  ;;  %v2908_v35 = vld [vmem:[%s3912_s0 + $0x8] ss:$36 sps:$4 sm:$0xff]  }
  0x57   :  { %1469 = vmatpush1.bf16.msra.mxu1 %v2812_v36  ;;  %v2911_v36 = vld [vmem:[%s3912_s0 + $0x18] ss:$36 sps:$4 sm:$0xff]  }
  0x58   :  { %1695 = vmatpush1.bf16.msra.mxu0 %v2815_v37  ;;  %1470 = vmatprep.subr.bf16.mxu1 %v2825_v38  ;;  %v2914_v37 = vld [vmem:[%s3911_s1 + $0x400] ss:$8 sps:$4 sm:$0xff]   ;;  %v2917_v38 = vld [vmem:[%s3912_s0 + $0x54] ss:$36 sps:$4 sm:$0xff]  }
  0x59   :  { %1696 = vmatprep.subr.bf16.mxu0 %v2829_v39  ;;  %v2919_v39 = vld [vmem:[%s3912_s0 + $0x64] ss:$36 sps:$4 sm:$0xff]  }
  0x5a   :  { %1408 = vmatmul.mubr.bf16.gmra.mrb[12].mxu1 %v2822_v40  ;;  %v2925_v40 = vld [vmem:[%s3911_s1 + $0x414] ss:$8 sps:$4 sm:$0xff]  }
  0x5b   :  { %1634 = vmatmul.mubr.bf16.gmra.mrb[12].mxu0 %v2826_v42  ;;  %1471 = vmatpush1.bf16.msra.mxu1 %v2823_v41  ;;  %v2923_v41 = vld [vmem:[%s3911_s1 + $0x410] ss:$8 sps:$4 sm:$0xff]   ;;  %v2934_v42 = vld [vmem:[%s3911_s1 + $0x424] ss:$8 sps:$4 sm:$0xff]  }
  0x5c   :  { %1697 = vmatpush1.bf16.msra.mxu0 %v2827_v43  ;;  %1472 = vmatprep.subr.bf16.mxu1 %v2832_v44  ;;  %v2921_v43 = vld [vmem:[%s3912_s0 + $0x50] ss:$36 sps:$4 sm:$0xff]   ;;  %v2922_v44 = vld [vmem:[%s3912_s0 + $0x60] ss:$36 sps:$4 sm:$0xff]  }
  0x5d   :  { %1698 = vmatprep.subr.bf16.mxu0 %v2835_v45  ;;  %1417 = vmatprep.mubr.bf16.mxu1 %v2836_v46  ;;  %v2926_v45 = vld [vmem:[%s3912_s0 + $0x9c] ss:$36 sps:$4 sm:$0xff]   ;;  %v2928_v46 = vld [vmem:[%s3912_s0 + $0xac] ss:$36 sps:$4 sm:$0xff]  }
  0x5e   :  { %1643 = vmatprep.mubr.bf16.mxu0 %v2838_v47  ;;  %v2932_v47 = vld [vmem:[%s3911_s1 + $0x420] ss:$8 sps:$4 sm:$0xff]  }
  0x5f   :  { %1473 = vmatpush1.bf16.msra.mxu1 %v2830_v48  ;;  %v2943_v48 = vld [vmem:[%s3911_s1 + $0x434] ss:$8 sps:$4 sm:$0xff]  }
  0x60   :  { %1699 = vmatpush1.bf16.msra.mxu0 %v2833_v49  ;;  %1474 = vmatprep.subr.bf16.mxu1 %v2843_v50  ;;  %v2930_v49 = vld [vmem:[%s3912_s0 + $0x98] ss:$36 sps:$4 sm:$0xff]   ;;  %v2931_v50 = vld [vmem:[%s3912_s0 + $0xa8] ss:$36 sps:$4 sm:$0xff]  }
  0x61   :  { %1700 = vmatprep.subr.bf16.mxu0 %v2847_v51  ;;  %v2941_v51 = vld [vmem:[%s3911_s1 + $0x430] ss:$8 sps:$4 sm:$0xff]  }
  0x62   :  { %1418 = vmatmul.mubr.bf16.gmra.mrb[16].mxu1 %v2840_v52  ;;  %v2952_v52 = vld [vmem:[%s3911_s1 + $0x444] ss:$8 sps:$4 sm:$0xff]  }
  0x63   :  { %1644 = vmatmul.mubr.bf16.gmra.mrb[16].mxu0 %v2844_v54  ;;  %1475 = vmatpush1.bf16.msra.mxu1 %v2841_v53  ;;  %v2935_v53 = vld [vmem:[%s3912_s0 + $0xe4] ss:$36 sps:$4 sm:$0xff]   ;;  %v2937_v54 = vld [vmem:[%s3912_s0 + $0xf4] ss:$36 sps:$4 sm:$0xff]  }
  0x64   :  { %1701 = vmatpush1.bf16.msra.mxu0 %v2845_v55  ;;  %1476 = vmatprep.subr.bf16.mxu1 %v2850_v56  ;;  %v2950_v55 = vld [vmem:[%s3911_s1 + $0x440] ss:$8 sps:$4 sm:$0xff]   ;;  %v2961_v56 = vld [vmem:[%s3911_s1 + $0x454] ss:$8 sps:$4 sm:$0xff]  }
  0x65   :  { %1702 = vmatprep.subr.bf16.mxu0 %v2853_v57  ;;  %1427 = vmatprep.mubr.bf16.mxu1 %v2854_v58  ;;  %v2959_v57 = vld [vmem:[%s3911_s1 + $0x450] ss:$8 sps:$4 sm:$0xff]   ;;  %v2970_v58 = vld [vmem:[%s3911_s1 + $0x464] ss:$8 sps:$4 sm:$0xff]  }
  0x66   :  { %1653 = vmatprep.mubr.bf16.mxu0 %v2856_v59  ;;  %v2939_v59 = vld [vmem:[%s3912_s0 + $0xe0] ss:$36 sps:$4 sm:$0xff]  }
  0x67   :  { %1477 = vmatpush1.bf16.msra.mxu1 %v2848_v60  ;;  %v2940_v60 = vld [vmem:[%s3912_s0 + $0xf0] ss:$36 sps:$4 sm:$0xff]  }
  0x68   :  { %1703 = vmatpush1.bf16.msra.mxu0 %v2851_v61  ;;  %1478 = vmatprep.subr.bf16.mxu1 %v2861_v62  ;;  %v2944_v61 = vld [vmem:[%s3912_s0 + $0x12c] ss:$36 sps:$4 sm:$0xff]   ;;  %v2946_v62 = vld [vmem:[%s3912_s0 + $0x13c] ss:$36 sps:$4 sm:$0xff]  }
  0x69   :  { %1704 = vmatprep.subr.bf16.mxu0 %v2865_v63  ;;  %v2968_v63 = vld [vmem:[%s3911_s1 + $0x460] ss:$8 sps:$4 sm:$0xff]  }
  0x6a   :  { %1428 = vmatmul.mubr.bf16.gmra.mrb[20].mxu1 %v2858_v0  ;;  %v2979_v0 = vld [vmem:[%s3911_s1 + $0x474] ss:$8 sps:$4 sm:$0xff]  }
  0x6b   :  { %1654 = vmatmul.mubr.bf16.gmra.mrb[20].mxu0 %v2862_v2  ;;  %1479 = vmatpush1.bf16.msra.mxu1 %v2859_v1  ;;  %v2977_v1 = vld [vmem:[%s3911_s1 + $0x470] ss:$8 sps:$4 sm:$0xff]   ;;  %v2948_v2 = vld [vmem:[%s3912_s0 + $0x128] ss:$36 sps:$4 sm:$0xff]  }
  0x6c   :  { %1705 = vmatpush1.bf16.msra.mxu0 %v2863_v3  ;;  %1480 = vmatprep.subr.bf16.mxu1 %v2868_v4  ;;  %v2949_v3 = vld [vmem:[%s3912_s0 + $0x138] ss:$36 sps:$4 sm:$0xff]  }
  0x6d   :  { %1706 = vmatprep.subr.bf16.mxu0 %v2871_v5  ;;  %1437 = vmatprep.mubr.bf16.mxu1 %v2872_v6  ;;  %v2953_v4 = vld [vmem:[%s3912_s0 + $0x174] ss:$36 sps:$4 sm:$0xff]   ;;  %v2955_v5 = vld [vmem:[%s3912_s0 + $0x184] ss:$36 sps:$4 sm:$0xff]  }
  0x6e   :  { %1663 = vmatprep.mubr.bf16.mxu0 %v2874_v7  ;;  %v2957_v6 = vld [vmem:[%s3912_s0 + $0x170] ss:$36 sps:$4 sm:$0xff]   ;;  %v2958_v7 = vld [vmem:[%s3912_s0 + $0x180] ss:$36 sps:$4 sm:$0xff]  }
  0x6f   :  { %1481 = vmatpush1.bf16.msra.mxu1 %v2866_v8  ;;  %v2962_v8 = vld [vmem:[%s3912_s0 + $0x1bc] ss:$36 sps:$4 sm:$0xff]  }
  0x70   :  { %1707 = vmatpush1.bf16.msra.mxu0 %v2869_v9  ;;  %1482 = vmatprep.subr.bf16.mxu1 %v2879_v10  ;;  %v2964_v9 = vld [vmem:[%s3912_s0 + $0x1cc] ss:$36 sps:$4 sm:$0xff]   ;;  %v2966_v10 = vld [vmem:[%s3912_s0 + $0x1b8] ss:$36 sps:$4 sm:$0xff]  }
  0x71   :  { %1708 = vmatprep.subr.bf16.mxu0 %v2883_v11  ;;  %v2967_v11 = vld [vmem:[%s3912_s0 + $0x1c8] ss:$36 sps:$4 sm:$0xff]  }
  0x72   :  { %1438 = vmatmul.mubr.bf16.gmra.mrb[24].mxu1 %v2876_v12  ;;  %v2971_v12 = vld [vmem:[%s3912_s0 + $0x204] ss:$36 sps:$4 sm:$0xff]  }
  0x73   :  { %1664 = vmatmul.mubr.bf16.gmra.mrb[24].mxu0 %v2880_v14  ;;  %1483 = vmatpush1.bf16.msra.mxu1 %v2877_v13  ;;  %v2973_v13 = vld [vmem:[%s3912_s0 + $0x214] ss:$36 sps:$4 sm:$0xff]   ;;  %v2975_v14 = vld [vmem:[%s3912_s0 + $0x200] ss:$36 sps:$4 sm:$0xff]  }
  0x74   :  { %1709 = vmatpush1.bf16.msra.mxu0 %v2881_v15  ;;  %1484 = vmatprep.subr.bf16.mxu1 %v2886_v16  ;;  %v2976_v15 = vld [vmem:[%s3912_s0 + $0x210] ss:$36 sps:$4 sm:$0xff]   ;;  %v3004_v16 = vmov 0  }
  0x75   :  { %1710 = vmatprep.subr.bf16.mxu0 %v2889_v17  ;;  %1447 = vmatprep.mubr.bf16.mxu1 %v2890_v18  ;;  %v2980_v17 = vld [vmem:[%s3912_s0 + $0x20] ss:$36 sps:$4 sm:$0xff]   ;;  %v2981_v18 = vld [vmem:[%s3912_s0 + $0x68] ss:$36 sps:$4 sm:$0xff]  }
  0x76   :  { %1673 = vmatprep.mubr.bf16.mxu0 %v2892_v19  ;;  %v2982_v19 = vld [vmem:[%s3912_s0 + $0xb0] ss:$36 sps:$4 sm:$0xff]  }
  0x77   :  { %1485 = vmatpush1.bf16.msra.mxu1 %v2884_v20  ;;  %v2983_v20 = vld [vmem:[%s3912_s0 + $0xf8] ss:$36 sps:$4 sm:$0xff]  }
  0x78   :  { %1711 = vmatpush1.bf16.msra.mxu0 %v2887_v21  ;;  %1486 = vmatprep.subr.bf16.mxu1 %v2897_v22  ;;  %v2984_v21 = vld [vmem:[%s3912_s0 + $0x140] ss:$36 sps:$4 sm:$0xff]  }
  0x79   :  { %1712 = vmatprep.subr.bf16.mxu0 %v2901_v23  ;;  %v2988_v22 = vld [vmem:[%s3913_s3 + $0x40] sm:$0xff]  }
  0x7a   :  { %1448 = vmatmul.mubr.bf16.gmra.mrb[28].mxu1 %v2894_v24  ;;  %v2989_v23 = vld [vmem:[%s3913_s3] sm:$0xff]   ;;  %v2985_v24 = vld [vmem:[%s3912_s0 + $0x188] ss:$36 sps:$4 sm:$0xff]  }
  0x7b   :  { %1674 = vmatmul.mubr.bf16.gmra.mrb[28].mxu0 %v2898_v26  ;;  %1487 = vmatpush1.bf16.msra.mxu1 %v2895_v25  ;;  %v2990_v25 = vld [vmem:[%s3913_s3 + $0x48] sm:$0xff]  }
  0x7c   :  { %1713 = vmatpush1.bf16.msra.mxu0 %v2899_v27  ;;  %1488 = vmatprep.subr.bf16.mxu1 %v2904_v28  ;;  %v2991_v26 = vld [vmem:[%s3913_s3 + $0x8] sm:$0xff]   ;;  %v2986_v27 = vld [vmem:[%s3912_s0 + $0x1d0] ss:$36 sps:$4 sm:$0xff]  }
  0x7d   :  { %1714 = vmatprep.subr.bf16.mxu0 %v2907_v29  ;;  %1490 = vmatprep.mubr.bf16.mxu1 %v2910_v30  ;;  %v2992_v28 = vld [vmem:[%s3913_s3 + $0x50] sm:$0xff]   ;;  %v2987_v30 = vld [vmem:[%s3912_s0 + $0x218] ss:$36 sps:$4 sm:$0xff]  }
  0x7e   :  { %1716 = vmatprep.mubr.bf16.mxu0 %v2913_v31  ;;  %v2993_v29 = vld [vmem:[%s3913_s3 + $0x10] sm:$0xff]   ;;  %v2994_v31 = vld [vmem:[%s3913_s3 + $0x58] sm:$0xff]  }
  0x7f   :  { %1489 = vmatpush1.bf16.msra.mxu1 %v2902_v32  ;;  %v2995_v32 = vld [vmem:[%s3913_s3 + $0x18] sm:$0xff]  }
  0x80   :  { %1715 = vmatpush1.bf16.msra.mxu0 %v2905_v33  ;;  %2443 = vmatprep.subr.bf16.mxu1 %v2988_v22  ;;  %v2996_v33 = vld [vmem:[%s3913_s3 + $0x60] sm:$0xff]  }
  0x81   :  { %1797 = vmatprep.subr.bf16.mxu0 %v2916_v34  ;;  %v2997_v34 = vld [vmem:[%s3913_s3 + $0x20] sm:$0xff]  }
  0x82   :  { %1491 = vmatmul.mubr.bf16.vlgmr.msra.gmra.mrb[0].mxu1 %v2908_v35  ;;  %v2998_v35 = vld [vmem:[%s3913_s3 + $0x68] sm:$0xff]  }
  0x83   :  { %1717 = vmatmul.mubr.bf16.vlgmr.msra.gmra.mrb[0].mxu0 %v2911_v36  ;;  %1500 = vmatprep.mubr.bf16.mxu1 %v2917_v38  ;;  %v2999_v36 = vld [vmem:[%s3913_s3 + $0x28] sm:$0xff]   ;;  %v3001_v38 = vld [vmem:[%s3913_s3 + $0x30] sm:$0xff]  }
  0x84   :  { %1798 = vmatpush1.bf16.msra.mxu0 %v2914_v37  ;;  %1726 = vmatprep.mubr.bf16.mxu0 %v2919_v39  ;;  %v3000_v37 = vld [vmem:[%s3913_s3 + $0x70] sm:$0xff]   ;;  %v3002_v39 = vld [vmem:[%s3913_s3 + $0x78] sm:$0xff]  }
  0x85   :  { %1799 = vmatprep.subr.bf16.mxu0 %v2925_v40  ;;  %2444 = vmatpush3.bf16.msra.mxu1 %v2989_v23  ;;  %v3003_v40 = vld [vmem:[%s3913_s3 + $0x38] sm:$0xff]  }
  0x86   :  { %2445 = vmatprep.subr.bf16.mxu1 %v2990_v25 }
  0x88   :  { %1800 = vmatpush1.bf16.msra.mxu0 %v2923_v41 }
  0x89   :  { %1801 = vmatprep.subr.bf16.mxu0 %v2934_v42  ;;  %2446 = vmatpush3.bf16.msra.mxu1 %v2991_v26 }
  0x8a   :  { %1501 = vmatmul.mubr.bf16.gmra.mrb[4].mxu1 %v2921_v43  ;;  %2447 = vmatprep.subr.bf16.mxu1 %v2992_v28 }
  0x8b   :  { %1727 = vmatmul.mubr.bf16.gmra.mrb[4].mxu0 %v2922_v44  ;;  %1510 = vmatprep.mubr.bf16.mxu1 %v2926_v45 }
  0x8c   :  { %1736 = vmatprep.mubr.bf16.mxu0 %v2928_v46  ;;  %1802 = vmatpush1.bf16.msra.mxu0 %v2932_v47 }
  0x8d   :  { %1803 = vmatprep.subr.bf16.mxu0 %v2943_v48  ;;  %2448 = vmatpush3.bf16.msra.mxu1 %v2993_v29 }
  0x8e   :  { %2449 = vmatprep.subr.bf16.mxu1 %v2994_v31 }
  0x90   :  { %1804 = vmatpush1.bf16.msra.mxu0 %v2941_v51 }
  0x91   :  { %1805 = vmatprep.subr.bf16.mxu0 %v2952_v52  ;;  %2450 = vmatpush3.bf16.msra.mxu1 %v2995_v32 }
  0x92   :  { %1511 = vmatmul.mubr.bf16.gmra.mrb[8].mxu1 %v2930_v49  ;;  %2451 = vmatprep.subr.bf16.mxu1 %v2996_v33 }
  0x93   :  { %1737 = vmatmul.mubr.bf16.gmra.mrb[8].mxu0 %v2931_v50  ;;  %1520 = vmatprep.mubr.bf16.mxu1 %v2935_v53 }
  0x94   :  { %1746 = vmatprep.mubr.bf16.mxu0 %v2937_v54  ;;  %1806 = vmatpush1.bf16.msra.mxu0 %v2950_v55 }
  0x95   :  { %1807 = vmatprep.subr.bf16.mxu0 %v2961_v56  ;;  %2452 = vmatpush3.bf16.msra.mxu1 %v2997_v34 }
  0x96   :  { %2453 = vmatprep.subr.bf16.mxu1 %v2998_v35 }
  0x98   :  { %1808 = vmatpush1.bf16.msra.mxu0 %v2959_v57 }
  0x99   :  { %1809 = vmatprep.subr.bf16.mxu0 %v2970_v58  ;;  %2454 = vmatpush3.bf16.msra.mxu1 %v2999_v36 }
  0x9a   :  { %1521 = vmatmul.mubr.bf16.gmra.mrb[12].mxu1 %v2939_v59  ;;  %2455 = vmatprep.subr.bf16.mxu1 %v3000_v37 }
  0x9b   :  { %1747 = vmatmul.mubr.bf16.gmra.mrb[12].mxu0 %v2940_v60  ;;  %1530 = vmatprep.mubr.bf16.mxu1 %v2944_v61 }
  0x9c   :  { %1756 = vmatprep.mubr.bf16.mxu0 %v2946_v62  ;;  %1810 = vmatpush1.bf16.msra.mxu0 %v2968_v63 }
  0x9d   :  { %1811 = vmatprep.subr.bf16.mxu0 %v2979_v0  ;;  %2456 = vmatpush3.bf16.msra.mxu1 %v3001_v38 }
  0x9e   :  { %2457 = vmatprep.subr.bf16.mxu1 %v3002_v39 }
  0xa0   :  { %1812 = vmatpush1.bf16.msra.mxu0 %v2977_v1  ;;  %v247_v1 = vlaneseq }
  0xa1   :  { %2458 = vmatpush3.bf16.msra.mxu1 %v3003_v40 }
  0xa2   :  { %1531 = vmatmul.mubr.bf16.gmra.mrb[16].mxu1 %v2948_v2 }
  0xa3   :  { %1757 = vmatmul.mubr.bf16.gmra.mrb[16].mxu0 %v2949_v3  ;;  %1540 = vmatprep.mubr.bf16.mxu1 %v2953_v4 }
  0xa4   :  { %1766 = vmatprep.mubr.bf16.mxu0 %v2955_v5  ;;  %v248_v5 = vshrl.u32 %v247_v1, 7 }
  0xaa   :  { %1541 = vmatmul.mubr.bf16.gmra.mrb[20].mxu1 %v2957_v6 }
  0xab   :  { %1767 = vmatmul.mubr.bf16.gmra.mrb[20].mxu0 %v2958_v7  ;;  %1550 = vmatprep.mubr.bf16.mxu1 %v2962_v8  ;;  %v249_v7 = vsub.s32 0, %v248_v5  ;;  %v245_v8 = vld [vmem:[%s3914_s2] sm:$0x3] }
  0xac   :  { %1776 = vmatprep.mubr.bf16.mxu0 %v2964_v9  ;;  %v253_v9 = vsub.s32 1, %v248_v5 }
  0xb2   :  { %1551 = vmatmul.mubr.bf16.gmra.mrb[24].mxu1 %v2966_v10 }
  0xb3   :  { %1777 = vmatmul.mubr.bf16.gmra.mrb[24].mxu0 %v2967_v11  ;;  %1560 = vmatprep.mubr.bf16.mxu1 %v2971_v12 }
  0xb4   :  { %1786 = vmatprep.mubr.bf16.mxu0 %v2973_v13  ;;  %v3780_v13 = vrot.slane %v245_v8, %v249_v7 }
  0xba   :  { %1561 = vmatmul.mubr.bf16.gmra.mrb[28].mxu1 %v2975_v14 }
  0xbb   :  { %1787 = vmatmul.mubr.bf16.gmra.mrb[28].mxu0 %v2976_v15  ;;  %v3784_v15 = vrot.slane %v245_v8, %v253_v9 }
  0xbc   :  { %1829 = vmatprep.mubr.bf16.mxu0 %v3004_v16 }
  0xc3   :  { %1830 = vmatmul.mubr.bf16.vlgmr.msra.gmra.mrb[0].mxu0 %v2980_v17 }
  0xc4   :  { %1839 = vmatprep.mubr.bf16.mxu0 %v3004_v16 }
  0xcb   :  { %1840 = vmatmul.mubr.bf16.gmra.mrb[4].mxu0 %v2981_v18 }
  0xcc   :  { %1849 = vmatprep.mubr.bf16.mxu0 %v3004_v16 }
  0xd3   :  { %1850 = vmatmul.mubr.bf16.gmra.mrb[8].mxu0 %v2982_v19 }
  0xd4   :  { %1859 = vmatprep.mubr.bf16.mxu0 %v3004_v16 }
  0xdb   :  { %1860 = vmatmul.mubr.bf16.gmra.mrb[12].mxu0 %v2983_v20 }
  0xdc   :  { %1869 = vmatprep.mubr.bf16.mxu0 %v3004_v16 }
  0xe3   :  { %1870 = vmatmul.mubr.bf16.gmra.mrb[16].mxu0 %v2984_v21 }
  0xe4   :  { %1879 = vmatprep.mubr.bf16.mxu0 %v3004_v16 }
  0xeb   :  { %1880 = vmatmul.mubr.bf16.gmra.mrb[20].mxu0 %v2985_v24 }
  0xec   :  { %1889 = vmatprep.mubr.bf16.mxu0 %v3004_v16 }
  0xf3   :  { %1890 = vmatmul.mubr.bf16.gmra.mrb[24].mxu0 %v2986_v27 }
  0xf4   :  { %1899 = vmatprep.mubr.bf16.mxu0 %v3004_v16 }
  0xfb   :  { %1900 = vmatmul.mubr.bf16.gmra.mrb[28].mxu0 %v2987_v30 }
 0x155   :  { %v1492_v41 = vpop.f32.mrb[0].mxu1 }
 0x156   :  { %v1494_v42 = vpop.f32.mrb[1].mxu1  ;;  %v2507_v16 = vadd.f32 %v1492_v41, %v3780_v13 }
 0x157   :  { %v1496_v43 = vpop.f32.mrb[2].mxu1  ;;  %v2509_v17 = vadd.f32 %v1494_v42, %v3784_v15 }
 0x158   :  { %v1498_v44 = vpop.f32.mrb[3].mxu1  ;;  %v2511_v19 = vadd.f32 %v1496_v43, %v3780_v13 }
 0x159   :  { %v2513_v22 = vadd.f32 %v1498_v44, %v3784_v15 }
 0x15d   :  { %v1502_v45 = vpop.f32.mrb[4].mxu1 }
 0x15e   :  { %v1504_v46 = vpop.f32.mrb[5].mxu1  ;;  %v2515_v32 = vadd.f32 %v1502_v45, %v3780_v13 }
 0x15f   :  { %v1506_v47 = vpop.f32.mrb[6].mxu1  ;;  %v2517_v34 = vadd.f32 %v1504_v46, %v3784_v15 }
 0x160   :  { %v1508_v48 = vpop.f32.mrb[7].mxu1  ;;  %v2519_v37 = vadd.f32 %v1506_v47, %v3780_v13 }
 0x161   :  { %v2521_v40 = vadd.f32 %v1508_v48, %v3784_v15 }
 0x165   :  { %v3731_v49 = vpop.f32.mrb[8].mxu1 }
 0x166   :  { %v3733_v50 = vpop.f32.mrb[9].mxu1  ;;  %v2523_v46 = vadd.f32 %v3731_v49, %v3780_v13 }
 0x167   :  { %v3735_v51 = vpop.f32.mrb[10].mxu1  ;;  %v2525_v47 = vadd.f32 %v3733_v50, %v3784_v15 }
 0x168   :  { %v3737_v52 = vpop.f32.mrb[11].mxu1 }
 0x16d   :  { %v3739_v53 = vpop.f32.mrb[12].mxu1 }
 0x16e   :  { %v3741_v54 = vpop.f32.mrb[13].mxu1 }
 0x16f   :  { %v3743_v55 = vpop.f32.mrb[14].mxu1 }
 0x170   :  { %v3745_v56 = vpop.f32.mrb[15].mxu1 }
 0x175   :  { %v3747_v57 = vpop.f32.mrb[16].mxu1 }
 0x176   :  { %v3749_v58 = vpop.f32.mrb[17].mxu1 }
 0x177   :  { %v3751_v59 = vpop.f32.mrb[18].mxu1 }
 0x178   :  { %v3753_v60 = vpop.f32.mrb[19].mxu1 }
 0x17d   :  { %v3755_v61 = vpop.f32.mrb[20].mxu1 }
 0x17e   :  { %v3757_v62 = vpop.f32.mrb[21].mxu1 }
 0x17f   :  { %v3759_v63 = vpop.f32.mrb[22].mxu1 }
 0x180   :  { %v3761_v0 = vpop.f32.mrb[23].mxu1 }
 0x185   :  { %v3763_v2 = vpop.f32.mrb[24].mxu1 }
 0x186   :  { %v3765_v3 = vpop.f32.mrb[25].mxu1 }
 0x187   :  { %v3767_v4 = vpop.f32.mrb[26].mxu1 }
 0x188   :  { %v3769_v6 = vpop.f32.mrb[27].mxu1 }
 0x18d   :  { %v3774_v10 = vpop.f32.mrb[28].mxu1 }
 0x18e   :  { %v3776_v11 = vpop.f32.mrb[29].mxu1 }
 0x18f   :  { %v3778_v12 = vpop.f32.mrb[30].mxu1 }
 0x190   :  { %v3782_v14 = vpop.f32.mrb[31].mxu1 }
 0x196   :  { %v1831_v18 = vpop.f32.mrb[0].mxu0 }
 0x197   :  { %v2508_v20 = vadd.f32 %v2507_v16, %v1831_v18  ;;  %v1833_v21 = vpop.f32.mrb[1].mxu0 }
 0x198   :  { %v2510_v23 = vadd.f32 %v2509_v17, %v1833_v21  ;;  %v1835_v24 = vpop.f32.mrb[2].mxu0  ;;  %v2527_v17 = vadd.f32 %v3735_v51, %v3780_v13 }
 0x199   :  { %v2512_v25 = vadd.f32 %v2511_v19, %v1835_v24  ;;  %v1837_v26 = vpop.f32.mrb[3].mxu0  ;;  %v1910_v28 = vmax.f32 %v2508_v20, 0.0  ;;  %v2529_v20 = vadd.f32 %v3737_v52, %v3784_v15 }
 0x19a   :  { %v2514_v27 = vadd.f32 %v2513_v22, %v1837_v26  ;;  %v1911_v30 = vmax.f32 %v2510_v23, 0.0 }
 0x19b   :  { %v1912_v29 = vmax.f32 %v2512_v25, 0.0 }
 0x19c   :  { %v1913_v31 = vmax.f32 %v2514_v27, 0.0 }
 0x19d   :  { %v1942_v33 = vpack.c.bf16 %v1912_v29, %v1910_v28  ;;  %v2531_v28 = vadd.f32 %v3739_v53, %v3780_v13  ;;  %v2533_v29 = vadd.f32 %v3741_v54, %v3784_v15 }
 0x19e   :  { %v1943_v35 = vpack.c.bf16 %v1913_v31, %v1911_v30  ;;  %v1841_v36 = vpop.f32.mrb[4].mxu0  ;;  %v2535_v31 = vadd.f32 %v3743_v55, %v3780_v13 }
 0x19f   :  { %v2516_v38 = vadd.f32 %v2515_v32, %v1841_v36  ;;  %v1843_v39 = vpop.f32.mrb[5].mxu0 }
 0x1a0   :  { %v2518_v41 = vadd.f32 %v2517_v34, %v1843_v39  ;;  %v1845_v42 = vpop.f32.mrb[6].mxu0  ;;  %2125 = vmatprep.mubr.bf16.mxu1 %v1943_v35  ;;  %v2537_v34 = vadd.f32 %v3745_v56, %v3784_v15 }
 0x1a1   :  { %v2520_v43 = vadd.f32 %v2519_v37, %v1845_v42  ;;  %v1847_v44 = vpop.f32.mrb[7].mxu0  ;;  %2126 = vmatmul.mubr.bf16.vlgmr.msra.gmra.mrb[32].mxu1 %v1942_v33  ;;  %v1914_v5 = vmax.f32 %v2516_v38, 0.0  ;;  %v2539_v42 = vadd.f32 %v3747_v57, %v3780_v13 }
 0x1a2   :  { %v2522_v1 = vadd.f32 %v2521_v40, %v1847_v44  ;;  %v1915_v7 = vmax.f32 %v2518_v41, 0.0 }
 0x1a3   :  { %v1916_v45 = vmax.f32 %v2520_v43, 0.0  ;;  %v2541_v43 = vadd.f32 %v3749_v58, %v3784_v15 }
 0x1a4   :  { %v1917_v8 = vmax.f32 %v2522_v1, 0.0  ;;  %v2543_v1 = vadd.f32 %v3751_v59, %v3780_v13 }
 0x1a5   :  { %v1944_v9 = vpack.c.bf16 %v1916_v45, %v1914_v5 }
 0x1a6   :  { %v1945_v16 = vpack.c.bf16 %v1917_v8, %v1915_v7  ;;  %v1851_v48 = vpop.f32.mrb[8].mxu0  ;;  %v2545_v7 = vadd.f32 %v3753_v60, %v3784_v15 }
 0x1a7   :  { %v2524_v18 = vadd.f32 %v2523_v46, %v1851_v48  ;;  %v1853_v19 = vpop.f32.mrb[9].mxu0 }
 0x1a8   :  { %v2526_v21 = vadd.f32 %v2525_v47, %v1853_v19  ;;  %v1855_v22 = vpop.f32.mrb[10].mxu0  ;;  %2133 = vmatprep.mubr.bf16.mxu1 %v1945_v16  ;;  %v2549_v19 = vadd.f32 %v3757_v62, %v3784_v15 }
 0x1a9   :  { %v2528_v23 = vadd.f32 %v2527_v17, %v1855_v22  ;;  %v1857_v24 = vpop.f32.mrb[11].mxu0  ;;  %2134 = vmatmul.mubr.bf16.gmra.mrb[36].mxu1 %v1944_v9  ;;  %v1918_v25 = vmax.f32 %v2524_v18, 0.0  ;;  %v2547_v18 = vadd.f32 %v3755_v61, %v3780_v13 }
 0x1aa   :  { %v2530_v49 = vadd.f32 %v2529_v20, %v1857_v24  ;;  %v1919_v50 = vmax.f32 %v2526_v21, 0.0  ;;  %v2551_v21 = vadd.f32 %v3759_v63, %v3780_v13  ;;  %v2553_v24 = vadd.f32 %v3761_v0, %v3784_v15 }
 0x1ab   :  { %v1920_v26 = vmax.f32 %v2528_v23, 0.0 }
 0x1ac   :  { %v1921_v27 = vmax.f32 %v2530_v49, 0.0 }
 0x1ad   :  { %v1946_v51 = vpack.c.bf16 %v1920_v26, %v1918_v25 }
 0x1ae   :  { %v1947_v30 = vpack.c.bf16 %v1921_v27, %v1919_v50  ;;  %v1861_v52 = vpop.f32.mrb[12].mxu0 }
 0x1af   :  { %v2532_v32 = vadd.f32 %v2531_v28, %v1861_v52  ;;  %v1863_v33 = vpop.f32.mrb[13].mxu0 }
 0x1b0   :  { %v2534_v35 = vadd.f32 %v2533_v29, %v1863_v33  ;;  %v1865_v36 = vpop.f32.mrb[14].mxu0  ;;  %2141 = vmatprep.mubr.bf16.mxu1 %v1947_v30  ;;  %v2555_v29 = vadd.f32 %v3763_v2, %v3780_v13  ;;  %v2557_v30 = vadd.f32 %v3765_v3, %v3784_v15 }
 0x1b1   :  { %v2536_v37 = vadd.f32 %v2535_v31, %v1865_v36  ;;  %v1867_v38 = vpop.f32.mrb[15].mxu0  ;;  %2142 = vmatmul.mubr.bf16.gmra.mrb[40].mxu1 %v1946_v51  ;;  %v1922_v39 = vmax.f32 %v2532_v32, 0.0  ;;  %v2559_v31 = vadd.f32 %v3767_v4, %v3780_v13 }
 0x1b2   :  { %v2538_v53 = vadd.f32 %v2537_v34, %v1867_v38  ;;  %v1923_v54 = vmax.f32 %v2534_v35, 0.0  ;;  %v2561_v34 = vadd.f32 %v3769_v6, %v3784_v15 }
 0x1b3   :  { %v1924_v40 = vmax.f32 %v2536_v37, 0.0 }
 0x1b4   :  { %v1925_v41 = vmax.f32 %v2538_v53, 0.0 }
 0x1b5   :  { %v1948_v55 = vpack.c.bf16 %v1924_v40, %v1922_v39 }
 0x1b6   :  { %v1949_v44 = vpack.c.bf16 %v1925_v41, %v1923_v54  ;;  %v1871_v56 = vpop.f32.mrb[16].mxu0  ;;  %v2563_v54 = vadd.f32 %v3774_v10, %v3780_v13  ;;  %v2565_v41 = vadd.f32 %v3776_v11, %v3784_v15 }
 0x1b7   :  { %v2540_v5 = vadd.f32 %v2539_v42, %v1871_v56  ;;  %v1873_v45 = vpop.f32.mrb[17].mxu0  ;;  %v2569_v56 = vadd.f32 %v3782_v14, %v3784_v15 }
 0x1b8   :  { %v2542_v8 = vadd.f32 %v2541_v43, %v1873_v45  ;;  %v1875_v46 = vpop.f32.mrb[18].mxu0  ;;  %2149 = vmatprep.mubr.bf16.mxu1 %v1949_v44 }
 0x1b9   :  { %v2544_v9 = vadd.f32 %v2543_v1, %v1875_v46  ;;  %v1877_v47 = vpop.f32.mrb[19].mxu0  ;;  %2150 = vmatmul.mubr.bf16.gmra.mrb[44].mxu1 %v1948_v55  ;;  %v1926_v16 = vmax.f32 %v2540_v5, 0.0  ;;  %v2567_v55 = vadd.f32 %v3778_v12, %v3780_v13  ;;  %v3845_v13 = vld [vmem:[%s3915_s4] ss:$0 sm:$0xff] }
 0x1ba   :  { %v2546_v57 = vadd.f32 %v2545_v7, %v1877_v47  ;;  %v1927_v58 = vmax.f32 %v2542_v8, 0.0 }
 0x1bb   :  { %v1928_v48 = vmax.f32 %v2544_v9, 0.0 }
 0x1bc   :  { %v1929_v17 = vmax.f32 %v2546_v57, 0.0 }
 0x1bd   :  { %v1950_v59 = vpack.c.bf16 %v1928_v48, %v1926_v16 }
 0x1be   :  { %v1951_v20 = vpack.c.bf16 %v1929_v17, %v1927_v58  ;;  %v1881_v60 = vpop.f32.mrb[20].mxu0 }
 0x1bf   :  { %v2548_v22 = vadd.f32 %v2547_v18, %v1881_v60  ;;  %v1883_v23 = vpop.f32.mrb[21].mxu0 }
 0x1c0   :  { %v2550_v49 = vadd.f32 %v2549_v19, %v1883_v23  ;;  %v1885_v25 = vpop.f32.mrb[22].mxu0  ;;  %2157 = vmatprep.mubr.bf16.mxu1 %v1951_v20 }
 0x1c1   :  { %v2552_v26 = vadd.f32 %v2551_v21, %v1885_v25  ;;  %v1887_v50 = vpop.f32.mrb[23].mxu0  ;;  %2158 = vmatmul.mubr.bf16.gmra.mrb[48].mxu1 %v1950_v59  ;;  %v1930_v27 = vmax.f32 %v2548_v22, 0.0 }
 0x1c2   :  { %v2554_v61 = vadd.f32 %v2553_v24, %v1887_v50  ;;  %v1931_v62 = vmax.f32 %v2550_v49, 0.0 }
 0x1c3   :  { %v1932_v28 = vmax.f32 %v2552_v26, 0.0 }
 0x1c4   :  { %v1933_v51 = vmax.f32 %v2554_v61, 0.0 }
 0x1c5   :  { %v1952_v63 = vpack.c.bf16 %v1932_v28, %v1930_v27 }
 0x1c6   :  { %v1953_v52 = vpack.c.bf16 %v1933_v51, %v1931_v62  ;;  %v1891_v0 = vpop.f32.mrb[24].mxu0 }
 0x1c7   :  { %v2556_v32 = vadd.f32 %v2555_v29, %v1891_v0  ;;  %v1893_v33 = vpop.f32.mrb[25].mxu0 }
 0x1c8   :  { %v2558_v35 = vadd.f32 %v2557_v30, %v1893_v33  ;;  %v1895_v36 = vpop.f32.mrb[26].mxu0  ;;  %2165 = vmatprep.mubr.bf16.mxu1 %v1953_v52 }
 0x1c9   :  { %v2560_v37 = vadd.f32 %v2559_v31, %v1895_v36  ;;  %v1897_v38 = vpop.f32.mrb[27].mxu0  ;;  %2166 = vmatmul.mubr.bf16.gmra.mrb[52].mxu1 %v1952_v63  ;;  %v1934_v53 = vmax.f32 %v2556_v32, 0.0 }
 0x1ca   :  { %v2562_v2 = vadd.f32 %v2561_v34, %v1897_v38  ;;  %v1935_v3 = vmax.f32 %v2558_v35, 0.0 }
 0x1cb   :  { %v1936_v39 = vmax.f32 %v2560_v37, 0.0 }
 0x1cc   :  { %v1937_v40 = vmax.f32 %v2562_v2, 0.0 }
 0x1cd   :  { %v1954_v4 = vpack.c.bf16 %v1936_v39, %v1934_v53 }
 0x1ce   :  { %v1955_v42 = vpack.c.bf16 %v1937_v40, %v1935_v3  ;;  %v1901_v6 = vpop.f32.mrb[28].mxu0 }
 0x1cf   :  { %v2564_v43 = vadd.f32 %v2563_v54, %v1901_v6  ;;  %v1903_v44 = vpop.f32.mrb[29].mxu0 }
 0x1d0   :  { %v2566_v1 = vadd.f32 %v2565_v41, %v1903_v44  ;;  %v1905_v5 = vpop.f32.mrb[30].mxu0  ;;  %2173 = vmatprep.mubr.bf16.mxu1 %v1955_v42 }
 0x1d1   :  { %v2568_v45 = vadd.f32 %v2567_v55, %v1905_v5  ;;  %v1907_v7 = vpop.f32.mrb[31].mxu0  ;;  %2174 = vmatmul.mubr.bf16.gmra.mrb[56].mxu1 %v1954_v4  ;;  %v1938_v8 = vmax.f32 %v2564_v43, 0.0 }
 0x1d2   :  { %v2570_v10 = vadd.f32 %v2569_v56, %v1907_v7  ;;  %v1939_v11 = vmax.f32 %v2566_v1, 0.0 }
 0x1d3   :  { %v1940_v46 = vmax.f32 %v2568_v45, 0.0 }
 0x1d4   :  { %v1941_v9 = vmax.f32 %v2570_v10, 0.0 }
 0x1d5   :  { %v1956_v47 = vpack.c.bf16 %v1940_v46, %v1938_v8 }
 0x1d6   :  { %v1957_v57 = vpack.c.bf16 %v1941_v9, %v1939_v11 }
 0x1d8   :  { %2181 = vmatprep.mubr.bf16.mxu1 %v1957_v57 }
 0x1d9   :  { %2182 = vmatmul.mubr.bf16.gmra.mrb[60].mxu1 %v1956_v47 }
 0x274   :  { %v2459_v12 = vpop.f32.mrb[32].mxu1 }
 0x275   :  { %v2460_v14 = vpop.f32.mrb[33].mxu1 }
 0x276   :  { %v2461_v15 = vadd.f32 %v2460_v14, %v2459_v12  ;;  %v2462_v16 = vpop.f32.mrb[34].mxu1 }
 0x277   :  { %v2463_v48 = vpop.f32.mrb[35].mxu1 }
 0x278   :  { %v2128_v58 = vadd.f32 %v2461_v15, %v3845_v13  ;;  %v2464_v17 = vadd.f32 %v2463_v48, %v2462_v16 }
 0x27a   :  { %2190 = vst [vmem:[%s3916_s5] sm:$0xff] %v2128_v58  ;;  %v2131_v18 = vadd.f32 %v2464_v17, %v3845_v13 }
 0x27c   :  { %2191 = vst [vmem:[%s3916_s5 + $0x8] sm:$0xff] %v2131_v18  ;;  %v2465_v59 = vpop.f32.mrb[36].mxu1 }
 0x27d   :  { %v2466_v19 = vpop.f32.mrb[37].mxu1 }
 0x27e   :  { %v2467_v20 = vadd.f32 %v2466_v19, %v2465_v59  ;;  %v2468_v60 = vpop.f32.mrb[38].mxu1 }
 0x27f   :  { %v2469_v21 = vpop.f32.mrb[39].mxu1 }
 0x280   :  { %v2136_v22 = vadd.f32 %v2467_v20, %v3845_v13  ;;  %v2470_v23 = vadd.f32 %v2469_v21, %v2468_v60 }
 0x282   :  { %2192 = vst [vmem:[%s3916_s5 + $0x10] sm:$0xff] %v2136_v22  ;;  %v2139_v24 = vadd.f32 %v2470_v23, %v3845_v13 }
 0x284   :  { %2193 = vst [vmem:[%s3916_s5 + $0x18] sm:$0xff] %v2139_v24  ;;  %v2471_v49 = vpop.f32.mrb[40].mxu1 }
 0x285   :  { %v2472_v25 = vpop.f32.mrb[41].mxu1 }
 0x286   :  { %v2473_v26 = vadd.f32 %v2472_v25, %v2471_v49  ;;  %v2474_v50 = vpop.f32.mrb[42].mxu1 }
 0x287   :  { %v2475_v61 = vpop.f32.mrb[43].mxu1 }
 0x288   :  { %v2144_v27 = vadd.f32 %v2473_v26, %v3845_v13  ;;  %v2476_v28 = vadd.f32 %v2475_v61, %v2474_v50 }
 0x28a   :  { %2194 = vst [vmem:[%s3916_s5 + $0x20] sm:$0xff] %v2144_v27  ;;  %v2147_v62 = vadd.f32 %v2476_v28, %v3845_v13 }
 0x28c   :  { %2195 = vst [vmem:[%s3916_s5 + $0x28] sm:$0xff] %v2147_v62  ;;  %v2477_v51 = vpop.f32.mrb[44].mxu1 }
 0x28d   :  { %v2478_v29 = vpop.f32.mrb[45].mxu1 }
 0x28e   :  { %v2479_v63 = vadd.f32 %v2478_v29, %v2477_v51  ;;  %v2480_v30 = vpop.f32.mrb[46].mxu1 }
 0x28f   :  { %v2481_v52 = vpop.f32.mrb[47].mxu1 }
 0x290   :  { %v2152_v0 = vadd.f32 %v2479_v63, %v3845_v13  ;;  %v2482_v31 = vadd.f32 %v2481_v52, %v2480_v30 }
 0x292   :  { %2196 = vst [vmem:[%s3916_s5 + $0x30] sm:$0xff] %v2152_v0  ;;  %v2155_v32 = vadd.f32 %v2482_v31, %v3845_v13 }
 0x294   :  { %2197 = vst [vmem:[%s3916_s5 + $0x38] sm:$0xff] %v2155_v32  ;;  %v2483_v33 = vpop.f32.mrb[48].mxu1 }
 0x295   :  { %v2484_v34 = vpop.f32.mrb[49].mxu1 }
 0x296   :  { %v2485_v35 = vadd.f32 %v2484_v34, %v2483_v33  ;;  %v2486_v36 = vpop.f32.mrb[50].mxu1 }
 0x297   :  { %v2487_v37 = vpop.f32.mrb[51].mxu1 }
 0x298   :  { %v2160_v38 = vadd.f32 %v2485_v35, %v3845_v13  ;;  %v2488_v2 = vadd.f32 %v2487_v37, %v2486_v36 }
 0x29a   :  { %2198 = vst [vmem:[%s3916_s5 + $0x40] sm:$0xff] %v2160_v38  ;;  %v2163_v53 = vadd.f32 %v2488_v2, %v3845_v13 }
 0x29c   :  { %2199 = vst [vmem:[%s3916_s5 + $0x48] sm:$0xff] %v2163_v53  ;;  %v2489_v39 = vpop.f32.mrb[52].mxu1 }
 0x29d   :  { %v2490_v3 = vpop.f32.mrb[53].mxu1 }
 0x29e   :  { %v2491_v40 = vadd.f32 %v2490_v3, %v2489_v39  ;;  %v2492_v54 = vpop.f32.mrb[54].mxu1 }
 0x29f   :  { %v2493_v4 = vpop.f32.mrb[55].mxu1 }
 0x2a0   :  { %v2168_v41 = vadd.f32 %v2491_v40, %v3845_v13  ;;  %v2494_v42 = vadd.f32 %v2493_v4, %v2492_v54 }
 0x2a2   :  { %2200 = vst [vmem:[%s3916_s5 + $0x50] sm:$0xff] %v2168_v41  ;;  %v2171_v6 = vadd.f32 %v2494_v42, %v3845_v13 }
 0x2a4   :  { %2201 = vst [vmem:[%s3916_s5 + $0x58] sm:$0xff] %v2171_v6  ;;  %v2495_v55 = vpop.f32.mrb[56].mxu1 }
 0x2a5   :  { %v2496_v43 = vpop.f32.mrb[57].mxu1 }
 0x2a6   :  { %v2497_v44 = vadd.f32 %v2496_v43, %v2495_v55  ;;  %v2498_v56 = vpop.f32.mrb[58].mxu1 }
 0x2a7   :  { %v2499_v1 = vpop.f32.mrb[59].mxu1 }
 0x2a8   :  { %v2176_v5 = vadd.f32 %v2497_v44, %v3845_v13  ;;  %v2500_v45 = vadd.f32 %v2499_v1, %v2498_v56 }
 0x2aa   :  { %2202 = vst [vmem:[%s3916_s5 + $0x60] sm:$0xff] %v2176_v5  ;;  %v2179_v7 = vadd.f32 %v2500_v45, %v3845_v13 }
 0x2ac   :  { %2203 = vst [vmem:[%s3916_s5 + $0x68] sm:$0xff] %v2179_v7  ;;  %v2501_v10 = vpop.f32.mrb[60].mxu1 }
 0x2ad   :  { %v2502_v8 = vpop.f32.mrb[61].mxu1 }
 0x2ae   :  { %v2503_v46 = vadd.f32 %v2502_v8, %v2501_v10  ;;  %v2504_v11 = vpop.f32.mrb[62].mxu1 }
 0x2af   :  { %v2505_v9 = vpop.f32.mrb[63].mxu1 }
 0x2b0   :  { %v2184_v47 = vadd.f32 %v2503_v46, %v3845_v13  ;;  %v2506_v57 = vadd.f32 %v2505_v9, %v2504_v11 }
 0x2b2   :  { %2204 = vst [vmem:[%s3916_s5 + $0x70] sm:$0xff] %v2184_v47  ;;  %v2187_v12 = vadd.f32 %v2506_v57, %v3845_v13 }
 0x2b4   :  { %2205 = vst [vmem:[%s3916_s5 + $0x78] sm:$0xff] %v2187_v12 }

// kernel: rcnn_tail_forward.7
= control target key start
LH: loop header
LB: loop body
LE: loop exit
PB: predicated region body
PF: predicated region fallthrough
CT: control target
= control target key end

     0   :  { %s9601_s1 = inlined_call_operand.vmem [shape: bf16[1152,128], index: 1, kind: input, shape index: {}]   ;;  %s9602_s0 = inlined_call_operand.vmem [shape: f32[2,18,18,128], index: 0, kind: input, shape index: {}]   ;;  %s9603_s3 = inlined_call_operand.vmem [shape: bf16[128,128], index: 3, kind: input, shape index: {}]   ;;  %s9604_s2 = inlined_call_operand.vmem [shape: f32[1,128], index: 2, kind: input, shape index: {}]   ;;  %s9605_s4 = inlined_call_operand.vmem [shape: f32[1,128], index: 4, kind: input, shape index: {}]   ;;  %s9606_s5 = inlined_call_operand.vmem [shape: f32[512,128], index: 5, kind: output, shape index: {}]  }
   0x1   :  { %v7285_v0 = vld [vmem:[%s9601_s1 + $0x40] sm:$0xff]   ;;  %v7287_v2 = vld [vmem:[%s9601_s1 + $0x48] sm:$0xff]   ;;  %v7289_v4 = vld [vmem:[%s9601_s1 + $0x50] sm:$0xff]  }
   0x2   :  { %v7286_v1 = vld [vmem:[%s9601_s1 + $0x100] sm:$0xff]   ;;  %5973 = vmatprep.subr.bf16.mxu1 %v7285_v0  ;;  %v7288_v3 = vld [vmem:[%s9601_s1 + $0x108] sm:$0xff]   ;;  %v7290_v5 = vld [vmem:[%s9601_s1 + $0x110] sm:$0xff]  }
   0x3   :  { %6293 = vmatprep.subr.bf16.mxu0 %v7286_v1  ;;  %5974 = vmatpush3.bf16.msra.mxu1 %v7285_v0  ;;  %v7291_v6 = vld [vmem:[%s9601_s1 + $0x58] sm:$0xff]   ;;  %v7293_v8 = vld [vmem:[%s9601_s1 + $0x60] sm:$0xff]   ;;  %v7295_v10 = vld [vmem:[%s9601_s1 + $0x68] sm:$0xff]  }
   0x4   :  { %6294 = vmatpush3.bf16.msra.mxu0 %v7286_v1  ;;  %5975 = vmatprep.subr.bf16.mxu1 %v7287_v2  ;;  %v7292_v7 = vld [vmem:[%s9601_s1 + $0x118] sm:$0xff]   ;;  %v7294_v9 = vld [vmem:[%s9601_s1 + $0x120] sm:$0xff]   ;;  %v134_v12 = vld [vmem:[%s9602_s0 + $0x9] sm:$0xff] }
   0x5   :  { %6295 = vmatprep.subr.bf16.mxu0 %v7288_v3  ;;  %v133_v11 = vld [vmem:[%s9602_s0 + $0x1] sm:$0xff]  ;;  %v5203_v13 = vld [vmem:[%s9602_s0 + $0x19] sm:$0xff]  ;;  %v7297_v18 = vld [vmem:[%s9601_s1 + $0x70] sm:$0xff]  }
   0x6   :  { %v7296_v14 = vld [vmem:[%s9601_s1 + $0x128] sm:$0xff]   ;;  %v197_v15 = vpack.c.bf16 %v134_v12, %v133_v11  ;;  %v7298_v19 = vld [vmem:[%s9601_s1 + $0x130] sm:$0xff]   ;;  %v7299_v20 = vld [vmem:[%s9601_s1 + $0x78] sm:$0xff]  }
   0x7   :  { %5976 = vmatpush3.bf16.msra.mxu1 %v7287_v2  ;;  %v5204_v16 = vld [vmem:[%s9602_s0 + $0x21] sm:$0xff]  ;;  %v7300_v21 = vld [vmem:[%s9601_s1 + $0x138] sm:$0xff]   ;;  %v5207_v25 = vld [vmem:[%s9602_s0 + $0x49] sm:$0xff] }
   0x8   :  { %6296 = vmatpush3.bf16.msra.mxu0 %v7288_v3  ;;  %5977 = vmatprep.subr.bf16.mxu1 %v7289_v4  ;;  %v2010_v17 = vpack.c.bf16 %v5204_v16, %v5203_v13  ;;  %v5205_v22 = vld [vmem:[%s9602_s0 + $0x31] sm:$0xff]  ;;  %v5206_v23 = vld [vmem:[%s9602_s0 + $0x39] sm:$0xff]  ;;  %v7302_v29 = vld [vmem:[%s9601_s1 + $0x148] sm:$0xff]  }
   0x9   :  { %6297 = vmatprep.subr.bf16.mxu0 %v7290_v5  ;;  %5989 = vmatprep.mubr.bf16.mxu1 %v197_v15  ;;  %v7301_v24 = vld [vmem:[%s9601_s1 + $0x140] sm:$0xff]   ;;  %v5208_v26 = vld [vmem:[%s9602_s0 + $0x51] sm:$0xff]  ;;  %v2011_v27 = vpack.c.bf16 %v5206_v23, %v5205_v22  ;;  %v5210_v31 = vld [vmem:[%s9602_s0 + $0x69] sm:$0xff] }
   0xa   :  { %6309 = vmatprep.mubr.bf16.mxu0 %v2010_v17  ;;  %v2012_v28 = vpack.c.bf16 %v5208_v26, %v5207_v25  ;;  %v5209_v30 = vld [vmem:[%s9602_s0 + $0x61] sm:$0xff]  ;;  %v5211_v32 = vld [vmem:[%s9602_s0 + $0x79] sm:$0xff]  ;;  %v7303_v34 = vld [vmem:[%s9601_s1 + $0x150] sm:$0xff]  }
   0xb   :  { %5978 = vmatpush3.bf16.msra.mxu1 %v7289_v4  ;;  %v5212_v33 = vld [vmem:[%s9602_s0 + $0x81] sm:$0xff]  ;;  %v2013_v35 = vpack.c.bf16 %v5210_v31, %v5209_v30  ;;  %v7304_v38 = vld [vmem:[%s9601_s1 + $0x158] sm:$0xff]   ;;  %v5215_v42 = vld [vmem:[%s9602_s0 + $0xa9] sm:$0xff] }
   0xc   :  { %6298 = vmatpush3.bf16.msra.mxu0 %v7290_v5  ;;  %5979 = vmatprep.subr.bf16.mxu1 %v7291_v6  ;;  %v2014_v36 = vpack.c.bf16 %v5212_v33, %v5211_v32  ;;  %v7307_v37 = vld [vmem:[%s9601_s1] sm:$0xff]   ;;  %v5213_v39 = vld [vmem:[%s9602_s0 + $0x91] sm:$0xff]  ;;  %v7309_v40 = vld [vmem:[%s9601_s1 + $0x8] sm:$0xff]  }
   0xd   :  { %6299 = vmatprep.subr.bf16.mxu0 %v7292_v7  ;;  %v5214_v41 = vld [vmem:[%s9602_s0 + $0x99] sm:$0xff]  ;;  %v5216_v43 = vld [vmem:[%s9602_s0 + $0xb1] sm:$0xff]  ;;  %v7306_v48 = vld [vmem:[%s9601_s1 + $0x168] sm:$0xff]  }
   0xe   :  { %v7305_v44 = vld [vmem:[%s9601_s1 + $0x160] sm:$0xff]   ;;  %v7310_v45 = vld [vmem:[%s9601_s1 + $0x10] sm:$0xff]   ;;  %v2015_v46 = vpack.c.bf16 %v5214_v41, %v5213_v39  ;;  %v2016_v47 = vpack.c.bf16 %v5216_v43, %v5215_v42  ;;  %v7311_v49 = vld [vmem:[%s9601_s1 + $0x18] sm:$0xff]  }
   0xf   :  { %5980 = vmatpush3.bf16.msra.mxu1 %v7291_v6  ;;  %v5217_v50 = vld [vmem:[%s9602_s0 + $0xc1] sm:$0xff]  ;;  %v5218_v51 = vld [vmem:[%s9602_s0 + $0xc9] sm:$0xff]  ;;  %v5219_v52 = vld [vmem:[%s9602_s0 + $0xd9] sm:$0xff] }
  0x10   :  { %6300 = vmatpush3.bf16.msra.mxu0 %v7292_v7  ;;  %5981 = vmatprep.subr.bf16.mxu1 %v7293_v8  ;;  %v5220_v53 = vld [vmem:[%s9602_s0 + $0xe1] sm:$0xff]  ;;  %v7308_v54 = vld [vmem:[%s9601_s1 + $0x170] sm:$0xff]   ;;  %v2017_v56 = vpack.c.bf16 %v5218_v51, %v5217_v50  ;;  %v7313_v58 = vld [vmem:[%s9601_s1 + $0x178] sm:$0xff]  }
  0x11   :  { %6301 = vmatprep.subr.bf16.mxu0 %v7294_v9  ;;  %v7312_v55 = vld [vmem:[%s9601_s1 + $0x20] sm:$0xff]   ;;  %v2018_v57 = vpack.c.bf16 %v5220_v53, %v5219_v52  ;;  %v7314_v59 = vld [vmem:[%s9601_s1 + $0x28] sm:$0xff]   ;;  %v5221_v60 = vld [vmem:[%s9602_s0 + $0xf1] sm:$0xff] }
  0x12   :  { %v5222_v61 = vld [vmem:[%s9602_s0 + $0xf9] sm:$0xff]  ;;  %v5223_v62 = vld [vmem:[%s9602_s0 + $0x109] sm:$0xff]  ;;  %v5224_v63 = vld [vmem:[%s9602_s0 + $0x111] sm:$0xff] }
  0x13   :  { %5982 = vmatpush3.bf16.msra.mxu1 %v7293_v8  ;;  %v7560_v0 = vld [vmem:[%s9601_s1 + $0x180] sm:$0xff]   ;;  %v7315_v1 = vld [vmem:[%s9601_s1 + $0x30] sm:$0xff]   ;;  %v2019_v2 = vpack.c.bf16 %v5222_v61, %v5221_v60  ;;  %v2020_v3 = vpack.c.bf16 %v5224_v63, %v5223_v62  ;;  %v7316_v4 = vld [vmem:[%s9601_s1 + $0x38] sm:$0xff]  }
  0x14   :  { %6302 = vmatpush3.bf16.msra.mxu0 %v7294_v9  ;;  %5983 = vmatprep.subr.bf16.mxu1 %v7295_v10  ;;  %v5225_v5 = vld [vmem:[%s9602_s0 + $0x121] sm:$0xff]  ;;  %v5226_v6 = vld [vmem:[%s9602_s0 + $0x129] sm:$0xff]  ;;  %v5227_v7 = vld [vmem:[%s9602_s0 + $0x139] sm:$0xff] }
  0x15   :  { %6303 = vmatprep.subr.bf16.mxu0 %v7296_v14  ;;  %v5228_v8 = vld [vmem:[%s9602_s0 + $0x141] sm:$0xff]  ;;  %v2021_v9 = vpack.c.bf16 %v5226_v6, %v5225_v5  ;;  %v5229_v11 = vld [vmem:[%s9602_s0 + $0x151] sm:$0xff]  ;;  %v5230_v12 = vld [vmem:[%s9602_s0 + $0x159] sm:$0xff] }
  0x16   :  { %v5231_v13 = vld [vmem:[%s9602_s0 + $0x169] sm:$0xff]  ;;  %v2023_v15 = vpack.c.bf16 %v5230_v12, %v5229_v11  ;;  %v5236_v22 = vld [vmem:[%s9602_s0 + $0x1d1] sm:$0xff]  ;;  %v5237_v26 = vld [vmem:[%s9602_s0 + $0x1e1] sm:$0xff] }
  0x17   :  { %5984 = vmatpush3.bf16.msra.mxu1 %v7295_v10  ;;  %v2022_v10 = vpack.c.bf16 %v5228_v8, %v5227_v7  ;;  %v5241_v32 = vld [vmem:[%s9602_s0 + $0x211] sm:$0xff]  ;;  %v5242_v33 = vld [vmem:[%s9602_s0 + $0x219] sm:$0xff]  ;;  %v5246_v39 = vld [vmem:[%s9602_s0 + $0x249] sm:$0xff] }
  0x18   :  { %6304 = vmatpush3.bf16.msra.mxu0 %v7296_v14  ;;  %5985 = vmatprep.subr.bf16.mxu1 %v7297_v18  ;;  %v5232_v14 = vld [vmem:[%s9602_s0 + $0x171] sm:$0xff]  ;;  %v5248_v41 = vld [vmem:[%s9602_s0 + $0x261] sm:$0xff]  ;;  %v5254_v51 = vld [vmem:[%s9602_s0 + $0x2a9] sm:$0xff] }
  0x19   :  { %6305 = vmatprep.subr.bf16.mxu0 %v7298_v19  ;;  %v2024_v16 = vpack.c.bf16 %v5232_v14, %v5231_v13  ;;  %v5253_v50 = vld [vmem:[%s9602_s0 + $0x2a1] sm:$0xff]  ;;  %v5255_v52 = vld [vmem:[%s9602_s0 + $0x2b9] sm:$0xff]  ;;  %v5260_v60 = vld [vmem:[%s9602_s0 + $0x2f1] sm:$0xff] }
  0x1a   :  { %v5256_v53 = vld [vmem:[%s9602_s0 + $0x2c1] sm:$0xff]  ;;  %v5265_v6 = vld [vmem:[%s9602_s0 + $0x331] sm:$0xff]  ;;  %v5266_v7 = vld [vmem:[%s9602_s0 + $0x339] sm:$0xff] }
  0x1b   :  { %5986 = vmatpush3.bf16.msra.mxu1 %v7297_v18  ;;  %v5234_v18 = vld [vmem:[%s9602_s0 + $0x189] sm:$0xff]  ;;  %v5261_v63 = vld [vmem:[%s9602_s0 + $0x301] sm:$0xff]  ;;  %v2041_v12 = vpack.c.bf16 %v5266_v7, %v5265_v6 }
  0x1c   :  { %6306 = vmatpush3.bf16.msra.mxu0 %v7298_v19  ;;  %5987 = vmatprep.subr.bf16.mxu1 %v7299_v20  ;;  %v165_v19 = vld [vmem:[%s9602_s0 + $0x1b1] sm:$0xff]  ;;  %v21_v8 = vld [vmem:[%s9602_s0] sm:$0xff] }
  0x1d   :  { %6307 = vmatprep.subr.bf16.mxu0 %v7300_v21  ;;  %v5276_v11 = vld [vmem:[%s9602_s0 + $0x22] sm:$0xff]  ;;  %v7331_v7 = vld [vmem:[%s9601_s1 + $0xb0] sm:$0xff]  }
  0x1f   :  { %5988 = vmatpush3.bf16.msra.mxu1 %v7299_v20  ;;  %v166_v20 = vld [vmem:[%s9602_s0 + $0x1b9] sm:$0xff] }
  0x20   :  { %6308 = vmatpush3.bf16.msra.mxu0 %v7300_v21  ;;  %6053 = vmatprep.subr.bf16.mxu1 %v7307_v37  ;;  %v5235_v21 = vld [vmem:[%s9602_s0 + $0x1c9] sm:$0xff] }
  0x21   :  { %6373 = vmatprep.subr.bf16.mxu0 %v7301_v24  ;;  %v2026_v25 = vpack.c.bf16 %v5236_v22, %v5235_v21  ;;  %v5279_v21 = vld [vmem:[%s9602_s0 + $0x4a] sm:$0xff]  ;;  %v5280_v22 = vld [vmem:[%s9602_s0 + $0x52] sm:$0xff] }
  0x22   :  { %5990 = vmatmul.mubr.bf16.vlgmr.msra.gmra.mrb[0].mxu1 %v2010_v17  ;;  %v5233_v17 = vld [vmem:[%s9602_s0 + $0x181] sm:$0xff] }
  0x23   :  { %6310 = vmatmul.mubr.bf16.vlgmr.msra.gmra.mrb[0].mxu0 %v2011_v27  ;;  %5993 = vmatprep.mubr.bf16.mxu1 %v2011_v27  ;;  %v2025_v23 = vpack.c.bf16 %v5234_v18, %v5233_v17  ;;  %v5238_v27 = vld [vmem:[%s9602_s0 + $0x1e9] sm:$0xff]  ;;  %v5277_v17 = vld [vmem:[%s9602_s0 + $0x32] sm:$0xff]  ;;  %v5278_v18 = vld [vmem:[%s9602_s0 + $0x3a] sm:$0xff] }
  0x24   :  { %6374 = vmatpush3.bf16.msra.mxu0 %v7301_v24  ;;  %6313 = vmatprep.mubr.bf16.mxu0 %v2012_v28  ;;  %v213_v24 = vpack.c.bf16 %v166_v20, %v165_v19  ;;  %v2027_v30 = vpack.c.bf16 %v5238_v27, %v5237_v26  ;;  %v25_v19 = vld [vmem:[%s9602_s0 + $0x30] sm:$0xff]  ;;  %v26_v20 = vld [vmem:[%s9602_s0 + $0x38] sm:$0xff]  ;;  %v7750_v26 = vpack.c.bf16 %v5280_v22, %v5279_v21  ;;  %v7318_v27 = vld [vmem:[%s9601_s1 + $0x188] sm:$0xff]  }
  0x25   :  { %6375 = vmatprep.subr.bf16.mxu0 %v7302_v29  ;;  %6054 = vmatpush3.bf16.msra.mxu1 %v7307_v37  ;;  %v5296_v21 = vld [vmem:[%s9602_s0 + $0x112] sm:$0xff]  ;;  %v7934_v22 = vld [vmem:[%s9601_s1 + $0x1c0] sm:$0xff]  }
  0x26   :  { %6055 = vmatprep.subr.bf16.mxu1 %v7309_v40 }
  0x28   :  { %6376 = vmatpush3.bf16.msra.mxu0 %v7302_v29  ;;  %v5240_v29 = vld [vmem:[%s9602_s0 + $0x201] sm:$0xff] }
  0x29   :  { %6377 = vmatprep.subr.bf16.mxu0 %v7303_v34  ;;  %6056 = vmatpush3.bf16.msra.mxu1 %v7309_v40  ;;  %v5247_v40 = vld [vmem:[%s9602_s0 + $0x259] sm:$0xff] }
  0x2a   :  { %5994 = vmatmul.mubr.bf16.gmra.mrb[4].mxu1 %v2012_v28  ;;  %6057 = vmatprep.subr.bf16.mxu1 %v7310_v45  ;;  %v5239_v28 = vld [vmem:[%s9602_s0 + $0x1f9] sm:$0xff]  ;;  %v2032_v43 = vpack.c.bf16 %v5248_v41, %v5247_v40 }
  0x2b   :  { %6314 = vmatmul.mubr.bf16.gmra.mrb[4].mxu0 %v2013_v35  ;;  %5997 = vmatprep.mubr.bf16.mxu1 %v2013_v35  ;;  %v2028_v31 = vpack.c.bf16 %v5240_v29, %v5239_v28  ;;  %v5244_v35 = vld [vmem:[%s9602_s0 + $0x231] sm:$0xff]  ;;  %v7325_v28 = vld [vmem:[%s9601_s1 + $0x88] sm:$0xff]  }
  0x2c   :  { %6317 = vmatprep.mubr.bf16.mxu0 %v2014_v36  ;;  %6378 = vmatpush3.bf16.msra.mxu0 %v7303_v34  ;;  %v5243_v34 = vld [vmem:[%s9602_s0 + $0x229] sm:$0xff] }
  0x2d   :  { %6379 = vmatprep.subr.bf16.mxu0 %v7304_v38  ;;  %6058 = vmatpush3.bf16.msra.mxu1 %v7310_v45  ;;  %v2030_v37 = vpack.c.bf16 %v5244_v35, %v5243_v34  ;;  %v5250_v45 = vld [vmem:[%s9602_s0 + $0x279] sm:$0xff]  ;;  %v27_v29 = vld [vmem:[%s9602_s0 + $0x48] sm:$0xff] }
  0x2e   :  { %6059 = vmatprep.subr.bf16.mxu1 %v7311_v49  ;;  %v30_v34 = vld [vmem:[%s9602_s0 + $0x68] sm:$0xff]  ;;  %v5283_v35 = vld [vmem:[%s9602_s0 + $0x7a] sm:$0xff] }
  0x30   :  { %6380 = vmatpush3.bf16.msra.mxu0 %v7304_v38  ;;  %v5245_v38 = vld [vmem:[%s9602_s0 + $0x241] sm:$0xff] }
  0x31   :  { %6381 = vmatprep.subr.bf16.mxu0 %v7305_v44  ;;  %6060 = vmatpush3.bf16.msra.mxu1 %v7311_v49  ;;  %v2031_v42 = vpack.c.bf16 %v5246_v39, %v5245_v38  ;;  %v7326_v38 = vld [vmem:[%s9601_s1 + $0x90] sm:$0xff]  }
  0x32   :  { %5998 = vmatmul.mubr.bf16.gmra.mrb[8].mxu1 %v2014_v36  ;;  %6061 = vmatprep.subr.bf16.mxu1 %v7312_v55  ;;  %v2029_v36 = vpack.c.bf16 %v5242_v33, %v5241_v32  ;;  %v5282_v32 = vld [vmem:[%s9602_s0 + $0x6a] sm:$0xff]  ;;  %v29_v33 = vld [vmem:[%s9602_s0 + $0x60] sm:$0xff] }
  0x33   :  { %6318 = vmatmul.mubr.bf16.gmra.mrb[8].mxu0 %v2015_v46  ;;  %6001 = vmatprep.mubr.bf16.mxu1 %v2015_v46  ;;  %v5251_v46 = vld [vmem:[%s9602_s0 + $0x289] sm:$0xff]  ;;  %v7797_v40 = vpack.c.bf16 %v30_v34, %v29_v33  ;;  %v45_v34 = vld [vmem:[%s9602_s0 + $0x120] sm:$0xff] }
  0x34   :  { %6321 = vmatprep.mubr.bf16.mxu0 %v2016_v47  ;;  %6382 = vmatpush3.bf16.msra.mxu0 %v7305_v44  ;;  %v5249_v44 = vld [vmem:[%s9602_s0 + $0x271] sm:$0xff] }
  0x35   :  { %6383 = vmatprep.subr.bf16.mxu0 %v7306_v48  ;;  %6062 = vmatpush3.bf16.msra.mxu1 %v7312_v55  ;;  %v2036_v55 = vpack.c.bf16 %v5256_v53, %v5255_v52  ;;  %v7321_v52 = vld [vmem:[%s9601_s1 + $0x1a0] sm:$0xff]   ;;  %v5298_v33 = vld [vmem:[%s9602_s0 + $0x12a] sm:$0xff] }
  0x36   :  { %6063 = vmatprep.subr.bf16.mxu1 %v7314_v59 }
  0x38   :  { %6384 = vmatpush3.bf16.msra.mxu0 %v7306_v48  ;;  %v2033_v48 = vpack.c.bf16 %v5250_v45, %v5249_v44  ;;  %v31_v44 = vld [vmem:[%s9602_s0 + $0x78] sm:$0xff]  ;;  %v32_v45 = vld [vmem:[%s9602_s0 + $0x80] sm:$0xff] }
  0x39   :  { %6385 = vmatprep.subr.bf16.mxu0 %v7308_v54  ;;  %6064 = vmatpush3.bf16.msra.mxu1 %v7314_v59  ;;  %v5259_v59 = vld [vmem:[%s9602_s0 + $0x2e9] sm:$0xff]  ;;  %v7838_v53 = vpack.c.bf16 %v32_v45, %v31_v44  ;;  %v47_v45 = vld [vmem:[%s9602_s0 + $0x138] sm:$0xff] }
  0x3a   :  { %6002 = vmatmul.mubr.bf16.gmra.mrb[12].mxu1 %v2016_v47  ;;  %6065 = vmatprep.subr.bf16.mxu1 %v7315_v1  ;;  %v5252_v47 = vld [vmem:[%s9602_s0 + $0x291] sm:$0xff]  ;;  %v2038_v62 = vpack.c.bf16 %v5260_v60, %v5259_v59  ;;  %v7330_v59 = vld [vmem:[%s9601_s1 + $0xa8] sm:$0xff]  }
  0x3b   :  { %6322 = vmatmul.mubr.bf16.gmra.mrb[12].mxu0 %v2017_v56  ;;  %6005 = vmatprep.mubr.bf16.mxu1 %v2017_v56  ;;  %v2034_v49 = vpack.c.bf16 %v5252_v47, %v5251_v46  ;;  %v7674_v56 = vld [vmem:[%s9601_s1 + $0x80] sm:$0xff]   ;;  %v5285_v46 = vld [vmem:[%s9602_s0 + $0x92] sm:$0xff]  ;;  %v35_v60 = vld [vmem:[%s9602_s0 + $0xa8] sm:$0xff] }
  0x3c   :  { %6325 = vmatprep.mubr.bf16.mxu0 %v2018_v57  ;;  %6386 = vmatpush3.bf16.msra.mxu0 %v7308_v54  ;;  %v2035_v54 = vpack.c.bf16 %v5254_v51, %v5253_v50  ;;  %v5286_v47 = vld [vmem:[%s9602_s0 + $0x9a] sm:$0xff]  ;;  %v5287_v50 = vld [vmem:[%s9602_s0 + $0xaa] sm:$0xff]  ;;  %v5288_v51 = vld [vmem:[%s9602_s0 + $0xb2] sm:$0xff] }
  0x3d   :  { %6387 = vmatprep.subr.bf16.mxu0 %v7313_v58  ;;  %6066 = vmatpush3.bf16.msra.mxu1 %v7315_v1  ;;  %v5262_v1 = vld [vmem:[%s9602_s0 + $0x309] sm:$0xff] }
  0x3e   :  { %6067 = vmatprep.subr.bf16.mxu1 %v7316_v4 }
  0x40   :  { %6388 = vmatpush3.bf16.msra.mxu0 %v7313_v58  ;;  %v5258_v58 = vld [vmem:[%s9602_s0 + $0x2d9] sm:$0xff] }
  0x41   :  { %6453 = vmatprep.subr.bf16.mxu0 %v7560_v0  ;;  %6068 = vmatpush3.bf16.msra.mxu1 %v7316_v4  ;;  %v2039_v4 = vpack.c.bf16 %v5262_v1, %v5261_v63  ;;  %v5290_v63 = vld [vmem:[%s9602_s0 + $0xca] sm:$0xff]  ;;  %v37_v1 = vld [vmem:[%s9602_s0 + $0xc0] sm:$0xff] }
  0x42   :  { %6006 = vmatmul.mubr.bf16.gmra.mrb[16].mxu1 %v2018_v57  ;;  %v5257_v57 = vld [vmem:[%s9602_s0 + $0x2d1] sm:$0xff]  ;;  %6133 = vmatprep.subr.bf16.mxu1 %v7674_v56 }
  0x43   :  { %6326 = vmatmul.mubr.bf16.gmra.mrb[16].mxu0 %v2019_v2  ;;  %6009 = vmatprep.mubr.bf16.mxu1 %v2019_v2  ;;  %v2037_v61 = vpack.c.bf16 %v5258_v58, %v5257_v57  ;;  %v5263_v2 = vld [vmem:[%s9602_s0 + $0x319] sm:$0xff]  ;;  %v7847_v57 = vpack.c.bf16 %v5288_v51, %v5287_v50  ;;  %v7322_v58 = vld [vmem:[%s9601_s1 + $0x1a8] sm:$0xff]  }
  0x44   :  { %6329 = vmatprep.mubr.bf16.mxu0 %v2020_v3  ;;  %v50_v50 = vld [vmem:[%s9602_s0 + $0x158] sm:$0xff]  ;;  %v5303_v51 = vld [vmem:[%s9602_s0 + $0x16a] sm:$0xff] }
  0x4a   :  { %6010 = vmatmul.mubr.bf16.gmra.mrb[20].mxu1 %v2020_v3  ;;  %v5264_v3 = vld [vmem:[%s9602_s0 + $0x321] sm:$0xff] }
  0x4b   :  { %6330 = vmatmul.mubr.bf16.gmra.mrb[20].mxu0 %v2021_v9  ;;  %6013 = vmatprep.mubr.bf16.mxu1 %v2021_v9  ;;  %v2040_v5 = vpack.c.bf16 %v5264_v3, %v5263_v2  ;;  %v22_v9 = vld [vmem:[%s9602_s0 + $0x8] sm:$0xff]  ;;  %v5291_v3 = vld [vmem:[%s9602_s0 + $0xda] sm:$0xff] }
  0x4c   :  { %6333 = vmatprep.mubr.bf16.mxu0 %v2022_v10  ;;  %v85_v13 = vpack.c.bf16 %v22_v9, %v21_v8  ;;  %v38_v2 = vld [vmem:[%s9602_s0 + $0xc8] sm:$0xff] }
  0x4d   :  { %v7893_v9 = vpack.c.bf16 %v38_v2, %v37_v1  ;;  %v5306_v1 = vld [vmem:[%s9602_s0 + $0x18a] sm:$0xff] }
  0x4e   :  { %v53_v2 = vld [vmem:[%s9602_s0 + $0x1b0] sm:$0xff] }
  0x52   :  { %6014 = vmatmul.mubr.bf16.gmra.mrb[24].mxu1 %v2022_v10  ;;  %v5275_v10 = vld [vmem:[%s9602_s0 + $0x1a] sm:$0xff] }
  0x53   :  { %6334 = vmatmul.mubr.bf16.gmra.mrb[24].mxu0 %v2023_v15  ;;  %6017 = vmatprep.mubr.bf16.mxu1 %v2023_v15  ;;  %v7719_v14 = vpack.c.bf16 %v5276_v11, %v5275_v10  ;;  %v23_v15 = vld [vmem:[%s9602_s0 + $0x18] sm:$0xff] }
  0x54   :  { %6337 = vmatprep.mubr.bf16.mxu0 %v2024_v16  ;;  %v7329_v11 = vld [vmem:[%s9601_s1 + $0x1b8] sm:$0xff]  }
  0x5a   :  { %6018 = vmatmul.mubr.bf16.gmra.mrb[28].mxu1 %v2024_v16  ;;  %v24_v16 = vld [vmem:[%s9602_s0 + $0x20] sm:$0xff] }
  0x5b   :  { %6338 = vmatmul.mubr.bf16.gmra.mrb[28].mxu0 %v2025_v23  ;;  %6021 = vmatprep.mubr.bf16.mxu1 %v213_v24  ;;  %v86_v23 = vpack.c.bf16 %v24_v16, %v23_v15  ;;  %v7746_v24 = vpack.c.bf16 %v5278_v18, %v5277_v17  ;;  %v40_v15 = vld [vmem:[%s9602_s0 + $0xe0] sm:$0xff]  ;;  %v5293_v16 = vld [vmem:[%s9602_s0 + $0xf2] sm:$0xff] }
  0x5c   :  { %6341 = vmatprep.mubr.bf16.mxu0 %v2026_v25  ;;  %v5294_v17 = vld [vmem:[%s9602_s0 + $0xfa] sm:$0xff]  ;;  %v41_v18 = vld [vmem:[%s9602_s0 + $0xf0] sm:$0xff] }
  0x62   :  { %6022 = vmatmul.mubr.bf16.gmra.mrb[32].mxu1 %v2026_v25  ;;  %v7748_v25 = vpack.c.bf16 %v26_v20, %v25_v19  ;;  %v42_v19 = vld [vmem:[%s9602_s0 + $0xf8] sm:$0xff]  ;;  %v5295_v20 = vld [vmem:[%s9602_s0 + $0x10a] sm:$0xff] }
  0x63   :  { %6342 = vmatmul.mubr.bf16.gmra.mrb[32].mxu0 %v2027_v30  ;;  %6025 = vmatprep.mubr.bf16.mxu1 %v2027_v30  ;;  %v28_v30 = vld [vmem:[%s9602_s0 + $0x50] sm:$0xff] }
  0x64   :  { %6345 = vmatprep.mubr.bf16.mxu0 %v2028_v31 }
  0x6a   :  { %6026 = vmatmul.mubr.bf16.gmra.mrb[36].mxu1 %v2028_v31  ;;  %v5281_v31 = vld [vmem:[%s9602_s0 + $0x62] sm:$0xff] }
  0x6b   :  { %6346 = vmatmul.mubr.bf16.gmra.mrb[36].mxu0 %v2029_v36  ;;  %6029 = vmatprep.mubr.bf16.mxu1 %v2029_v36  ;;  %v7319_v36 = vld [vmem:[%s9601_s1 + $0x190] sm:$0xff]   ;;  %v7795_v39 = vpack.c.bf16 %v5282_v32, %v5281_v31  ;;  %v5297_v32 = vld [vmem:[%s9602_s0 + $0x122] sm:$0xff] }
  0x6c   :  { %6349 = vmatprep.mubr.bf16.mxu0 %v2030_v37  ;;  %v44_v31 = vld [vmem:[%s9602_s0 + $0x110] sm:$0xff] }
  0x72   :  { %6030 = vmatmul.mubr.bf16.gmra.mrb[40].mxu1 %v2030_v37  ;;  %v7790_v37 = vpack.c.bf16 %v28_v30, %v27_v29  ;;  %v7942_v29 = vpack.c.bf16 %v5296_v21, %v5295_v20  ;;  %v43_v30 = vld [vmem:[%s9602_s0 + $0x108] sm:$0xff]  ;;  %v5311_v21 = vld [vmem:[%s9602_s0 + $0x1fa] sm:$0xff] }
  0x73   :  { %6350 = vmatmul.mubr.bf16.gmra.mrb[40].mxu0 %v2031_v42  ;;  %6033 = vmatprep.mubr.bf16.mxu1 %v2031_v42  ;;  %v7320_v42 = vld [vmem:[%s9601_s1 + $0x198] sm:$0xff]   ;;  %v58_v20 = vld [vmem:[%s9602_s0 + $0x1e8] sm:$0xff] }
  0x74   :  { %6353 = vmatprep.mubr.bf16.mxu0 %v2032_v43 }
  0x7a   :  { %6034 = vmatmul.mubr.bf16.gmra.mrb[44].mxu1 %v2032_v43  ;;  %v7327_v43 = vld [vmem:[%s9601_s1 + $0x98] sm:$0xff]  }
  0x7b   :  { %6354 = vmatmul.mubr.bf16.gmra.mrb[44].mxu0 %v2033_v48  ;;  %6037 = vmatprep.mubr.bf16.mxu1 %v2033_v48  ;;  %v33_v48 = vld [vmem:[%s9602_s0 + $0x90] sm:$0xff] }
  0x7c   :  { %6357 = vmatprep.mubr.bf16.mxu0 %v2034_v49 }
  0x82   :  { %6038 = vmatmul.mubr.bf16.gmra.mrb[48].mxu1 %v2034_v49  ;;  %v34_v49 = vld [vmem:[%s9602_s0 + $0x98] sm:$0xff] }
  0x83   :  { %6358 = vmatmul.mubr.bf16.gmra.mrb[48].mxu0 %v2035_v54  ;;  %6041 = vmatprep.mubr.bf16.mxu1 %v2035_v54  ;;  %v7328_v54 = vld [vmem:[%s9601_s1 + $0xa0] sm:$0xff]  }
  0x84   :  { %6361 = vmatprep.mubr.bf16.mxu0 %v2036_v55 }
  0x8a   :  { %6042 = vmatmul.mubr.bf16.gmra.mrb[52].mxu1 %v2036_v55  ;;  %v7843_v55 = vpack.c.bf16 %v5286_v47, %v5285_v46  ;;  %v48_v46 = vld [vmem:[%s9602_s0 + $0x140] sm:$0xff]  ;;  %v5301_v47 = vld [vmem:[%s9602_s0 + $0x152] sm:$0xff] }
  0x8b   :  { %6362 = vmatmul.mubr.bf16.gmra.mrb[52].mxu0 %v2037_v61  ;;  %6045 = vmatprep.mubr.bf16.mxu1 %v2037_v61  ;;  %v36_v61 = vld [vmem:[%s9602_s0 + $0xb0] sm:$0xff] }
  0x8c   :  { %6365 = vmatprep.mubr.bf16.mxu0 %v2038_v62  ;;  %v7886_v6 = vpack.c.bf16 %v36_v61, %v35_v60  ;;  %v51_v61 = vld [vmem:[%s9602_s0 + $0x168] sm:$0xff] }
  0x92   :  { %6046 = vmatmul.mubr.bf16.gmra.mrb[56].mxu1 %v2038_v62  ;;  %v5289_v62 = vld [vmem:[%s9602_s0 + $0xc2] sm:$0xff] }
  0x93   :  { %6366 = vmatmul.mubr.bf16.gmra.mrb[56].mxu0 %v2039_v4  ;;  %6049 = vmatprep.mubr.bf16.mxu1 %v2039_v4  ;;  %v5292_v4 = vld [vmem:[%s9602_s0 + $0xe2] sm:$0xff]  ;;  %v7891_v8 = vpack.c.bf16 %v5290_v63, %v5289_v62  ;;  %v52_v62 = vld [vmem:[%s9602_s0 + $0x170] sm:$0xff] }
  0x94   :  { %6369 = vmatprep.mubr.bf16.mxu0 %v2040_v5  ;;  %v7895_v10 = vpack.c.bf16 %v5292_v4, %v5291_v3  ;;  %v5305_v63 = vld [vmem:[%s9602_s0 + $0x182] sm:$0xff]  ;;  %v54_v3 = vld [vmem:[%s9602_s0 + $0x1b8] sm:$0xff]  ;;  %v5307_v4 = vld [vmem:[%s9602_s0 + $0x1ca] sm:$0xff] }
  0x9a   :  { %6050 = vmatmul.mubr.bf16.gmra.mrb[60].mxu1 %v2040_v5  ;;  %v7324_v5 = vld [vmem:[%s9601_s1 + $0x1b0] sm:$0xff]  }
  0x9b   :  { %6370 = vmatmul.mubr.bf16.gmra.mrb[60].mxu0 %v2041_v12  ;;  %6069 = vmatprep.mubr.bf16.mxu1 %v85_v13  ;;  %v7332_v12 = vld [vmem:[%s9601_s1 + $0xb8] sm:$0xff]  }
  0x9c   :  { %6389 = vmatprep.mubr.bf16.mxu0 %v7719_v14  ;;  %v39_v13 = vld [vmem:[%s9602_s0 + $0xd8] sm:$0xff] }
  0xa2   :  { %6070 = vmatmul.mubr.bf16.vlgmr.msra.gmra.mrb[0].mxu1 %v86_v23  ;;  %v7936_v23 = vpack.c.bf16 %v40_v15, %v39_v13  ;;  %v55_v15 = vld [vmem:[%s9602_s0 + $0x1c8] sm:$0xff] }
  0xa3   :  { %6390 = vmatmul.mubr.bf16.vlgmr.msra.gmra.mrb[0].mxu0 %v7746_v24  ;;  %6073 = vmatprep.mubr.bf16.mxu1 %v7748_v25 }
  0xa4   :  { %6454 = vmatpush3.bf16.msra.mxu0 %v7560_v0  ;;  %6393 = vmatprep.mubr.bf16.mxu0 %v7750_v26  ;;  %v5284_v0 = vld [vmem:[%s9602_s0 + $0x82] sm:$0xff] }
  0xa5   :  { %6455 = vmatprep.subr.bf16.mxu0 %v7318_v27  ;;  %6134 = vmatpush3.bf16.msra.mxu1 %v7674_v56  ;;  %v7799_v41 = vpack.c.bf16 %v5284_v0, %v5283_v35  ;;  %v7845_v56 = vpack.c.bf16 %v34_v49, %v33_v48  ;;  %v46_v35 = vld [vmem:[%s9602_s0 + $0x128] sm:$0xff]  ;;  %v5299_v0 = vld [vmem:[%s9602_s0 + $0x13a] sm:$0xff]  ;;  %v49_v49 = vld [vmem:[%s9602_s0 + $0x150] sm:$0xff] }
  0xa6   :  { %6135 = vmatprep.subr.bf16.mxu1 %v7325_v28  ;;  %v5302_v48 = vld [vmem:[%s9602_s0 + $0x15a] sm:$0xff] }
  0xa8   :  { %6456 = vmatpush3.bf16.msra.mxu0 %v7318_v27  ;;  %v7938_v27 = vpack.c.bf16 %v5294_v17, %v5293_v16  ;;  %v56_v16 = vld [vmem:[%s9602_s0 + $0x1d0] sm:$0xff]  ;;  %v5309_v17 = vld [vmem:[%s9602_s0 + $0x1e2] sm:$0xff] }
  0xa9   :  { %6457 = vmatprep.subr.bf16.mxu0 %v7319_v36  ;;  %6136 = vmatpush3.bf16.msra.mxu1 %v7325_v28  ;;  %v7940_v28 = vpack.c.bf16 %v42_v19, %v41_v18  ;;  %v5310_v18 = vld [vmem:[%s9602_s0 + $0x1ea] sm:$0xff]  ;;  %v57_v19 = vld [vmem:[%s9602_s0 + $0x1e0] sm:$0xff] }
  0xaa   :  { %6074 = vmatmul.mubr.bf16.gmra.mrb[4].mxu1 %v7790_v37  ;;  %6137 = vmatprep.subr.bf16.mxu1 %v7326_v38 }
  0xab   :  { %6394 = vmatmul.mubr.bf16.gmra.mrb[4].mxu0 %v7795_v39  ;;  %6077 = vmatprep.mubr.bf16.mxu1 %v7797_v40 }
  0xac   :  { %6397 = vmatprep.mubr.bf16.mxu0 %v7799_v41  ;;  %6458 = vmatpush3.bf16.msra.mxu0 %v7319_v36  ;;  %v5300_v36 = vld [vmem:[%s9602_s0 + $0x142] sm:$0xff] }
  0xad   :  { %6459 = vmatprep.subr.bf16.mxu0 %v7320_v42  ;;  %6138 = vmatpush3.bf16.msra.mxu1 %v7326_v38  ;;  %v7973_v38 = vpack.c.bf16 %v44_v31, %v43_v30  ;;  %v7979_v44 = vpack.c.bf16 %v5300_v36, %v5299_v0  ;;  %v5312_v30 = vld [vmem:[%s9602_s0 + $0x202] sm:$0xff]  ;;  %v102_v31 = vpack.c.bf16 %v56_v16, %v55_v15  ;;  %v5313_v36 = vld [vmem:[%s9602_s0 + $0x212] sm:$0xff] }
  0xae   :  { %6139 = vmatprep.subr.bf16.mxu1 %v7327_v43  ;;  %v60_v0 = vld [vmem:[%s9602_s0 + $0x200] sm:$0xff] }
  0xb0   :  { %6460 = vmatpush3.bf16.msra.mxu0 %v7320_v42  ;;  %v7975_v42 = vpack.c.bf16 %v5298_v33, %v5297_v32  ;;  %v8075_v32 = vpack.c.bf16 %v5310_v18, %v5309_v17  ;;  %v8077_v33 = vpack.c.bf16 %v58_v20, %v57_v19  ;;  %v67_v18 = vld [vmem:[%s9602_s0 + $0x258] sm:$0xff]  ;;  %v68_v19 = vld [vmem:[%s9602_s0 + $0x260] sm:$0xff] }
  0xb1   :  { %6461 = vmatprep.subr.bf16.mxu0 %v7321_v52  ;;  %6140 = vmatpush3.bf16.msra.mxu1 %v7327_v43  ;;  %v7977_v43 = vpack.c.bf16 %v46_v35, %v45_v34  ;;  %v8079_v34 = vpack.c.bf16 %v5312_v30, %v5311_v21  ;;  %v59_v35 = vld [vmem:[%s9602_s0 + $0x1f8] sm:$0xff]  ;;  %v69_v30 = vld [vmem:[%s9602_s0 + $0x270] sm:$0xff] }
  0xb2   :  { %6078 = vmatmul.mubr.bf16.gmra.mrb[8].mxu1 %v7838_v53  ;;  %6141 = vmatprep.subr.bf16.mxu1 %v7328_v54  ;;  %v5321_v20 = vld [vmem:[%s9602_s0 + $0x272] sm:$0xff]  ;;  %v5322_v21 = vld [vmem:[%s9602_s0 + $0x27a] sm:$0xff] }
  0xb3   :  { %6398 = vmatmul.mubr.bf16.gmra.mrb[8].mxu0 %v7843_v55  ;;  %6081 = vmatprep.mubr.bf16.mxu1 %v7845_v56 }
  0xb4   :  { %6401 = vmatprep.mubr.bf16.mxu0 %v7847_v57  ;;  %6462 = vmatpush3.bf16.msra.mxu0 %v7321_v52  ;;  %v5304_v52 = vld [vmem:[%s9602_s0 + $0x172] sm:$0xff] }
  0xb5   :  { %6463 = vmatprep.subr.bf16.mxu0 %v7322_v58  ;;  %6142 = vmatpush3.bf16.msra.mxu1 %v7328_v54  ;;  %v8009_v54 = vpack.c.bf16 %v48_v46, %v47_v45  ;;  %v8015_v60 = vpack.c.bf16 %v5304_v52, %v5303_v51  ;;  %v5314_v45 = vld [vmem:[%s9602_s0 + $0x21a] sm:$0xff]  ;;  %v61_v46 = vld [vmem:[%s9602_s0 + $0x210] sm:$0xff] }
  0xb6   :  { %6143 = vmatprep.subr.bf16.mxu1 %v7330_v59  ;;  %v8110_v51 = vpack.c.bf16 %v5314_v45, %v5313_v36  ;;  %v8180_v36 = vpack.c.bf16 %v68_v19, %v67_v18  ;;  %v8182_v45 = vpack.c.bf16 %v5322_v21, %v5321_v20  ;;  %v7339_v20 = vld [vmem:[%s9601_s1 + $0xc0] sm:$0xff]   ;;  %v75_v21 = vld [vmem:[%s9602_s0 + $0x2b8] sm:$0xff] }
  0xb8   :  { %6464 = vmatpush3.bf16.msra.mxu0 %v7322_v58  ;;  %v8011_v58 = vpack.c.bf16 %v5302_v48, %v5301_v47  ;;  %v62_v47 = vld [vmem:[%s9602_s0 + $0x218] sm:$0xff]  ;;  %v5315_v48 = vld [vmem:[%s9602_s0 + $0x22a] sm:$0xff] }
  0xb9   :  { %6465 = vmatprep.subr.bf16.mxu0 %v7324_v5  ;;  %6144 = vmatpush3.bf16.msra.mxu1 %v7330_v59  ;;  %v8013_v59 = vpack.c.bf16 %v50_v50, %v49_v49  ;;  %v5316_v49 = vld [vmem:[%s9602_s0 + $0x232] sm:$0xff]  ;;  %v8108_v50 = vpack.c.bf16 %v60_v0, %v59_v35  ;;  %v8112_v52 = vpack.c.bf16 %v62_v47, %v61_v46  ;;  %v5323_v35 = vld [vmem:[%s9602_s0 + $0x28a] sm:$0xff] }
  0xba   :  { %6082 = vmatmul.mubr.bf16.gmra.mrb[12].mxu1 %v7886_v6  ;;  %6145 = vmatprep.subr.bf16.mxu1 %v7331_v7  ;;  %v5324_v0 = vld [vmem:[%s9602_s0 + $0x292] sm:$0xff] }
  0xbb   :  { %6402 = vmatmul.mubr.bf16.gmra.mrb[12].mxu0 %v7891_v8  ;;  %6085 = vmatprep.mubr.bf16.mxu1 %v7893_v9  ;;  %v8186_v47 = vpack.c.bf16 %v5324_v0, %v5323_v35  ;;  %v5330_v35 = vld [vmem:[%s9602_s0 + $0x2da] sm:$0xff]  ;;  %v77_v0 = vld [vmem:[%s9602_s0 + $0x2d0] sm:$0xff] }
  0xbc   :  { %6405 = vmatprep.mubr.bf16.mxu0 %v7895_v10  ;;  %6466 = vmatpush3.bf16.msra.mxu0 %v7324_v5  ;;  %v5308_v5 = vld [vmem:[%s9602_s0 + $0x1d2] sm:$0xff] }
  0xbd   :  { %6467 = vmatprep.subr.bf16.mxu0 %v7329_v11  ;;  %6146 = vmatpush3.bf16.msra.mxu1 %v7331_v7  ;;  %v8045_v7 = vpack.c.bf16 %v52_v62, %v51_v61  ;;  %v8047_v13 = vpack.c.bf16 %v5308_v5, %v5307_v4  ;;  %v8114_v61 = vpack.c.bf16 %v5316_v49, %v5315_v48  ;;  %v63_v62 = vld [vmem:[%s9602_s0 + $0x228] sm:$0xff]  ;;  %v5319_v5 = vld [vmem:[%s9602_s0 + $0x25a] sm:$0xff]  ;;  %v72_v49 = vld [vmem:[%s9602_s0 + $0x290] sm:$0xff] }
  0xbe   :  { %6147 = vmatprep.subr.bf16.mxu1 %v7332_v12  ;;  %v66_v4 = vld [vmem:[%s9602_s0 + $0x248] sm:$0xff] }
  0xbf   :  { %v71_v48 = vld [vmem:[%s9602_s0 + $0x288] sm:$0xff] }
  0xc0   :  { %6468 = vmatpush3.bf16.msra.mxu0 %v7329_v11  ;;  %v2538_v11 = vpack.c.bf16 %v5306_v1, %v5305_v63  ;;  %v64_v63 = vld [vmem:[%s9602_s0 + $0x230] sm:$0xff]  ;;  %v5317_v1 = vld [vmem:[%s9602_s0 + $0x242] sm:$0xff] }
  0xc1   :  { %6148 = vmatpush3.bf16.msra.mxu1 %v7332_v12  ;;  %6533 = vmatprep.subr.bf16.mxu0 %v7934_v22  ;;  %v101_v12 = vpack.c.bf16 %v54_v3, %v53_v2  ;;  %v5318_v2 = vld [vmem:[%s9602_s0 + $0x24a] sm:$0xff]  ;;  %v65_v3 = vld [vmem:[%s9602_s0 + $0x240] sm:$0xff] }
  0xc2   :  { %6086 = vmatmul.mubr.bf16.gmra.mrb[16].mxu1 %v7936_v23  ;;  %v8146_v15 = vpack.c.bf16 %v5318_v2, %v5317_v1  ;;  %v8148_v16 = vpack.c.bf16 %v66_v4, %v65_v3  ;;  %v73_v1 = vld [vmem:[%s9602_s0 + $0x2a0] sm:$0xff]  ;;  %v74_v2 = vld [vmem:[%s9602_s0 + $0x2a8] sm:$0xff]  ;;  %6213 = vmatprep.subr.bf16.mxu1 %v7339_v20 }
  0xc3   :  { %6406 = vmatmul.mubr.bf16.gmra.mrb[16].mxu0 %v7938_v27  ;;  %6089 = vmatprep.mubr.bf16.mxu1 %v7940_v28  ;;  %v5327_v3 = vld [vmem:[%s9602_s0 + $0x2ba] sm:$0xff]  ;;  %v5328_v4 = vld [vmem:[%s9602_s0 + $0x2c2] sm:$0xff]  ;;  %v8220_v18 = vpack.c.bf16 %v74_v2, %v73_v1 }
  0xc4   :  { %6409 = vmatprep.mubr.bf16.mxu0 %v7942_v29  ;;  %v8222_v19 = vpack.c.bf16 %v5328_v4, %v5327_v3  ;;  %v79_v4 = vld [vmem:[%s9602_s0 + $0x2e8] sm:$0xff] }
  0xc6   :  { %9613 = vst [vmem:[#allocation2_spill] sm:$0xff] %v8222_v19 }
  0xca   :  { %6090 = vmatmul.mubr.bf16.gmra.mrb[20].mxu1 %v7973_v38 }
  0xcb   :  { %6410 = vmatmul.mubr.bf16.gmra.mrb[20].mxu0 %v7975_v42  ;;  %6093 = vmatprep.mubr.bf16.mxu1 %v7977_v43 }
  0xcc   :  { %6413 = vmatprep.mubr.bf16.mxu0 %v7979_v44 }
  0xd2   :  { %6094 = vmatmul.mubr.bf16.gmra.mrb[24].mxu1 %v8009_v54 }
  0xd3   :  { %6414 = vmatmul.mubr.bf16.gmra.mrb[24].mxu0 %v8011_v58  ;;  %6097 = vmatprep.mubr.bf16.mxu1 %v8013_v59 }
  0xd4   :  { %6417 = vmatprep.mubr.bf16.mxu0 %v8015_v60 }
  0xda   :  { %6098 = vmatmul.mubr.bf16.gmra.mrb[28].mxu1 %v8045_v7 }
  0xdb   :  { %6418 = vmatmul.mubr.bf16.gmra.mrb[28].mxu0 %v2538_v11  ;;  %6101 = vmatprep.mubr.bf16.mxu1 %v101_v12  ;;  %v5320_v11 = vld [vmem:[%s9602_s0 + $0x262] sm:$0xff]  ;;  %v8144_v12 = vpack.c.bf16 %v64_v63, %v63_v62  ;;  %v5326_v63 = vld [vmem:[%s9602_s0 + $0x2aa] sm:$0xff] }
  0xdc   :  { %6421 = vmatprep.mubr.bf16.mxu0 %v8047_v13  ;;  %v8150_v17 = vpack.c.bf16 %v5320_v11, %v5319_v5  ;;  %v5325_v62 = vld [vmem:[%s9602_s0 + $0x2a2] sm:$0xff]  ;;  %v8216_v5 = vpack.c.bf16 %v72_v49, %v71_v48  ;;  %v78_v48 = vld [vmem:[%s9602_s0 + $0x2d8] sm:$0xff]  ;;  %v5331_v49 = vld [vmem:[%s9602_s0 + $0x2ea] sm:$0xff] }
  0xdd   :  { %v8218_v11 = vpack.c.bf16 %v5326_v63, %v5325_v62  ;;  %v5332_v62 = vld [vmem:[%s9602_s0 + $0x2f2] sm:$0xff]  ;;  %v8259_v2 = vpack.c.bf16 %v78_v48, %v77_v0  ;;  %v82_v0 = vld [vmem:[%s9602_s0 + $0x308] sm:$0xff]  ;;  %v5335_v48 = vld [vmem:[%s9602_s0 + $0x31a] sm:$0xff] }
  0xde   :  { %v8261_v3 = vpack.c.bf16 %v5332_v62, %v5331_v49  ;;  %v5336_v49 = vld [vmem:[%s9602_s0 + $0x322] sm:$0xff] }
  0xdf   :  { %9615 = vst [vmem:[#allocation4_spill] sm:$0xff] %v8259_v2 }
  0xe0   :  { %9616 = vst [vmem:[#allocation5_spill] sm:$0xff] %v8261_v3 }
  0xe2   :  { %6102 = vmatmul.mubr.bf16.gmra.mrb[32].mxu1 %v102_v31  ;;  %v70_v31 = vld [vmem:[%s9602_s0 + $0x278] sm:$0xff] }
  0xe3   :  { %6422 = vmatmul.mubr.bf16.gmra.mrb[32].mxu0 %v8075_v32  ;;  %6105 = vmatprep.mubr.bf16.mxu1 %v8077_v33  ;;  %v8184_v46 = vpack.c.bf16 %v70_v31, %v69_v30  ;;  %v76_v30 = vld [vmem:[%s9602_s0 + $0x2c0] sm:$0xff]  ;;  %v5329_v31 = vld [vmem:[%s9602_s0 + $0x2d2] sm:$0xff] }
  0xe4   :  { %6425 = vmatprep.mubr.bf16.mxu0 %v8079_v34  ;;  %v8255_v63 = vpack.c.bf16 %v76_v30, %v75_v21  ;;  %v8257_v1 = vpack.c.bf16 %v5330_v35, %v5329_v31  ;;  %v80_v21 = vld [vmem:[%s9602_s0 + $0x2f0] sm:$0xff]  ;;  %v5333_v30 = vld [vmem:[%s9602_s0 + $0x302] sm:$0xff] }
  0xe5   :  { %v5334_v31 = vld [vmem:[%s9602_s0 + $0x30a] sm:$0xff]  ;;  %v81_v35 = vld [vmem:[%s9602_s0 + $0x300] sm:$0xff]  ;;  %v8291_v62 = vpack.c.bf16 %v80_v21, %v79_v4  ;;  %v5337_v21 = vld [vmem:[%s9602_s0 + $0x332] sm:$0xff] }
  0xe6   :  { %9614 = vst [vmem:[#allocation3_spill] sm:$0xff] %v8257_v1  ;;  %v84_v4 = vld [vmem:[%s9602_s0 + $0x320] sm:$0xff] }
  0xea   :  { %6106 = vmatmul.mubr.bf16.gmra.mrb[36].mxu1 %v8108_v50 }
  0xeb   :  { %6426 = vmatmul.mubr.bf16.gmra.mrb[36].mxu0 %v8110_v51  ;;  %6109 = vmatprep.mubr.bf16.mxu1 %v8112_v52 }
  0xec   :  { %6429 = vmatprep.mubr.bf16.mxu0 %v8114_v61 }
  0xf2   :  { %6110 = vmatmul.mubr.bf16.gmra.mrb[40].mxu1 %v8144_v12 }
  0xf3   :  { %6430 = vmatmul.mubr.bf16.gmra.mrb[40].mxu0 %v8146_v15  ;;  %6113 = vmatprep.mubr.bf16.mxu1 %v8148_v16 }
  0xf4   :  { %6433 = vmatprep.mubr.bf16.mxu0 %v8150_v17 }
  0xfa   :  { %6114 = vmatmul.mubr.bf16.gmra.mrb[44].mxu1 %v8180_v36 }
  0xfb   :  { %6434 = vmatmul.mubr.bf16.gmra.mrb[44].mxu0 %v8182_v45  ;;  %6117 = vmatprep.mubr.bf16.mxu1 %v8184_v46 }
  0xfc   :  { %6437 = vmatprep.mubr.bf16.mxu0 %v8186_v47 }
 0x102   :  { %6118 = vmatmul.mubr.bf16.gmra.mrb[48].mxu1 %v8216_v5 }
 0x103   :  { %6438 = vmatmul.mubr.bf16.gmra.mrb[48].mxu0 %v8218_v11  ;;  %6121 = vmatprep.mubr.bf16.mxu1 %v8220_v18 }
 0x104   :  { %6441 = vmatprep.mubr.bf16.mxu0 %v8222_v19  ;;  %v8297_v19 = vpack.c.bf16 %v5336_v49, %v5335_v48 }
 0x106   :  { %9618 = vst [vmem:[#allocation7_spill] sm:$0xff] %v8297_v19 }
 0x10a   :  { %6122 = vmatmul.mubr.bf16.gmra.mrb[52].mxu1 %v8255_v63 }
 0x10b   :  { %6442 = vmatmul.mubr.bf16.gmra.mrb[52].mxu0 %v8257_v1  ;;  %6125 = vmatprep.mubr.bf16.mxu1 %v8259_v2  ;;  %v8295_v1 = vpack.c.bf16 %v82_v0, %v81_v35  ;;  %v83_v2 = vld [vmem:[%s9602_s0 + $0x318] sm:$0xff]  ;;  %v920_v35 = vld [vmem:[%s9602_s0 + $0xa] sm:$0xff] }
 0x10c   :  { %6445 = vmatprep.mubr.bf16.mxu0 %v8261_v3  ;;  %v8293_v3 = vpack.c.bf16 %v5334_v31, %v5333_v30  ;;  %v5338_v30 = vld [vmem:[%s9602_s0 + $0x33a] sm:$0xff]  ;;  %v919_v31 = vld [vmem:[%s9602_s0 + $0x2] sm:$0xff]  ;;  %v8321_v0 = vpack.c.bf16 %v84_v4, %v83_v2 }
 0x10d   :  { %v2554_v48 = vpack.c.bf16 %v5338_v30, %v5337_v21  ;;  %v983_v49 = vpack.c.bf16 %v920_v35, %v919_v31  ;;  %v5137_v2 = vld [vmem:[%s9602_s0 + $0x60] sm:$0xff]  ;;  %v5139_v21 = vld [vmem:[%s9602_s0 + $0x78] sm:$0xff] }
 0x10e   :  { %9617 = vst [vmem:[#allocation6_spill] sm:$0xff] %v8293_v3  ;;  %v5426_v4 = vld [vmem:[%s9602_s0 + $0x81] sm:$0xff]  ;;  %v5427_v31 = vld [vmem:[%s9602_s0 + $0x91] sm:$0xff]  ;;  %v5428_v35 = vld [vmem:[%s9602_s0 + $0x99] sm:$0xff] }
 0x10f   :  { %v5140_v30 = vld [vmem:[%s9602_s0 + $0x80] sm:$0xff] }
 0x112   :  { %6126 = vmatmul.mubr.bf16.gmra.mrb[56].mxu1 %v8291_v62 }
 0x113   :  { %6446 = vmatmul.mubr.bf16.gmra.mrb[56].mxu0 %v8293_v3  ;;  %6129 = vmatprep.mubr.bf16.mxu1 %v8295_v1  ;;  %v7341_v3 = vld [vmem:[%s9601_s1 + $0xc8] sm:$0xff]  }
 0x114   :  { %6449 = vmatprep.mubr.bf16.mxu0 %v8297_v19  ;;  %v7334_v19 = vld [vmem:[%s9601_s1 + $0x1c8] sm:$0xff]  }
 0x11a   :  { %6130 = vmatmul.mubr.bf16.gmra.mrb[60].mxu1 %v8321_v0 }
 0x11b   :  { %6450 = vmatmul.mubr.bf16.gmra.mrb[60].mxu0 %v2554_v48  ;;  %6149 = vmatprep.mubr.bf16.mxu1 %v983_v49 }
 0x11c   :  { %6469 = vmatprep.mubr.bf16.mxu0 %v7748_v25  ;;  %v7335_v25 = vld [vmem:[%s9601_s1 + $0x1d0] sm:$0xff]  }
 0x122   :  { %6150 = vmatmul.mubr.bf16.vlgmr.msra.gmra.mrb[0].mxu1 %v7719_v14  ;;  %v7342_v14 = vld [vmem:[%s9601_s1 + $0xd0] sm:$0xff]  }
 0x123   :  { %6470 = vmatmul.mubr.bf16.vlgmr.msra.gmra.mrb[0].mxu0 %v7790_v37  ;;  %6153 = vmatprep.mubr.bf16.mxu1 %v7746_v24  ;;  %v7336_v24 = vld [vmem:[%s9601_s1 + $0x1d8] sm:$0xff]  }
 0x124   :  { %6534 = vmatpush3.bf16.msra.mxu0 %v7934_v22  ;;  %6473 = vmatprep.mubr.bf16.mxu0 %v7797_v40  ;;  %v7343_v37 = vld [vmem:[%s9601_s1 + $0xd8] sm:$0xff]   ;;  %v7337_v40 = vld [vmem:[%s9601_s1 + $0x1e0] sm:$0xff]  }
 0x125   :  { %6535 = vmatprep.subr.bf16.mxu0 %v7334_v19  ;;  %6214 = vmatpush3.bf16.msra.mxu1 %v7339_v20  ;;  %v5377_v22 = vld [vmem:[%s9602_s0 + $0x198] sm:$0xff] }
 0x126   :  { %6215 = vmatprep.subr.bf16.mxu1 %v7341_v3 }
 0x128   :  { %6536 = vmatpush3.bf16.msra.mxu0 %v7334_v19 }
 0x129   :  { %6537 = vmatprep.subr.bf16.mxu0 %v7335_v25  ;;  %6216 = vmatpush3.bf16.msra.mxu1 %v7341_v3  ;;  %v5138_v3 = vld [vmem:[%s9602_s0 + $0x68] sm:$0xff] }
 0x12a   :  { %6154 = vmatmul.mubr.bf16.gmra.mrb[4].mxu1 %v7750_v26  ;;  %6217 = vmatprep.subr.bf16.mxu1 %v7342_v14  ;;  %v7344_v26 = vld [vmem:[%s9601_s1 + $0xe0] sm:$0xff]   ;;  %v1500_v48 = vpack.c.bf16 %v5138_v3, %v5137_v2 }
 0x12b   :  { %6474 = vmatmul.mubr.bf16.gmra.mrb[4].mxu0 %v7838_v53  ;;  %6157 = vmatprep.mubr.bf16.mxu1 %v7795_v39  ;;  %v7338_v39 = vld [vmem:[%s9601_s1 + $0x1e8] sm:$0xff]  }
 0x12c   :  { %6477 = vmatprep.mubr.bf16.mxu0 %v7845_v56  ;;  %6538 = vmatpush3.bf16.msra.mxu0 %v7335_v25  ;;  %v7346_v53 = vld [vmem:[%s9601_s1 + $0xe8] sm:$0xff]   ;;  %v7340_v56 = vld [vmem:[%s9601_s1 + $0x1f0] sm:$0xff]   ;;  %v1501_v25 = vpack.c.bf16 %v5140_v30, %v5139_v21  ;;  %v5158_v30 = vld [vmem:[%s9602_s0 + $0x158] sm:$0xff] }
 0x12d   :  { %6539 = vmatprep.subr.bf16.mxu0 %v7336_v24  ;;  %6218 = vmatpush3.bf16.msra.mxu1 %v7342_v14  ;;  %v3554_v14 = vpack.c.bf16 %v5428_v35, %v5427_v31  ;;  %v5157_v21 = vld [vmem:[%s9602_s0 + $0x150] sm:$0xff] }
 0x12e   :  { %6219 = vmatprep.subr.bf16.mxu1 %v7343_v37  ;;  %v5445_v31 = vld [vmem:[%s9602_s0 + $0x169] sm:$0xff]  ;;  %v5446_v35 = vld [vmem:[%s9602_s0 + $0x171] sm:$0xff] }
 0x130   :  { %6540 = vmatpush3.bf16.msra.mxu0 %v7336_v24  ;;  %v7352_v24 = vld [vmem:[%s9601_s1 + $0x218] sm:$0xff]  }
 0x131   :  { %6541 = vmatprep.subr.bf16.mxu0 %v7337_v40  ;;  %6220 = vmatpush3.bf16.msra.mxu1 %v7343_v37  ;;  %v5141_v37 = vld [vmem:[%s9602_s0 + $0x90] sm:$0xff] }
 0x132   :  { %6158 = vmatmul.mubr.bf16.gmra.mrb[8].mxu1 %v7799_v41  ;;  %6221 = vmatprep.subr.bf16.mxu1 %v7344_v26  ;;  %v7347_v41 = vld [vmem:[%s9601_s1 + $0xf0] sm:$0xff]  }
 0x133   :  { %6478 = vmatmul.mubr.bf16.gmra.mrb[8].mxu0 %v7886_v6  ;;  %6161 = vmatprep.mubr.bf16.mxu1 %v7843_v55  ;;  %v7345_v55 = vld [vmem:[%s9601_s1 + $0x1f8] sm:$0xff]  }
 0x134   :  { %6481 = vmatprep.mubr.bf16.mxu0 %v7893_v9  ;;  %6542 = vmatpush3.bf16.msra.mxu0 %v7337_v40  ;;  %v7348_v6 = vld [vmem:[%s9601_s1 + $0xf8] sm:$0xff]   ;;  %v8387_v9 = vld [vmem:[%s9601_s1 + $0x200] sm:$0xff]  }
 0x135   :  { %6543 = vmatprep.subr.bf16.mxu0 %v7338_v39  ;;  %6222 = vmatpush3.bf16.msra.mxu1 %v7344_v26  ;;  %v5142_v40 = vld [vmem:[%s9602_s0 + $0x98] sm:$0xff]  ;;  %v5429_v26 = vld [vmem:[%s9602_s0 + $0xa9] sm:$0xff] }
 0x136   :  { %6223 = vmatprep.subr.bf16.mxu1 %v7346_v53 }
 0x138   :  { %6544 = vmatpush3.bf16.msra.mxu0 %v7338_v39  ;;  %v5430_v39 = vld [vmem:[%s9602_s0 + $0xb1] sm:$0xff] }
 0x139   :  { %6545 = vmatprep.subr.bf16.mxu0 %v7340_v56  ;;  %6224 = vmatpush3.bf16.msra.mxu1 %v7346_v53  ;;  %v5143_v53 = vld [vmem:[%s9602_s0 + $0xa8] sm:$0xff] }
 0x13a   :  { %6162 = vmatmul.mubr.bf16.gmra.mrb[12].mxu1 %v7847_v57  ;;  %6225 = vmatprep.subr.bf16.mxu1 %v7347_v41  ;;  %v5375_v57 = vld [vmem:[%s9602_s0 + $0x180] sm:$0xff] }
 0x13b   :  { %6482 = vmatmul.mubr.bf16.gmra.mrb[12].mxu0 %v7936_v23  ;;  %6165 = vmatprep.mubr.bf16.mxu1 %v7891_v8  ;;  %v5376_v8 = vld [vmem:[%s9602_s0 + $0x188] sm:$0xff]  ;;  %v5378_v23 = vld [vmem:[%s9602_s0 + $0x1a0] sm:$0xff] }
 0x13c   :  { %6485 = vmatprep.mubr.bf16.mxu0 %v7940_v28  ;;  %6546 = vmatpush3.bf16.msra.mxu0 %v7340_v56  ;;  %v952_v28 = vld [vmem:[%s9602_s0 + $0x1ba] sm:$0xff]  ;;  %v5144_v56 = vld [vmem:[%s9602_s0 + $0xb0] sm:$0xff] }
 0x13d   :  { %6547 = vmatprep.subr.bf16.mxu0 %v7345_v55  ;;  %6226 = vmatpush3.bf16.msra.mxu1 %v7347_v41  ;;  %v5431_v41 = vld [vmem:[%s9602_s0 + $0xc1] sm:$0xff] }
 0x13e   :  { %6227 = vmatprep.subr.bf16.mxu1 %v7348_v6 }
 0x140   :  { %6548 = vmatpush3.bf16.msra.mxu0 %v7345_v55  ;;  %v5432_v55 = vld [vmem:[%s9602_s0 + $0xc9] sm:$0xff] }
 0x141   :  { %6228 = vmatpush3.bf16.msra.mxu1 %v7348_v6  ;;  %6613 = vmatprep.subr.bf16.mxu0 %v8387_v9  ;;  %v7353_v6 = vld [vmem:[%s9601_s1 + $0x220] sm:$0xff]  }
 0x142   :  { %6166 = vmatmul.mubr.bf16.gmra.mrb[16].mxu1 %v7895_v10  ;;  %v8404_v10 = vpack.c.bf16 %v5376_v8, %v5375_v57  ;;  %v3555_v57 = vpack.c.bf16 %v5430_v39, %v5429_v26  ;;  %v1503_v8 = vpack.c.bf16 %v5144_v56, %v5143_v53  ;;  %v5449_v26 = vld [vmem:[%s9602_s0 + $0x199] sm:$0xff]  ;;  %v5450_v39 = vld [vmem:[%s9602_s0 + $0x1a1] sm:$0xff]  ;;  %v5164_v56 = vld [vmem:[%s9602_s0 + $0x1d0] sm:$0xff] }
 0x143   :  { %6486 = vmatmul.mubr.bf16.gmra.mrb[16].mxu0 %v7973_v38  ;;  %6169 = vmatprep.mubr.bf16.mxu1 %v7938_v27  ;;  %v951_v27 = vld [vmem:[%s9602_s0 + $0x1b2] sm:$0xff]  ;;  %v5163_v53 = vld [vmem:[%s9602_s0 + $0x1c8] sm:$0xff] }
 0x144   :  { %6489 = vmatprep.mubr.bf16.mxu0 %v7977_v43  ;;  %v999_v38 = vpack.c.bf16 %v952_v28, %v951_v27  ;;  %v9620_v43 = vld [vmem:[#allocation2_spill] sm:$0xff]  ;;  %v5146_v28 = vld [vmem:[%s9602_s0 + $0xc8] sm:$0xff] }
 0x145   :  { %v5145_v27 = vld [vmem:[%s9602_s0 + $0xc0] sm:$0xff] }
 0x14a   :  { %6170 = vmatmul.mubr.bf16.gmra.mrb[20].mxu1 %v7942_v29  ;;  %v3052_v29 = vpack.c.bf16 %v5378_v23, %v5377_v22  ;;  %v3556_v22 = vpack.c.bf16 %v5432_v55, %v5431_v41  ;;  %v7354_v23 = vld [vmem:[%s9601_s1 + $0x228] sm:$0xff]  }
 0x14b   :  { %6490 = vmatmul.mubr.bf16.gmra.mrb[20].mxu0 %v8009_v54  ;;  %6173 = vmatprep.mubr.bf16.mxu1 %v7975_v42  ;;  %v9619_v42 = vld [vmem:[#allocation4_spill] sm:$0xff]  ;;  %v5451_v41 = vld [vmem:[%s9602_s0 + $0x1e1] sm:$0xff] }
 0x14c   :  { %6493 = vmatprep.mubr.bf16.mxu0 %v8013_v59  ;;  %v5407_v54 = vld [vmem:[%s9602_s0 + $0x330] sm:$0xff] }
 0x14d   :  { %v5452_v55 = vld [vmem:[%s9602_s0 + $0x1e9] sm:$0xff] }
 0x152   :  { %6174 = vmatmul.mubr.bf16.gmra.mrb[24].mxu1 %v7979_v44  ;;  %v9621_v44 = vld [vmem:[#allocation3_spill] sm:$0xff] }
 0x153   :  { %6494 = vmatmul.mubr.bf16.gmra.mrb[24].mxu0 %v8045_v7  ;;  %6177 = vmatprep.mubr.bf16.mxu1 %v8011_v58  ;;  %v5408_v58 = vld [vmem:[%s9602_s0 + $0x338] sm:$0xff]  ;;  %v9623_v7 = vld [vmem:[#allocation6_spill] sm:$0xff] }
 0x154   :  { %6497 = vmatprep.mubr.bf16.mxu0 %v8404_v10  ;;  %v8454_v59 = vpack.c.bf16 %v5408_v58, %v5407_v54  ;;  %v5436_v54 = vld [vmem:[%s9602_s0 + $0xf9] sm:$0xff]  ;;  %v7355_v58 = vld [vmem:[%s9601_s1 + $0x230] sm:$0xff]  }
 0x15a   :  { %6178 = vmatmul.mubr.bf16.gmra.mrb[28].mxu1 %v8015_v60  ;;  %v9622_v60 = vld [vmem:[#allocation5_spill] sm:$0xff] }
 0x15b   :  { %6498 = vmatmul.mubr.bf16.gmra.mrb[28].mxu0 %v3052_v29  ;;  %6181 = vmatprep.mubr.bf16.mxu1 %v999_v38  ;;  %v5433_v29 = vld [vmem:[%s9602_s0 + $0xd9] sm:$0xff]  ;;  %v5434_v38 = vld [vmem:[%s9602_s0 + $0xe1] sm:$0xff] }
 0x15c   :  { %6501 = vmatprep.mubr.bf16.mxu0 %v8077_v33  ;;  %v5131_v33 = vld [vmem:[%s9602_s0 + $0x18] sm:$0xff] }
 0x162   :  { %6182 = vmatmul.mubr.bf16.gmra.mrb[32].mxu1 %v8047_v13  ;;  %v5409_v13 = vld [vmem:[%s9602_s0 + $0x348] sm:$0xff] }
 0x163   :  { %6502 = vmatmul.mubr.bf16.gmra.mrb[32].mxu0 %v8108_v50  ;;  %6185 = vmatprep.mubr.bf16.mxu1 %v8075_v32  ;;  %v5410_v32 = vld [vmem:[%s9602_s0 + $0x350] sm:$0xff] }
 0x164   :  { %6505 = vmatprep.mubr.bf16.mxu0 %v8112_v52  ;;  %v5419_v50 = vld [vmem:[%s9602_s0 + $0x31] sm:$0xff]  ;;  %v3068_v52 = vpack.c.bf16 %v5410_v32, %v5409_v13 }
 0x16a   :  { %6186 = vmatmul.mubr.bf16.gmra.mrb[36].mxu1 %v8079_v34  ;;  %v5132_v34 = vld [vmem:[%s9602_s0 + $0x20] sm:$0xff] }
 0x16b   :  { %6506 = vmatmul.mubr.bf16.gmra.mrb[36].mxu0 %v8144_v12  ;;  %6189 = vmatprep.mubr.bf16.mxu1 %v8110_v51  ;;  %v5420_v51 = vld [vmem:[%s9602_s0 + $0x39] sm:$0xff] }
 0x16c   :  { %6509 = vmatprep.mubr.bf16.mxu0 %v8148_v16  ;;  %v3550_v12 = vpack.c.bf16 %v5420_v51, %v5419_v50  ;;  %v5133_v16 = vld [vmem:[%s9602_s0 + $0x30] sm:$0xff]  ;;  %v5150_v50 = vld [vmem:[%s9602_s0 + $0xf8] sm:$0xff] }
 0x16d   :  { %v5437_v51 = vld [vmem:[%s9602_s0 + $0x109] sm:$0xff] }
 0x172   :  { %6190 = vmatmul.mubr.bf16.gmra.mrb[40].mxu1 %v8114_v61  ;;  %v1497_v61 = vpack.c.bf16 %v5132_v34, %v5131_v33  ;;  %v7356_v33 = vld [vmem:[%s9601_s1 + $0x238] sm:$0xff]   ;;  %v5149_v34 = vld [vmem:[%s9602_s0 + $0xf0] sm:$0xff] }
 0x173   :  { %6510 = vmatmul.mubr.bf16.gmra.mrb[40].mxu0 %v8180_v36  ;;  %6193 = vmatprep.mubr.bf16.mxu1 %v8146_v15  ;;  %v9624_v15 = vld [vmem:[#allocation7_spill] sm:$0xff] }
 0x174   :  { %6513 = vmatprep.mubr.bf16.mxu0 %v8184_v46  ;;  %v5421_v36 = vld [vmem:[%s9602_s0 + $0x49] sm:$0xff] }
 0x175   :  { %v5135_v46 = vld [vmem:[%s9602_s0 + $0x48] sm:$0xff] }
 0x17a   :  { %6194 = vmatmul.mubr.bf16.gmra.mrb[44].mxu1 %v8150_v17  ;;  %v5134_v17 = vld [vmem:[%s9602_s0 + $0x38] sm:$0xff] }
 0x17b   :  { %6514 = vmatmul.mubr.bf16.gmra.mrb[44].mxu0 %v8216_v5  ;;  %6197 = vmatprep.mubr.bf16.mxu1 %v8182_v45  ;;  %v5422_v45 = vld [vmem:[%s9602_s0 + $0x51] sm:$0xff]  ;;  %v5423_v5 = vld [vmem:[%s9602_s0 + $0x61] sm:$0xff] }
 0x17c   :  { %6517 = vmatprep.mubr.bf16.mxu0 %v8220_v18  ;;  %v1498_v18 = vpack.c.bf16 %v5134_v17, %v5133_v16  ;;  %v3551_v19 = vpack.c.bf16 %v5422_v45, %v5421_v36  ;;  %v5440_v16 = vld [vmem:[%s9602_s0 + $0x129] sm:$0xff]  ;;  %v1506_v17 = vpack.c.bf16 %v5150_v50, %v5149_v34  ;;  %v5459_v34 = vld [vmem:[%s9602_s0 + $0x241] sm:$0xff] }
 0x17d   :  { %v5460_v50 = vld [vmem:[%s9602_s0 + $0x249] sm:$0xff] }
 0x182   :  { %6198 = vmatmul.mubr.bf16.gmra.mrb[48].mxu1 %v8186_v47  ;;  %v5136_v47 = vld [vmem:[%s9602_s0 + $0x50] sm:$0xff] }
 0x183   :  { %6518 = vmatmul.mubr.bf16.gmra.mrb[48].mxu0 %v8255_v63  ;;  %6201 = vmatprep.mubr.bf16.mxu1 %v8218_v11  ;;  %v5424_v11 = vld [vmem:[%s9602_s0 + $0x69] sm:$0xff]  ;;  %v1499_v20 = vpack.c.bf16 %v5136_v47, %v5135_v46  ;;  %v5153_v47 = vld [vmem:[%s9602_s0 + $0x120] sm:$0xff] }
 0x184   :  { %6521 = vmatprep.mubr.bf16.mxu0 %v9619_v42  ;;  %v3552_v63 = vpack.c.bf16 %v5424_v11, %v5423_v5  ;;  %v5147_v42 = vld [vmem:[%s9602_s0 + $0xd8] sm:$0xff]  ;;  %v5154_v5 = vld [vmem:[%s9602_s0 + $0x128] sm:$0xff] }
 0x185   :  { %v5441_v11 = vld [vmem:[%s9602_s0 + $0x139] sm:$0xff]  ;;  %v1508_v2 = vpack.c.bf16 %v5154_v5, %v5153_v47  ;;  %v5463_v47 = vld [vmem:[%s9602_s0 + $0x271] sm:$0xff] }
 0x186   :  { %v5464_v5 = vld [vmem:[%s9602_s0 + $0x279] sm:$0xff] }
 0x18a   :  { %6202 = vmatmul.mubr.bf16.gmra.mrb[52].mxu1 %v9620_v43  ;;  %v5148_v43 = vld [vmem:[%s9602_s0 + $0xe0] sm:$0xff] }
 0x18b   :  { %6522 = vmatmul.mubr.bf16.gmra.mrb[52].mxu0 %v8291_v62  ;;  %6205 = vmatprep.mubr.bf16.mxu1 %v9621_v44  ;;  %v5425_v62 = vld [vmem:[%s9602_s0 + $0x79] sm:$0xff]  ;;  %v5435_v44 = vld [vmem:[%s9602_s0 + $0xf1] sm:$0xff]  ;;  %v1505_v13 = vpack.c.bf16 %v5148_v43, %v5147_v42 }
 0x18c   :  { %6525 = vmatprep.mubr.bf16.mxu0 %v8295_v1  ;;  %v7350_v1 = vld [vmem:[%s9601_s1 + $0x208] sm:$0xff]   ;;  %v3553_v49 = vpack.c.bf16 %v5426_v4, %v5425_v62  ;;  %v3558_v32 = vpack.c.bf16 %v5436_v54, %v5435_v44 }
 0x192   :  { %6206 = vmatmul.mubr.bf16.gmra.mrb[56].mxu1 %v9622_v60  ;;  %v1504_v60 = vpack.c.bf16 %v5146_v28, %v5145_v27  ;;  %v5454_v27 = vld [vmem:[%s9602_s0 + $0x201] sm:$0xff] }
 0x193   :  { %6526 = vmatmul.mubr.bf16.gmra.mrb[56].mxu0 %v8321_v0  ;;  %6209 = vmatprep.mubr.bf16.mxu1 %v9623_v7  ;;  %v7351_v0 = vld [vmem:[%s9601_s1 + $0x210] sm:$0xff]   ;;  %v3557_v7 = vpack.c.bf16 %v5434_v38, %v5433_v29  ;;  %v5168_v28 = vld [vmem:[%s9602_s0 + $0x200] sm:$0xff] }
 0x194   :  { %6529 = vmatprep.mubr.bf16.mxu0 %v8454_v59  ;;  %v5455_v29 = vld [vmem:[%s9602_s0 + $0x211] sm:$0xff]  ;;  %v5456_v38 = vld [vmem:[%s9602_s0 + $0x219] sm:$0xff] }
 0x195   :  { %v3568_v54 = vpack.c.bf16 %v5456_v38, %v5455_v29 }
 0x19a   :  { %6210 = vmatmul.mubr.bf16.gmra.mrb[60].mxu1 %v9624_v15  ;;  %v5439_v15 = vld [vmem:[%s9602_s0 + $0x121] sm:$0xff] }
 0x19b   :  { %6530 = vmatmul.mubr.bf16.gmra.mrb[60].mxu0 %v3068_v52  ;;  %6229 = vmatprep.mubr.bf16.mxu1 %v1497_v61  ;;  %v5438_v52 = vld [vmem:[%s9602_s0 + $0x111] sm:$0xff]  ;;  %v5151_v61 = vld [vmem:[%s9602_s0 + $0x108] sm:$0xff]  ;;  %v3560_v46 = vpack.c.bf16 %v5440_v16, %v5439_v15  ;;  %v5173_v15 = vld [vmem:[%s9602_s0 + $0x240] sm:$0xff] }
 0x19c   :  { %6549 = vmatprep.mubr.bf16.mxu0 %v3550_v12  ;;  %v5152_v12 = vld [vmem:[%s9602_s0 + $0x110] sm:$0xff]  ;;  %v3559_v36 = vpack.c.bf16 %v5438_v52, %v5437_v51  ;;  %v5174_v16 = vld [vmem:[%s9602_s0 + $0x248] sm:$0xff] }
 0x19d   :  { %v1507_v45 = vpack.c.bf16 %v5152_v12, %v5151_v61  ;;  %v3570_v12 = vpack.c.bf16 %v5460_v50, %v5459_v34 }
 0x1a2   :  { %6230 = vmatmul.mubr.bf16.vlgmr.msra.gmra.mrb[0].mxu1 %v1498_v18  ;;  %v5442_v18 = vld [vmem:[%s9602_s0 + $0x141] sm:$0xff] }
 0x1a3   :  { %6550 = vmatmul.mubr.bf16.vlgmr.msra.gmra.mrb[0].mxu0 %v3551_v19  ;;  %6233 = vmatprep.mubr.bf16.mxu1 %v1499_v20  ;;  %v5155_v19 = vld [vmem:[%s9602_s0 + $0x138] sm:$0xff]  ;;  %v5156_v20 = vld [vmem:[%s9602_s0 + $0x140] sm:$0xff]  ;;  %v3561_v3 = vpack.c.bf16 %v5442_v18, %v5441_v11  ;;  %v1518_v11 = vpack.c.bf16 %v5174_v16, %v5173_v15 }
 0x1a4   :  { %6614 = vmatpush3.bf16.msra.mxu0 %v8387_v9  ;;  %6553 = vmatprep.mubr.bf16.mxu0 %v3552_v63  ;;  %v1502_v9 = vpack.c.bf16 %v5142_v40, %v5141_v37  ;;  %v5443_v63 = vld [vmem:[%s9602_s0 + $0x151] sm:$0xff]  ;;  %v1509_v62 = vpack.c.bf16 %v5156_v20, %v5155_v19  ;;  %v3572_v20 = vpack.c.bf16 %v5464_v5, %v5463_v47  ;;  %v5495_v5 = vld [vmem:[%s9602_s0 + $0x62] sm:$0xff] }
 0x1a5   :  { %6615 = vmatprep.subr.bf16.mxu0 %v7350_v1  ;;  %v5482_v15 = vld [vmem:[%s9602_s0 + $0x351] sm:$0xff] }
 0x1a6   :  { %v5491_v16 = vld [vmem:[%s9602_s0 + $0x32] sm:$0xff] }
 0x1a7   :  { %v5494_v47 = vld [vmem:[%s9602_s0 + $0x52] sm:$0xff] }
 0x1a8   :  { %6616 = vmatpush3.bf16.msra.mxu0 %v7350_v1  ;;  %v5444_v1 = vld [vmem:[%s9602_s0 + $0x159] sm:$0xff] }
 0x1a9   :  { %6617 = vmatprep.subr.bf16.mxu0 %v7351_v0  ;;  %v3562_v4 = vpack.c.bf16 %v5444_v1, %v5443_v63  ;;  %v5177_v63 = vld [vmem:[%s9602_s0 + $0x270] sm:$0xff]  ;;  %v5178_v1 = vld [vmem:[%s9602_s0 + $0x278] sm:$0xff] }
 0x1aa   :  { %6234 = vmatmul.mubr.bf16.gmra.mrb[4].mxu1 %v1500_v48  ;;  %v5160_v48 = vld [vmem:[%s9602_s0 + $0x170] sm:$0xff] }
 0x1ab   :  { %6554 = vmatmul.mubr.bf16.gmra.mrb[4].mxu0 %v3553_v49  ;;  %6237 = vmatprep.mubr.bf16.mxu1 %v1501_v25  ;;  %v5447_v49 = vld [vmem:[%s9602_s0 + $0x181] sm:$0xff]  ;;  %v5448_v25 = vld [vmem:[%s9602_s0 + $0x189] sm:$0xff] }
 0x1ac   :  { %6557 = vmatprep.mubr.bf16.mxu0 %v3554_v14  ;;  %6618 = vmatpush3.bf16.msra.mxu0 %v7351_v0  ;;  %v5159_v0 = vld [vmem:[%s9602_s0 + $0x168] sm:$0xff]  ;;  %v1510_v14 = vpack.c.bf16 %v5158_v30, %v5157_v21  ;;  %v3564_v40 = vpack.c.bf16 %v5448_v25, %v5447_v49  ;;  %v5181_v49 = vld [vmem:[%s9602_s0 + $0x2a0] sm:$0xff] }
 0x1ad   :  { %6619 = vmatprep.subr.bf16.mxu0 %v7352_v24  ;;  %v1511_v37 = vpack.c.bf16 %v5160_v48, %v5159_v0  ;;  %v5467_v21 = vld [vmem:[%s9602_s0 + $0x2a1] sm:$0xff]  ;;  %v5468_v30 = vld [vmem:[%s9602_s0 + $0x2a9] sm:$0xff] }
 0x1ae   :  { %v3574_v48 = vpack.c.bf16 %v5468_v30, %v5467_v21  ;;  %v5182_v25 = vld [vmem:[%s9602_s0 + $0x2a8] sm:$0xff]  ;;  %v5502_v21 = vld [vmem:[%s9602_s0 + $0xb2] sm:$0xff] }
 0x1af   :  { %v5503_v30 = vld [vmem:[%s9602_s0 + $0xc2] sm:$0xff] }
 0x1b0   :  { %6620 = vmatpush3.bf16.msra.mxu0 %v7352_v24  ;;  %v3563_v24 = vpack.c.bf16 %v5446_v35, %v5445_v31  ;;  %v1520_v31 = vpack.c.bf16 %v5178_v1, %v5177_v63  ;;  %v5498_v63 = vld [vmem:[%s9602_s0 + $0x82] sm:$0xff]  ;;  %v5499_v1 = vld [vmem:[%s9602_s0 + $0x92] sm:$0xff] }
 0x1b1   :  { %6621 = vmatprep.subr.bf16.mxu0 %v7353_v6 }
 0x1b2   :  { %6238 = vmatmul.mubr.bf16.gmra.mrb[8].mxu1 %v1502_v9  ;;  %v1513_v9 = vpack.c.bf16 %v5164_v56, %v5163_v53  ;;  %v1522_v53 = vpack.c.bf16 %v5182_v25, %v5181_v49  ;;  %v5505_v49 = vld [vmem:[%s9602_s0 + $0xda] sm:$0xff]  ;;  %v5506_v25 = vld [vmem:[%s9602_s0 + $0xe2] sm:$0xff] }
 0x1b3   :  { %6558 = vmatmul.mubr.bf16.gmra.mrb[8].mxu0 %v3555_v57  ;;  %6241 = vmatprep.mubr.bf16.mxu1 %v1503_v8  ;;  %v3566_v57 = vpack.c.bf16 %v5452_v55, %v5451_v41  ;;  %v5165_v8 = vld [vmem:[%s9602_s0 + $0x1e0] sm:$0xff] }
 0x1b4   :  { %6561 = vmatprep.mubr.bf16.mxu0 %v3556_v22  ;;  %6622 = vmatpush3.bf16.msra.mxu0 %v7353_v6  ;;  %v3565_v6 = vpack.c.bf16 %v5450_v39, %v5449_v26  ;;  %v5166_v22 = vld [vmem:[%s9602_s0 + $0x1e8] sm:$0xff]  ;;  %v5471_v26 = vld [vmem:[%s9602_s0 + $0x2d1] sm:$0xff]  ;;  %v5472_v39 = vld [vmem:[%s9602_s0 + $0x2d9] sm:$0xff] }
 0x1b5   :  { %6623 = vmatprep.subr.bf16.mxu0 %v7354_v23  ;;  %v1514_v42 = vpack.c.bf16 %v5166_v22, %v5165_v8  ;;  %v3576_v55 = vpack.c.bf16 %v5472_v39, %v5471_v26  ;;  %v5474_v8 = vld [vmem:[%s9602_s0 + $0x2f1] sm:$0xff]  ;;  %v5187_v22 = vld [vmem:[%s9602_s0 + $0x2e8] sm:$0xff] }
 0x1b6   :  { %v5509_v26 = vld [vmem:[%s9602_s0 + $0x10a] sm:$0xff]  ;;  %v5510_v39 = vld [vmem:[%s9602_s0 + $0x112] sm:$0xff] }
 0x1b8   :  { %6624 = vmatpush3.bf16.msra.mxu0 %v7354_v23  ;;  %v5453_v23 = vld [vmem:[%s9602_s0 + $0x1f9] sm:$0xff] }
 0x1b9   :  { %6625 = vmatprep.subr.bf16.mxu0 %v7355_v58  ;;  %v3567_v43 = vpack.c.bf16 %v5454_v27, %v5453_v23  ;;  %v5188_v23 = vld [vmem:[%s9602_s0 + $0x2f0] sm:$0xff]  ;;  %v5475_v27 = vld [vmem:[%s9602_s0 + $0x301] sm:$0xff] }
 0x1ba   :  { %6242 = vmatmul.mubr.bf16.gmra.mrb[12].mxu1 %v1504_v60  ;;  %v5170_v60 = vld [vmem:[%s9602_s0 + $0x218] sm:$0xff] }
 0x1bb   :  { %6562 = vmatmul.mubr.bf16.gmra.mrb[12].mxu0 %v3557_v7  ;;  %6245 = vmatprep.mubr.bf16.mxu1 %v1505_v13  ;;  %v5457_v7 = vld [vmem:[%s9602_s0 + $0x229] sm:$0xff]  ;;  %v5458_v13 = vld [vmem:[%s9602_s0 + $0x231] sm:$0xff] }
 0x1bc   :  { %6565 = vmatprep.mubr.bf16.mxu0 %v3558_v32  ;;  %6626 = vmatpush3.bf16.msra.mxu0 %v7355_v58  ;;  %v5169_v58 = vld [vmem:[%s9602_s0 + $0x210] sm:$0xff]  ;;  %v5171_v32 = vld [vmem:[%s9602_s0 + $0x228] sm:$0xff]  ;;  %v3569_v52 = vpack.c.bf16 %v5458_v13, %v5457_v7  ;;  %v5191_v7 = vld [vmem:[%s9602_s0 + $0x318] sm:$0xff] }
 0x1bd   :  { %6627 = vmatprep.subr.bf16.mxu0 %v7356_v33  ;;  %v1516_v51 = vpack.c.bf16 %v5170_v60, %v5169_v58  ;;  %v5477_v58 = vld [vmem:[%s9602_s0 + $0x319] sm:$0xff]  ;;  %v5478_v60 = vld [vmem:[%s9602_s0 + $0x321] sm:$0xff] }
 0x1be   :  { %v5192_v13 = vld [vmem:[%s9602_s0 + $0x320] sm:$0xff]  ;;  %v3579_v50 = vpack.c.bf16 %v5478_v60, %v5477_v58 }
 0x1bf   :  { %v5522_v58 = vld [vmem:[%s9602_s0 + $0x1a2] sm:$0xff] }
 0x1c0   :  { %6628 = vmatpush3.bf16.msra.mxu0 %v7356_v33  ;;  %v5172_v33 = vld [vmem:[%s9602_s0 + $0x230] sm:$0xff]  ;;  %v5523_v60 = vld [vmem:[%s9602_s0 + $0x1e2] sm:$0xff] }
 0x1c1   :  { %v1517_v61 = vpack.c.bf16 %v5172_v33, %v5171_v32  ;;  %v5479_v32 = vld [vmem:[%s9602_s0 + $0x331] sm:$0xff]  ;;  %v5480_v33 = vld [vmem:[%s9602_s0 + $0x339] sm:$0xff] }
 0x1c2   :  { %6246 = vmatmul.mubr.bf16.gmra.mrb[16].mxu1 %v1506_v17  ;;  %v5461_v17 = vld [vmem:[%s9602_s0 + $0x259] sm:$0xff] }
 0x1c3   :  { %6566 = vmatmul.mubr.bf16.gmra.mrb[16].mxu0 %v3559_v36  ;;  %6249 = vmatprep.mubr.bf16.mxu1 %v1507_v45  ;;  %v5462_v36 = vld [vmem:[%s9602_s0 + $0x261] sm:$0xff]  ;;  %v5175_v45 = vld [vmem:[%s9602_s0 + $0x258] sm:$0xff] }
 0x1c4   :  { %6569 = vmatprep.mubr.bf16.mxu0 %v3560_v46  ;;  %v5176_v46 = vld [vmem:[%s9602_s0 + $0x260] sm:$0xff]  ;;  %v3571_v18 = vpack.c.bf16 %v5462_v36, %v5461_v17 }
 0x1c5   :  { %v1519_v19 = vpack.c.bf16 %v5176_v46, %v5175_v45  ;;  %v5492_v17 = vld [vmem:[%s9602_s0 + $0x3a] sm:$0xff]  ;;  %v5493_v46 = vld [vmem:[%s9602_s0 + $0x4a] sm:$0xff] }
 0x1c6   :  { %v4063_v45 = vpack.c.bf16 %v5492_v17, %v5491_v16  ;;  %v5530_v16 = vld [vmem:[%s9602_s0 + $0x232] sm:$0xff]  ;;  %v5531_v17 = vld [vmem:[%s9602_s0 + $0x242] sm:$0xff] }
 0x1ca   :  { %6250 = vmatmul.mubr.bf16.gmra.mrb[20].mxu1 %v1508_v2  ;;  %v5465_v2 = vld [vmem:[%s9602_s0 + $0x289] sm:$0xff] }
 0x1cb   :  { %6570 = vmatmul.mubr.bf16.gmra.mrb[20].mxu0 %v3561_v3  ;;  %6253 = vmatprep.mubr.bf16.mxu1 %v1509_v62  ;;  %v5466_v3 = vld [vmem:[%s9602_s0 + $0x291] sm:$0xff]  ;;  %v5179_v62 = vld [vmem:[%s9602_s0 + $0x288] sm:$0xff] }
 0x1cc   :  { %6573 = vmatprep.mubr.bf16.mxu0 %v3562_v4  ;;  %v5180_v4 = vld [vmem:[%s9602_s0 + $0x290] sm:$0xff]  ;;  %v3573_v35 = vpack.c.bf16 %v5466_v3, %v5465_v2  ;;  %v5500_v2 = vld [vmem:[%s9602_s0 + $0x9a] sm:$0xff] }
 0x1cd   :  { %v1521_v0 = vpack.c.bf16 %v5180_v4, %v5179_v62  ;;  %v4067_v62 = vpack.c.bf16 %v5500_v2, %v5499_v1  ;;  %v5501_v4 = vld [vmem:[%s9602_s0 + $0xaa] sm:$0xff]  ;;  %v5538_v1 = vld [vmem:[%s9602_s0 + $0x292] sm:$0xff] }
 0x1d2   :  { %6254 = vmatmul.mubr.bf16.gmra.mrb[24].mxu1 %v1510_v14  ;;  %v5469_v14 = vld [vmem:[%s9602_s0 + $0x2b9] sm:$0xff] }
 0x1d3   :  { %6574 = vmatmul.mubr.bf16.gmra.mrb[24].mxu0 %v3563_v24  ;;  %6257 = vmatprep.mubr.bf16.mxu1 %v1511_v37  ;;  %v5470_v24 = vld [vmem:[%s9602_s0 + $0x2c1] sm:$0xff]  ;;  %v5183_v37 = vld [vmem:[%s9602_s0 + $0x2b8] sm:$0xff] }
 0x1d4   :  { %6577 = vmatprep.mubr.bf16.mxu0 %v3564_v40  ;;  %v5184_v40 = vld [vmem:[%s9602_s0 + $0x2c0] sm:$0xff]  ;;  %v3575_v56 = vpack.c.bf16 %v5470_v24, %v5469_v14  ;;  %v5507_v14 = vld [vmem:[%s9602_s0 + $0xf2] sm:$0xff] }
 0x1d5   :  { %v1523_v41 = vpack.c.bf16 %v5184_v40, %v5183_v37  ;;  %v5508_v24 = vld [vmem:[%s9602_s0 + $0xfa] sm:$0xff]  ;;  %v4070_v37 = vpack.c.bf16 %v5506_v25, %v5505_v49  ;;  %v5543_v25 = vld [vmem:[%s9602_s0 + $0x2d2] sm:$0xff] }
 0x1d6   :  { %v4071_v40 = vpack.c.bf16 %v5508_v24, %v5507_v14  ;;  %v5544_v14 = vld [vmem:[%s9602_s0 + $0x2da] sm:$0xff] }
 0x1da   :  { %6258 = vmatmul.mubr.bf16.gmra.mrb[28].mxu1 %v8404_v10  ;;  %v5167_v10 = vld [vmem:[%s9602_s0 + $0x1f8] sm:$0xff] }
 0x1db   :  { %6578 = vmatmul.mubr.bf16.gmra.mrb[28].mxu0 %v3565_v6  ;;  %6261 = vmatprep.mubr.bf16.mxu1 %v1513_v9  ;;  %v1515_v44 = vpack.c.bf16 %v5168_v28, %v5167_v10  ;;  %v5185_v6 = vld [vmem:[%s9602_s0 + $0x2d0] sm:$0xff]  ;;  %v5186_v9 = vld [vmem:[%s9602_s0 + $0x2d8] sm:$0xff]  ;;  %v7357_v28 = vld [vmem:[%s9603_s3] sm:$0xff]  }
 0x1dc   :  { %6581 = vmatprep.mubr.bf16.mxu0 %v3566_v57  ;;  %v5473_v57 = vld [vmem:[%s9602_s0 + $0x2e9] sm:$0xff]  ;;  %v1524_v29 = vpack.c.bf16 %v5186_v9, %v5185_v6  ;;  %6693 = vmatprep.subr.bf16.mxu1 %v7357_v28  ;;  %v7361_v6 = vld [vmem:[%s9603_s3 + $0x20] sm:$0xff]  }
 0x1dd   :  { %v5476_v10 = vld [vmem:[%s9602_s0 + $0x309] sm:$0xff]  ;;  %v3577_v38 = vpack.c.bf16 %v5474_v8, %v5473_v57  ;;  %6694 = vmatpush3.bf16.msra.mxu1 %v7357_v28  ;;  %v5513_v9 = vld [vmem:[%s9602_s0 + $0x13a] sm:$0xff]  ;;  %v5515_v8 = vld [vmem:[%s9602_s0 + $0x152] sm:$0xff] }
 0x1de   :  { %v5514_v57 = vld [vmem:[%s9602_s0 + $0x142] sm:$0xff]  ;;  %v5518_v28 = vld [vmem:[%s9602_s0 + $0x172] sm:$0xff] }
 0x1e2   :  { %6262 = vmatmul.mubr.bf16.gmra.mrb[32].mxu1 %v1514_v42  ;;  %v1525_v42 = vpack.c.bf16 %v5188_v23, %v5187_v22  ;;  %v5516_v22 = vld [vmem:[%s9602_s0 + $0x15a] sm:$0xff]  ;;  %v4074_v23 = vpack.c.bf16 %v5514_v57, %v5513_v9 }
 0x1e3   :  { %6582 = vmatmul.mubr.bf16.gmra.mrb[32].mxu0 %v3567_v43  ;;  %6265 = vmatprep.mubr.bf16.mxu1 %v1515_v44  ;;  %v3578_v43 = vpack.c.bf16 %v5476_v10, %v5475_v27  ;;  %v5189_v44 = vld [vmem:[%s9602_s0 + $0x300] sm:$0xff]  ;;  %v4075_v27 = vpack.c.bf16 %v5516_v22, %v5515_v8  ;;  %v5517_v10 = vld [vmem:[%s9602_s0 + $0x16a] sm:$0xff] }
 0x1e4   :  { %6585 = vmatprep.mubr.bf16.mxu0 %v3568_v54  ;;  %v5190_v54 = vld [vmem:[%s9602_s0 + $0x308] sm:$0xff] }
 0x1e5   :  { %v1526_v34 = vpack.c.bf16 %v5190_v54, %v5189_v44  ;;  %v7362_v44 = vld [vmem:[%s9603_s3 + $0x28] sm:$0xff]   ;;  %v5521_v54 = vld [vmem:[%s9602_s0 + $0x19a] sm:$0xff] }
 0x1ea   :  { %6266 = vmatmul.mubr.bf16.gmra.mrb[36].mxu1 %v1516_v51  ;;  %v1527_v51 = vpack.c.bf16 %v5192_v13, %v5191_v7  ;;  %v5524_v7 = vld [vmem:[%s9602_s0 + $0x1ea] sm:$0xff]  ;;  %v4078_v13 = vpack.c.bf16 %v5522_v58, %v5521_v54 }
 0x1eb   :  { %6586 = vmatmul.mubr.bf16.gmra.mrb[36].mxu0 %v3569_v52  ;;  %6269 = vmatprep.mubr.bf16.mxu1 %v1517_v61  ;;  %v3580_v52 = vpack.c.bf16 %v5480_v33, %v5479_v32  ;;  %v7358_v61 = vld [vmem:[%s9603_s3 + $0x8] sm:$0xff]   ;;  %v4079_v32 = vpack.c.bf16 %v5524_v7, %v5523_v60  ;;  %v5525_v33 = vld [vmem:[%s9602_s0 + $0x1fa] sm:$0xff]  ;;  %v5554_v7 = vld [vmem:[%s9602_s0 + $0x352] sm:$0xff] }
 0x1ec   :  { %6589 = vmatprep.mubr.bf16.mxu0 %v3570_v12  ;;  %v5481_v12 = vld [vmem:[%s9602_s0 + $0x349] sm:$0xff]  ;;  %6695 = vmatprep.subr.bf16.mxu1 %v7358_v61 }
 0x1ed   :  { %6696 = vmatpush3.bf16.msra.mxu1 %v7358_v61  ;;  %v3581_v36 = vpack.c.bf16 %v5482_v15, %v5481_v12  ;;  %v7363_v12 = vld [vmem:[%s9603_s3 + $0x30] sm:$0xff]  }
 0x1ee   :  { %v5529_v15 = vld [vmem:[%s9602_s0 + $0x22a] sm:$0xff] }
 0x1ef   :  { %v5553_v60 = vld [vmem:[%s9602_s0 + $0x34a] sm:$0xff] }
 0x1f2   :  { %6270 = vmatmul.mubr.bf16.gmra.mrb[40].mxu1 %v1518_v11  ;;  %v5496_v11 = vld [vmem:[%s9602_s0 + $0x6a] sm:$0xff] }
 0x1f3   :  { %6590 = vmatmul.mubr.bf16.gmra.mrb[40].mxu0 %v3571_v18  ;;  %6273 = vmatprep.mubr.bf16.mxu1 %v1519_v19  ;;  %v4064_v18 = vpack.c.bf16 %v5494_v47, %v5493_v46  ;;  %v7359_v19 = vld [vmem:[%s9603_s3 + $0x10] sm:$0xff]   ;;  %v5533_v47 = vld [vmem:[%s9602_s0 + $0x25a] sm:$0xff] }
 0x1f4   :  { %6593 = vmatprep.mubr.bf16.mxu0 %v3572_v20  ;;  %6697 = vmatprep.subr.bf16.mxu1 %v7359_v19  ;;  %v5497_v20 = vld [vmem:[%s9602_s0 + $0x7a] sm:$0xff] }
 0x1f5   :  { %6698 = vmatpush3.bf16.msra.mxu1 %v7359_v19  ;;  %v4066_v3 = vpack.c.bf16 %v5498_v63, %v5497_v20  ;;  %v7364_v20 = vld [vmem:[%s9603_s3 + $0x38] sm:$0xff]   ;;  %v5537_v63 = vld [vmem:[%s9602_s0 + $0x28a] sm:$0xff] }
 0x1fa   :  { %6274 = vmatmul.mubr.bf16.gmra.mrb[44].mxu1 %v1520_v31  ;;  %v5504_v31 = vld [vmem:[%s9602_s0 + $0xca] sm:$0xff] }
 0x1fb   :  { %6594 = vmatmul.mubr.bf16.gmra.mrb[44].mxu0 %v3573_v35  ;;  %6277 = vmatprep.mubr.bf16.mxu1 %v1521_v0  ;;  %v4068_v35 = vpack.c.bf16 %v5502_v21, %v5501_v4  ;;  %v4069_v0 = vpack.c.bf16 %v5504_v31, %v5503_v30  ;;  %v4086_v30 = vpack.c.bf16 %v5538_v1, %v5537_v63 }
 0x1fc   :  { %6597 = vmatprep.mubr.bf16.mxu0 %v3574_v48  ;;  %v7360_v48 = vld [vmem:[%s9603_s3 + $0x18] sm:$0xff]  }
 0x1fd   :  { %6699 = vmatprep.subr.bf16.mxu1 %v7360_v48 }
 0x1fe   :  { %6700 = vmatpush3.bf16.msra.mxu1 %v7360_v48  ;;  %v5542_v48 = vld [vmem:[%s9602_s0 + $0x2c2] sm:$0xff] }
 0x1ff   :  { %6701 = vmatprep.subr.bf16.mxu1 %v7361_v6 }
 0x202   :  { %6278 = vmatmul.mubr.bf16.gmra.mrb[48].mxu1 %v1522_v53  ;;  %v5511_v53 = vld [vmem:[%s9602_s0 + $0x122] sm:$0xff] }
 0x203   :  { %6598 = vmatmul.mubr.bf16.gmra.mrb[48].mxu0 %v3575_v56  ;;  %6281 = vmatprep.mubr.bf16.mxu1 %v1523_v41  ;;  %v5512_v56 = vld [vmem:[%s9602_s0 + $0x12a] sm:$0xff]  ;;  %v4072_v41 = vpack.c.bf16 %v5510_v39, %v5509_v26  ;;  %v4089_v39 = vpack.c.bf16 %v5544_v14, %v5543_v25 }
 0x204   :  { %6601 = vmatprep.mubr.bf16.mxu0 %v3576_v55  ;;  %v4073_v55 = vpack.c.bf16 %v5512_v56, %v5511_v53  ;;  %6702 = vmatpush3.bf16.msra.mxu1 %v7361_v6  ;;  %v5545_v53 = vld [vmem:[%s9602_s0 + $0x2ea] sm:$0xff]  ;;  %v5546_v56 = vld [vmem:[%s9602_s0 + $0x2f2] sm:$0xff] }
 0x205   :  { %6703 = vmatprep.subr.bf16.mxu1 %v7362_v44  ;;  %v5548_v6 = vld [vmem:[%s9602_s0 + $0x30a] sm:$0xff]  ;;  %v4090_v8 = vpack.c.bf16 %v5546_v56, %v5545_v53 }
 0x208   :  { %6704 = vmatpush3.bf16.msra.mxu1 %v7362_v44 }
 0x209   :  { %6705 = vmatprep.subr.bf16.mxu1 %v7363_v12 }
 0x20a   :  { %6282 = vmatmul.mubr.bf16.gmra.mrb[52].mxu1 %v1524_v29  ;;  %v5519_v29 = vld [vmem:[%s9602_s0 + $0x182] sm:$0xff] }
 0x20b   :  { %6602 = vmatmul.mubr.bf16.gmra.mrb[52].mxu0 %v3577_v38  ;;  %6285 = vmatprep.mubr.bf16.mxu1 %v1525_v42  ;;  %v5520_v38 = vld [vmem:[%s9602_s0 + $0x18a] sm:$0xff]  ;;  %v4076_v42 = vpack.c.bf16 %v5518_v28, %v5517_v10  ;;  %v5550_v10 = vld [vmem:[%s9602_s0 + $0x322] sm:$0xff] }
 0x20c   :  { %6605 = vmatprep.mubr.bf16.mxu0 %v3578_v43  ;;  %v4077_v43 = vpack.c.bf16 %v5520_v38, %v5519_v29  ;;  %6706 = vmatpush3.bf16.msra.mxu1 %v7363_v12  ;;  %v5551_v29 = vld [vmem:[%s9602_s0 + $0x332] sm:$0xff]  ;;  %v5552_v38 = vld [vmem:[%s9602_s0 + $0x33a] sm:$0xff] }
 0x20d   :  { %6707 = vmatprep.subr.bf16.mxu1 %v7364_v20  ;;  %v4093_v58 = vpack.c.bf16 %v5552_v38, %v5551_v29 }
 0x210   :  { %6708 = vmatpush3.bf16.msra.mxu1 %v7364_v20 }
 0x212   :  { %6286 = vmatmul.mubr.bf16.gmra.mrb[56].mxu1 %v1526_v34  ;;  %v5526_v34 = vld [vmem:[%s9602_s0 + $0x202] sm:$0xff] }
 0x213   :  { %6606 = vmatmul.mubr.bf16.gmra.mrb[56].mxu0 %v3579_v50  ;;  %6289 = vmatprep.mubr.bf16.mxu1 %v1527_v51  ;;  %v5527_v50 = vld [vmem:[%s9602_s0 + $0x212] sm:$0xff]  ;;  %v5528_v51 = vld [vmem:[%s9602_s0 + $0x21a] sm:$0xff] }
 0x214   :  { %6609 = vmatprep.mubr.bf16.mxu0 %v3580_v52  ;;  %v4080_v52 = vpack.c.bf16 %v5526_v34, %v5525_v33  ;;  %v4081_v61 = vpack.c.bf16 %v5528_v51, %v5527_v50  ;;  %v4094_v34 = vpack.c.bf16 %v5554_v7, %v5553_v60 }
 0x21a   :  { %6290 = vmatmul.mubr.bf16.gmra.mrb[60].mxu1 %v8454_v59  ;;  %v4065_v59 = vpack.c.bf16 %v5496_v11, %v5495_v5  ;;  %v5534_v5 = vld [vmem:[%s9602_s0 + $0x262] sm:$0xff]  ;;  %v5535_v11 = vld [vmem:[%s9602_s0 + $0x272] sm:$0xff] }
 0x21b   :  { %6610 = vmatmul.mubr.bf16.gmra.mrb[60].mxu0 %v3581_v36  ;;  %v5532_v36 = vld [vmem:[%s9602_s0 + $0x24a] sm:$0xff] }
 0x21c   :  { %6629 = vmatprep.mubr.bf16.mxu0 %v4063_v45  ;;  %v4082_v45 = vpack.c.bf16 %v5530_v16, %v5529_v15  ;;  %v4083_v46 = vpack.c.bf16 %v5532_v36, %v5531_v17 }
 0x223   :  { %6630 = vmatmul.mubr.bf16.vlgmr.msra.gmra.mrb[0].mxu0 %v4064_v18  ;;  %v5536_v18 = vld [vmem:[%s9602_s0 + $0x27a] sm:$0xff] }
 0x224   :  { %6633 = vmatprep.mubr.bf16.mxu0 %v4065_v59  ;;  %v4084_v59 = vpack.c.bf16 %v5534_v5, %v5533_v47  ;;  %v4085_v19 = vpack.c.bf16 %v5536_v18, %v5535_v11 }
 0x22b   :  { %6634 = vmatmul.mubr.bf16.gmra.mrb[4].mxu0 %v4066_v3  ;;  %v5539_v3 = vld [vmem:[%s9602_s0 + $0x2a2] sm:$0xff] }
 0x22c   :  { %6637 = vmatprep.mubr.bf16.mxu0 %v4067_v62  ;;  %v5540_v62 = vld [vmem:[%s9602_s0 + $0x2aa] sm:$0xff] }
 0x233   :  { %6638 = vmatmul.mubr.bf16.gmra.mrb[8].mxu0 %v4068_v35  ;;  %v4087_v35 = vpack.c.bf16 %v5540_v62, %v5539_v3 }
 0x234   :  { %6641 = vmatprep.mubr.bf16.mxu0 %v4069_v0  ;;  %v5541_v0 = vld [vmem:[%s9602_s0 + $0x2ba] sm:$0xff] }
 0x23b   :  { %6642 = vmatmul.mubr.bf16.gmra.mrb[12].mxu0 %v4070_v37 }
 0x23c   :  { %6645 = vmatprep.mubr.bf16.mxu0 %v4071_v40  ;;  %v4088_v40 = vpack.c.bf16 %v5542_v48, %v5541_v0 }
 0x243   :  { %6646 = vmatmul.mubr.bf16.gmra.mrb[16].mxu0 %v4072_v41 }
 0x244   :  { %6649 = vmatprep.mubr.bf16.mxu0 %v4073_v55  ;;  %v5547_v55 = vld [vmem:[%s9602_s0 + $0x302] sm:$0xff] }
 0x24b   :  { %6650 = vmatmul.mubr.bf16.gmra.mrb[20].mxu0 %v4074_v23  ;;  %v4091_v23 = vpack.c.bf16 %v5548_v6, %v5547_v55 }
 0x24c   :  { %6653 = vmatprep.mubr.bf16.mxu0 %v4075_v27  ;;  %v5549_v27 = vld [vmem:[%s9602_s0 + $0x31a] sm:$0xff] }
 0x24d   :  { %v4092_v44 = vpack.c.bf16 %v5550_v10, %v5549_v27 }
 0x253   :  { %6654 = vmatmul.mubr.bf16.gmra.mrb[24].mxu0 %v4076_v42 }
 0x254   :  { %6657 = vmatprep.mubr.bf16.mxu0 %v4077_v43 }
 0x25b   :  { %6658 = vmatmul.mubr.bf16.gmra.mrb[28].mxu0 %v4078_v13 }
 0x25c   :  { %6661 = vmatprep.mubr.bf16.mxu0 %v4079_v32 }
 0x263   :  { %6662 = vmatmul.mubr.bf16.gmra.mrb[32].mxu0 %v4080_v52 }
 0x264   :  { %6665 = vmatprep.mubr.bf16.mxu0 %v4081_v61 }
 0x26b   :  { %6666 = vmatmul.mubr.bf16.gmra.mrb[36].mxu0 %v4082_v45 }
 0x26c   :  { %6669 = vmatprep.mubr.bf16.mxu0 %v4083_v46 }
 0x273   :  { %6670 = vmatmul.mubr.bf16.gmra.mrb[40].mxu0 %v4084_v59 }
 0x274   :  { %6673 = vmatprep.mubr.bf16.mxu0 %v4085_v19 }
 0x275   :  { %v9031_v2 = vpop.f32.mrb[0].mxu1 }
 0x276   :  { %v9039_v4 = vpop.f32.mrb[1].mxu1 }
 0x277   :  { %v9041_v21 = vpop.f32.mrb[2].mxu1 }
 0x278   :  { %v9043_v31 = vpop.f32.mrb[3].mxu1 }
 0x27b   :  { %6674 = vmatmul.mubr.bf16.gmra.mrb[44].mxu0 %v4086_v30 }
 0x27c   :  { %6677 = vmatprep.mubr.bf16.mxu0 %v4087_v35 }
 0x27d   :  { %v9051_v49 = vpop.f32.mrb[4].mxu1 }
 0x27e   :  { %v9059_v24 = vpop.f32.mrb[5].mxu1 }
 0x27f   :  { %v9061_v37 = vpop.f32.mrb[6].mxu1 }
 0x280   :  { %v9063_v26 = vpop.f32.mrb[7].mxu1 }
 0x283   :  { %6678 = vmatmul.mubr.bf16.gmra.mrb[48].mxu0 %v4088_v40 }
 0x284   :  { %6681 = vmatprep.mubr.bf16.mxu0 %v4089_v39 }
 0x285   :  { %v9071_v41 = vpop.f32.mrb[8].mxu1 }
 0x286   :  { %v9079_v9 = vpop.f32.mrb[9].mxu1 }
 0x287   :  { %v9081_v57 = vpop.f32.mrb[10].mxu1 }
 0x288   :  { %v9083_v22 = vpop.f32.mrb[11].mxu1 }
 0x28b   :  { %6682 = vmatmul.mubr.bf16.gmra.mrb[52].mxu0 %v4090_v8 }
 0x28c   :  { %6685 = vmatprep.mubr.bf16.mxu0 %v4091_v23 }
 0x28d   :  { %v9091_v28 = vpop.f32.mrb[12].mxu1 }
 0x28e   :  { %v9099_v42 = vpop.f32.mrb[13].mxu1 }
 0x28f   :  { %v9101_v43 = vpop.f32.mrb[14].mxu1 }
 0x290   :  { %v9103_v54 = vpop.f32.mrb[15].mxu1 }
 0x293   :  { %6686 = vmatmul.mubr.bf16.gmra.mrb[56].mxu0 %v4092_v44 }
 0x294   :  { %6689 = vmatprep.mubr.bf16.mxu0 %v4093_v58 }
 0x295   :  { %v9111_v13 = vpop.f32.mrb[16].mxu1 }
 0x296   :  { %v9113_v32 = vpop.f32.mrb[17].mxu1 }
 0x297   :  { %v9115_v33 = vpop.f32.mrb[18].mxu1 }
 0x298   :  { %v9117_v50 = vpop.f32.mrb[19].mxu1 }
 0x29b   :  { %6690 = vmatmul.mubr.bf16.gmra.mrb[60].mxu0 %v4094_v34 }
 0x29d   :  { %v9119_v51 = vpop.f32.mrb[20].mxu1 }
 0x29e   :  { %v9121_v52 = vpop.f32.mrb[21].mxu1 }
 0x29f   :  { %v9123_v61 = vpop.f32.mrb[22].mxu1 }
 0x2a0   :  { %v9125_v12 = vpop.f32.mrb[23].mxu1 }
 0x2a5   :  { %v9127_v15 = vpop.f32.mrb[24].mxu1 }
 0x2a6   :  { %v9129_v16 = vpop.f32.mrb[25].mxu1 }
 0x2a7   :  { %v9131_v17 = vpop.f32.mrb[26].mxu1 }
 0x2a8   :  { %v9133_v36 = vpop.f32.mrb[27].mxu1 }
 0x2ad   :  { %v9135_v45 = vpop.f32.mrb[28].mxu1 }
 0x2ae   :  { %v9137_v46 = vpop.f32.mrb[29].mxu1 }
 0x2af   :  { %v9139_v47 = vpop.f32.mrb[30].mxu1 }
 0x2b0   :  { %v9141_v5 = vpop.f32.mrb[31].mxu1 }
 0x2b5   :  { %v9143_v11 = vpop.f32.mrb[32].mxu1 }
 0x2b6   :  { %v9145_v18 = vpop.f32.mrb[33].mxu1 }
 0x2b7   :  { %v9147_v59 = vpop.f32.mrb[34].mxu1 }
 0x2b8   :  { %v9149_v19 = vpop.f32.mrb[35].mxu1 }
 0x2bd   :  { %v9151_v20 = vpop.f32.mrb[36].mxu1 }
 0x2be   :  { %v9153_v63 = vpop.f32.mrb[37].mxu1 }
 0x2bf   :  { %v9155_v1 = vpop.f32.mrb[38].mxu1 }
 0x2c0   :  { %v9157_v3 = vpop.f32.mrb[39].mxu1 }
 0x2c5   :  { %v9159_v62 = vpop.f32.mrb[40].mxu1 }
 0x2c6   :  { %v9161_v30 = vpop.f32.mrb[41].mxu1 }
 0x2c7   :  { %v9163_v35 = vpop.f32.mrb[42].mxu1 }
 0x2c8   :  { %v9165_v0 = vpop.f32.mrb[43].mxu1 }
 0x2cd   :  { %v9167_v48 = vpop.f32.mrb[44].mxu1 }
 0x2ce   :  { %v9169_v25 = vpop.f32.mrb[45].mxu1 }
 0x2cf   :  { %v9171_v14 = vpop.f32.mrb[46].mxu1 }
 0x2d0   :  { %v9173_v40 = vpop.f32.mrb[47].mxu1 }
 0x2d1   :  { %9625 = vst [vmem:[#allocation4_spill] sm:$0xff] %v9173_v40 }
 0x2d5   :  { %v9175_v39 = vpop.f32.mrb[48].mxu1 }
 0x2d6   :  { %9626 = vst [vmem:[#allocation2_spill] sm:$0xff] %v9175_v39  ;;  %v9177_v53 = vpop.f32.mrb[49].mxu1 }
 0x2d7   :  { %9627 = vst [vmem:[#allocation3_spill] sm:$0xff] %v9177_v53  ;;  %v9179_v56 = vpop.f32.mrb[50].mxu1 }
 0x2d8   :  { %9628 = vst [vmem:[#allocation5_spill] sm:$0xff] %v9179_v56  ;;  %v9181_v55 = vpop.f32.mrb[51].mxu1 }
 0x2d9   :  { %9629 = vst [vmem:[#allocation6_spill] sm:$0xff] %v9181_v55 }
 0x2dd   :  { %v9183_v6 = vpop.f32.mrb[52].mxu1 }
 0x2de   :  { %9630 = vst [vmem:[#allocation7_spill] sm:$0xff] %v9183_v6  ;;  %v9185_v8 = vpop.f32.mrb[53].mxu1 }
 0x2df   :  { %9631 = vst [vmem:[#allocation8_spill] sm:$0xff] %v9185_v8  ;;  %v9187_v23 = vpop.f32.mrb[54].mxu1 }
 0x2e0   :  { %9632 = vst [vmem:[#allocation9_spill] sm:$0xff] %v9187_v23  ;;  %v9189_v27 = vpop.f32.mrb[55].mxu1 }
 0x2e1   :  { %9633 = vst [vmem:[#allocation10_spill] sm:$0xff] %v9189_v27  ;;  %v9210_v27 = vld [vmem:[%s9604_s2] ss:$0 sm:$0xff] }
 0x2e5   :  { %v9191_v10 = vpop.f32.mrb[56].mxu1 }
 0x2e6   :  { %9634 = vst [vmem:[#allocation11_spill] sm:$0xff] %v9191_v10  ;;  %v9193_v29 = vpop.f32.mrb[57].mxu1 }
 0x2e7   :  { %9635 = vst [vmem:[#allocation12_spill] sm:$0xff] %v9193_v29  ;;  %v9195_v38 = vpop.f32.mrb[58].mxu1 }
 0x2e8   :  { %9636 = vst [vmem:[#allocation13_spill] sm:$0xff] %v9195_v38  ;;  %v9197_v44 = vpop.f32.mrb[59].mxu1 }
 0x2e9   :  { %9637 = vst [vmem:[#allocation14_spill] sm:$0xff] %v9197_v44 }
 0x2ed   :  { %v9199_v58 = vpop.f32.mrb[60].mxu1 }
 0x2ee   :  { %9638 = vst [vmem:[#allocation15_spill] sm:$0xff] %v9199_v58  ;;  %v9201_v60 = vpop.f32.mrb[61].mxu1 }
 0x2ef   :  { %9639 = vst [vmem:[#allocation16_spill] sm:$0xff] %v9201_v60  ;;  %v9203_v7 = vpop.f32.mrb[62].mxu1 }
 0x2f0   :  { %9640 = vst [vmem:[#allocation17_spill] sm:$0xff] %v9203_v7  ;;  %v9205_v34 = vpop.f32.mrb[63].mxu1 }
 0x2f1   :  { %9641 = vst [vmem:[#allocation18_spill] sm:$0xff] %v9205_v34 }
 0x2f6   :  { %v6631_v8 = vpop.f32.mrb[0].mxu0 }
 0x2f7   :  { %v6773_v29 = vadd.f32 %v6631_v8, %v9031_v2  ;;  %v4193_v10 = vpop.f32.mrb[1].mxu0 }
 0x2f8   :  { %v6774_v38 = vadd.f32 %v4193_v10, %v9039_v4  ;;  %v6632_v44 = vpop.f32.mrb[2].mxu0 }
 0x2f9   :  { %v4521_v58 = vadd.f32 %v6773_v29, %v9210_v27  ;;  %v6775_v60 = vadd.f32 %v6632_v44, %v9041_v21  ;;  %v4196_v23 = vpop.f32.mrb[3].mxu0 }
 0x2fa   :  { %v4519_v7 = vadd.f32 %v6774_v38, %v9210_v27  ;;  %v6776_v34 = vadd.f32 %v4196_v23, %v9043_v31 }
 0x2fb   :  { %v4522_v6 = vadd.f32 %v6775_v60, %v9210_v27  ;;  %v4585_v56 = vmax.f32 %v4521_v58, 0.0 }
 0x2fc   :  { %v4520_v55 = vadd.f32 %v6776_v34, %v9210_v27  ;;  %v4583_v2 = vmax.f32 %v4519_v7, 0.0 }
 0x2fd   :  { %v4586_v53 = vmax.f32 %v4522_v6, 0.0 }
 0x2fe   :  { %v4584_v8 = vmax.f32 %v4520_v55, 0.0  ;;  %v6635_v39 = vpop.f32.mrb[4].mxu0 }
 0x2ff   :  { %v4648_v4 = vpack.c.bf16 %v4586_v53, %v4585_v56  ;;  %v6777_v10 = vadd.f32 %v6635_v39, %v9051_v49  ;;  %v4209_v29 = vpop.f32.mrb[5].mxu0 }
 0x300   :  { %v6778_v21 = vadd.f32 %v4209_v29, %v9059_v24  ;;  %v6636_v44 = vpop.f32.mrb[6].mxu0  ;;  %v4647_v40 = vpack.c.bf16 %v4584_v8, %v4583_v2 }
 0x301   :  { %v4525_v38 = vadd.f32 %v6777_v10, %v9210_v27  ;;  %v6779_v31 = vadd.f32 %v6636_v44, %v9061_v37  ;;  %v4212_v23 = vpop.f32.mrb[7].mxu0 }
 0x302   :  { %v4523_v60 = vadd.f32 %v6778_v21, %v9210_v27  ;;  %v6780_v6 = vadd.f32 %v4212_v23, %v9063_v26  ;;  %6709 = vmatprep.mubr.bf16.mxu1 %v4647_v40 }
 0x303   :  { %v4526_v55 = vadd.f32 %v6779_v31, %v9210_v27  ;;  %6710 = vmatmul.mubr.bf16.vlgmr.msra.gmra.mrb[64].mxu1 %v4648_v4  ;;  %v4589_v39 = vmax.f32 %v4525_v38, 0.0 }
 0x304   :  { %v4524_v49 = vadd.f32 %v6780_v6, %v9210_v27  ;;  %v4587_v24 = vmax.f32 %v4523_v60, 0.0 }
 0x305   :  { %v4590_v53 = vmax.f32 %v4526_v55, 0.0 }
 0x306   :  { %v4588_v56 = vmax.f32 %v4524_v49, 0.0  ;;  %v6639_v58 = vpop.f32.mrb[8].mxu0 }
 0x307   :  { %v6781_v7 = vadd.f32 %v6639_v58, %v9071_v41  ;;  %v4225_v34 = vpop.f32.mrb[9].mxu0  ;;  %v4650_v37 = vpack.c.bf16 %v4590_v53, %v4589_v39 }
 0x308   :  { %v6782_v2 = vadd.f32 %v4225_v34, %v9079_v9  ;;  %v6640_v8 = vpop.f32.mrb[10].mxu0  ;;  %v4649_v10 = vpack.c.bf16 %v4588_v56, %v4587_v24 }
 0x309   :  { %v4529_v26 = vadd.f32 %v6781_v7, %v9210_v27  ;;  %v6783_v40 = vadd.f32 %v6640_v8, %v9081_v57  ;;  %v4228_v4 = vpop.f32.mrb[11].mxu0 }
 0x30a   :  { %v4527_v29 = vadd.f32 %v6782_v2, %v9210_v27  ;;  %v6784_v21 = vadd.f32 %v4228_v4, %v9083_v22  ;;  %6713 = vmatprep.mubr.bf16.mxu1 %v4649_v10 }
 0x30b   :  { %v4530_v44 = vadd.f32 %v6783_v40, %v9210_v27  ;;  %6714 = vmatmul.mubr.bf16.gmra.mrb[68].mxu1 %v4650_v37  ;;  %v4593_v38 = vmax.f32 %v4529_v26, 0.0 }
 0x30c   :  { %v4528_v41 = vadd.f32 %v6784_v21, %v9210_v27  ;;  %v4591_v9 = vmax.f32 %v4527_v29, 0.0 }
 0x30d   :  { %v4594_v31 = vmax.f32 %v4530_v44, 0.0 }
 0x30e   :  { %v4592_v23 = vmax.f32 %v4528_v41, 0.0  ;;  %v6643_v60 = vpop.f32.mrb[12].mxu0 }
 0x30f   :  { %v6785_v6 = vadd.f32 %v6643_v60, %v9091_v28  ;;  %v4241_v55 = vpop.f32.mrb[13].mxu0  ;;  %v4652_v57 = vpack.c.bf16 %v4594_v31, %v4593_v38 }
 0x310   :  { %v6786_v49 = vadd.f32 %v4241_v55, %v9099_v42  ;;  %v6644_v39 = vpop.f32.mrb[14].mxu0  ;;  %v4651_v53 = vpack.c.bf16 %v4592_v23, %v4591_v9 }
 0x311   :  { %v4533_v22 = vadd.f32 %v6785_v6, %v9210_v27  ;;  %v6787_v24 = vadd.f32 %v6644_v39, %v9101_v43  ;;  %v4244_v56 = vpop.f32.mrb[15].mxu0 }
 0x312   :  { %v4531_v58 = vadd.f32 %v6786_v49, %v9210_v27  ;;  %v6788_v7 = vadd.f32 %v4244_v56, %v9103_v54  ;;  %6717 = vmatprep.mubr.bf16.mxu1 %v4651_v53 }
 0x313   :  { %v4534_v34 = vadd.f32 %v6787_v24, %v9210_v27  ;;  %6718 = vmatmul.mubr.bf16.gmra.mrb[72].mxu1 %v4652_v57  ;;  %v4597_v37 = vmax.f32 %v4533_v22, 0.0 }
 0x314   :  { %v4532_v28 = vadd.f32 %v6788_v7, %v9210_v27  ;;  %v4595_v42 = vmax.f32 %v4531_v58, 0.0 }
 0x315   :  { %v4598_v2 = vmax.f32 %v4534_v34, 0.0 }
 0x316   :  { %v4596_v8 = vmax.f32 %v4532_v28, 0.0  ;;  %v6647_v10 = vpop.f32.mrb[16].mxu0 }
 0x317   :  { %v6789_v26 = vadd.f32 %v6647_v10, %v9111_v13  ;;  %v4257_v40 = vpop.f32.mrb[17].mxu0  ;;  %v4654_v43 = vpack.c.bf16 %v4598_v2, %v4597_v37 }
 0x318   :  { %v6790_v4 = vadd.f32 %v4257_v40, %v9113_v32  ;;  %v6648_v29 = vpop.f32.mrb[18].mxu0  ;;  %v4653_v21 = vpack.c.bf16 %v4596_v8, %v4595_v42 }
 0x319   :  { %v4537_v54 = vadd.f32 %v6789_v26, %v9210_v27  ;;  %v6791_v44 = vadd.f32 %v6648_v29, %v9115_v33  ;;  %v4260_v41 = vpop.f32.mrb[19].mxu0 }
 0x31a   :  { %v4535_v38 = vadd.f32 %v6790_v4, %v9210_v27  ;;  %v6792_v31 = vadd.f32 %v4260_v41, %v9117_v50  ;;  %6721 = vmatprep.mubr.bf16.mxu1 %v4653_v21 }
 0x31b   :  { %v4538_v9 = vadd.f32 %v6791_v44, %v9210_v27  ;;  %6722 = vmatmul.mubr.bf16.gmra.mrb[76].mxu1 %v4654_v43  ;;  %v4601_v23 = vmax.f32 %v4537_v54, 0.0 }
 0x31c   :  { %v4536_v13 = vadd.f32 %v6792_v31, %v9210_v27  ;;  %v4599_v32 = vmax.f32 %v4535_v38, 0.0 }
 0x31d   :  { %v4602_v60 = vmax.f32 %v4538_v9, 0.0 }
 0x31e   :  { %v4600_v6 = vmax.f32 %v4536_v13, 0.0  ;;  %v6651_v55 = vpop.f32.mrb[20].mxu0 }
 0x31f   :  { %v6793_v57 = vadd.f32 %v6651_v55, %v9119_v51  ;;  %v4273_v49 = vpop.f32.mrb[21].mxu0  ;;  %v4656_v33 = vpack.c.bf16 %v4602_v60, %v4601_v23 }
 0x320   :  { %v6794_v39 = vadd.f32 %v4273_v49, %v9121_v52  ;;  %v6652_v53 = vpop.f32.mrb[22].mxu0  ;;  %v4655_v22 = vpack.c.bf16 %v4600_v6, %v4599_v32 }
 0x321   :  { %v4541_v50 = vadd.f32 %v6793_v57, %v9210_v27  ;;  %v6795_v24 = vadd.f32 %v6652_v53, %v9123_v61  ;;  %v4276_v56 = vpop.f32.mrb[23].mxu0 }
 0x322   :  { %v4539_v58 = vadd.f32 %v6794_v39, %v9210_v27  ;;  %v6796_v7 = vadd.f32 %v4276_v56, %v9125_v12  ;;  %6725 = vmatprep.mubr.bf16.mxu1 %v4655_v22 }
 0x323   :  { %v4542_v34 = vadd.f32 %v6795_v24, %v9210_v27  ;;  %6726 = vmatmul.mubr.bf16.gmra.mrb[80].mxu1 %v4656_v33  ;;  %v4605_v28 = vmax.f32 %v4541_v50, 0.0 }
 0x324   :  { %v4540_v51 = vadd.f32 %v6796_v7, %v9210_v27  ;;  %v4603_v52 = vmax.f32 %v4539_v58, 0.0 }
 0x325   :  { %v4606_v37 = vmax.f32 %v4542_v34, 0.0 }
 0x326   :  { %v4604_v2 = vmax.f32 %v4540_v51, 0.0  ;;  %v6655_v42 = vpop.f32.mrb[24].mxu0 }
 0x327   :  { %v6797_v8 = vadd.f32 %v6655_v42, %v9127_v15  ;;  %v4289_v10 = vpop.f32.mrb[25].mxu0  ;;  %v4658_v61 = vpack.c.bf16 %v4606_v37, %v4605_v28 }
 0x328   :  { %v6798_v26 = vadd.f32 %v4289_v10, %v9129_v16  ;;  %v6656_v40 = vpop.f32.mrb[26].mxu0  ;;  %v4657_v43 = vpack.c.bf16 %v4604_v2, %v4603_v52 }
 0x329   :  { %v4545_v12 = vadd.f32 %v6797_v8, %v9210_v27  ;;  %v6799_v4 = vadd.f32 %v6656_v40, %v9131_v17  ;;  %v4292_v29 = vpop.f32.mrb[27].mxu0 }
 0x32a   :  { %v4543_v21 = vadd.f32 %v6798_v26, %v9210_v27  ;;  %v6800_v54 = vadd.f32 %v4292_v29, %v9133_v36  ;;  %6729 = vmatprep.mubr.bf16.mxu1 %v4657_v43 }
 0x32b   :  { %v4546_v44 = vadd.f32 %v6799_v4, %v9210_v27  ;;  %6730 = vmatmul.mubr.bf16.gmra.mrb[84].mxu1 %v4658_v61  ;;  %v4609_v41 = vmax.f32 %v4545_v12, 0.0 }
 0x32c   :  { %v4544_v15 = vadd.f32 %v6800_v54, %v9210_v27  ;;  %v4607_v16 = vmax.f32 %v4543_v21, 0.0 }
 0x32d   :  { %v4610_v38 = vmax.f32 %v4546_v44, 0.0 }
 0x32e   :  { %v4608_v31 = vmax.f32 %v4544_v15, 0.0  ;;  %v6659_v9 = vpop.f32.mrb[28].mxu0 }
 0x32f   :  { %v6801_v13 = vadd.f32 %v6659_v9, %v9135_v45  ;;  %v4305_v23 = vpop.f32.mrb[29].mxu0  ;;  %v4660_v17 = vpack.c.bf16 %v4610_v38, %v4609_v41 }
 0x330   :  { %v6802_v60 = vadd.f32 %v4305_v23, %v9137_v46  ;;  %v6660_v32 = vpop.f32.mrb[30].mxu0  ;;  %v4659_v6 = vpack.c.bf16 %v4608_v31, %v4607_v16 }
 0x331   :  { %v4549_v36 = vadd.f32 %v6801_v13, %v9210_v27  ;;  %v6803_v55 = vadd.f32 %v6660_v32, %v9139_v47  ;;  %v4308_v57 = vpop.f32.mrb[31].mxu0 }
 0x332   :  { %v4547_v49 = vadd.f32 %v6802_v60, %v9210_v27  ;;  %v6804_v33 = vadd.f32 %v4308_v57, %v9141_v5  ;;  %6733 = vmatprep.mubr.bf16.mxu1 %v4659_v6 }
 0x333   :  { %v4550_v39 = vadd.f32 %v6803_v55, %v9210_v27  ;;  %6734 = vmatmul.mubr.bf16.gmra.mrb[88].mxu1 %v4660_v17  ;;  %v4613_v53 = vmax.f32 %v4549_v36, 0.0 }
 0x334   :  { %v4548_v45 = vadd.f32 %v6804_v33, %v9210_v27  ;;  %v4611_v46 = vmax.f32 %v4547_v49, 0.0 }
 0x335   :  { %v4614_v22 = vmax.f32 %v4550_v39, 0.0 }
 0x336   :  { %v4612_v50 = vmax.f32 %v4548_v45, 0.0  ;;  %v6663_v24 = vpop.f32.mrb[32].mxu0 }
 0x337   :  { %v6805_v56 = vadd.f32 %v6663_v24, %v9143_v11  ;;  %v4321_v58 = vpop.f32.mrb[33].mxu0  ;;  %v4662_v47 = vpack.c.bf16 %v4614_v22, %v4613_v53 }
 0x338   :  { %v6806_v7 = vadd.f32 %v4321_v58, %v9145_v18  ;;  %v6664_v34 = vpop.f32.mrb[34].mxu0  ;;  %v4661_v51 = vpack.c.bf16 %v4612_v50, %v4611_v46 }
 0x339   :  { %v4553_v5 = vadd.f32 %v6805_v56, %v9210_v27  ;;  %v6807_v28 = vadd.f32 %v6664_v34, %v9147_v59  ;;  %v4324_v37 = vpop.f32.mrb[35].mxu0  ;;  %v9642_v34 = vld [vmem:[#allocation4_spill] sm:$0xff] }
 0x33a   :  { %v4551_v52 = vadd.f32 %v6806_v7, %v9210_v27  ;;  %v6808_v2 = vadd.f32 %v4324_v37, %v9149_v19  ;;  %6737 = vmatprep.mubr.bf16.mxu1 %v4661_v51 }
 0x33b   :  { %v4554_v42 = vadd.f32 %v6807_v28, %v9210_v27  ;;  %6738 = vmatmul.mubr.bf16.gmra.mrb[92].mxu1 %v4662_v47  ;;  %v4617_v8 = vmax.f32 %v4553_v5, 0.0 }
 0x33c   :  { %v4552_v11 = vadd.f32 %v6808_v2, %v9210_v27  ;;  %v4615_v18 = vmax.f32 %v4551_v52, 0.0 }
 0x33d   :  { %v4618_v10 = vmax.f32 %v4554_v42, 0.0  ;;  %v9643_v42 = vld [vmem:[#allocation2_spill] sm:$0xff] }
 0x33e   :  { %v4616_v61 = vmax.f32 %v4552_v11, 0.0  ;;  %v6667_v26 = vpop.f32.mrb[36].mxu0 }
 0x33f   :  { %v6809_v40 = vadd.f32 %v6667_v26, %v9151_v20  ;;  %v4337_v43 = vpop.f32.mrb[37].mxu0  ;;  %v4664_v59 = vpack.c.bf16 %v4618_v10, %v4617_v8  ;;  %v9644_v10 = vld [vmem:[#allocation3_spill] sm:$0xff] }
 0x340   :  { %v6810_v12 = vadd.f32 %v4337_v43, %v9153_v63  ;;  %v6668_v4 = vpop.f32.mrb[38].mxu0  ;;  %v4663_v29 = vpack.c.bf16 %v4616_v61, %v4615_v18  ;;  %v9645_v43 = vld [vmem:[#allocation5_spill] sm:$0xff] }
 0x341   :  { %v4557_v19 = vadd.f32 %v6809_v40, %v9210_v27  ;;  %v6811_v21 = vadd.f32 %v6668_v4, %v9155_v1  ;;  %v4340_v54 = vpop.f32.mrb[39].mxu0 }
 0x342   :  { %v4555_v44 = vadd.f32 %v6810_v12, %v9210_v27  ;;  %v6812_v15 = vadd.f32 %v4340_v54, %v9157_v3  ;;  %6741 = vmatprep.mubr.bf16.mxu1 %v4663_v29  ;;  %v9646_v29 = vld [vmem:[#allocation6_spill] sm:$0xff] }
 0x343   :  { %v4558_v41 = vadd.f32 %v6811_v21, %v9210_v27  ;;  %6742 = vmatmul.mubr.bf16.gmra.mrb[96].mxu1 %v4664_v59  ;;  %v4621_v38 = vmax.f32 %v4557_v19, 0.0 }
 0x344   :  { %v4556_v20 = vadd.f32 %v6812_v15, %v9210_v27  ;;  %v4619_v63 = vmax.f32 %v4555_v44, 0.0 }
 0x345   :  { %v4622_v16 = vmax.f32 %v4558_v41, 0.0 }
 0x346   :  { %v4620_v31 = vmax.f32 %v4556_v20, 0.0  ;;  %v6671_v9 = vpop.f32.mrb[40].mxu0 }
 0x347   :  { %v6813_v13 = vadd.f32 %v6671_v9, %v9159_v62  ;;  %v4353_v23 = vpop.f32.mrb[41].mxu0  ;;  %v4666_v1 = vpack.c.bf16 %v4622_v16, %v4621_v38  ;;  %v9647_v16 = vld [vmem:[#allocation7_spill] sm:$0xff] }
 0x348   :  { %v6814_v17 = vadd.f32 %v4353_v23, %v9161_v30  ;;  %v6672_v60 = vpop.f32.mrb[42].mxu0  ;;  %v4665_v32 = vpack.c.bf16 %v4620_v31, %v4619_v63 }
 0x349   :  { %v4561_v3 = vadd.f32 %v6813_v13, %v9210_v27  ;;  %v6815_v6 = vadd.f32 %v6672_v60, %v9163_v35  ;;  %v4356_v36 = vpop.f32.mrb[43].mxu0  ;;  %v9648_v13 = vld [vmem:[#allocation8_spill] sm:$0xff] }
 0x34a   :  { %v4559_v55 = vadd.f32 %v6814_v17, %v9210_v27  ;;  %v6816_v57 = vadd.f32 %v4356_v36, %v9165_v0  ;;  %6745 = vmatprep.mubr.bf16.mxu1 %v4665_v32  ;;  %v9649_v32 = vld [vmem:[#allocation9_spill] sm:$0xff] }
 0x34b   :  { %v4562_v49 = vadd.f32 %v6815_v6, %v9210_v27  ;;  %6746 = vmatmul.mubr.bf16.gmra.mrb[100].mxu1 %v4666_v1  ;;  %v4625_v33 = vmax.f32 %v4561_v3, 0.0 }
 0x34c   :  { %v4560_v62 = vadd.f32 %v6816_v57, %v9210_v27  ;;  %v4623_v30 = vmax.f32 %v4559_v55, 0.0  ;;  %v9650_v55 = vld [vmem:[#allocation10_spill] sm:$0xff] }
 0x34d   :  { %v4626_v39 = vmax.f32 %v4562_v49, 0.0 }
 0x34e   :  { %v4624_v45 = vmax.f32 %v4560_v62, 0.0  ;;  %v6675_v53 = vpop.f32.mrb[44].mxu0 }
 0x34f   :  { %v6817_v22 = vadd.f32 %v6675_v53, %v9167_v48  ;;  %v4369_v46 = vpop.f32.mrb[45].mxu0  ;;  %v4668_v35 = vpack.c.bf16 %v4626_v39, %v4625_v33 }
 0x350   :  { %v6818_v50 = vadd.f32 %v4369_v46, %v9169_v25  ;;  %v6676_v24 = vpop.f32.mrb[46].mxu0  ;;  %v4667_v56 = vpack.c.bf16 %v4624_v45, %v4623_v30 }
 0x351   :  { %v4565_v0 = vadd.f32 %v6817_v22, %v9210_v27  ;;  %v6819_v58 = vadd.f32 %v6676_v24, %v9171_v14  ;;  %v4372_v47 = vpop.f32.mrb[47].mxu0  ;;  %v9651_v22 = vld [vmem:[#allocation11_spill] sm:$0xff]  ;;  %v9652_v24 = vld [vmem:[#allocation12_spill] sm:$0xff] }
 0x352   :  { %v4563_v7 = vadd.f32 %v6818_v50, %v9210_v27  ;;  %v6820_v51 = vadd.f32 %v4372_v47, %v9642_v34  ;;  %6749 = vmatprep.mubr.bf16.mxu1 %v4667_v56 }
 0x353   :  { %v4566_v5 = vadd.f32 %v6819_v58, %v9210_v27  ;;  %6750 = vmatmul.mubr.bf16.gmra.mrb[104].mxu1 %v4668_v35  ;;  %v4629_v28 = vmax.f32 %v4565_v0, 0.0 }
 0x354   :  { %v4564_v48 = vadd.f32 %v6820_v51, %v9210_v27  ;;  %v4627_v25 = vmax.f32 %v4563_v7, 0.0  ;;  %v9653_v7 = vld [vmem:[#allocation13_spill] sm:$0xff] }
 0x355   :  { %v4630_v37 = vmax.f32 %v4566_v5, 0.0 }
 0x356   :  { %v4628_v52 = vmax.f32 %v4564_v48, 0.0  ;;  %v6679_v2 = vpop.f32.mrb[48].mxu0  ;;  %v9654_v48 = vld [vmem:[#allocation14_spill] sm:$0xff] }
 0x357   :  { %v6821_v11 = vadd.f32 %v6679_v2, %v9643_v42  ;;  %v4385_v8 = vpop.f32.mrb[49].mxu0  ;;  %v4670_v14 = vpack.c.bf16 %v4630_v37, %v4629_v28 }
 0x358   :  { %v6822_v18 = vadd.f32 %v4385_v8, %v9644_v10  ;;  %v6680_v61 = vpop.f32.mrb[50].mxu0  ;;  %v4669_v26 = vpack.c.bf16 %v4628_v52, %v4627_v25 }
 0x359   :  { %v4569_v40 = vadd.f32 %v6821_v11, %v9210_v27  ;;  %v6823_v59 = vadd.f32 %v6680_v61, %v9645_v43  ;;  %v4388_v12 = vpop.f32.mrb[51].mxu0 }
 0x35a   :  { %v4567_v4 = vadd.f32 %v6822_v18, %v9210_v27  ;;  %v6824_v19 = vadd.f32 %v4388_v12, %v9646_v29  ;;  %6753 = vmatprep.mubr.bf16.mxu1 %v4669_v26  ;;  %v9656_v26 = vld [vmem:[#allocation16_spill] sm:$0xff] }
 0x35b   :  { %v4570_v21 = vadd.f32 %v6823_v59, %v9210_v27  ;;  %6754 = vmatmul.mubr.bf16.gmra.mrb[108].mxu1 %v4670_v14  ;;  %v4633_v44 = vmax.f32 %v4569_v40, 0.0  ;;  %v9655_v14 = vld [vmem:[#allocation15_spill] sm:$0xff] }
 0x35c   :  { %v4568_v54 = vadd.f32 %v6824_v19, %v9210_v27  ;;  %v4631_v41 = vmax.f32 %v4567_v4, 0.0  ;;  %v9657_v4 = vld [vmem:[#allocation17_spill] sm:$0xff] }
 0x35d   :  { %v4634_v15 = vmax.f32 %v4570_v21, 0.0 }
 0x35e   :  { %v4632_v20 = vmax.f32 %v4568_v54, 0.0  ;;  %v6683_v38 = vpop.f32.mrb[52].mxu0  ;;  %v9658_v54 = vld [vmem:[#allocation18_spill] sm:$0xff] }
 0x35f   :  { %v6825_v63 = vadd.f32 %v6683_v38, %v9647_v16  ;;  %v4401_v31 = vpop.f32.mrb[53].mxu0  ;;  %v4672_v9 = vpack.c.bf16 %v4634_v15, %v4633_v44 }
 0x360   :  { %v6826_v23 = vadd.f32 %v4401_v31, %v9648_v13  ;;  %v6684_v1 = vpop.f32.mrb[54].mxu0  ;;  %v4671_v17 = vpack.c.bf16 %v4632_v20, %v4631_v41  ;;  %v9343_v13 = vld [vmem:[%s9605_s4] ss:$0 sm:$0xff] }
 0x361   :  { %v4573_v60 = vadd.f32 %v6825_v63, %v9210_v27  ;;  %v6827_v3 = vadd.f32 %v6684_v1, %v9649_v32  ;;  %v4404_v6 = vpop.f32.mrb[55].mxu0 }
 0x362   :  { %v4571_v36 = vadd.f32 %v6826_v23, %v9210_v27  ;;  %v6828_v57 = vadd.f32 %v4404_v6, %v9650_v55  ;;  %6757 = vmatprep.mubr.bf16.mxu1 %v4671_v17 }
 0x363   :  { %v4574_v49 = vadd.f32 %v6827_v3, %v9210_v27  ;;  %6758 = vmatmul.mubr.bf16.gmra.mrb[112].mxu1 %v4672_v9  ;;  %v4637_v33 = vmax.f32 %v4573_v60, 0.0 }
 0x364   :  { %v4572_v62 = vadd.f32 %v6828_v57, %v9210_v27  ;;  %v4635_v30 = vmax.f32 %v4571_v36, 0.0 }
 0x365   :  { %v4638_v39 = vmax.f32 %v4574_v49, 0.0 }
 0x366   :  { %v4636_v45 = vmax.f32 %v4572_v62, 0.0  ;;  %v6687_v53 = vpop.f32.mrb[56].mxu0 }
 0x367   :  { %v6829_v46 = vadd.f32 %v6687_v53, %v9651_v22  ;;  %v4417_v35 = vpop.f32.mrb[57].mxu0  ;;  %v4674_v50 = vpack.c.bf16 %v4638_v39, %v4637_v33 }
 0x368   :  { %v6830_v56 = vadd.f32 %v4417_v35, %v9652_v24  ;;  %v6688_v0 = vpop.f32.mrb[58].mxu0  ;;  %v4673_v58 = vpack.c.bf16 %v4636_v45, %v4635_v30 }
 0x369   :  { %v4577_v47 = vadd.f32 %v6829_v46, %v9210_v27  ;;  %v6831_v34 = vadd.f32 %v6688_v0, %v9653_v7  ;;  %v4420_v51 = vpop.f32.mrb[59].mxu0 }
 0x36a   :  { %v4575_v5 = vadd.f32 %v6830_v56, %v9210_v27  ;;  %v6832_v28 = vadd.f32 %v4420_v51, %v9654_v48  ;;  %6761 = vmatprep.mubr.bf16.mxu1 %v4673_v58 }
 0x36b   :  { %v4578_v37 = vadd.f32 %v6831_v34, %v9210_v27  ;;  %6762 = vmatmul.mubr.bf16.gmra.mrb[116].mxu1 %v4674_v50  ;;  %v4641_v52 = vmax.f32 %v4577_v47, 0.0 }
 0x36c   :  { %v4576_v25 = vadd.f32 %v6832_v28, %v9210_v27  ;;  %v4639_v42 = vmax.f32 %v4575_v5, 0.0 }
 0x36d   :  { %v4642_v2 = vmax.f32 %v4578_v37, 0.0 }
 0x36e   :  { %v4640_v11 = vmax.f32 %v4576_v25, 0.0  ;;  %v6691_v8 = vpop.f32.mrb[60].mxu0 }
 0x36f   :  { %v6833_v10 = vadd.f32 %v6691_v8, %v9655_v14  ;;  %v4433_v18 = vpop.f32.mrb[61].mxu0  ;;  %v4676_v61 = vpack.c.bf16 %v4642_v2, %v4641_v52 }
 0x370   :  { %v6834_v40 = vadd.f32 %v4433_v18, %v9656_v26  ;;  %v6692_v43 = vpop.f32.mrb[62].mxu0  ;;  %v4675_v59 = vpack.c.bf16 %v4640_v11, %v4639_v42 }
 0x371   :  { %v4581_v12 = vadd.f32 %v6833_v10, %v9210_v27  ;;  %v6835_v29 = vadd.f32 %v6692_v43, %v9657_v4  ;;  %v4436_v19 = vpop.f32.mrb[63].mxu0 }
 0x372   :  { %v4579_v21 = vadd.f32 %v6834_v40, %v9210_v27  ;;  %v6836_v44 = vadd.f32 %v4436_v19, %v9658_v54  ;;  %6765 = vmatprep.mubr.bf16.mxu1 %v4675_v59 }
 0x373   :  { %v4582_v15 = vadd.f32 %v6835_v29, %v9210_v27  ;;  %6766 = vmatmul.mubr.bf16.gmra.mrb[120].mxu1 %v4676_v61  ;;  %v4645_v20 = vmax.f32 %v4581_v12, 0.0 }
 0x374   :  { %v4580_v41 = vadd.f32 %v6836_v44, %v9210_v27  ;;  %v4643_v16 = vmax.f32 %v4579_v21, 0.0 }
 0x375   :  { %v4646_v38 = vmax.f32 %v4582_v15, 0.0 }
 0x376   :  { %v4644_v63 = vmax.f32 %v4580_v41, 0.0 }
 0x377   :  { %v4678_v31 = vpack.c.bf16 %v4646_v38, %v4645_v20 }
 0x378   :  { %v4677_v9 = vpack.c.bf16 %v4644_v63, %v4643_v16 }
 0x37a   :  { %6769 = vmatprep.mubr.bf16.mxu1 %v4677_v9 }
 0x37b   :  { %6770 = vmatmul.mubr.bf16.gmra.mrb[124].mxu1 %v4678_v31 }
 0x3d6   :  { %v6711_v23 = vpop.f32.mrb[64].mxu1 }
 0x3d7   :  { %v4793_v1 = vadd.f32 %v6711_v23, %v9343_v13  ;;  %v4784_v17 = vpop.f32.mrb[65].mxu1 }
 0x3d8   :  { %v4785_v60 = vadd.f32 %v9343_v13, %v4784_v17  ;;  %v6712_v27 = vpop.f32.mrb[66].mxu1 }
 0x3d9   :  { %5041 = vst [vmem:[%s9606_s5 + $0x10] sm:$0xff] %v4793_v1  ;;  %v4796_v32 = vadd.f32 %v6712_v27, %v9343_v13  ;;  %v4787_v3 = vpop.f32.mrb[67].mxu1 }
 0x3da   :  { %5039 = vst [vmem:[%s9606_s5] sm:$0xff] %v4785_v60  ;;  %v4788_v6 = vadd.f32 %v9343_v13, %v4787_v3 }
 0x3db   :  { %5042 = vst [vmem:[%s9606_s5 + $0x18] sm:$0xff] %v4796_v32 }
 0x3dc   :  { %5040 = vst [vmem:[%s9606_s5 + $0x8] sm:$0xff] %v4788_v6 }
 0x3de   :  { %v6715_v36 = vpop.f32.mrb[68].mxu1 }
 0x3df   :  { %v4809_v55 = vadd.f32 %v6715_v36, %v9343_v13  ;;  %v4800_v57 = vpop.f32.mrb[69].mxu1 }
 0x3e0   :  { %v4801_v49 = vadd.f32 %v9343_v13, %v4800_v57  ;;  %v6716_v62 = vpop.f32.mrb[70].mxu1 }
 0x3e1   :  { %5045 = vst [vmem:[%s9606_s5 + $0x30] sm:$0xff] %v4809_v55  ;;  %v4812_v33 = vadd.f32 %v6716_v62, %v9343_v13  ;;  %v4803_v39 = vpop.f32.mrb[71].mxu1 }
 0x3e2   :  { %5043 = vst [vmem:[%s9606_s5 + $0x20] sm:$0xff] %v4801_v49  ;;  %v4804_v30 = vadd.f32 %v9343_v13, %v4803_v39 }
 0x3e3   :  { %5046 = vst [vmem:[%s9606_s5 + $0x38] sm:$0xff] %v4812_v33 }
 0x3e4   :  { %5044 = vst [vmem:[%s9606_s5 + $0x28] sm:$0xff] %v4804_v30 }
 0x3e6   :  { %v6719_v45 = vpop.f32.mrb[72].mxu1 }
 0x3e7   :  { %v4825_v53 = vadd.f32 %v6719_v45, %v9343_v13  ;;  %v4816_v22 = vpop.f32.mrb[73].mxu1 }
 0x3e8   :  { %v4817_v46 = vadd.f32 %v9343_v13, %v4816_v22  ;;  %v6720_v35 = vpop.f32.mrb[74].mxu1 }
 0x3e9   :  { %5049 = vst [vmem:[%s9606_s5 + $0x50] sm:$0xff] %v4825_v53  ;;  %v4828_v50 = vadd.f32 %v6720_v35, %v9343_v13  ;;  %v4819_v24 = vpop.f32.mrb[75].mxu1 }
 0x3ea   :  { %5047 = vst [vmem:[%s9606_s5 + $0x40] sm:$0xff] %v4817_v46  ;;  %v4820_v56 = vadd.f32 %v9343_v13, %v4819_v24 }
 0x3eb   :  { %5050 = vst [vmem:[%s9606_s5 + $0x58] sm:$0xff] %v4828_v50 }
 0x3ec   :  { %5048 = vst [vmem:[%s9606_s5 + $0x48] sm:$0xff] %v4820_v56 }
 0x3ee   :  { %v6723_v0 = vpop.f32.mrb[76].mxu1 }
 0x3ef   :  { %v4841_v58 = vadd.f32 %v6723_v0, %v9343_v13  ;;  %v4832_v47 = vpop.f32.mrb[77].mxu1 }
 0x3f0   :  { %v4833_v7 = vadd.f32 %v9343_v13, %v4832_v47  ;;  %v6724_v34 = vpop.f32.mrb[78].mxu1 }
 0x3f1   :  { %5053 = vst [vmem:[%s9606_s5 + $0x70] sm:$0xff] %v4841_v58  ;;  %v4844_v51 = vadd.f32 %v6724_v34, %v9343_v13  ;;  %v4835_v5 = vpop.f32.mrb[79].mxu1 }
 0x3f2   :  { %5051 = vst [vmem:[%s9606_s5 + $0x60] sm:$0xff] %v4833_v7  ;;  %v4836_v48 = vadd.f32 %v9343_v13, %v4835_v5 }
 0x3f3   :  { %5054 = vst [vmem:[%s9606_s5 + $0x78] sm:$0xff] %v4844_v51 }
 0x3f4   :  { %5052 = vst [vmem:[%s9606_s5 + $0x68] sm:$0xff] %v4836_v48 }
 0x3f6   :  { %v6727_v28 = vpop.f32.mrb[80].mxu1 }
 0x3f7   :  { %v4857_v37 = vadd.f32 %v6727_v28, %v9343_v13  ;;  %v4848_v25 = vpop.f32.mrb[81].mxu1 }
 0x3f8   :  { %v4849_v52 = vadd.f32 %v9343_v13, %v4848_v25  ;;  %v6728_v2 = vpop.f32.mrb[82].mxu1 }
 0x3f9   :  { %5057 = vst [vmem:[%s9606_s5 + $0x90] sm:$0xff] %v4857_v37  ;;  %v4860_v42 = vadd.f32 %v6728_v2, %v9343_v13  ;;  %v4851_v11 = vpop.f32.mrb[83].mxu1 }
 0x3fa   :  { %5055 = vst [vmem:[%s9606_s5 + $0x80] sm:$0xff] %v4849_v52  ;;  %v4852_v8 = vadd.f32 %v9343_v13, %v4851_v11 }
 0x3fb   :  { %5058 = vst [vmem:[%s9606_s5 + $0x98] sm:$0xff] %v4860_v42 }
 0x3fc   :  { %5056 = vst [vmem:[%s9606_s5 + $0x88] sm:$0xff] %v4852_v8 }
 0x3fe   :  { %v6731_v14 = vpop.f32.mrb[84].mxu1 }
 0x3ff   :  { %v4873_v10 = vadd.f32 %v6731_v14, %v9343_v13  ;;  %v4864_v18 = vpop.f32.mrb[85].mxu1 }
 0x400   :  { %v4865_v61 = vadd.f32 %v9343_v13, %v4864_v18  ;;  %v6732_v26 = vpop.f32.mrb[86].mxu1 }
 0x401   :  { %5061 = vst [vmem:[%s9606_s5 + $0xb0] sm:$0xff] %v4873_v10  ;;  %v4876_v40 = vadd.f32 %v6732_v26, %v9343_v13  ;;  %v4867_v43 = vpop.f32.mrb[87].mxu1 }
 0x402   :  { %5059 = vst [vmem:[%s9606_s5 + $0xa0] sm:$0xff] %v4865_v61  ;;  %v4868_v59 = vadd.f32 %v9343_v13, %v4867_v43 }
 0x403   :  { %5062 = vst [vmem:[%s9606_s5 + $0xb8] sm:$0xff] %v4876_v40 }
 0x404   :  { %5060 = vst [vmem:[%s9606_s5 + $0xa8] sm:$0xff] %v4868_v59 }
 0x406   :  { %v6735_v12 = vpop.f32.mrb[88].mxu1 }
 0x407   :  { %v4889_v4 = vadd.f32 %v6735_v12, %v9343_v13  ;;  %v4880_v29 = vpop.f32.mrb[89].mxu1 }
 0x408   :  { %v4881_v19 = vadd.f32 %v9343_v13, %v4880_v29  ;;  %v6736_v21 = vpop.f32.mrb[90].mxu1 }
 0x409   :  { %5065 = vst [vmem:[%s9606_s5 + $0xd0] sm:$0xff] %v4889_v4  ;;  %v4892_v54 = vadd.f32 %v6736_v21, %v9343_v13  ;;  %v4883_v44 = vpop.f32.mrb[91].mxu1 }
 0x40a   :  { %5063 = vst [vmem:[%s9606_s5 + $0xc0] sm:$0xff] %v4881_v19  ;;  %v4884_v15 = vadd.f32 %v9343_v13, %v4883_v44 }
 0x40b   :  { %5066 = vst [vmem:[%s9606_s5 + $0xd8] sm:$0xff] %v4892_v54 }
 0x40c   :  { %5064 = vst [vmem:[%s9606_s5 + $0xc8] sm:$0xff] %v4884_v15 }
 0x40e   :  { %v6739_v41 = vpop.f32.mrb[92].mxu1 }
 0x40f   :  { %v4905_v20 = vadd.f32 %v6739_v41, %v9343_v13  ;;  %v4896_v38 = vpop.f32.mrb[93].mxu1 }
 0x410   :  { %v4897_v16 = vadd.f32 %v9343_v13, %v4896_v38  ;;  %v6740_v63 = vpop.f32.mrb[94].mxu1 }
 0x411   :  { %5069 = vst [vmem:[%s9606_s5 + $0xf0] sm:$0xff] %v4905_v20  ;;  %v4908_v31 = vadd.f32 %v6740_v63, %v9343_v13  ;;  %v4899_v9 = vpop.f32.mrb[95].mxu1 }
 0x412   :  { %5067 = vst [vmem:[%s9606_s5 + $0xe0] sm:$0xff] %v4897_v16  ;;  %v4900_v23 = vadd.f32 %v9343_v13, %v4899_v9 }
 0x413   :  { %5070 = vst [vmem:[%s9606_s5 + $0xf8] sm:$0xff] %v4908_v31 }
 0x414   :  { %5068 = vst [vmem:[%s9606_s5 + $0xe8] sm:$0xff] %v4900_v23 }
 0x416   :  { %v6743_v1 = vpop.f32.mrb[96].mxu1 }
 0x417   :  { %v4921_v17 = vadd.f32 %v6743_v1, %v9343_v13  ;;  %v4912_v60 = vpop.f32.mrb[97].mxu1 }
 0x418   :  { %v4913_v27 = vadd.f32 %v9343_v13, %v4912_v60  ;;  %v6744_v32 = vpop.f32.mrb[98].mxu1 }
 0x419   :  { %5073 = vst [vmem:[%s9606_s5 + $0x110] sm:$0xff] %v4921_v17  ;;  %v4924_v3 = vadd.f32 %v6744_v32, %v9343_v13  ;;  %v4915_v6 = vpop.f32.mrb[99].mxu1 }
 0x41a   :  { %5071 = vst [vmem:[%s9606_s5 + $0x100] sm:$0xff] %v4913_v27  ;;  %v4916_v36 = vadd.f32 %v9343_v13, %v4915_v6 }
 0x41b   :  { %5074 = vst [vmem:[%s9606_s5 + $0x118] sm:$0xff] %v4924_v3 }
 0x41c   :  { %5072 = vst [vmem:[%s9606_s5 + $0x108] sm:$0xff] %v4916_v36 }
 0x41e   :  { %v6747_v55 = vpop.f32.mrb[100].mxu1 }
 0x41f   :  { %v4937_v57 = vadd.f32 %v6747_v55, %v9343_v13  ;;  %v4928_v49 = vpop.f32.mrb[101].mxu1 }
 0x420   :  { %v4929_v62 = vadd.f32 %v9343_v13, %v4928_v49  ;;  %v6748_v33 = vpop.f32.mrb[102].mxu1 }
 0x421   :  { %5077 = vst [vmem:[%s9606_s5 + $0x130] sm:$0xff] %v4937_v57  ;;  %v4940_v39 = vadd.f32 %v6748_v33, %v9343_v13  ;;  %v4931_v30 = vpop.f32.mrb[103].mxu1 }
 0x422   :  { %5075 = vst [vmem:[%s9606_s5 + $0x120] sm:$0xff] %v4929_v62  ;;  %v4932_v45 = vadd.f32 %v9343_v13, %v4931_v30 }
 0x423   :  { %5078 = vst [vmem:[%s9606_s5 + $0x138] sm:$0xff] %v4940_v39 }
 0x424   :  { %5076 = vst [vmem:[%s9606_s5 + $0x128] sm:$0xff] %v4932_v45 }
 0x426   :  { %v6751_v53 = vpop.f32.mrb[104].mxu1 }
 0x427   :  { %v4953_v22 = vadd.f32 %v6751_v53, %v9343_v13  ;;  %v4944_v46 = vpop.f32.mrb[105].mxu1 }
 0x428   :  { %v4945_v35 = vadd.f32 %v9343_v13, %v4944_v46  ;;  %v6752_v50 = vpop.f32.mrb[106].mxu1 }
 0x429   :  { %5081 = vst [vmem:[%s9606_s5 + $0x150] sm:$0xff] %v4953_v22  ;;  %v4956_v24 = vadd.f32 %v6752_v50, %v9343_v13  ;;  %v4947_v56 = vpop.f32.mrb[107].mxu1 }
 0x42a   :  { %5079 = vst [vmem:[%s9606_s5 + $0x140] sm:$0xff] %v4945_v35  ;;  %v4948_v0 = vadd.f32 %v9343_v13, %v4947_v56 }
 0x42b   :  { %5082 = vst [vmem:[%s9606_s5 + $0x158] sm:$0xff] %v4956_v24 }
 0x42c   :  { %5080 = vst [vmem:[%s9606_s5 + $0x148] sm:$0xff] %v4948_v0 }
 0x42e   :  { %v6755_v58 = vpop.f32.mrb[108].mxu1 }
 0x42f   :  { %v4969_v47 = vadd.f32 %v6755_v58, %v9343_v13  ;;  %v4960_v7 = vpop.f32.mrb[109].mxu1 }
 0x430   :  { %v4961_v34 = vadd.f32 %v9343_v13, %v4960_v7  ;;  %v6756_v51 = vpop.f32.mrb[110].mxu1 }
 0x431   :  { %5085 = vst [vmem:[%s9606_s5 + $0x170] sm:$0xff] %v4969_v47  ;;  %v4972_v5 = vadd.f32 %v6756_v51, %v9343_v13  ;;  %v4963_v48 = vpop.f32.mrb[111].mxu1 }
 0x432   :  { %5083 = vst [vmem:[%s9606_s5 + $0x160] sm:$0xff] %v4961_v34  ;;  %v4964_v28 = vadd.f32 %v9343_v13, %v4963_v48 }
 0x433   :  { %5086 = vst [vmem:[%s9606_s5 + $0x178] sm:$0xff] %v4972_v5 }
 0x434   :  { %5084 = vst [vmem:[%s9606_s5 + $0x168] sm:$0xff] %v4964_v28 }
 0x436   :  { %v6759_v37 = vpop.f32.mrb[112].mxu1 }
 0x437   :  { %v4985_v25 = vadd.f32 %v6759_v37, %v9343_v13  ;;  %v4976_v52 = vpop.f32.mrb[113].mxu1 }
 0x438   :  { %v4977_v2 = vadd.f32 %v9343_v13, %v4976_v52  ;;  %v6760_v42 = vpop.f32.mrb[114].mxu1 }
 0x439   :  { %5089 = vst [vmem:[%s9606_s5 + $0x190] sm:$0xff] %v4985_v25  ;;  %v4988_v11 = vadd.f32 %v6760_v42, %v9343_v13  ;;  %v4979_v8 = vpop.f32.mrb[115].mxu1 }
 0x43a   :  { %5087 = vst [vmem:[%s9606_s5 + $0x180] sm:$0xff] %v4977_v2  ;;  %v4980_v14 = vadd.f32 %v9343_v13, %v4979_v8 }
 0x43b   :  { %5090 = vst [vmem:[%s9606_s5 + $0x198] sm:$0xff] %v4988_v11 }
 0x43c   :  { %5088 = vst [vmem:[%s9606_s5 + $0x188] sm:$0xff] %v4980_v14 }
 0x43e   :  { %v6763_v10 = vpop.f32.mrb[116].mxu1 }
 0x43f   :  { %v5001_v18 = vadd.f32 %v6763_v10, %v9343_v13  ;;  %v4992_v61 = vpop.f32.mrb[117].mxu1 }
 0x440   :  { %v4993_v26 = vadd.f32 %v9343_v13, %v4992_v61  ;;  %v6764_v40 = vpop.f32.mrb[118].mxu1 }
 0x441   :  { %5093 = vst [vmem:[%s9606_s5 + $0x1b0] sm:$0xff] %v5001_v18  ;;  %v5004_v43 = vadd.f32 %v6764_v40, %v9343_v13  ;;  %v4995_v59 = vpop.f32.mrb[119].mxu1 }
 0x442   :  { %5091 = vst [vmem:[%s9606_s5 + $0x1a0] sm:$0xff] %v4993_v26  ;;  %v4996_v12 = vadd.f32 %v9343_v13, %v4995_v59 }
 0x443   :  { %5094 = vst [vmem:[%s9606_s5 + $0x1b8] sm:$0xff] %v5004_v43 }
 0x444   :  { %5092 = vst [vmem:[%s9606_s5 + $0x1a8] sm:$0xff] %v4996_v12 }
 0x446   :  { %v6767_v4 = vpop.f32.mrb[120].mxu1 }
 0x447   :  { %v5017_v29 = vadd.f32 %v6767_v4, %v9343_v13  ;;  %v5008_v19 = vpop.f32.mrb[121].mxu1 }
 0x448   :  { %v5009_v21 = vadd.f32 %v9343_v13, %v5008_v19  ;;  %v6768_v54 = vpop.f32.mrb[122].mxu1 }
 0x449   :  { %5097 = vst [vmem:[%s9606_s5 + $0x1d0] sm:$0xff] %v5017_v29  ;;  %v5020_v44 = vadd.f32 %v6768_v54, %v9343_v13  ;;  %v5011_v15 = vpop.f32.mrb[123].mxu1 }
 0x44a   :  { %5095 = vst [vmem:[%s9606_s5 + $0x1c0] sm:$0xff] %v5009_v21  ;;  %v5012_v41 = vadd.f32 %v9343_v13, %v5011_v15 }
 0x44b   :  { %5098 = vst [vmem:[%s9606_s5 + $0x1d8] sm:$0xff] %v5020_v44 }
 0x44c   :  { %5096 = vst [vmem:[%s9606_s5 + $0x1c8] sm:$0xff] %v5012_v41 }
 0x44e   :  { %v6771_v20 = vpop.f32.mrb[124].mxu1 }
 0x44f   :  { %v5033_v38 = vadd.f32 %v6771_v20, %v9343_v13  ;;  %v5024_v16 = vpop.f32.mrb[125].mxu1 }
 0x450   :  { %v5025_v63 = vadd.f32 %v9343_v13, %v5024_v16  ;;  %v6772_v31 = vpop.f32.mrb[126].mxu1 }
 0x451   :  { %5101 = vst [vmem:[%s9606_s5 + $0x1f0] sm:$0xff] %v5033_v38  ;;  %v5036_v9 = vadd.f32 %v6772_v31, %v9343_v13  ;;  %v5027_v23 = vpop.f32.mrb[127].mxu1 }
 0x452   :  { %5099 = vst [vmem:[%s9606_s5 + $0x1e0] sm:$0xff] %v5025_v63  ;;  %v5028_v1 = vadd.f32 %v9343_v13, %v5027_v23 }
 0x453   :  { %5102 = vst [vmem:[%s9606_s5 + $0x1f8] sm:$0xff] %v5036_v9 }
 0x454   :  { %5100 = vst [vmem:[%s9606_s5 + $0x1e8] sm:$0xff] %v5028_v1 }

// kernel: rcnn_tail_forward.9
= control target key start
LH: loop header
LB: loop body
LE: loop exit
PB: predicated region body
PF: predicated region fallthrough
CT: control target
= control target key end

     0   :  { %v207_v51 = vlaneseq  ;;  %v573_v55 = vmov 1966171168   ;;  %s806_s0 = inlined_call_operand.vmem [shape: f32[4,960], index: 0, kind: input, shape index: {}]   ;;  %s807_s1 = inlined_call_operand.vmem [shape: f32[2,4,960], index: 1, kind: input, shape index: {}]   ;;  %s808_s2 = inlined_call_operand.vmem [shape: f32[2,1,960], index: 2, kind: input, shape index: {}]   ;;  %s809_s3 = inlined_call_operand.vmem [shape: f32[2,4,960], index: 3, kind: output, shape index: {0}]   ;;  %s810_s4 = inlined_call_operand.vmem [shape: f32[2,1,960], index: 4, kind: output, shape index: {1}]  }
   0x1   :  { %v16_v0 = vld [vmem:[%s806_s0] sm:$0xff]  ;;  %v17_v1 = vld [vmem:[%s806_s0 + $0x8] sm:$0xff]  ;;  %v608_v2 = vld [vmem:[%s806_s0 + $0x10] sm:$0xff]  ;;  %v205_v56 = vunpack.c.l.s4 %v573_v55 }
   0x2   :  { %v613_v3 = vld [vmem:[%s806_s0 + $0x18] sm:$0xff]  ;;  %v24_v4 = vrot.slane %v16_v0, 6  ;;  %v25_v5 = vrot.slane %v17_v1, 6  ;;  %v60_v6 = vld [vmem:[%s807_s1] sm:$0xff]  ;;  %v26_v7 = vrot.slane %v608_v2, 6  ;;  %v61_v11 = vld [vmem:[%s807_s1 + $0x8] sm:$0xff] }
   0x3   :  { %v68_v8 = vmin.f32 %v60_v6, 4.1351666  ;;  %v27_v9 = vrot.slane %v613_v3, 6  ;;  %v62_v12 = vld [vmem:[%s807_s1 + $0x10] sm:$0xff]  ;;  %v63_v14 = vld [vmem:[%s807_s1 + $0x18] sm:$0xff]  ;;  %v64_v26 = vld [vmem:[%s807_s1 + $0x20] sm:$0xff] }
   0x4   :  { %v620_v10 = vsub.f32 %v16_v0, %v24_v4  ;;  %v628_v13 = vsub.f32 %v17_v1, %v25_v5  ;;  %v634_v15 = vsub.f32 %v608_v2, %v26_v7  ;;  %v69_v16 = vmin.f32 %v61_v11, 4.1351666  ;;  %v65_v27 = vld [vmem:[%s807_s1 + $0x28] sm:$0xff]  ;;  %v66_v28 = vld [vmem:[%s807_s1 + $0x30] sm:$0xff]  ;;  %v67_v32 = vld [vmem:[%s807_s1 + $0x38] sm:$0xff] }
   0x5   :  { %v70_v17 = vmin.f32 %v62_v12, 4.1351666  ;;  %v108_v18 = vmul.f32 1.442695, %v68_v8  ;;  %v637_v19 = vsub.f32 %v613_v3, %v27_v9  ;;  %v71_v21 = vmin.f32 %v63_v14, 4.1351666 }
   0x6   :  { %v36_v20 = vmul.f32 0.5, %v620_v10  ;;  %v37_v22 = vmul.f32 0.5, %v628_v13  ;;  %v80_v23 = vrot.slane %v620_v10, 6  ;;  %v38_v24 = vmul.f32 0.5, %v634_v15 }
   0x7   :  { %v82_v25 = vrot.slane %v628_v13, 6  ;;  %v84_v29 = vrot.slane %v634_v15, 6  ;;  %549 = vpow2.f32 %v108_v18  ;;  %v110_v30 = vmul.f32 1.442695, %v69_v16 }
   0x8   :  { %v112_v31 = vmul.f32 1.442695, %v70_v17  ;;  %v39_v33 = vmul.f32 0.5, %v637_v19  ;;  %v535_v34 = vrot.slane %v36_v20, 10  ;;  %v86_v35 = vrot.slane %v637_v19, 6 }
   0x9   :  { %v114_v36 = vmul.f32 1.442695, %v71_v21  ;;  %v536_v37 = vrot.slane %v37_v22, 10  ;;  %v81_v38 = vrot.slane %v80_v23, 4  ;;  %551 = vpow2.f32 %v110_v30 }
   0xa   :  { %v72_v39 = vmin.f32 %v64_v26, 4.1351666  ;;  %553 = vpow2.f32 %v112_v31  ;;  %v73_v40 = vmin.f32 %v65_v27, 4.1351666  ;;  %v74_v41 = vmin.f32 %v66_v28, 4.1351666 }
   0xb   :  { %v75_v42 = vmin.f32 %v67_v32, 4.1351666  ;;  %v537_v43 = vrot.slane %v38_v24, 10  ;;  %v83_v44 = vrot.slane %v82_v25, 4  ;;  %v85_v45 = vrot.slane %v84_v29, 4 }
   0xc   :  { %555 = vpow2.f32 %v114_v36  ;;  %v116_v46 = vmul.f32 1.442695, %v72_v39  ;;  %v118_v47 = vmul.f32 1.442695, %v73_v40  ;;  %v120_v48 = vmul.f32 1.442695, %v74_v41 }
   0xd   :  { %v538_v49 = vrot.slane %v39_v33, 10  ;;  %v87_v50 = vrot.slane %v86_v35, 4  ;;  %v122_v52 = vmul.f32 1.442695, %v75_v42  ;;  %v56_v53 = vadd.f32 %v535_v34, %v16_v0  ;;  %v511_v0 = vld [vmem:[%s808_s2] sm:$0xff] }
   0xe   :  { %v92_v54 = vmul.f32 %v81_v38, %v60_v6  ;;  %557 = vpow2.f32 %v116_v46  ;;  %v57_v57 = vadd.f32 %v536_v37, %v17_v1  ;;  %v93_v58 = vmul.f32 %v83_v44, %v61_v11 }
   0xf   :  { %559 = vpow2.f32 %v118_v47  ;;  %v58_v59 = vadd.f32 %v537_v43, %v608_v2  ;;  %v94_v60 = vmul.f32 %v85_v45, %v62_v12  ;;  %v59_v62 = vadd.f32 %v538_v49, %v613_v3  ;;  %v512_v2 = vld [vmem:[%s808_s2 + $0x8] sm:$0xff] }
  0x10   :  { %561 = vpow2.f32 %v120_v48  ;;  %v95_v63 = vmul.f32 %v87_v50, %v63_v14  ;;  %v100_v4 = vadd.f32 %v92_v54, %v56_v53  ;;  %v206_v6 = vunpack.c.0.s8 %v205_v56 }
  0x11   :  { %v550_v61 = vpop.eup %549  ;;  %563 = vpow2.f32 %v122_v52  ;;  %v208_v1 = vshrl.u32 %v207_v51, 7  ;;  %v669_v8 = vadd.f32 %v93_v58, %v57_v57  ;;  %v96_v3 = vmul.f32 %v81_v38, %v64_v26 }
  0x12   :  { %v124_v5 = vmul.f32 %v550_v61, %v620_v10  ;;  %v97_v9 = vmul.f32 %v83_v44, %v65_v27  ;;  %v98_v11 = vmul.f32 %v85_v45, %v66_v28  ;;  %v671_v14 = vadd.f32 %v94_v60, %v58_v59 }
  0x13   :  { %v552_v7 = vpop.eup %551  ;;  %v546_v18 = vmul.f32 -1.442695, %v511_v0  ;;  %v674_v21 = vadd.f32 %v95_v63, %v59_v62  ;;  %v99_v23 = vmul.f32 %v87_v50, %v67_v32  ;;  %v547_v24 = vmul.f32 -1.442695, %v512_v2 }
  0x14   :  { %v554_v12 = vpop.eup %553  ;;  %v125_v16 = vmul.f32 %v552_v7, %v628_v13  ;;  %v132_v17 = vmul.f32 0.5, %v124_v5  ;;  %v678_v27 = vsub.s32 %v206_v6, %v208_v1  ;;  %v680_v30 = vadd.f32 %v96_v3, %v56_v53 }
  0x15   :  { %v126_v22 = vmul.f32 %v554_v12, %v634_v15  ;;  %v682_v31 = vadd.f32 %v97_v9, %v57_v57  ;;  %v684_v33 = vadd.f32 %v98_v11, %v58_v59  ;;  %565 = vpow2.f32 %v546_v18 }
  0x16   :  { %v556_v20 = vpop.eup %555  ;;  %v133_v29 = vmul.f32 0.5, %v125_v16  ;;  %v148_v26 = vrot.slane %v132_v17, 6  ;;  %v686_v39 = vadd.f32 %v99_v23, %v59_v62  ;;  %567 = vpow2.f32 %v547_v24 }
  0x17   :  { %v127_v25 = vmul.f32 %v556_v20, %v637_v19  ;;  %v134_v28 = vmul.f32 0.5, %v126_v22  ;;  %vm701_vm0 = vcmp.lt.s32.totalorder %v207_v51, 960 }
  0x18   :  { %v558_v34 = vpop.eup %557  ;;  %v149_v36 = vrot.slane %v148_v26, 4  ;;  %v150_v37 = vrot.slane %v133_v29, 6 }
  0x19   :  { %v135_v35 = vmul.f32 0.5, %v127_v25  ;;  %v560_v32 = vpop.eup %559  ;;  %v152_v38 = vrot.slane %v134_v28, 6  ;;  %v128_v40 = vmul.f32 %v558_v34, %v620_v10 }
  0x1a   :  { %v562_v41 = vpop.eup %561  ;;  %v151_v42 = vrot.slane %v150_v37, 4  ;;  %v172_v44 = vsub.f32 %v100_v4, %v149_v36  ;;  %v129_v45 = vmul.f32 %v560_v32, %v628_v13  ;;  %v691_v50 = vadd.f32 %v149_v36, %v100_v4 }
  0x1b   :  { %v154_v43 = vrot.slane %v135_v35, 6  ;;  %v564_v46 = vpop.eup %563  ;;  %v153_v47 = vrot.slane %v152_v38, 4  ;;  %v130_v48 = vmul.f32 %v562_v41, %v634_v15  ;;  %v136_v49 = vmul.f32 0.5, %v128_v40 }
  0x1c   :  { %v173_v53 = vsub.f32 %v669_v8, %v151_v42  ;;  %v180_v54 = vmax.f32 %v172_v44, 0.0  ;;  %v131_v10 = vmul.f32 %v564_v46, %v637_v19  ;;  %v137_v56 = vmul.f32 0.5, %v129_v45 }
  0x1d   :  { %v155_v52 = vrot.slane %v154_v43, 4  ;;  %v174_v55 = vsub.f32 %v671_v14, %v153_v47  ;;  %v138_v57 = vmul.f32 0.5, %v130_v48  ;;  %v156_v58 = vrot.slane %v136_v49, 6 }
  0x1e   :  { %v181_v59 = vmax.f32 %v173_v53, 0.0  ;;  %v188_v60 = vmin.f32 %v180_v54, 64.0  ;;  %v139_v61 = vmul.f32 0.5, %v131_v10  ;;  %v158_v63 = vrot.slane %v137_v56, 6 }
  0x1f   :  { %v175_v13 = vsub.f32 %v674_v21, %v155_v52  ;;  %v182_v15 = vmax.f32 %v174_v55, 0.0  ;;  %v697_v62 = vrot.slane %v156_v58, 4  ;;  %v160_v0 = vrot.slane %v138_v57, 6  ;;  %v707_v11 = vpop.eup %565 }
  0x20   :  { %v189_v5 = vmin.f32 %v181_v59, 64.0  ;;  %v210_v6 = vrot.slane %v188_v60, %v678_v27  ;;  %v162_v19 = vrot.slane %v139_v61, 6  ;;  %v159_v7 = vrot.slane %v158_v63, 4  ;;  %v711_v20 = vpop.eup %567 }
  0x21   :  { %v183_v4 = vmax.f32 %v175_v13, 0.0  ;;  %v190_v1 = vmin.f32 %v182_v15, 64.0  ;;  %v161_v3 = vrot.slane %v160_v0, 4  ;;  %v176_v9 = vsub.f32 %v680_v30, %v697_v62 }
  0x22   :  { %v217_v16 = vrot.slane %v189_v5, %v678_v27  ;;  %v163_v17 = vrot.slane %v162_v19, 4  ;;  %v344_v18 = vadd.f32 %v151_v42, %v669_v8  ;;  %v177_v22 = vsub.f32 %v682_v31, %v159_v7 }
  0x23   :  { %v191_v12 = vmin.f32 %v183_v4, 64.0  ;;  %v224_v51 = vrot.slane %v190_v1, %v678_v27  ;;  %v178_v23 = vsub.f32 %v684_v33, %v161_v3  ;;  %v184_v24 = vmax.f32 %v176_v9, 0.0 }
  0x24   :  { %v232_v29 = vcombine.low %v210_v6, %v217_v16  ;;  %v179_v26 = vsub.f32 %v686_v39, %v163_v17  ;;  %v303_v28 = vcombine.high %v210_v6, %v217_v16  ;;  %v185_v34 = vmax.f32 %v177_v22, 0.0 }
  0x25   :  { %v231_v25 = vrot.slane %v191_v12, %v678_v27  ;;  %v186_v35 = vmax.f32 %v178_v23, 0.0  ;;  %v192_v36 = vmin.f32 %v184_v24, 64.0  ;;  %v345_v8 = vadd.f32 %v153_v47, %v671_v14 }
  0x26   :  { %v240_v32 = vrot.slane %v232_v29, %v678_v27  ;;  %v187_v38 = vmax.f32 %v179_v26, 0.0  ;;  %v193_v41 = vmin.f32 %v185_v34, 64.0  ;;  %v311_v44 = vrot.slane %v303_v28, %v678_v27 }
  0x27   :  { %v233_v37 = vcombine.low %v224_v51, %v231_v25  ;;  %v304_v40 = vcombine.high %v224_v51, %v231_v25  ;;  %v194_v42 = vmin.f32 %v186_v35, 64.0  ;;  %v255_v43 = vrot.slane %v192_v36, %v678_v27 }
  0x28   :  { %v195_v46 = vmin.f32 %v187_v38, 64.0  ;;  %v346_v49 = vadd.f32 %v155_v52, %v674_v21  ;;  %v262_v14 = vrot.slane %v193_v41, %v678_v27  ;;  %v351_v53 = vmax.f32 %v691_v50, 0.0 }
  0x29   :  { %v247_v45 = vrot.slane %v233_v37, %v678_v27  ;;  %v318_v48 = vrot.slane %v304_v40, %v678_v27  ;;  %v269_v47 = vrot.slane %v194_v42, %v678_v27  ;;  %v352_v54 = vmax.f32 %v344_v18, 0.0 }
  0x2a   :  { %v276_v55 = vrot.slane %v195_v46, %v678_v27  ;;  %v353_v57 = vmax.f32 %v345_v8, 0.0  ;;  %v277_v58 = vcombine.low %v255_v43, %v262_v14  ;;  %v320_v13 = vcombine.high %v255_v43, %v262_v14 }
  0x2b   :  { %v248_v10 = vcombine.low %v240_v32, %v247_v45  ;;  %v319_v56 = vcombine.low %v311_v44, %v318_v48  ;;  %v354_v59 = vmax.f32 %v346_v49, 0.0  ;;  %v359_v60 = vmin.f32 %v351_v53, 64.0 }
  0x2c   :  { %v278_v21 = vcombine.low %v269_v47, %v276_v55  ;;  %v321_v50 = vcombine.high %v269_v47, %v276_v55  ;;  %v360_v52 = vmin.f32 %v352_v54, 64.0  ;;  %v361_v61 = vmin.f32 %v353_v57, 64.0 }
  0x2d   :  { %300 = vst.msk [vmem:[%s809_s3] ss:$4 sm:$0xff] %vm701_vm0, %v248_v10  ;;  %540 = vst.msk [vmem:[%s809_s3 + $0x1] ss:$4 sm:$0xff] %vm701_vm0, %v319_v56  ;;  %v285_v15 = vrot.slane %v277_v58, %v678_v27  ;;  %v328_v63 = vrot.slane %v320_v13, %v678_v27  ;;  %v362_v0 = vmin.f32 %v354_v59, 64.0  ;;  %v381_v4 = vrot.slane %v359_v60, %v678_v27 }
  0x2e   :  { %v292_v5 = vrot.slane %v278_v21, %v678_v27  ;;  %v335_v6 = vrot.slane %v321_v50, %v678_v27  ;;  %v388_v19 = vrot.slane %v360_v52, %v678_v27  ;;  %v395_v1 = vrot.slane %v361_v61, %v678_v27 }
  0x2f   :  { %v402_v9 = vrot.slane %v362_v0, %v678_v27  ;;  %v347_v12 = vadd.f32 %v697_v62, %v680_v30  ;;  %v348_v16 = vadd.f32 %v159_v7, %v682_v31  ;;  %v349_v18 = vadd.f32 %v161_v3, %v684_v33 }
  0x30   :  { %v293_v51 = vcombine.low %v285_v15, %v292_v5  ;;  %v336_v22 = vcombine.low %v328_v63, %v335_v6  ;;  %v403_v23 = vcombine.low %v381_v4, %v388_v19  ;;  %v350_v24 = vadd.f32 %v163_v17, %v686_v39 }
  0x31   :  { %v404_v25 = vcombine.low %v395_v1, %v402_v9  ;;  %v355_v29 = vmax.f32 %v347_v12, 0.0  ;;  %v356_v26 = vmax.f32 %v348_v16, 0.0  ;;  %v357_v28 = vmax.f32 %v349_v18, 0.0 }
  0x32   :  { %539 = vst.msk [vmem:[%s809_s3 + $0x20] ss:$4 sm:$0xff] %vm701_vm0, %v293_v51  ;;  %541 = vst.msk [vmem:[%s809_s3 + $0x21] ss:$4 sm:$0xff] %vm701_vm0, %v336_v22  ;;  %v411_v30 = vrot.slane %v403_v23, %v678_v27  ;;  %v358_v31 = vmax.f32 %v350_v24, 0.0  ;;  %v471_v33 = vcombine.high %v381_v4, %v388_v19  ;;  %v472_v39 = vcombine.high %v395_v1, %v402_v9 }
  0x33   :  { %v418_v62 = vrot.slane %v404_v25, %v678_v27  ;;  %v363_v7 = vmin.f32 %v355_v29, 64.0  ;;  %v364_v3 = vmin.f32 %v356_v26, 64.0  ;;  %v365_v17 = vmin.f32 %v357_v28, 64.0 }
  0x34   :  { %v366_v34 = vmin.f32 %v358_v31, 64.0  ;;  %v479_v35 = vrot.slane %v471_v33, %v678_v27  ;;  %v486_v36 = vrot.slane %v472_v39, %v678_v27  ;;  %v519_v8 = vadd.f32 1.0, %v707_v11 }
  0x35   :  { %v419_v37 = vcombine.low %v411_v30, %v418_v62  ;;  %v426_v32 = vrot.slane %v363_v7, %v678_v27  ;;  %v433_v38 = vrot.slane %v364_v3, %v678_v27  ;;  %v440_v40 = vrot.slane %v365_v17, %v678_v27 }
  0x36   :  { %v447_v41 = vrot.slane %v366_v34, %v678_v27  ;;  %v487_v42 = vcombine.low %v479_v35, %v486_v36  ;;  %569 = vrcp.f32 %v519_v8  ;;  %v520_v43 = vadd.f32 1.0, %v711_v20 }
  0x37   :  { %542 = vst.msk [vmem:[%s809_s3 + $0x2] ss:$4 sm:$0xff] %vm701_vm0, %v419_v37  ;;  %v448_v11 = vcombine.low %v426_v32, %v433_v38  ;;  %v488_v44 = vcombine.high %v426_v32, %v433_v38 }
  0x38   :  { %v449_v45 = vcombine.low %v440_v40, %v447_v41  ;;  %544 = vst.msk [vmem:[%s809_s3 + $0x3] ss:$4 sm:$0xff] %vm701_vm0, %v487_v42  ;;  %v489_v46 = vcombine.high %v440_v40, %v447_v41  ;;  %571 = vrcp.f32 %v520_v43 }
  0x39   :  { %v456_v48 = vrot.slane %v448_v11, %v678_v27  ;;  %v496_v20 = vrot.slane %v488_v44, %v678_v27 }
  0x3a   :  { %v463_v49 = vrot.slane %v449_v45, %v678_v27  ;;  %v503_v14 = vrot.slane %v489_v46, %v678_v27 }
  0x3c   :  { %v464_v47 = vcombine.low %v456_v48, %v463_v49  ;;  %v504_v53 = vcombine.low %v496_v20, %v503_v14 }
  0x3e   :  { %543 = vst.msk [vmem:[%s809_s3 + $0x22] ss:$4 sm:$0xff] %vm701_vm0, %v464_v47  ;;  %545 = vst.msk [vmem:[%s809_s3 + $0x23] ss:$4 sm:$0xff] %vm701_vm0, %v504_v53 }
  0x40   :  { %v570_v54 = vpop.eup %569 }
  0x41   :  { %525 = vst.msk [vmem:[%s810_s4] sm:$0xff] %vm701_vm0, %v570_v54 }
  0x42   :  { %v572_v27 = vpop.eup %571 }
  0x43   :  { %526 = vst.msk [vmem:[%s810_s4 + $0x8] sm:$0xff] %vm701_vm0, %v572_v27 }

</bundles_post_ra>
